<compile_context>
chip_gen: v5e
topology: v5e:2x2
jax: 0.10.0
libtpu: 0.0.40
codegen_flags: <defaults>
</compile_context>

<pallas_src>
import functools

import numpy as np
import jax
import jax.numpy as jnp
from jax.experimental import pallas as pl
from jax.experimental.pallas import tpu as pltpu


# ----------------------------------------------------------------------------- #
# Host-side constant builders (numpy, lru_cache'd on static shapes -> jit constants)
# ----------------------------------------------------------------------------- #
def _bilinear_matrix(in_size, out_size):
    """F.interpolate(mode='bilinear', align_corners=False) as a matrix (out, in)."""
    A = np.zeros((out_size, in_size), dtype=np.float32)
    scale = in_size / out_size
    for o in range(out_size):
        src = (o + 0.5) * scale - 0.5
        if src < 0.0:
            src = 0.0
        i0 = int(np.floor(src))
        i1 = min(i0 + 1, in_size - 1)
        lam = src - i0
        A[o, i0] += 1.0 - lam
        A[o, i1] += lam
    return A


def _band3(taps, size):
    """Banded matrix M with M[h, h+d] = taps[d+1], d in {-1,0,1} (zero-pad 1-D conv operator)."""
    M = np.zeros((size, size), dtype=np.float32)
    for h in range(size):
        for d in (-1, 0, 1):
            r = h + d
            if 0 <= r < size:
                M[h, r] = taps[d + 1]
    return M


def _block_diag2(m):
    r, c = m.shape
    out = np.zeros((2 * r, 2 * c), dtype=np.float32)
    out[:r, :c] = m
    out[r:, c:] = m
    return out


@functools.lru_cache(maxsize=None)
def _score_constants(P, H, W, BC):
    """Indicator matrices so that  Rh @ [d | d*d] @ blockdiag(Rw, Rw)  yields per-patch sums of
    d and d^2 side by side (cross-patch and cross-plane differences excluded by zeros)."""
    n_h, n_w = H // P, W // P
    BCH = BC * H
    # dx = |x[:,1:]-x[:,:-1]| -> (BCH, W-1): all rows kept, cross-patch columns dropped.
    rhx = np.zeros((n_h, BCH), np.float32)
    for h in range(BCH):
        rhx[(h % H) // P, h] = 1.0
    rwx = np.zeros((W - 1, n_w), np.float32)
    for k in range(W - 1):
        if k % P != P - 1:
            rwx[k, k // P] = 1.0
    # dy = |x[1:,:]-x[:-1,:]| -> (BCH-1, W): rows crossing a patch (or plane) boundary dropped.
    rhy = np.zeros((n_h, BCH - 1), np.float32)
    for h in range(BCH - 1):
        if h % P != P - 1:
            rhy[(h % H) // P, h] = 1.0
    rwy = np.zeros((W, n_w), np.float32)
    for k in range(W):
        rwy[k, k // P] = 1.0
    return rhx, rhy, _block_diag2(rwx), _block_diag2(rwy)


@functools.lru_cache(maxsize=None)
def _gap_constants(in_size, out_size, n_groups, C):
    """Collapse bilinear-resize -> SRM(3x3, zero pad) -> GAP into a rank-2 linear functional:
         gap_plane = (1/S^2) * (a1 @ plane @ b1 + a2 @ plane @ b2)
       SRM = u1 v1^T + u2 v2^T with u1=[-1,3,-1], v1=[1,0,1], u2=[3,-8,3], v2=[0,1,0] (exact).
       Vectors are kron-expanded so all (n_groups x C) planes reduce via two small sandwiches."""
    Ah = _bilinear_matrix(in_size, out_size)               # (S, in)
    R1 = _band3((-1.0, 3.0, -1.0), out_size)
    R2 = _band3((3.0, -8.0, 3.0), out_size)
    C1 = _band3((1.0, 0.0, 1.0), out_size)                 # second column factor == identity
    ones = np.ones((out_size,), np.float32)
    a1 = ones @ R1 @ Ah                                    # (in,)
    a2 = ones @ R2 @ Ah
    b1 = Ah.T @ (C1 @ ones)                                # (in,)
    b2 = Ah.T @ ones
    ru1 = np.kron(np.eye(n_groups, dtype=np.float32), a1[None, :])   # (G, G*in)
    ru2 = np.kron(np.eye(n_groups, dtype=np.float32), a2[None, :])
    cw1 = np.kron(np.eye(C, dtype=np.float32), b1[:, None])          # (C*in, C)
    cw2 = np.kron(np.eye(C, dtype=np.float32), b2[:, None])
    return ru1, ru2, cw1, cw2


# ----------------------------------------------------------------------------- #
# Kernel 1: per-patch texture scores (2 fused indicator sandwiches == 4 MXU issues)
# ----------------------------------------------------------------------------- #
def _texture_scores(x2d, rhx, rhy, rwx_blk, rwy_blk, n_w, n_dx, n_dy):
    """x2d: (B*C*H, W) f32 -> (n_h, n_w) f32 texture scores (grad_mean * grad_var)."""
    n_h = rhx.shape[0]

    def kernel(x_ref, rhx_ref, rhy_ref, rwx_ref, rwy_ref, s_ref):
        x = x_ref[...]                                          # (BCH, W)
        dx = jnp.abs(x[:, 1:] - x[:, :-1])                      # (BCH, W-1)
        dy = jnp.abs(x[1:, :] - x[:-1, :])                      # (BCH-1, W)
        dx_cat = jnp.concatenate([dx, dx * dx], axis=1)         # (BCH, 2(W-1))
        dy_cat = jnp.concatenate([dy, dy * dy], axis=1)         # (BCH-1, 2W)

        def sandwich(rl, m, rr):
            t = jnp.dot(rl, m, preferred_element_type=jnp.float32)
            return jnp.dot(t, rr, preferred_element_type=jnp.float32)

        rx = sandwich(rhx_ref[...], dx_cat, rwx_ref[...])       # (n_h, 2*n_w) = [sum d | sum d^2]
        ry = sandwich(rhy_ref[...], dy_cat, rwy_ref[...])
        sdx, sdx2 = rx[:, :n_w], rx[:, n_w:]
        sdy, sdy2 = ry[:, :n_w], ry[:, n_w:]

        mx = sdx * (1.0 / n_dx)
        my = sdy * (1.0 / n_dy)
        # torch.var default is unbiased (N-1); one-pass E[x^2]-E[x]^2 form (fine for |grad| of
        # O(1)-scaled images; prefer a shifted/two-pass form for 0..255-scaled inputs).
        vx = (sdx2 - sdx * sdx * (1.0 / n_dx)) * (1.0 / (n_dx - 1.0))
        vy = (sdy2 - sdy * sdy * (1.0 / n_dy)) * (1.0 / (n_dy - 1.0))
        s_ref[...] = ((mx + my) * 0.5) * ((vx + vy) * 0.5)

    return pl.pallas_call(
        kernel,
        out_shape=jax.ShapeDtypeStruct((n_h, n_w), jnp.float32),
        in_specs=[pl.BlockSpec(memory_space=pltpu.MemorySpace.VMEM)] * 5,
        out_specs=pl.BlockSpec(memory_space=pltpu.MemorySpace.VMEM),
    )(x2d, rhx, rhy, rwx_blk, rwy_blk)


# ----------------------------------------------------------------------------- #
# Kernel 2: collapsed resize->SRM->GAP  +  fused rich/poor feature heads
# ----------------------------------------------------------------------------- #
def _gap_head(planes, ru1, ru2, cw1, cw2, wb, bb, we, be, inv_area):
    """planes: (G*in, C*in) stacked planes (G = 2*B groups: rich b0.., poor b0..).
       gap  = (1/S^2) * (ru1 @ planes @ cw1 + ru2 @ planes @ cw2)          -> (G, C)
       out  = relu(gap @ Wb + bb) @ [We_rich | We_poor] + [be_rich | be_poor] -> (G, 2*embed)."""
    G = ru1.shape[0]
    N = we.shape[1]

    def kernel(x_ref, ru1_ref, ru2_ref, cw1_ref, cw2_ref,
               wb_ref, bb_ref, we_ref, be_ref, out_ref):
        xv = x_ref[...]                                                       # (G*in, C*in)
        y1 = jnp.dot(xv, cw1_ref[...], preferred_element_type=jnp.float32)    # (G*in, C)
        y2 = jnp.dot(xv, cw2_ref[...], preferred_element_type=jnp.float32)
        gap = (jnp.dot(ru1_ref[...], y1, preferred_element_type=jnp.float32)
               + jnp.dot(ru2_ref[...], y2, preferred_element_type=jnp.float32)) * inv_area
        # ResNet50 stand-in projection + per-branch Linear heads (bf16 weights, f32 accumulation).
        feat = jnp.dot(gap.astype(jnp.bfloat16), wb_ref[...],
                       preferred_element_type=jnp.float32) + bb_ref[...]
        feat = jnp.maximum(feat, 0.0)
        out_ref[...] = (jnp.dot(feat.astype(jnp.bfloat16), we_ref[...],
                                preferred_element_type=jnp.float32) + be_ref[...])

    return pl.pallas_call(
        kernel,
        out_shape=jax.ShapeDtypeStruct((G, N), jnp.float32),
        in_specs=[pl.BlockSpec(memory_space=pltpu.MemorySpace.VMEM)] * 9,
        out_specs=pl.BlockSpec(memory_space=pltpu.MemorySpace.VMEM),
    )(planes, ru1, ru2, cw1, cw2, wb, bb, we, be)


# ----------------------------------------------------------------------------- #
# Full forward (jitted; glue in plain JAX, hot paths in 2 Pallas kernels)
# ----------------------------------------------------------------------------- #
@functools.partial(jax.jit, static_argnames=("patch_size", "output_size", "num_patches"))
def texture_analysis_forward(x, params, patch_size=16, output_size=64, num_patches=9):
    B, C, H, W = x.shape
    P = patch_size

    # Pad so H, W are multiples of patch_size (same as F.pad in the module).
    H_pad = (P - H % P) % P
    W_pad = (P - W % P) % P
    if H_pad > 0 or W_pad > 0:
        x = jnp.pad(x, ((0, 0), (0, 0), (0, H_pad), (0, W_pad)))
        H, W = H + H_pad, W + W_pad
    n_h, n_w = H // P, W // P
    BC = B * C

    # --- 1. texture scores (single vectorized Pallas kernel) ---
    rhx, rhy, rwx_blk, rwy_blk = _score_constants(P, H, W, BC)
    n_dx = float(BC * P * (P - 1))        # == torch dx.numel() per patch (pooled over B and C)
    n_dy = float(BC * (P - 1) * P)
    scores = _texture_scores(x.reshape(BC * H, W),
                             jnp.asarray(rhx), jnp.asarray(rhy),
                             jnp.asarray(rwx_blk), jnp.asarray(rwy_blk),
                             n_w, n_dx, n_dy)
    scores_flat = scores.reshape(-1)      # order == i * n_w + j of the reference double loop

    sorted_idx = jnp.argsort(scores_flat)
    rich_idx = sorted_idx[-num_patches:]
    poor_idx = sorted_idx[:num_patches]

    # patches: (n_h*n_w, B, C, P, P), row-major (i over n_h, j over n_w)
    patches = (x.reshape(B, C, n_h, P, n_w, P)
                 .transpose(2, 4, 0, 1, 3, 5)
                 .reshape(n_h * n_w, B, C, P, P))

    def reconstruct(idx, rows=3, cols=3):
        sel = jnp.take(patches, idx, axis=0)                              # (9, B, C, P, P)
        g = sel.reshape(rows, cols, B, C, P, P)
        return g.transpose(2, 3, 0, 4, 1, 5).reshape(B, C, rows * P, cols * P)

    rich_image = reconstruct(rich_idx)                                    # (B, C, 3P, 3P)
    poor_image = reconstruct(poor_idx)

    # --- 2. collapsed bilinear->SRM->GAP + fused rich/poor heads (one Pallas call) ---
    in_size = 3 * P
    S = output_size
    G = 2 * B                                                             # rich b0.., poor b0..
    ru1, ru2, cw1, cw2 = _gap_constants(in_size, S, G, C)
    stacked = jnp.concatenate([rich_image, poor_image], axis=0)           # (G, C, 3P, 3P)
    planes = stacked.transpose(0, 2, 1, 3).reshape(G * in_size, C * in_size)
    out_cat = _gap_head(planes, jnp.asarray(ru1), jnp.asarray(ru2),
                        jnp.asarray(cw1), jnp.asarray(cw2),
                        params["Wb"], params["bb"], params["We"], params["be"],
                        1.0 / float(S * S))                               # (G, 2*embed)

    E = params["be"].shape[1] // 2
    rich_embedding = out_cat[:B, :E]
    poor_embedding = out_cat[B:, E:]
    return rich_embedding, poor_embedding


def init_params(channels=3, feat_dim=2048, embed_dim=512):
    key = jax.random.PRNGKey(0)
    k1, k2, k3, k4, k5, k6 = jax.random.split(key, 6)
    we = jnp.concatenate(
        [jax.random.normal(k3, (feat_dim, embed_dim), jnp.float32) / np.sqrt(feat_dim),
         jax.random.normal(k5, (feat_dim, embed_dim), jnp.float32) / np.sqrt(feat_dim)], axis=1)
    be = jnp.concatenate(
        [jax.random.normal(k4, (1, embed_dim), jnp.float32) * 0.01,
         jax.random.normal(k6, (1, embed_dim), jnp.float32) * 0.01], axis=1)
    return {
        # ResNet50 stand-in projection (shared between rich/poor, like the shared backbone)
        "Wb": (jax.random.normal(k1, (channels, feat_dim), jnp.float32) * 0.1).astype(jnp.bfloat16),
        "bb": jax.random.normal(k2, (1, feat_dim), jnp.float32) * 0.01,
        # rich_embed / poor_embed: nn.Linear(2048, 512), concatenated along N, bf16 weights
        "We": we.astype(jnp.bfloat16),
        "be": be,
    }


if __name__ == "__main__":
    # Small shapes consistent with the module: B=2, C=3 (SRM expects RGB), 64x64 image,
    # patch_size=16 -> 16 candidate patches, num_patches=9, output_size=64 (downscaled 224).
    key = jax.random.PRNGKey(0)
    x = jax.random.uniform(key, (2, 3, 64, 64), dtype=jnp.float32)

    params = init_params()
    rich_emb, poor_emb = texture_analysis_forward(
        x, params, patch_size=16, output_size=64, num_patches=9)

    jax.block_until_ready(rich_emb)
    jax.block_until_ready(poor_emb)
    assert rich_emb.shape == (2, 512) and poor_emb.shape == (2, 512)
    print("KERNEL_OK")
</pallas_src>

<mosaic_0001>
module attributes {stable_mosaic.version = 11 : i64} {
  func.func @kernel(%arg0: memref<384x64xf32, #tpu.memory_space<vmem>>, %arg1: memref<4x384xf32, #tpu.memory_space<vmem>>, %arg2: memref<4x383xf32, #tpu.memory_space<vmem>>, %arg3: memref<126x8xf32, #tpu.memory_space<vmem>>, %arg4: memref<128x8xf32, #tpu.memory_space<vmem>>, %arg5: memref<4x4xf32, #tpu.memory_space<vmem>>) attributes {dimension_semantics = [], scalar_prefetch = 0 : i64, scratch_operands = 0 : i64, tpu.core_type = #tpu.core_type<tc>} {
    %c0 = arith.constant 0 : index
    %c0_0 = arith.constant 0 : index
    %0 = vector.load %arg0[%c0, %c0_0] : memref<384x64xf32, #tpu.memory_space<vmem>>, vector<384x64xf32>
    %1 = vector.extract_strided_slice %0 {offsets = [0, 1], sizes = [384, 63], strides = [1, 1]} : vector<384x64xf32> to vector<384x63xf32>
    %2 = vector.extract_strided_slice %0 {offsets = [0, 0], sizes = [384, 63], strides = [1, 1]} : vector<384x64xf32> to vector<384x63xf32>
    %3 = arith.subf %1, %2 : vector<384x63xf32>
    %4 = math.absf %3 : vector<384x63xf32>
    %5 = vector.extract_strided_slice %0 {offsets = [1, 0], sizes = [383, 64], strides = [1, 1]} : vector<384x64xf32> to vector<383x64xf32>
    %6 = vector.extract_strided_slice %0 {offsets = [0, 0], sizes = [383, 64], strides = [1, 1]} : vector<384x64xf32> to vector<383x64xf32>
    %7 = arith.subf %5, %6 : vector<383x64xf32>
    %8 = math.absf %7 : vector<383x64xf32>
    %9 = arith.mulf %4, %4 : vector<384x63xf32>
    %10 = tpu.concatenate %4, %9 in 1 : vector<384x63xf32>, vector<384x63xf32> -> vector<384x126xf32>
    %11 = arith.mulf %8, %8 : vector<383x64xf32>
    %12 = tpu.concatenate %8, %11 in 1 : vector<383x64xf32>, vector<383x64xf32> -> vector<383x128xf32>
    %c0_1 = arith.constant 0 : index
    %c0_2 = arith.constant 0 : index
    %13 = vector.load %arg1[%c0_1, %c0_2] : memref<4x384xf32, #tpu.memory_space<vmem>>, vector<4x384xf32>
    %c0_3 = arith.constant 0 : index
    %c0_4 = arith.constant 0 : index
    %14 = vector.load %arg3[%c0_3, %c0_4] : memref<126x8xf32, #tpu.memory_space<vmem>>, vector<126x8xf32>
    %cst = arith.constant dense<0.000000e+00> : vector<4x126xf32>
    %15 = tpu.matmul %13, %10, %cst {dimension_numbers = #tpu.dot_dimension_numbers<[1], [0], [0], [1], [0, 0, 1, 1], [], []>} : vector<4x384xf32>, vector<384x126xf32>, vector<4x126xf32> -> vector<4x126xf32>
    %cst_5 = arith.constant dense<0.000000e+00> : vector<4x8xf32>
    %16 = tpu.matmul %15, %14, %cst_5 {dimension_numbers = #tpu.dot_dimension_numbers<[1], [0], [0], [1], [0, 0, 1, 1], [], []>} : vector<4x126xf32>, vector<126x8xf32>, vector<4x8xf32> -> vector<4x8xf32>
    %c0_6 = arith.constant 0 : index
    %c0_7 = arith.constant 0 : index
    %17 = vector.load %arg2[%c0_6, %c0_7] : memref<4x383xf32, #tpu.memory_space<vmem>>, vector<4x383xf32>
    %c0_8 = arith.constant 0 : index
    %c0_9 = arith.constant 0 : index
    %18 = vector.load %arg4[%c0_8, %c0_9] : memref<128x8xf32, #tpu.memory_space<vmem>>, vector<128x8xf32>
    %cst_10 = arith.constant dense<0.000000e+00> : vector<4x128xf32>
    %19 = tpu.matmul %17, %12, %cst_10 {dimension_numbers = #tpu.dot_dimension_numbers<[1], [0], [0], [1], [0, 0, 1, 1], [], []>} : vector<4x383xf32>, vector<383x128xf32>, vector<4x128xf32> -> vector<4x128xf32>
    %cst_11 = arith.constant dense<0.000000e+00> : vector<4x8xf32>
    %20 = tpu.matmul %19, %18, %cst_11 {dimension_numbers = #tpu.dot_dimension_numbers<[1], [0], [0], [1], [0, 0, 1, 1], [], []>} : vector<4x128xf32>, vector<128x8xf32>, vector<4x8xf32> -> vector<4x8xf32>
    %21 = vector.extract_strided_slice %16 {offsets = [0, 0], sizes = [4, 4], strides = [1, 1]} : vector<4x8xf32> to vector<4x4xf32>
    %22 = vector.extract_strided_slice %16 {offsets = [0, 4], sizes = [4, 4], strides = [1, 1]} : vector<4x8xf32> to vector<4x4xf32>
    %23 = vector.extract_strided_slice %20 {offsets = [0, 0], sizes = [4, 4], strides = [1, 1]} : vector<4x8xf32> to vector<4x4xf32>
    %24 = vector.extract_strided_slice %20 {offsets = [0, 4], sizes = [4, 4], strides = [1, 1]} : vector<4x8xf32> to vector<4x4xf32>
    %cst_12 = arith.constant 6.94444461E-4 : f32
    %25 = vector.broadcast %cst_12 : f32 to vector<4x4xf32>
    %26 = arith.mulf %21, %25 : vector<4x4xf32>
    %cst_13 = arith.constant 6.94444461E-4 : f32
    %27 = vector.broadcast %cst_13 : f32 to vector<4x4xf32>
    %28 = arith.mulf %23, %27 : vector<4x4xf32>
    %29 = arith.mulf %21, %21 : vector<4x4xf32>
    %cst_14 = arith.constant 6.94444461E-4 : f32
    %30 = vector.broadcast %cst_14 : f32 to vector<4x4xf32>
    %31 = arith.mulf %29, %30 : vector<4x4xf32>
    %32 = arith.subf %22, %31 : vector<4x4xf32>
    %cst_15 = arith.constant 6.94927061E-4 : f32
    %33 = vector.broadcast %cst_15 : f32 to vector<4x4xf32>
    %34 = arith.mulf %32, %33 : vector<4x4xf32>
    %35 = arith.mulf %23, %23 : vector<4x4xf32>
    %cst_16 = arith.constant 6.94444461E-4 : f32
    %36 = vector.broadcast %cst_16 : f32 to vector<4x4xf32>
    %37 = arith.mulf %35, %36 : vector<4x4xf32>
    %38 = arith.subf %24, %37 : vector<4x4xf32>
    %cst_17 = arith.constant 6.94927061E-4 : f32
    %39 = vector.broadcast %cst_17 : f32 to vector<4x4xf32>
    %40 = arith.mulf %38, %39 : vector<4x4xf32>
    %41 = arith.addf %26, %28 : vector<4x4xf32>
    %cst_18 = arith.constant 5.000000e-01 : f32
    %42 = vector.broadcast %cst_18 : f32 to vector<4x4xf32>
    %43 = arith.mulf %41, %42 : vector<4x4xf32>
    %44 = arith.addf %34, %40 : vector<4x4xf32>
    %cst_19 = arith.constant 5.000000e-01 : f32
    %45 = vector.broadcast %cst_19 : f32 to vector<4x4xf32>
    %46 = arith.mulf %44, %45 : vector<4x4xf32>
    %47 = arith.mulf %43, %46 : vector<4x4xf32>
    %c0_20 = arith.constant 0 : index
    %c0_21 = arith.constant 0 : index
    %48 = vector.load %arg5[%c0_20, %c0_21] : memref<4x4xf32, #tpu.memory_space<vmem>>, vector<4x4xf32>
    tpu.vector_store %arg5[%c0_20, %c0_21], %47 {strides = array<i32>} : memref<4x4xf32, #tpu.memory_space<vmem>>, vector<4x4xf32>,
    return
  }
}

module attributes {stable_mosaic.version = 11 : i64} {
  func.func @kernel(%arg0: memref<192x144xf32, #tpu.memory_space<vmem>>, %arg1: memref<4x192xf32, #tpu.memory_space<vmem>>, %arg2: memref<4x192xf32, #tpu.memory_space<vmem>>, %arg3: memref<144x3xf32, #tpu.memory_space<vmem>>, %arg4: memref<144x3xf32, #tpu.memory_space<vmem>>, %arg5: memref<3x2048xbf16, #tpu.memory_space<vmem>>, %arg6: memref<1x2048xf32, #tpu.memory_space<vmem>>, %arg7: memref<2048x1024xbf16, #tpu.memory_space<vmem>>, %arg8: memref<1x1024xf32, #tpu.memory_space<vmem>>, %arg9: memref<4x1024xf32, #tpu.memory_space<vmem>>) attributes {dimension_semantics = [], scalar_prefetch = 0 : i64, scratch_operands = 0 : i64, tpu.core_type = #tpu.core_type<tc>} {
    %c0 = arith.constant 0 : index
    %c0_0 = arith.constant 0 : index
    %0 = vector.load %arg0[%c0, %c0_0] : memref<192x144xf32, #tpu.memory_space<vmem>>, vector<192x144xf32>
    %c0_1 = arith.constant 0 : index
    %c0_2 = arith.constant 0 : index
    %1 = vector.load %arg3[%c0_1, %c0_2] : memref<144x3xf32, #tpu.memory_space<vmem>>, vector<144x3xf32>
    %cst = arith.constant dense<0.000000e+00> : vector<192x3xf32>
    %2 = tpu.matmul %0, %1, %cst {dimension_numbers = #tpu.dot_dimension_numbers<[1], [0], [0], [1], [0, 0, 1, 1], [], []>} : vector<192x144xf32>, vector<144x3xf32>, vector<192x3xf32> -> vector<192x3xf32>
    %c0_3 = arith.constant 0 : index
    %c0_4 = arith.constant 0 : index
    %3 = vector.load %arg4[%c0_3, %c0_4] : memref<144x3xf32, #tpu.memory_space<vmem>>, vector<144x3xf32>
    %cst_5 = arith.constant dense<0.000000e+00> : vector<192x3xf32>
    %4 = tpu.matmul %0, %3, %cst_5 {dimension_numbers = #tpu.dot_dimension_numbers<[1], [0], [0], [1], [0, 0, 1, 1], [], []>} : vector<192x144xf32>, vector<144x3xf32>, vector<192x3xf32> -> vector<192x3xf32>
    %c0_6 = arith.constant 0 : index
    %c0_7 = arith.constant 0 : index
    %5 = vector.load %arg1[%c0_6, %c0_7] : memref<4x192xf32, #tpu.memory_space<vmem>>, vector<4x192xf32>
    %cst_8 = arith.constant dense<0.000000e+00> : vector<4x3xf32>
    %6 = tpu.matmul %5, %2, %cst_8 {dimension_numbers = #tpu.dot_dimension_numbers<[1], [0], [0], [1], [0, 0, 1, 1], [], []>} : vector<4x192xf32>, vector<192x3xf32>, vector<4x3xf32> -> vector<4x3xf32>
    %c0_9 = arith.constant 0 : index
    %c0_10 = arith.constant 0 : index
    %7 = vector.load %arg2[%c0_9, %c0_10] : memref<4x192xf32, #tpu.memory_space<vmem>>, vector<4x192xf32>
    %cst_11 = arith.constant dense<0.000000e+00> : vector<4x3xf32>
    %8 = tpu.matmul %7, %4, %cst_11 {dimension_numbers = #tpu.dot_dimension_numbers<[1], [0], [0], [1], [0, 0, 1, 1], [], []>} : vector<4x192xf32>, vector<192x3xf32>, vector<4x3xf32> -> vector<4x3xf32>
    %9 = arith.addf %6, %8 : vector<4x3xf32>
    %cst_12 = arith.constant 2.44140625E-4 : f32
    %10 = vector.broadcast %cst_12 : f32 to vector<4x3xf32>
    %11 = arith.mulf %9, %10 : vector<4x3xf32>
    %12 = arith.truncf %11 : vector<4x3xf32> to vector<4x3xbf16>
    %c0_13 = arith.constant 0 : index
    %c0_14 = arith.constant 0 : index
    %13 = vector.load %arg5[%c0_13, %c0_14] : memref<3x2048xbf16, #tpu.memory_space<vmem>>, vector<3x2048xbf16>
    %cst_15 = arith.constant dense<0.000000e+00> : vector<4x2048xf32>
    %14 = tpu.matmul %12, %13, %cst_15 {dimension_numbers = #tpu.dot_dimension_numbers<[1], [0], [0], [1], [0, 0, 1, 1], [], []>} : vector<4x3xbf16>, vector<3x2048xbf16>, vector<4x2048xf32> -> vector<4x2048xf32>
    %c0_16 = arith.constant 0 : index
    %c0_17 = arith.constant 0 : index
    %15 = vector.load %arg6[%c0_16, %c0_17] : memref<1x2048xf32, #tpu.memory_space<vmem>>, vector<1x2048xf32>
    %16 = vector.broadcast %15 : vector<1x2048xf32> to vector<4x2048xf32>
    %17 = arith.addf %14, %16 : vector<4x2048xf32>
    %cst_18 = arith.constant 0.000000e+00 : f32
    %18 = vector.broadcast %cst_18 : f32 to vector<4x2048xf32>
    %19 = arith.maximumf %17, %18 : vector<4x2048xf32>
    %20 = arith.truncf %19 : vector<4x2048xf32> to vector<4x2048xbf16>
    %c0_19 = arith.constant 0 : index
    %c0_20 = arith.constant 0 : index
    %21 = vector.load %arg7[%c0_19, %c0_20] : memref<2048x1024xbf16, #tpu.memory_space<vmem>>, vector<2048x1024xbf16>
    %cst_21 = arith.constant dense<0.000000e+00> : vector<4x1024xf32>
    %22 = tpu.matmul %20, %21, %cst_21 {dimension_numbers = #tpu.dot_dimension_numbers<[1], [0], [0], [1], [0, 0, 1, 1], [], []>} : vector<4x2048xbf16>, vector<2048x1024xbf16>, vector<4x1024xf32> -> vector<4x1024xf32>
    %c0_22 = arith.constant 0 : index
    %c0_23 = arith.constant 0 : index
    %23 = vector.load %arg8[%c0_22, %c0_23] : memref<1x1024xf32, #tpu.memory_space<vmem>>, vector<1x1024xf32>
    %24 = vector.broadcast %23 : vector<1x1024xf32> to vector<4x1024xf32>
    %25 = arith.addf %22, %24 : vector<4x1024xf32>
    %c0_24 = arith.constant 0 : index
    %c0_25 = arith.constant 0 : index
    %26 = vector.load %arg9[%c0_24, %c0_25] : memref<4x1024xf32, #tpu.memory_space<vmem>>, vector<4x1024xf32>
    tpu.vector_store %arg9[%c0_24, %c0_25], %25 {strides = array<i32>} : memref<4x1024xf32, #tpu.memory_space<vmem>>, vector<4x1024xf32>,
    return
  }
}

</mosaic_0001>

<bundles_post_ra>
// kernel: texture_analysis_forward.2
= control target key start
LH: loop header
LB: loop body
LE: loop exit
PB: predicated region body
PF: predicated region fallthrough
CT: control target
= control target key end

     0   :  { %10 = vsyncpa [#allocation3], 0  ;;  %s3945_s0 = inlined_call_operand.hbm [shape: f32[384,64], index: 0, kind: input, shape index: {}]   ;;  %s3946_s1 = inlined_call_operand.hbm [shape: f32[4,384], index: 1, kind: input, shape index: {}]   ;;  %s3947_s2 = inlined_call_operand.hbm [shape: f32[4,383], index: 2, kind: input, shape index: {}]   ;;  %s3948_s3 = inlined_call_operand.hbm [shape: f32[126,8], index: 3, kind: input, shape index: {}]   ;;  %s3949_s4 = inlined_call_operand.hbm [shape: f32[128,8], index: 4, kind: input, shape index: {}]   ;;  %s3950_s5 = inlined_call_operand.vmem [shape: f32[4,4], index: 5, kind: output, shape index: {}]  }
   0x1   :  { %11 = vsyncpa [#allocation5], 0  ;;  %s31_s20 = sshll.u32 %s3946_s1, 4  ;;  %s32_s20 = int_to_ptr.hbm [resolvable:$true] %s31_s20 }
   0x2   :  { %12 = vsyncpa [#allocation8], 0  ;;  %s2415_s21 = smov [#allocation4]   ;;  %s52_s25 = sshll.u32 %s3948_s3, 4  ;;  %s53_s25 = int_to_ptr.hbm [resolvable:$true] %s52_s25 }
   0x3   :  { %s33_s22 = sshll.u32 %s2415_s21, 4  ;;  %s2416_s26 = smov [#allocation7]   ;;  %s34_s22 = int_to_ptr.vmem [resolvable:$true] %s33_s22 }
   0x4   :  { %36 = dma.hbm_to_vmem [thread:$0]  %s32_s20, 192, %s34_s22, [#allocation5]  }
   0x5   :  { %s54_s27 = sshll.u32 %s2416_s26, 4  ;;  %s17_s30 = sshll.u32 %s3945_s0, 4  ;;  %s55_s27 = int_to_ptr.vmem [resolvable:$true] %s54_s27  ;;  %s18_s30 = int_to_ptr.hbm [resolvable:$true] %s17_s30 }
   0x6   :  { %s2417_s1 = smov 128   ;;  %s2418_s6 = smov 8  }
   0x7   :  { %60 = dma.hbm_to_vmem [thread:$0]  %s53_s25, 2048, %s55_s27, [#allocation8], %s2417_s1, %s2417_s1, %s2418_s6  }
   0x8   :  { %s42_s9 = sshll.u32 %s3947_s2, 4  ;;  %s2419_s10 = smov [#allocation2]   ;;  %s43_s9 = int_to_ptr.hbm [resolvable:$true] %s42_s9 }
   0x9   :  { %s19_s11 = sshll.u32 %s2419_s10, 4  ;;  %s2420_s3 = smov [#allocation6]   ;;  %s20_s11 = int_to_ptr.vmem [resolvable:$true] %s19_s11 }
   0xa   :  { %25 = dma.hbm_to_vmem [thread:$0]  %s18_s30, 6144, %s20_s11, [#allocation3], %s2417_s1, %s2417_s1, %s2418_s6  }
   0xb   :  { %s44_s12 = sshll.u32 %s2420_s3, 4  ;;  %s65_s0 = sshll.u32 %s3949_s4, 4  ;;  %s45_s12 = int_to_ptr.vmem [resolvable:$true] %s44_s12  ;;  %s66_s0 = int_to_ptr.hbm [resolvable:$true] %s65_s0 }
   0xc   :  { %47 = dma.hbm_to_vmem [thread:$0]  %s43_s9, 192, %s45_s12, [#allocation5]  }
   0xd   :  { %s2421_s15 = smov [#allocation9]  }
   0xe   :  { %s67_s16 = sshll.u32 %s2421_s15, 4  ;;  %s68_s16 = int_to_ptr.vmem [resolvable:$true] %s67_s16 }
   0xf   :  { %73 = dma.hbm_to_vmem [thread:$0]  %s66_s0, 2048, %s68_s16, [#allocation8], %s2417_s1, %s2417_s1, %s2418_s6  }
  0x10   :  { %2409 = dma.done.wait [#allocation3], 6144  }
  0x11   :  { %2410 = vsyncadd [#allocation3], 4294961152 }
  0x12   :  { %2411 = dma.done.wait [#allocation5], 384  }
  0x13   :  { %2412 = vsyncadd [#allocation5], 4294966912 }
  0x14   :  { %2413 = dma.done.wait [#allocation8], 4096  }
  0x15   :  { %2414 = vsyncadd [#allocation8], 4294963200  ;;  %v98_v0 = vld [vmem:[#allocation2 + $0x20] sm:$0xff]  ;;  %v2473_v1 = vld [vmem:[#allocation2 + $0x10] sm:$0xff]  ;;  %s2422_s2 = smov 1   ;;  %s2423_s4 = smov 127  }
  0x16   :  { %v2475_v2 = vld [vmem:[#allocation2] sm:$0xff]  ;;  %198 = vrot.lane.b32.xlu2 %v98_v0, %s2422_s2  ;;  %194 = vrot.lane.b32.xlu1 %v2473_v1, %s2422_s2  ;;  %v2482_v3 = vld [vmem:[#allocation2 + $0x28] sm:$0xff]  ;;  %v2484_v4 = vld [vmem:[#allocation2 + $0x18] sm:$0xff]  ;;  %vm430_vm0 = vcmask 1040384   ;;  %s2424_s17 = smov 62   ;;  %s2425_s18 = smov 64  }
  0x17   :  { %190 = vrot.lane.b32.xlu0 %v2475_v2, %s2422_s2  ;;  %v2486_v5 = vld [vmem:[#allocation2 + $0x8] sm:$0xff]  ;;  %v2494_v6 = vld [vmem:[#allocation2 + $0x40] sm:$0xff]  ;;  %v2496_v7 = vld [vmem:[#allocation2 + $0x38] sm:$0xff]  ;;  %vm1102_vm1 = vcmask 515072   ;;  %vm1391_vm2 = vcmask 523264   ;;  %vm1633_vm3 = vcmask 1046528  }
  0x18   :  { %4029 = vst [vmem:[#allocation13_spill] sm:$0xff] %v2496_v7  ;;  %v2498_v8 = vld [vmem:[#allocation2 + $0x30] sm:$0xff]  ;;  %v2506_v9 = vld [vmem:[#allocation2 + $0x58] sm:$0xff]  ;;  %v2510_v11 = vld [vmem:[#allocation2 + $0x48] sm:$0xff]  ;;  %vm1533_vm4 = vcmask 1045504   ;;  %vm1776_vm5 = vcmask 1039360  }
  0x19   :  { %4030 = vst [vmem:[#allocation14_spill] sm:$0xff] %v2498_v8  ;;  %v2508_v10 = vld [vmem:[#allocation2 + $0x50] sm:$0xff]  ;;  %v2520_v13 = vld [vmem:[#allocation2 + $0x68] sm:$0xff]  ;;  %v2522_v14 = vld [vmem:[#allocation2 + $0x60] sm:$0xff]  ;;  %vm1529_vm6 = vcmask 1031168   ;;  %s2426_s19 = smov 4  }
  0x1a   :  { %4031 = vst [vmem:[#allocation15_spill] sm:$0xff] %v2510_v11  ;;  %v2518_v12 = vld [vmem:[#allocation2 + $0x70] sm:$0xff]  ;;  %v2530_v15 = vld [vmem:[#allocation2 + $0x88] sm:$0xff]  ;;  %v2532_v16 = vld [vmem:[#allocation2 + $0x80] sm:$0xff]  ;;  %s2427_s20 = smov 124   ;;  %vm1888_vm7 = vcmask 27648  }
  0x1b   :  { %v2534_v17 = vld [vmem:[#allocation2 + $0x78] sm:$0xff]  ;;  %v2542_v18 = vld [vmem:[#allocation2 + $0xa0] sm:$0xff]  ;;  %v2546_v20 = vld [vmem:[#allocation2 + $0x90] sm:$0xff] }
  0x1c   :  { %v2544_v19 = vld [vmem:[#allocation2 + $0x98] sm:$0xff]  ;;  %v2556_v22 = vld [vmem:[#allocation2 + $0xb0] sm:$0xff]  ;;  %v2558_v23 = vld [vmem:[#allocation2 + $0xa8] sm:$0xff] }
  0x1d   :  { %v2554_v21 = vld [vmem:[#allocation2 + $0xb8] sm:$0xff]  ;;  %4033 = vst [vmem:[#allocation17_spill] sm:$0xff] %v2556_v22  ;;  %v2566_v24 = vld [vmem:[#allocation2 + $0xd0] sm:$0xff]  ;;  %v2568_v25 = vld [vmem:[#allocation2 + $0xc8] sm:$0xff] }
  0x1e   :  { %200 = vrot.lane.b32.xlu2 %v2482_v3, %s2422_s2  ;;  %196 = vrot.lane.b32.xlu1 %v2484_v4, %s2422_s2  ;;  %4032 = vst [vmem:[#allocation16_spill] sm:$0xff] %v2554_v21  ;;  %v2570_v26 = vld [vmem:[#allocation2 + $0xc0] sm:$0xff]  ;;  %v2578_v27 = vld [vmem:[#allocation2 + $0xe8] sm:$0xff]  ;;  %v2582_v29 = vld [vmem:[#allocation2 + $0xd8] sm:$0xff] }
  0x1f   :  { %192 = vrot.lane.b32.xlu0 %v2486_v5, %s2422_s2  ;;  %4034 = vst [vmem:[#allocation18_spill] sm:$0xff] %v2568_v25  ;;  %v2580_v28 = vld [vmem:[#allocation2 + $0xe0] sm:$0xff]  ;;  %v2592_v31 = vld [vmem:[#allocation2 + $0xf8] sm:$0xff]  ;;  %v2594_v32 = vld [vmem:[#allocation2 + $0xf0] sm:$0xff] }
  0x20   :  { %4035 = vst [vmem:[#allocation19_spill] sm:$0xff] %v2570_v26  ;;  %v2590_v30 = vld [vmem:[#allocation2 + $0x100] sm:$0xff]  ;;  %v2602_v33 = vld [vmem:[#allocation2 + $0x178] sm:$0xff]  ;;  %v2604_v34 = vld [vmem:[#allocation2 + $0x110] sm:$0xff] }
  0x21   :  { %v2606_v35 = vld [vmem:[#allocation2 + $0x108] sm:$0xff]  ;;  %v2616_v37 = vld [vmem:[#allocation2 + $0x160] sm:$0xff]  ;;  %v2620_v39 = vld [vmem:[#allocation2 + $0x170] sm:$0xff] }
  0x22   :  { %v2618_v38 = vld [vmem:[#allocation2 + $0x168] sm:$0xff]  ;;  %v2632_v42 = vld [vmem:[#allocation2 + $0x150] sm:$0xff]  ;;  %v2634_v43 = vld [vmem:[#allocation2 + $0x158] sm:$0xff] }
  0x23   :  { %v2630_v41 = vld [vmem:[#allocation2 + $0x148] sm:$0xff]  ;;  %v2644_v45 = vld [vmem:[#allocation2 + $0x130] sm:$0xff]  ;;  %v2646_v46 = vld [vmem:[#allocation2 + $0x138] sm:$0xff] }
  0x24   :  { %v2648_v47 = vld [vmem:[#allocation2 + $0x140] sm:$0xff]  ;;  %v2660_v51 = vld [vmem:[#allocation2 + $0x118] sm:$0xff]  ;;  %v2664_v53 = vld [vmem:[#allocation2 + $0x128] sm:$0xff] }
  0x25   :  { %4037 = vst [vmem:[#allocation21_spill] sm:$0xff] %v2660_v51  ;;  %v2662_v52 = vld [vmem:[#allocation2 + $0x120] sm:$0xff] }
  0x26   :  { %206 = vrot.lane.b32.xlu2 %v2494_v6, %s2422_s2  ;;  %204 = vrot.lane.b32.xlu1 %v2496_v7, %s2422_s2  ;;  %4038 = vst [vmem:[#allocation22_spill] sm:$0xff] %v2662_v52 }
  0x27   :  { %202 = vrot.lane.b32.xlu0 %v2498_v8, %s2422_s2  ;;  %4039 = vst [vmem:[#allocation23_spill] sm:$0xff] %v2664_v53 }
  0x2e   :  { %212 = vrot.lane.b32.xlu2 %v2506_v9, %s2422_s2  ;;  %210 = vrot.lane.b32.xlu1 %v2508_v10, %s2422_s2 }
  0x2f   :  { %208 = vrot.lane.b32.xlu0 %v2510_v11, %s2422_s2 }
  0x36   :  { %218 = vrot.lane.b32.xlu2 %v2518_v12, %s2422_s2  ;;  %216 = vrot.lane.b32.xlu1 %v2520_v13, %s2422_s2 }
  0x37   :  { %214 = vrot.lane.b32.xlu0 %v2522_v14, %s2422_s2 }
  0x3e   :  { %224 = vrot.lane.b32.xlu2 %v2530_v15, %s2422_s2  ;;  %222 = vrot.lane.b32.xlu1 %v2532_v16, %s2422_s2 }
  0x3f   :  { %220 = vrot.lane.b32.xlu0 %v2534_v17, %s2422_s2 }
  0x46   :  { %230 = vrot.lane.b32.xlu2 %v2542_v18, %s2422_s2  ;;  %228 = vrot.lane.b32.xlu1 %v2544_v19, %s2422_s2 }
  0x47   :  { %226 = vrot.lane.b32.xlu0 %v2546_v20, %s2422_s2 }
  0x4e   :  { %236 = vrot.lane.b32.xlu2 %v2554_v21, %s2422_s2  ;;  %234 = vrot.lane.b32.xlu1 %v2556_v22, %s2422_s2 }
  0x4f   :  { %232 = vrot.lane.b32.xlu0 %v2558_v23, %s2422_s2 }
  0x56   :  { %242 = vrot.lane.b32.xlu2 %v2566_v24, %s2422_s2  ;;  %240 = vrot.lane.b32.xlu1 %v2568_v25, %s2422_s2 }
  0x57   :  { %238 = vrot.lane.b32.xlu0 %v2570_v26, %s2422_s2 }
  0x5e   :  { %248 = vrot.lane.b32.xlu2 %v2578_v27, %s2422_s2  ;;  %246 = vrot.lane.b32.xlu1 %v2580_v28, %s2422_s2 }
  0x5f   :  { %244 = vrot.lane.b32.xlu0 %v2582_v29, %s2422_s2 }
  0x66   :  { %254 = vrot.lane.b32.xlu2 %v2590_v30, %s2422_s2  ;;  %252 = vrot.lane.b32.xlu1 %v2592_v31, %s2422_s2 }
  0x67   :  { %250 = vrot.lane.b32.xlu0 %v2594_v32, %s2422_s2 }
  0x6e   :  { %284 = vrot.lane.b32.xlu2 %v2602_v33, %s2422_s2  ;;  %258 = vrot.lane.b32.xlu1 %v2604_v34, %s2422_s2 }
  0x6f   :  { %256 = vrot.lane.b32.xlu0 %v2606_v35, %s2422_s2 }
  0x70   :  { %v2614_v36 = vpop.permute.xlu2 %198 }
  0x71   :  { %4036 = vst [vmem:[#allocation20_spill] sm:$0xff] %v2614_v36 }
  0x76   :  { %278 = vrot.lane.b32.xlu2 %v2616_v37, %s2422_s2  ;;  %280 = vrot.lane.b32.xlu1 %v2618_v38, %s2422_s2 }
  0x77   :  { %282 = vrot.lane.b32.xlu0 %v2620_v39, %s2422_s2 }
  0x78   :  { %v2628_v40 = vpop.permute.xlu2 %200 }
  0x7e   :  { %272 = vrot.lane.b32.xlu2 %v2630_v41, %s2422_s2  ;;  %274 = vrot.lane.b32.xlu1 %v2632_v42, %s2422_s2 }
  0x7f   :  { %276 = vrot.lane.b32.xlu0 %v2634_v43, %s2422_s2 }
  0x80   :  { %v2642_v44 = vpop.permute.xlu2 %206 }
  0x86   :  { %266 = vrot.lane.b32.xlu2 %v2644_v45, %s2422_s2  ;;  %268 = vrot.lane.b32.xlu1 %v2646_v46, %s2422_s2 }
  0x87   :  { %270 = vrot.lane.b32.xlu0 %v2648_v47, %s2422_s2 }
  0x88   :  { %v2656_v48 = vpop.permute.xlu2 %212  ;;  %v2658_v49 = vpop.permute.xlu1 %194 }
  0x89   :  { %v191_v50 = vpop.permute.xlu0 %190 }
  0x8a   :  { %v334_v54 = vsub.f32 %v2475_v2, %v191_v50 }
  0x8c   :  { %v382_v59 = vand.u32 2147483647, %v334_v54 }
  0x8e   :  { %260 = vrot.lane.b32.xlu2 %v2660_v51, %s2422_s2  ;;  %262 = vrot.lane.b32.xlu1 %v2662_v52, %s2422_s2  ;;  %v2721_v8 = vmul.f32 %v382_v59, %v382_v59 }
  0x8f   :  { %264 = vrot.lane.b32.xlu0 %v2664_v53, %s2422_s2 }
  0x90   :  { %v2673_v55 = vpop.permute.xlu2 %218  ;;  %v197_v56 = vpop.permute.xlu1 %196  ;;  %4049 = vst [vmem:[#allocation33_spill] sm:$0xff] %v2721_v8 }
  0x91   :  { %v193_v57 = vpop.permute.xlu0 %192 }
  0x92   :  { %v335_v58 = vsub.f32 %v2486_v5, %v193_v57 }
  0x94   :  { %v383_v60 = vand.u32 2147483647, %v335_v58 }
  0x96   :  { %v1914_v61 = vpack.i.bf16 %v383_v60, %v382_v59  ;;  %v2682_v2 = vmul.f32 %v383_v60, %v383_v60 }
  0x98   :  { %1915 = vrot.lane.b32.xlu0 %v1914_v61, %s2423_s4  ;;  %v225_v62 = vpop.permute.xlu2 %224  ;;  %v205_v63 = vpop.permute.xlu1 %204  ;;  %4042 = vst [vmem:[#allocation26_spill] sm:$0xff] %v2682_v2 }
  0x99   :  { %v351_v0 = vsub.f32 %v2530_v15, %v225_v62  ;;  %v2678_v36 = vpop.permute.xlu0 %202  ;;  %v341_v15 = vsub.f32 %v2496_v7, %v205_v63 }
  0x9a   :  { %4040 = vst [vmem:[#allocation24_spill] sm:$0xff] %v2678_v36  ;;  %v337_v36 = vsub.f32 %v2484_v4, %v197_v56 }
  0x9b   :  { %v2680_v51 = vand.u32 2147483647, %v351_v0  ;;  %v2697_v0 = vand.u32 2147483647, %v341_v15 }
  0x9d   :  { %4041 = vst [vmem:[#allocation25_spill] sm:$0xff] %v2680_v51  ;;  %v2686_v50 = vmul.f32 %v2680_v51, %v2680_v51  ;;  %v2706_v5 = vmul.f32 %v2697_v0, %v2697_v0 }
  0x9e   :  { %4044 = vst [vmem:[#allocation28_spill] sm:$0xff] %v2697_v0 }
  0x9f   :  { %4043 = vst [vmem:[#allocation27_spill] sm:$0xff] %v2686_v50 }
  0xa0   :  { %v2690_v54 = vpop.permute.xlu2 %230  ;;  %v2692_v57 = vpop.permute.xlu1 %210  ;;  %4046 = vst [vmem:[#allocation30_spill] sm:$0xff] %v2706_v5 }
  0xa1   :  { %v209_v58 = vpop.permute.xlu0 %208 }
  0xa8   :  { %v237_v61 = vpop.permute.xlu2 %236  ;;  %v2695_v62 = vpop.permute.xlu1 %216 }
  0xa9   :  { %v357_v60 = vsub.f32 %v2554_v21, %v237_v61  ;;  %v2700_v22 = vpop.permute.xlu0 %214 }
  0xab   :  { %v2702_v52 = vand.u32 2147483647, %v357_v60 }
  0xad   :  { %4045 = vst [vmem:[#allocation29_spill] sm:$0xff] %v2702_v52  ;;  %v2710_v2 = vmul.f32 %v2702_v52, %v2702_v52 }
  0xaf   :  { %4047 = vst [vmem:[#allocation31_spill] sm:$0xff] %v2710_v2  ;;  %v2734_v2 = vand.u32 2147483647, %v337_v36  ;;  %v339_v36 = vsub.f32 %v2482_v3, %v2628_v40  ;;  %v343_v3 = vsub.f32 %v2510_v11, %v209_v58 }
  0xb0   :  { %v2716_v50 = vpop.permute.xlu2 %242  ;;  %v223_v61 = vpop.permute.xlu1 %222 }
  0xb1   :  { %v350_v60 = vsub.f32 %v2532_v16, %v223_v61  ;;  %v221_v7 = vpop.permute.xlu0 %220  ;;  %4051 = vst [vmem:[#allocation35_spill] sm:$0xff] %v2734_v2  ;;  %v2741_v4 = vmul.f32 %v2734_v2, %v2734_v2  ;;  %v2759_v51 = vand.u32 2147483647, %v339_v36 }
  0xb3   :  { %v2719_v21 = vand.u32 2147483647, %v350_v60  ;;  %4053 = vst [vmem:[#allocation37_spill] sm:$0xff] %v2741_v4 }
  0xb4   :  { %4057 = vst [vmem:[#allocation41_spill] sm:$0xff] %v2759_v51 }
  0xb5   :  { %4048 = vst [vmem:[#allocation32_spill] sm:$0xff] %v2719_v21  ;;  %v2728_v63 = vmul.f32 %v2719_v21, %v2719_v21 }
  0xb7   :  { %4050 = vst [vmem:[#allocation34_spill] sm:$0xff] %v2728_v63 }
  0xb8   :  { %v2732_v5 = vpop.permute.xlu2 %248  ;;  %v229_v61 = vpop.permute.xlu1 %228 }
  0xb9   :  { %v353_v59 = vsub.f32 %v2544_v19, %v229_v61  ;;  %v227_v60 = vpop.permute.xlu0 %226 }
  0xba   :  { %v352_v53 = vsub.f32 %v2546_v20, %v227_v60 }
  0xbb   :  { %v2737_v0 = vand.u32 2147483647, %v353_v59 }
  0xbc   :  { %v2756_v8 = vand.u32 2147483647, %v352_v53 }
  0xbd   :  { %4052 = vst [vmem:[#allocation36_spill] sm:$0xff] %v2737_v0  ;;  %v2747_v15 = vmul.f32 %v2737_v0, %v2737_v0 }
  0xbe   :  { %4056 = vst [vmem:[#allocation40_spill] sm:$0xff] %v2756_v8  ;;  %v2769_v40 = vmul.f32 %v2756_v8, %v2756_v8 }
  0xbf   :  { %4054 = vst [vmem:[#allocation38_spill] sm:$0xff] %v2747_v15 }
  0xc0   :  { %v255_v61 = vpop.permute.xlu2 %254  ;;  %v2754_v59 = vpop.permute.xlu1 %234  ;;  %4060 = vst [vmem:[#allocation44_spill] sm:$0xff] %v2769_v40 }
  0xc1   :  { %4055 = vst [vmem:[#allocation39_spill] sm:$0xff] %v2754_v59  ;;  %v366_v63 = vsub.f32 %v2590_v30, %v255_v61  ;;  %v233_v56 = vpop.permute.xlu0 %232  ;;  %v2791_v61 = vand.u32 2147483647, %v343_v3  ;;  %v345_v3 = vsub.f32 %v2506_v9, %v2656_v48 }
  0xc2   :  { %v355_v21 = vsub.f32 %v2558_v23, %v233_v56  ;;  %v2779_v23 = vmul.f32 %v2759_v51, %v2759_v51 }
  0xc3   :  { %v2762_v2 = vand.u32 2147483647, %v366_v63  ;;  %v2814_v4 = vand.u32 2147483647, %v345_v3  ;;  %v354_v63 = vsub.f32 %v2542_v18, %v2690_v54  ;;  %v524_v18 = vrot.slane %v2602_v33, 7 }
  0xc4   :  { %v2764_v20 = vand.u32 2147483647, %v355_v21  ;;  %4062 = vst [vmem:[#allocation46_spill] sm:$0xff] %v2779_v23  ;;  %v2800_v21 = vmul.f32 %v2791_v61, %v2791_v61 }
  0xc5   :  { %4058 = vst [vmem:[#allocation42_spill] sm:$0xff] %v2762_v2  ;;  %v2773_v53 = vmul.f32 %v2762_v2, %v2762_v2  ;;  %v2843_v59 = vand.u32 2147483647, %v354_v63 }
  0xc6   :  { %4059 = vst [vmem:[#allocation43_spill] sm:$0xff] %v2764_v20  ;;  %v2785_v58 = vmul.f32 %v2764_v20, %v2764_v20  ;;  %v336_v20 = vsub.f32 %v2473_v1, %v2658_v49  ;;  %v348_v49 = vsub.f32 %v2518_v12, %v2673_v55 }
  0xc7   :  { %4061 = vst [vmem:[#allocation45_spill] sm:$0xff] %v2773_v53  ;;  %v2821_v53 = vmul.f32 %v2814_v4, %v2814_v4 }
  0xc8   :  { %4063 = vst [vmem:[#allocation47_spill] sm:$0xff] %v2785_v58  ;;  %v241_v56 = vpop.permute.xlu1 %240  ;;  %v2846_v52 = vand.u32 2147483647, %v336_v20  ;;  %v522_v20 = vrot.slane %v2620_v39, 7 }
  0xc9   :  { %v359_v60 = vsub.f32 %v2568_v25, %v241_v56  ;;  %v2794_v19 = vpop.permute.xlu0 %238  ;;  %4064 = vst [vmem:[#allocation48_spill] sm:$0xff] %v2800_v21  ;;  %v349_v56 = vsub.f32 %v2534_v17, %v221_v7 }
  0xca   :  { %4066 = vst [vmem:[#allocation50_spill] sm:$0xff] %v2843_v59  ;;  %v2870_v63 = vmul.f32 %v2846_v52, %v2846_v52  ;;  %v525_v55 = vsel %vm430_vm0, %v522_v20, %v524_v18 }
  0xcb   :  { %v2796_v8 = vand.u32 2147483647, %v359_v60  ;;  %v2835_v23 = vand.u32 2147483647, %v349_v56  ;;  %4067 = vst [vmem:[#allocation51_spill] sm:$0xff] %v2846_v52 }
  0xcd   :  { %v2804_v2 = vmul.f32 %v2796_v8, %v2796_v8 }
  0xcf   :  { %4065 = vst [vmem:[#allocation49_spill] sm:$0xff] %v2804_v2 }
  0xd0   :  { %v2812_v36 = vpop.permute.xlu1 %246 }
  0xd1   :  { %v245_v60 = vpop.permute.xlu0 %244 }
  0xd2   :  { %v361_v15 = vsub.f32 %v2582_v29, %v245_v60 }
  0xd4   :  { %v2817_v40 = vand.u32 2147483647, %v361_v15 }
  0xd6   :  { %v2827_v48 = vmul.f32 %v2817_v40, %v2817_v40 }
  0xd8   :  { %v253_v0 = vpop.permute.xlu1 %252 }
  0xd9   :  { %v365_v15 = vsub.f32 %v2592_v31, %v253_v0  ;;  %v2833_v60 = vpop.permute.xlu0 %250 }
  0xdb   :  { %v413_v58 = vand.u32 2147483647, %v365_v15  ;;  %v285_v15 = vpop.permute.xlu2 %284 }
  0xdc   :  { %v381_v54 = vsub.f32 %v2602_v33, %v285_v15  ;;  %v4000_v15 = vrot.slane %v2518_v12, 7 }
  0xdd   :  { %v1924_v51 = vpack.i.bf16 %v413_v58, %v2835_v23 }
  0xdf   :  { %1925 = vrot.lane.b32.xlu0 %v1924_v51, %s2423_s4  ;;  %v396_v51 = vand.u32 2147483647, %v348_v49  ;;  %v460_v49 = vrot.slane %v2534_v17, 7 }
  0xe0   :  { %v259_v7 = vpop.permute.xlu1 %258 }
  0xe1   :  { %v368_v0 = vsub.f32 %v2604_v34, %v259_v7  ;;  %v257_v3 = vpop.permute.xlu0 %256  ;;  %v2859_v34 = vmul.f32 %v2843_v59, %v2843_v59  ;;  %v684_v11 = vmul.f32 %v396_v51, %v396_v51  ;;  %v621_v7 = vsub.f32 %v2602_v33, %v525_v55 }
  0xe2   :  { %v367_v56 = vsub.f32 %v2606_v35, %v257_v3  ;;  %v492_v33 = vrot.slane %v2592_v31, 7 }
  0xe3   :  { %v2849_v21 = vand.u32 2147483647, %v368_v0  ;;  %4070 = vst [vmem:[#allocation54_spill] sm:$0xff] %v2859_v34  ;;  %v429_v0 = vand.u32 2147483647, %v381_v54 }
  0xe4   :  { %v2853_v1 = vand.u32 2147483647, %v367_v56 }
  0xe5   :  { %4068 = vst [vmem:[#allocation52_spill] sm:$0xff] %v2849_v21  ;;  %v2865_v35 = vmul.f32 %v2849_v21, %v2849_v21 }
  0xe6   :  { %4069 = vst [vmem:[#allocation53_spill] sm:$0xff] %v2853_v1  ;;  %v2876_v3 = vmul.f32 %v2853_v1, %v2853_v1  ;;  %v717_v1 = vmul.f32 %v429_v0, %v429_v0 }
  0xe7   :  { %4071 = vst [vmem:[#allocation55_spill] sm:$0xff] %v2865_v35 }
  0xe8   :  { %4072 = vst [vmem:[#allocation56_spill] sm:$0xff] %v2876_v3  ;;  %v281_v56 = vpop.permute.xlu1 %280 }
  0xe9   :  { %v379_v59 = vsub.f32 %v2618_v38, %v281_v56  ;;  %v283_v21 = vpop.permute.xlu0 %282 }
  0xea   :  { %v380_v2 = vsub.f32 %v2620_v39, %v283_v21  ;;  %v520_v21 = vrot.slane %v2618_v38, 7 }
  0xeb   :  { %v427_v52 = vand.u32 2147483647, %v379_v59  ;;  %v4002_v59 = vrot.slane %v2532_v16, 7 }
  0xec   :  { %v428_v25 = vand.u32 2147483647, %v380_v2  ;;  %v2891_v2 = vand.u32 2147483647, %v621_v7  ;;  %v523_v55 = vsel %vm430_vm0, %v520_v21, %v522_v20 }
  0xed   :  { %v715_v26 = vmul.f32 %v427_v52, %v427_v52  ;;  %v620_v20 = vsub.f32 %v2620_v39, %v523_v55 }
  0xee   :  { %v1919_v54 = vpack.i.bf16 %v428_v25, %v429_v0  ;;  %v716_v34 = vmul.f32 %v428_v25, %v428_v25  ;;  %v279_v25 = vpop.permute.xlu2 %278  ;;  %v1198_v7 = vmul.f32 %v2891_v2, %v2891_v2  ;;  %v685_v0 = vmul.f32 %v2835_v23, %v2835_v23 }
  0xef   :  { %v1944_v35 = vpack.i.bf16 %v684_v11, %v715_v26  ;;  %v490_v11 = vrot.slane %v2594_v32, 7  ;;  %v461_v26 = vsel %vm430_vm0, %v4000_v15, %v460_v49  ;;  %v378_v18 = vsub.f32 %v2616_v37, %v279_v25 }
  0xf0   :  { %1920 = vrot.lane.b32.xlu1 %v1919_v54, %s2423_s4  ;;  %v1934_v56 = vpack.i.bf16 %v716_v34, %v717_v1  ;;  %v701_v1 = vmul.f32 %v413_v58, %v413_v58  ;;  %v364_v34 = vsub.f32 %v2594_v32, %v2833_v60  ;;  %v1929_v54 = vpack.i.bf16 %v396_v51, %v427_v52 }
  0xf1   :  { %1945 = vrot.lane.b32.xlu0 %v1944_v35, %s2424_s17  ;;  %v277_v35 = vpop.permute.xlu0 %276  ;;  %v493_v58 = vsel %vm430_vm0, %v490_v11, %v492_v33  ;;  %v589_v60 = vsub.f32 %v2534_v17, %v461_v26  ;;  %v426_v15 = vand.u32 2147483647, %v378_v18  ;;  %v346_v52 = vsub.f32 %v2522_v14, %v2700_v22 }
  0xf2   :  { %1935 = vrot.lane.b32.xlu2 %v1934_v56, %s2424_s17  ;;  %v463_v56 = vsel %vm430_vm0, %v460_v49, %v4002_v59  ;;  %v377_v25 = vsub.f32 %v2634_v43, %v277_v35  ;;  %v412_v3 = vand.u32 2147483647, %v364_v34  ;;  %v1939_v23 = vpack.i.bf16 %v701_v1, %v685_v0 }
  0xf3   :  { %v590_v51 = vsub.f32 %v2532_v16, %v463_v56  ;;  %v605_v49 = vsub.f32 %v2592_v31, %v493_v58  ;;  %v714_v26 = vmul.f32 %v426_v15, %v426_v15  ;;  %v2924_v18 = vand.u32 2147483647, %v589_v60  ;;  %v275_v31 = vpop.permute.xlu1 %274 }
  0xf4   :  { %v425_v17 = vand.u32 2147483647, %v377_v25  ;;  %v700_v39 = vmul.f32 %v412_v3, %v412_v3  ;;  %v2926_v34 = vand.u32 2147483647, %v620_v20  ;;  %v394_v1 = vand.u32 2147483647, %v346_v52 }
  0xf5   :  { %v2928_v35 = vand.u32 2147483647, %v590_v51  ;;  %v2930_v22 = vand.u32 2147483647, %v605_v49  ;;  %v1949_v55 = vpack.i.bf16 %v426_v15, %v412_v3  ;;  %v363_v0 = vsub.f32 %v2578_v27, %v2732_v5 }
  0xf6   :  { %v1166_v56 = vmul.f32 %v2924_v18, %v2924_v18  ;;  %v1197_v58 = vmul.f32 %v2926_v34, %v2926_v34  ;;  %v4003_v60 = vrot.slane %v2590_v30, 7  ;;  %v518_v25 = vrot.slane %v2616_v37, 7 }
  0xf7   :  { %v1167_v3 = vmul.f32 %v2928_v35, %v2928_v35  ;;  %v1182_v5 = vmul.f32 %v2930_v22, %v2930_v22  ;;  %v347_v15 = vsub.f32 %v2520_v13, %v2695_v62  ;;  %v376_v20 = vsub.f32 %v2632_v42, %v275_v31 }
  0xf8   :  { %1930 = vrot.lane.b32.xlu1 %v1929_v54, %s2423_s4  ;;  %v1954_v54 = vpack.i.bf16 %v714_v26, %v700_v39  ;;  %v1959_v52 = vpack.i.bf16 %v1166_v56, %v1197_v58  ;;  %v521_v51 = vsel %vm430_vm0, %v518_v25, %v520_v21  ;;  %v362_v49 = vsub.f32 %v2580_v28, %v2812_v36 }
  0xf9   :  { %1341 = vrot.lane.b32.xlu0 %v1198_v7, %s2425_s18  ;;  %v1969_v7 = vpack.i.bf16 %v394_v1, %v425_v17  ;;  %v1984_v26 = vpack.i.bf16 %v1182_v5, %v1167_v3  ;;  %v495_v39 = vsel %vm430_vm0, %v492_v33, %v4003_v60  ;;  %v424_v62 = vand.u32 2147483647, %v376_v20  ;;  %v4094_v60 = vld [vmem:[#allocation13_spill] sm:$0xff] }
  0xfa   :  { %1940 = vrot.lane.b32.xlu2 %v1939_v23, %s2424_s17  ;;  %v411_v23 = vand.u32 2147483647, %v363_v0  ;;  %v606_v0 = vsub.f32 %v2590_v30, %v495_v39  ;;  %v456_v21 = vrot.slane %v2520_v13, 7  ;;  %v410_v31 = vand.u32 2147483647, %v362_v49 }
  0xfb   :  { %v454_v33 = vrot.slane %v2522_v14, 7  ;;  %v516_v56 = vrot.slane %v2634_v43, 7  ;;  %v712_v58 = vmul.f32 %v424_v62, %v424_v62  ;;  %v713_v5 = vmul.f32 %v425_v17, %v425_v17 }
  0xfc   :  { %v699_v36 = vmul.f32 %v411_v23, %v411_v23 }
  0xfd   :  { %v519_v17 = vsel %vm430_vm0, %v516_v56, %v518_v25 }
  0xfe   :  { %v618_v25 = vsub.f32 %v2616_v37, %v519_v17 }
 0x100   :  { %1950 = vrot.lane.b32.xlu1 %v1949_v55, %s2423_s4  ;;  %v395_v55 = vand.u32 2147483647, %v347_v15  ;;  %v2970_v15 = vand.u32 2147483647, %v606_v0 }
 0x101   :  { %1970 = vrot.lane.b32.xlu0 %v1969_v7, %s2423_s4  ;;  %v488_v7 = vrot.slane %v2578_v27, 7 }
 0x102   :  { %1955 = vrot.lane.b32.xlu2 %v1954_v54, %s2424_s17  ;;  %v619_v54 = vsub.f32 %v2618_v38, %v521_v51  ;;  %v1964_v59 = vpack.i.bf16 %v411_v23, %v395_v55  ;;  %v683_v3 = vmul.f32 %v395_v55, %v395_v55  ;;  %v698_v23 = vmul.f32 %v410_v31, %v410_v31  ;;  %v273_v55 = vpop.permute.xlu2 %272 }
 0x103   :  { %v491_v38 = vsel %vm430_vm0, %v488_v7, %v490_v11  ;;  %v682_v51 = vmul.f32 %v394_v1, %v394_v1  ;;  %v457_v11 = vsel %vm430_vm0, %v454_v33, %v456_v21  ;;  %v1183_v0 = vmul.f32 %v2970_v15, %v2970_v15 }
 0x104   :  { %v2972_v20 = vand.u32 2147483647, %v619_v54  ;;  %v1974_v49 = vpack.i.bf16 %v699_v36, %v683_v3  ;;  %v1999_v39 = vpack.i.bf16 %v712_v58, %v698_v23 }
 0x105   :  { %v1979_v54 = vpack.i.bf16 %v682_v51, %v713_v5  ;;  %v344_v5 = vsub.f32 %v2508_v10, %v2692_v57  ;;  %v271_v51 = vpop.permute.xlu0 %270 }
 0x106   :  { %v1196_v1 = vmul.f32 %v2972_v20, %v2972_v20  ;;  %v374_v17 = vsub.f32 %v2648_v47, %v271_v51 }
 0x107   :  { %v392_v57 = vand.u32 2147483647, %v344_v5 }
 0x108   :  { %1960 = vrot.lane.b32.xlu1 %v1959_v52, %s2425_s18 }
 0x109   :  { %1985 = vrot.lane.b32.xlu0 %v1984_v26, %s2425_s18  ;;  %v604_v26 = vsub.f32 %v2594_v32, %v491_v38  ;;  %v587_v32 = vsub.f32 %v2520_v13, %v457_v11  ;;  %v1989_v38 = vpack.i.bf16 %v1196_v1, %v1183_v0  ;;  %v680_v0 = vmul.f32 %v392_v57, %v392_v57 }
 0x10a   :  { %1965 = vrot.lane.b32.xlu2 %v1964_v59, %s2423_s4  ;;  %v4073_v59 = vrot.slane %v2518_v12, 7  ;;  %v360_v1 = vsub.f32 %v2566_v24, %v2716_v50  ;;  %v450_v50 = vrot.slane %v2508_v10, 7 }
 0x10b   :  { %v2995_v3 = vand.u32 2147483647, %v604_v26  ;;  %v2999_v23 = vand.u32 2147483647, %v587_v32  ;;  %v514_v26 = vrot.slane %v2632_v42, 7 }
 0x10c   :  { %v459_v52 = vsel %vm430_vm0, %v456_v21, %v4073_v59  ;;  %v375_v21 = vsub.f32 %v2630_v41, %v273_v55  ;;  %v408_v5 = vand.u32 2147483647, %v360_v1 }
 0x10d   :  { %v588_v36 = vsub.f32 %v2518_v12, %v459_v52  ;;  %v3001_v12 = vand.u32 2147483647, %v618_v25  ;;  %v1994_v52 = vpack.i.bf16 %v424_v62, %v410_v31  ;;  %v1181_v37 = vmul.f32 %v2995_v3, %v2995_v3 }
 0x10e   :  { %v423_v59 = vand.u32 2147483647, %v375_v21  ;;  %v1164_v62 = vmul.f32 %v2999_v23, %v2999_v23 }
 0x10f   :  { %v2993_v58 = vand.u32 2147483647, %v588_v36  ;;  %v1195_v31 = vmul.f32 %v3001_v12, %v3001_v12  ;;  %v422_v36 = vand.u32 2147483647, %v374_v17 }
 0x110   :  { %1975 = vrot.lane.b32.xlu1 %v1974_v49, %s2424_s17  ;;  %v486_v49 = vrot.slane %v2580_v28, 7  ;;  %v711_v11 = vmul.f32 %v423_v59, %v423_v59 }
 0x111   :  { %2000 = vrot.lane.b32.xlu0 %v1999_v39, %s2424_s17  ;;  %v1165_v13 = vmul.f32 %v2993_v58, %v2993_v58  ;;  %v4074_v39 = vpack.i.bf16 %v2817_v40, %v2814_v4  ;;  %v2009_v40 = vpack.i.bf16 %v1164_v62, %v1195_v31 }
 0x112   :  { %1980 = vrot.lane.b32.xlu2 %v1979_v54, %s2424_s17  ;;  %v517_v54 = vsel %vm430_vm0, %v514_v26, %v516_v56  ;;  %v489_v4 = vsel %vm430_vm0, %v486_v49, %v488_v7  ;;  %v2029_v32 = vpack.i.bf16 %v680_v0, %v711_v11  ;;  %v484_v56 = vrot.slane %v2582_v29, 7 }
 0x113   :  { %v2004_v55 = vpack.i.bf16 %v1181_v37, %v1165_v13  ;;  %v617_v25 = vsub.f32 %v2634_v43, %v517_v54  ;;  %v603_v21 = vsub.f32 %v2578_v27, %v489_v4  ;;  %v512_v7 = vrot.slane %v2630_v41, 7 }
 0x114   :  { %v696_v13 = vmul.f32 %v408_v5, %v408_v5  ;;  %v487_v37 = vsel %vm430_vm0, %v484_v56, %v486_v49 }
 0x115   :  { %v3035_v51 = vand.u32 2147483647, %v603_v21  ;;  %v3037_v43 = vand.u32 2147483647, %v617_v25  ;;  %v515_v62 = vsel %vm430_vm0, %v512_v7, %v514_v26  ;;  %v4075_v26 = vpack.i.bf16 %v2827_v48, %v2821_v53  ;;  %v267_v25 = vpop.permute.xlu2 %266 }
 0x116   :  { %v616_v49 = vsub.f32 %v2632_v42, %v515_v62  ;;  %v2039_v53 = vpack.i.bf16 %v422_v36, %v408_v5  ;;  %v482_v21 = vrot.slane %v2566_v24, 7 }
 0x117   :  { %v1180_v54 = vmul.f32 %v3035_v51, %v3035_v51 }
 0x118   :  { %1990 = vrot.lane.b32.xlu1 %v1989_v38, %s2425_s18  ;;  %v452_v38 = vrot.slane %v2506_v9, 7  ;;  %v3070_v42 = vand.u32 2147483647, %v616_v49 }
 0x119   :  { %2015 = vrot.lane.b32.xlu0 %v4074_v39, %s2423_s4  ;;  %v2019_v39 = vpack.i.bf16 %v392_v57, %v423_v59  ;;  %v602_v59 = vsub.f32 %v2580_v28, %v487_v37  ;;  %v342_v28 = vsub.f32 %v2494_v6, %v2642_v44  ;;  %v510_v44 = vrot.slane %v2648_v47, 7 }
 0x11a   :  { %1995 = vrot.lane.b32.xlu2 %v1994_v52, %s2423_s4  ;;  %v710_v52 = vmul.f32 %v422_v36, %v422_v36  ;;  %v455_v27 = vsel %vm430_vm0, %v452_v38, %v454_v33  ;;  %v453_v11 = vsel %vm430_vm0, %v450_v50, %v452_v38  ;;  %v1194_v33 = vmul.f32 %v3037_v43, %v3037_v43 }
 0x11b   :  { %v586_v17 = vsub.f32 %v2522_v14, %v455_v27  ;;  %v585_v14 = vsub.f32 %v2506_v9, %v453_v11  ;;  %v3064_v4 = vand.u32 2147483647, %v602_v59  ;;  %v390_v38 = vand.u32 2147483647, %v342_v28  ;;  %v4078_v59 = vld [vmem:[#allocation15_spill] sm:$0xff] }
 0x11c   :  { %v2044_v31 = vpack.i.bf16 %v710_v52, %v696_v13  ;;  %v2034_v0 = vpack.i.bf16 %v1194_v33, %v1180_v54  ;;  %v4076_v52 = vpack.i.bf16 %v2796_v8, %v2791_v61  ;;  %v1193_v5 = vmul.f32 %v3070_v42, %v3070_v42 }
 0x11d   :  { %v3062_v1 = vand.u32 2147483647, %v586_v17  ;;  %v1179_v48 = vmul.f32 %v3064_v4, %v3064_v4  ;;  %v372_v27 = vsub.f32 %v2644_v45, %v267_v25  ;;  %v678_v62 = vmul.f32 %v390_v38, %v390_v38 }
 0x11e   :  { %v513_v8 = vsel %vm430_vm0, %v510_v44, %v512_v7  ;;  %v448_v49 = vrot.slane %v4078_v59, 7  ;;  %v508_v7 = vrot.slane %v2646_v46, 7 }
 0x11f   :  { %v1163_v9 = vmul.f32 %v3062_v1, %v3062_v1  ;;  %v420_v17 = vand.u32 2147483647, %v372_v27  ;;  %v615_v33 = vsub.f32 %v2630_v41, %v513_v8 }
 0x120   :  { %2005 = vrot.lane.b32.xlu1 %v2004_v55, %s2425_s18  ;;  %v269_v55 = vpop.permute.xlu1 %268  ;;  %v451_v41 = vsel %vm430_vm0, %v448_v49, %v450_v50 }
 0x121   :  { %2030 = vrot.lane.b32.xlu0 %v2029_v32, %s2424_s17  ;;  %v373_v57 = vsub.f32 %v2646_v46, %v269_v55  ;;  %v2049_v37 = vpack.i.bf16 %v1179_v48, %v1163_v9  ;;  %v511_v48 = vsel %vm430_vm0, %v508_v7, %v510_v44  ;;  %v584_v50 = vsub.f32 %v2508_v10, %v451_v41  ;;  %v4080_v44 = vld [vmem:[#allocation49_spill] sm:$0xff] }
 0x122   :  { %2010 = vrot.lane.b32.xlu2 %v2009_v40, %s2425_s18  ;;  %v3068_v40 = vand.u32 2147483647, %v585_v14 }
 0x123   :  { %v421_v32 = vand.u32 2147483647, %v373_v57  ;;  %v708_v57 = vmul.f32 %v420_v17, %v420_v17 }
 0x124   :  { %v1162_v36 = vmul.f32 %v3068_v40, %v3068_v40 }
 0x125   :  { %v709_v13 = vmul.f32 %v421_v32, %v421_v32 }
 0x126   :  { %v2054_v61 = vpack.i.bf16 %v1162_v36, %v1193_v5  ;;  %v265_v36 = vpop.permute.xlu0 %264 }
 0x127   :  { %v2074_v55 = vpack.i.bf16 %v678_v62, %v709_v13  ;;  %v4081_v13 = vld [vmem:[#allocation48_spill] sm:$0xff] }
 0x128   :  { %2020 = vrot.lane.b32.xlu1 %v2019_v39, %s2423_s4  ;;  %v485_v39 = vsel %vm430_vm0, %v482_v21, %v484_v56 }
 0x129   :  { %2045 = vrot.lane.b32.xlu0 %v2044_v31, %s2424_s17  ;;  %v4077_v31 = vld [vmem:[#allocation19_spill] sm:$0xff]  ;;  %v601_v54 = vsub.f32 %v2582_v29, %v485_v39  ;;  %v3104_v29 = vand.u32 2147483647, %v615_v33 }
 0x12a   :  { %2025 = vrot.lane.b32.xlu2 %v4075_v26, %s2424_s17  ;;  %v358_v11 = vsub.f32 %v4077_v31, %v2794_v19  ;;  %v4079_v26 = vld [vmem:[#allocation18_spill] sm:$0xff]  ;;  %v4004_v19 = vrot.slane %v2494_v6, 7  ;;  %v4083_v39 = vld [vmem:[#allocation23_spill] sm:$0xff] }
 0x12b   :  { %v480_v14 = vrot.slane %v4079_v26, 7  ;;  %v1192_v27 = vmul.f32 %v3104_v29, %v3104_v29  ;;  %v371_v62 = vsub.f32 %v4083_v39, %v265_v36 }
 0x12c   :  { %v406_v56 = vand.u32 2147483647, %v358_v11  ;;  %v449_v9 = vsel %vm430_vm0, %v4004_v19, %v448_v49  ;;  %v3129_v11 = vpop.permute.xlu2 %260  ;;  %v444_v19 = vrot.slane %v4094_v60, 7 }
 0x12d   :  { %v483_v25 = vsel %vm430_vm0, %v480_v14, %v482_v21  ;;  %v583_v21 = vsub.f32 %v4078_v59, %v449_v9  ;;  %v263_v59 = vpop.permute.xlu1 %262  ;;  %v419_v49 = vand.u32 2147483647, %v371_v62 }
 0x12e   :  { %v694_v28 = vmul.f32 %v406_v56, %v406_v56 }
 0x12f   :  { %v3137_v33 = vand.u32 2147483647, %v583_v21  ;;  %v4092_v21 = vld [vmem:[#allocation17_spill] sm:$0xff] }
 0x130   :  { %2035 = vrot.lane.b32.xlu1 %v2034_v0, %s2425_s18  ;;  %v3102_v0 = vand.u32 2147483647, %v601_v54 }
 0x131   :  { %2060 = vrot.lane.b32.xlu0 %v4076_v52, %s2423_s4  ;;  %v2089_v52 = vpack.i.bf16 %v708_v57, %v694_v28  ;;  %v2084_v57 = vpack.i.bf16 %v420_v17, %v406_v56  ;;  %v3153_v56 = vpop.permute.xlu0 %1915 }
 0x132   :  { %2040 = vrot.lane.b32.xlu2 %v2039_v53, %s2423_s4  ;;  %v2064_v53 = vpack.i.bf16 %v390_v38, %v421_v32  ;;  %v1178_v5 = vmul.f32 %v3102_v0, %v3102_v0  ;;  %v600_v32 = vsub.f32 %v2566_v24, %v483_v25  ;;  %v614_v38 = vsub.f32 %v2648_v47, %v511_v48  ;;  %v4084_v24 = vld [vmem:[#allocation24_spill] sm:$0xff]  ;;  %v4086_v48 = vld [vmem:[#allocation29_spill] sm:$0xff] }
 0x133   :  { %v478_v25 = vrot.slane %v4077_v31, 7  ;;  %4090 = vst [vmem:[#allocation19_spill] sm:$0xff] %v3153_v56  ;;  %v2272_v56 = vld [vmem:[#allocation2 + $0xb8] sm:$0xff] }
 0x134   :  { %v2079_v8 = vpack.i.bf16 %v1192_v27, %v1178_v5  ;;  %v3133_v10 = vand.u32 2147483647, %v600_v32  ;;  %v3139_v47 = vand.u32 2147483647, %v614_v38  ;;  %v4089_v5 = vld [vmem:[#allocation22_spill] sm:$0xff]  ;;  %v1160_v27 = vmul.f32 %v3137_v33, %v3137_v33  ;;  %v4091_v32 = vld [vmem:[#allocation39_spill] sm:$0xff] }
 0x135   :  { %v370_v17 = vsub.f32 %v4089_v5, %v263_v59  ;;  %v356_v38 = vsub.f32 %v4092_v21, %v4091_v32 }
 0x136   :  { %v1177_v41 = vmul.f32 %v3133_v10, %v3133_v10 }
 0x138   :  { %2050 = vrot.lane.b32.xlu1 %v2049_v37, %s2425_s18  ;;  %v4082_v37 = vpack.i.bf16 %v4080_v44, %v4081_v13  ;;  %v707_v44 = vmul.f32 %v419_v49, %v419_v49 }
 0x139   :  { %2075 = vrot.lane.b32.xlu0 %v2074_v55, %s2424_s17  ;;  %v4085_v55 = vld [vmem:[#allocation14_spill] sm:$0xff] }
 0x13a   :  { %2055 = vrot.lane.b32.xlu2 %v2054_v61, %s2425_s18  ;;  %v3131_v61 = vand.u32 2147483647, %v584_v50  ;;  %v340_v54 = vsub.f32 %v4085_v55, %v4084_v24  ;;  %v1191_v50 = vmul.f32 %v3139_v47, %v3139_v47  ;;  %v481_v24 = vsel %vm430_vm0, %v478_v25, %v480_v14 }
 0x13c   :  { %v1161_v28 = vmul.f32 %v3131_v61, %v3131_v61  ;;  %v388_v9 = vand.u32 2147483647, %v340_v54  ;;  %v3166_v54 = vand.u32 2147483647, %v370_v17  ;;  %v2099_v59 = vpack.i.bf16 %v1160_v27, %v1191_v50 }
 0x13e   :  { %v706_v14 = vmul.f32 %v3166_v54, %v3166_v54 }
 0x140   :  { %2065 = vrot.lane.b32.xlu1 %v2064_v53, %s2423_s4  ;;  %v506_v53 = vrot.slane %v2644_v45, 7 }
 0x141   :  { %2090 = vrot.lane.b32.xlu0 %v2089_v52, %s2424_s17  ;;  %v4087_v52 = vld [vmem:[#allocation28_spill] sm:$0xff] }
 0x142   :  { %2070 = vrot.lane.b32.xlu2 %v4082_v37, %s2424_s17  ;;  %v4088_v36 = vpack.i.bf16 %v4086_v48, %v4087_v52  ;;  %v2094_v37 = vpack.i.bf16 %v1177_v41, %v1161_v28  ;;  %v509_v62 = vsel %vm430_vm0, %v506_v53, %v508_v7  ;;  %v3169_v52 = vand.u32 2147483647, %v356_v38 }
 0x143   :  { %v613_v32 = vsub.f32 %v2646_v46, %v509_v62  ;;  %v599_v28 = vsub.f32 %v4079_v26, %v481_v24  ;;  %v504_v46 = vrot.slane %v4083_v39, 7  ;;  %v4096_v38 = vrot.slane %v2494_v6, 7 }
 0x144   :  { %v692_v17 = vmul.f32 %v3169_v52, %v3169_v52 }
 0x145   :  { %v3186_v27 = vand.u32 2147483647, %v599_v28  ;;  %v3188_v50 = vand.u32 2147483647, %v613_v32  ;;  %v4097_v28 = vrot.slane %v4085_v55, 7  ;;  %v507_v6 = vsel %vm430_vm0, %v504_v46, %v506_v53  ;;  %v4100_v53 = vld [vmem:[#allocation30_spill] sm:$0xff] }
 0x147   :  { %4095 = vst [vmem:[#allocation15_spill] sm:$0xff] %v3188_v50  ;;  %v445_v32 = vsel %vm430_vm0, %v4097_v28, %v444_v19 }
 0x148   :  { %2080 = vrot.lane.b32.xlu1 %v2079_v8, %s2425_s18  ;;  %v676_v8 = vmul.f32 %v388_v9, %v388_v9 }
 0x149   :  { %2105 = vrot.lane.b32.xlu0 %v4088_v36, %s2423_s4 }
 0x14a   :  { %2085 = vrot.lane.b32.xlu2 %v2084_v57, %s2423_s4  ;;  %v4093_v57 = vld [vmem:[#allocation16_spill] sm:$0xff]  ;;  %v2119_v36 = vpack.i.bf16 %v676_v8, %v707_v44  ;;  %v447_v44 = vsel %vm430_vm0, %v444_v19, %v4096_v38  ;;  %v4099_v19 = vld [vmem:[#allocation31_spill] sm:$0xff]  ;;  %v612_v38 = vsub.f32 %v2644_v45, %v507_v6  ;;  %v474_v45 = vrot.slane %v4092_v21, 7 }
 0x14b   :  { %v4005_v48 = vrot.slane %v4093_v57, 7  ;;  %v2129_v6 = vpack.i.bf16 %v3166_v54, %v3169_v52 }
 0x14c   :  { %v3162_v13 = vpop.permute.xlu2 %1935 }
 0x14d   :  { %v479_v60 = vsel %vm430_vm0, %v4005_v48, %v478_v25 }
 0x14e   :  { %v598_v25 = vsub.f32 %v4077_v31, %v479_v60  ;;  %v1190_v31 = vmul.f32 %v3188_v50, %v3188_v50 }
 0x150   :  { %2095 = vrot.lane.b32.xlu1 %v2094_v37, %s2425_s18 }
 0x151   :  { %2120 = vrot.lane.b32.xlu0 %v2119_v36, %s2424_s17  ;;  %v1926_v7 = vpop.permute.xlu0 %1925  ;;  %v2134_v36 = vpack.i.bf16 %v706_v14, %v692_v17  ;;  %v4098_v14 = vld [vmem:[#allocation21_spill] sm:$0xff]  ;;  %v4101_v17 = vpack.i.bf16 %v4099_v19, %v4100_v53 }
 0x152   :  { %2100 = vrot.lane.b32.xlu2 %v2099_v59, %s2425_s18  ;;  %v1928_v37 = vunpack.i.h.bf16 %v1926_v7  ;;  %v1927_v62 = vunpack.i.l.bf16 %v1926_v7  ;;  %v2109_v59 = vpack.i.bf16 %v388_v9, %v419_v49  ;;  %v1176_v7 = vmul.f32 %v3186_v27, %v3186_v27  ;;  %v2269_v49 = vld [vmem:[#allocation2 + $0x40] sm:$0xff] }
 0x153   :  { %v582_v9 = vsub.f32 %v2269_v49, %v447_v44  ;;  %v369_v60 = vsub.f32 %v4098_v14, %v3129_v11  ;;  %v3219_v44 = vld [vmem:[#allocation2 + $0x20] sm:$0xff]  ;;  %v4104_v49 = vld [vmem:[#allocation43_spill] sm:$0xff] }
 0x154   :  { %v1941_v26 = vpop.permute.xlu2 %1940 }
 0x155   :  { %v1943_v8 = vunpack.i.h.bf16 %v1941_v26  ;;  %v1942_v24 = vunpack.i.l.bf16 %v1941_v26 }
 0x157   :  { %v1118_v48 = vsel %vm1102_vm1, %v1927_v62, %v1942_v24  ;;  %v1134_v41 = vsel %vm1102_vm1, %v1928_v37, %v1943_v8  ;;  %v2124_v62 = vpack.i.bf16 %v1190_v31, %v1176_v7  ;;  %v3215_v8 = vand.u32 2147483647, %v582_v9  ;;  %v4102_v24 = vld [vmem:[#allocation20_spill] sm:$0xff]  ;;  %v4105_v9 = vld [vmem:[#allocation41_spill] sm:$0xff] }
 0x158   :  { %2110 = vrot.lane.b32.xlu1 %v2109_v59, %s2423_s4  ;;  %1469 = vmatpush.msra.mxu0 %v1118_v48  ;;  %v2270_v48 = vld [vmem:[#allocation2 + $0x38] sm:$0xff]  ;;  %v338_v11 = vsub.f32 %v3219_v44, %v4102_v24  ;;  %v4006_v59 = vrot.slane %v4089_v5, 7 }
 0x159   :  { %1489 = vmatpush.msra.mxu1 %v1134_v41  ;;  %2135 = vrot.lane.b32.xlu0 %v2134_v36, %s2424_s17  ;;  %v581_v26 = vsub.f32 %v2270_v48, %v445_v32  ;;  %v3217_v41 = vand.u32 2147483647, %v598_v25  ;;  %v3224_v36 = vand.u32 2147483647, %v369_v60  ;;  %v3228_v32 = vand.u32 2147483647, %v612_v38 }
 0x15a   :  { %2115 = vrot.lane.b32.xlu2 %v4101_v17, %s2424_s17  ;;  %v1159_v25 = vmul.f32 %v3215_v8, %v3215_v8  ;;  %v386_v31 = vand.u32 2147483647, %v338_v11  ;;  %v4106_v60 = vpack.i.bf16 %v4104_v49, %v4105_v9  ;;  %v505_v21 = vsel %vm430_vm0, %v4006_v59, %v504_v46 }
 0x15b   :  { %v3226_v28 = vand.u32 2147483647, %v581_v26  ;;  %4103 = vst [vmem:[#allocation18_spill] sm:$0xff] %v3228_v32  ;;  %v1175_v7 = vmul.f32 %v3217_v41, %v3217_v41  ;;  %v705_v54 = vmul.f32 %v3224_v36, %v3224_v36  ;;  %v1189_v53 = vmul.f32 %v3228_v32, %v3228_v32 }
 0x15c   :  { %v3213_v37 = vpop.permute.xlu2 %1955  ;;  %v1937_v17 = vunpack.i.l.bf16 %v3162_v13  ;;  %v674_v49 = vmul.f32 %v386_v31, %v386_v31 }
 0x15d   :  { %v1158_v19 = vmul.f32 %v3226_v28, %v3226_v28  ;;  %v2139_v11 = vpack.i.bf16 %v1175_v7, %v1159_v25  ;;  %v3263_v25 = vld [vmem:[#allocation2 + $0xa8] sm:$0xff] }
 0x15e   :  { %v2164_v50 = vpack.i.bf16 %v674_v49, %v705_v54  ;;  %v500_v54 = vrot.slane %v4098_v14, 7  ;;  %v2154_v49 = vpack.i.bf16 %v386_v31, %v3224_v36  ;;  %v2276_v31 = vld [vmem:[#allocation2 + $0xb0] sm:$0xff] }
 0x15f   :  { %v2144_v59 = vpack.i.bf16 %v1158_v19, %v1189_v53 }
 0x160   :  { %2125 = vrot.lane.b32.xlu1 %v2124_v62, %s2425_s18  ;;  %v4107_v62 = vrot.slane %v4093_v57, 7  ;;  %v2273_v57 = vld [vmem:[#allocation2 + $0x28] sm:$0xff] }
 0x161   :  { %2150 = vrot.lane.b32.xlu0 %v4106_v60, %s2423_s4  ;;  %v611_v60 = vsub.f32 %v4083_v39, %v505_v21  ;;  %v4010_v39 = vrot.slane %v3219_v44, 7 }
 0x162   :  { %v1921_v52 = vpop.permute.xlu1 %1920  ;;  %2130 = vrot.lane.b32.xlu2 %v2129_v6, %s2423_s4  ;;  %v477_v46 = vsel %vm430_vm0, %v474_v45, %v4107_v62  ;;  %v1938_v6 = vunpack.i.h.bf16 %v3162_v13  ;;  %v440_v62 = vrot.slane %v2273_v57, 7  ;;  %v472_v13 = vrot.slane %v3263_v25, 7 }
 0x163   :  { %v1923_v48 = vunpack.i.h.bf16 %v1921_v52  ;;  %v1922_v26 = vunpack.i.l.bf16 %v1921_v52  ;;  %v1946_v38 = vpop.permute.xlu0 %1945  ;;  %v597_v32 = vsub.f32 %v2272_v56, %v477_v46  ;;  %v3271_v21 = vand.u32 2147483647, %v611_v60 }
 0x164   :  { %v3256_v24 = vpop.permute.xlu2 %1965  ;;  %v1948_v19 = vunpack.i.h.bf16 %v1946_v38 }
 0x165   :  { %v1150_v9 = vsel %vm1102_vm1, %v1922_v26, %v1937_v17  ;;  %v1149_v52 = vsel %vm1102_vm1, %v1923_v48, %v1938_v6  ;;  %v3269_v56 = vand.u32 2147483647, %v597_v32  ;;  %4109 = vst [vmem:[#allocation48_spill] sm:$0xff] %v3271_v21  ;;  %v1947_v26 = vunpack.i.l.bf16 %v1946_v38 }
 0x166   :  { %1509 = vmatpush.msra.mxu2 %v1150_v9  ;;  %v475_v32 = vsel %vm430_vm0, %v472_v13, %v474_v45  ;;  %v1188_v38 = vmul.f32 %v3271_v21, %v3271_v21  ;;  %v4111_v9 = vrot.slane %v4089_v5, 7  ;;  %v2275_v45 = vld [vmem:[#allocation2 + $0x30] sm:$0xff] }
 0x167   :  { %4108 = vst [vmem:[#allocation49_spill] sm:$0xff] %v3269_v56  ;;  %v1174_v6 = vmul.f32 %v3269_v56, %v3269_v56  ;;  %v3303_v5 = vld [vmem:[#allocation2 + $0x110] sm:$0xff] }
 0x168   :  { %1510 = vmatpush.msra.mxu2 %v1149_v52  ;;  %2140 = vrot.lane.b32.xlu1 %v2139_v11, %s2425_s18  ;;  %v503_v60 = vsel %vm430_vm0, %v500_v54, %v4111_v9  ;;  %v596_v52 = vsub.f32 %v2276_v31, %v475_v32  ;;  %v4116_v32 = vld [vmem:[#allocation46_spill] sm:$0xff]  ;;  %v1958_v31 = vunpack.i.h.bf16 %v3213_v37 }
 0x169   :  { %2165 = vrot.lane.b32.xlu0 %v2164_v50, %s2424_s17  ;;  %v4110_v50 = vrot.slane %v4085_v55, 7  ;;  %v441_v55 = vsel %vm430_vm0, %v4010_v39, %v440_v62  ;;  %v1957_v39 = vunpack.i.l.bf16 %v3213_v37 }
 0x16a   :  { %v1931_v7 = vpop.permute.xlu1 %1930  ;;  %2145 = vrot.lane.b32.xlu2 %v2144_v59, %s2425_s18 }
 0x16b   :  { %v1933_v53 = vunpack.i.h.bf16 %v1931_v7  ;;  %v1932_v17 = vunpack.i.l.bf16 %v1931_v7  ;;  %v3274_v48 = vpop.permute.xlu0 %1341  ;;  %v443_v11 = vsel %vm430_vm0, %v440_v62, %v4110_v50  ;;  %v3296_v7 = vld [vmem:[#allocation2 + $0xa0] sm:$0xff]  ;;  %v579_v62 = vsub.f32 %v2273_v57, %v441_v55 }
 0x16c   :  { %v3276_v46 = vpop.permute.xlu2 %1980  ;;  %v580_v36 = vsub.f32 %v2275_v45, %v443_v11  ;;  %v2169_v45 = vpack.i.bf16 %v1188_v38, %v1174_v6  ;;  %v3320_v50 = vand.u32 2147483647, %v596_v52 }
 0x16d   :  { %v1117_v59 = vsel %vm1102_vm1, %v1933_v53, %v1948_v19  ;;  %v1148_v14 = vsel %vm1102_vm1, %v1932_v17, %v1947_v26  ;;  %v4011_v19 = vrot.slane %v3296_v7, 7  ;;  %v4112_v53 = vld [vmem:[#allocation55_spill] sm:$0xff]  ;;  %v4113_v17 = vld [vmem:[#allocation54_spill] sm:$0xff]  ;;  %v1982_v55 = vunpack.i.l.bf16 %v3276_v46 }
 0x16e   :  { %1470 = vmatpush.msra.mxu0 %v1117_v59  ;;  %1511 = vmatpush.msra.mxu2 %v1148_v14  ;;  %v4114_v26 = vpack.i.bf16 %v4112_v53, %v4113_v17  ;;  %v2279_v59 = vld [vmem:[#allocation2 + $0x120] sm:$0xff]  ;;  %4119 = vst [vmem:[#allocation24_spill] sm:$0xff] %v3320_v50 }
 0x16f   :  { %v610_v11 = vsub.f32 %v2279_v59, %v503_v60  ;;  %v3318_v59 = vand.u32 2147483647, %v580_v36  ;;  %v473_v6 = vsel %vm430_vm0, %v4011_v19, %v472_v13  ;;  %v3331_v36 = vand.u32 2147483647, %v579_v62 }
 0x170   :  { %2155 = vrot.lane.b32.xlu1 %v2154_v49, %s2423_s4  ;;  %v4115_v49 = vld [vmem:[#allocation47_spill] sm:$0xff] }
 0x171   :  { %2180 = vrot.lane.b32.xlu0 %v4114_v26, %s2424_s17  ;;  %v4117_v9 = vpack.i.bf16 %v4115_v49, %v4116_v32  ;;  %4118 = vst [vmem:[#allocation23_spill] sm:$0xff] %v3318_v59  ;;  %v3333_v52 = vand.u32 2147483647, %v610_v11  ;;  %v595_v11 = vsub.f32 %v3263_v25, %v473_v6  ;;  %v1156_v19 = vmul.f32 %v3331_v36, %v3331_v36 }
 0x172   :  { %v1951_v14 = vpop.permute.xlu1 %1950  ;;  %4121 = vst [vmem:[#allocation14_spill] sm:$0xff] %v3331_v36 }
 0x173   :  { %2160 = vrot.lane.b32.xlu2 %v4117_v9, %s2424_s17  ;;  %v1953_v53 = vunpack.i.h.bf16 %v1951_v14  ;;  %v1952_v17 = vunpack.i.l.bf16 %v1951_v14  ;;  %v3312_v57 = vpop.permute.xlu0 %1970  ;;  %v4120_v14 = vrot.slane %v3303_v5, 7  ;;  %4122 = vst [vmem:[#allocation29_spill] sm:$0xff] %v3333_v52  ;;  %v3335_v9 = vld [vmem:[#allocation2 + $0x10] sm:$0xff]  ;;  %v1187_v25 = vmul.f32 %v3333_v52, %v3333_v52 }
 0x174   :  { %v3315_v26 = vpop.permute.xlu2 %1995  ;;  %v1972_v60 = vunpack.i.l.bf16 %v3312_v57  ;;  %v4013_v13 = vrot.slane %v3335_v9, 7 }
 0x175   :  { %v1133_v37 = vsel %vm1102_vm1, %v1952_v17, %v1957_v39  ;;  %v1147_v38 = vsel %vm1102_vm1, %v1953_v53, %v1958_v31  ;;  %v501_v49 = vsel %vm430_vm0, %v4120_v14, %v500_v54  ;;  %v1157_v39 = vmul.f32 %v3318_v59, %v3318_v59  ;;  %v3343_v31 = vld [vmem:[#allocation2 + $0x18] sm:$0xff]  ;;  %v4127_v14 = vld [vmem:[#allocation50_spill] sm:$0xff] }
 0x176   :  { %1490 = vmatpush.msra.mxu1 %v1133_v37  ;;  %1512 = vmatpush.msra.mxu2 %v1147_v38  ;;  %v1146_v32 = vsel %vm1102_vm1, %v1972_v60, %v1982_v55  ;;  %v1173_v54 = vmul.f32 %v3320_v50, %v3320_v50  ;;  %v436_v62 = vrot.slane %v3343_v31, 7  ;;  %v2282_v53 = vld [vmem:[#allocation2 + $0x118] sm:$0xff]  ;;  %v4123_v55 = vld [vmem:[#allocation36_spill] sm:$0xff]  ;;  %v4124_v60 = vld [vmem:[#allocation35_spill] sm:$0xff]  ;;  %v3380_v50 = vand.u32 2147483647, %v595_v11 }
 0x177   :  { %v609_v17 = vsub.f32 %v2282_v53, %v501_v49  ;;  %v4126_v38 = vld [vmem:[#allocation52_spill] sm:$0xff] }
 0x178   :  { %2170 = vrot.lane.b32.xlu1 %v2169_v45, %s2425_s18  ;;  %1513 = vmatpush.msra.mxu2 %v1146_v32  ;;  %v4125_v45 = vpack.i.bf16 %v4123_v55, %v4124_v60  ;;  %v4128_v32 = vpack.i.bf16 %v4126_v38, %v4127_v14  ;;  %v3362_v6 = vsel %vm430_vm0, %v4013_v13, %v436_v62  ;;  %v3366_v60 = vld [vmem:[#allocation2 + $0x98] sm:$0xff]  ;;  %v3377_v13 = vld [vmem:[#allocation2 + $0x108] sm:$0xff] }
 0x179   :  { %v3372_v38 = vsel %vm1391_vm2, %v2891_v2, %v3274_v48  ;;  %v2184_v36 = vpack.i.bf16 %v1173_v54, %v1157_v39  ;;  %4130 = vst [vmem:[#allocation22_spill] sm:$0xff] %v3380_v50  ;;  %v3382_v59 = vand.u32 2147483647, %v609_v17  ;;  %v577_v39 = vsub.f32 %v3343_v31, %v3362_v6 }
 0x17a   :  { %2195 = vrot.lane.b32.xlu0 %v4125_v45, %s2423_s4  ;;  %v1961_v37 = vpop.permute.xlu1 %1960  ;;  %4129 = vst [vmem:[#allocation28_spill] sm:$0xff] %v3372_v38  ;;  %v2189_v45 = vpack.i.bf16 %v1156_v19, %v1187_v25  ;;  %v4017_v54 = vrot.slane %v3372_v38, 1  ;;  %v1968_v19 = vunpack.i.h.bf16 %v3256_v24  ;;  %v4133_v25 = vld [vmem:[#allocation56_spill] sm:$0xff]  ;;  %v3412_v6 = vmul.f32 %v3380_v50, %v3380_v50  ;;  %v3458_v38 = vld [vmem:[#allocation2 + $0x88] sm:$0xff] }
 0x17b   :  { %2175 = vrot.lane.b32.xlu2 %v4128_v32, %s2423_s4  ;;  %v1963_v49 = vunpack.i.h.bf16 %v1961_v37  ;;  %v1962_v53 = vunpack.i.l.bf16 %v1961_v37  ;;  %v3364_v55 = vpop.permute.xlu0 %1985  ;;  %v496_v37 = vrot.slane %v3377_v13, 7  ;;  %4131 = vst [vmem:[#allocation39_spill] sm:$0xff] %v3382_v59  ;;  %v4134_v31 = vpack.i.bf16 %v2870_v63, %v4133_v25 }
 0x17c   :  { %v3374_v14 = vpop.permute.xlu2 %2010  ;;  %v1987_v32 = vunpack.i.l.bf16 %v3364_v55  ;;  %v4136_v63 = vrot.slane %v3219_v44, 7 }
 0x17d   :  { %v3386_v56 = vsel %vm1391_vm2, %v2926_v34, %v1962_v53  ;;  %v3390_v2 = vsel %vm1391_vm2, %v2924_v18, %v1963_v49  ;;  %v1967_v34 = vunpack.i.l.bf16 %v3256_v24  ;;  %v3416_v24 = vmul.f32 %v3382_v59, %v3382_v59 }
 0x17e   :  { %v3394_v48 = vsel %vm1391_vm2, %v2928_v35, %v1987_v32  ;;  %v4018_v11 = vrot.slane %v3386_v56, 1  ;;  %v1983_v35 = vunpack.i.h.bf16 %v3276_v46  ;;  %v439_v49 = vsel %vm430_vm0, %v436_v62, %v4136_v63 }
 0x17f   :  { %4132 = vst [vmem:[#allocation17_spill] sm:$0xff] %v3394_v48  ;;  %v4024_v17 = vrot.slane %v3394_v48, 1  ;;  %v4137_v53 = vrot.slane %v3296_v7, 7  ;;  %v4138_v32 = vrot.slane %v3366_v60, 7  ;;  %v1973_v62 = vunpack.i.h.bf16 %v3312_v57 }
 0x180   :  { %2185 = vrot.lane.b32.xlu1 %v2184_v36, %s2425_s18  ;;  %v3423_v36 = vsel %vm1633_vm3, %v4018_v11, %v4017_v54  ;;  %v4140_v54 = vrot.slane %v3390_v2, 1  ;;  %v1998_v11 = vunpack.i.h.bf16 %v3315_v26 }
 0x181   :  { %4135 = vst [vmem:[#allocation16_spill] sm:$0xff] %v3423_v36  ;;  %v471_v25 = vsel %vm430_vm0, %v4138_v32, %v4137_v53  ;;  %v1997_v53 = vunpack.i.l.bf16 %v3315_v26  ;;  %v2012_v32 = vunpack.i.l.bf16 %v3374_v14 }
 0x182   :  { %2210 = vrot.lane.b32.xlu0 %v4134_v31, %s2424_s17  ;;  %v1976_v46 = vpop.permute.xlu1 %1975  ;;  %v4139_v31 = vrot.slane %v3303_v5, 7 }
 0x183   :  { %2190 = vrot.lane.b32.xlu2 %v2189_v45, %s2425_s18  ;;  %v3442_v45 = vsel %vm1633_vm3, %v4140_v54, %v4024_v17  ;;  %v1978_v63 = vunpack.i.h.bf16 %v1976_v46  ;;  %v1977_v50 = vunpack.i.l.bf16 %v1976_v46  ;;  %v2001_v59 = vpop.permute.xlu0 %2000  ;;  %v578_v54 = vsub.f32 %v3219_v44, %v439_v49 }
 0x184   :  { %v499_v18 = vsel %vm430_vm0, %v496_v37, %v4139_v31  ;;  %4141 = vst [vmem:[#allocation13_spill] sm:$0xff] %v3442_v45  ;;  %v2026_v52 = vpop.permute.xlu2 %2025  ;;  %v2003_v31 = vunpack.i.h.bf16 %v2001_v59  ;;  %v2002_v21 = vunpack.i.l.bf16 %v2001_v59  ;;  %v594_v17 = vsub.f32 %v3296_v7, %v471_v25  ;;  %v3452_v45 = vld [vmem:[#allocation2 + $0x90] sm:$0xff]  ;;  %v4146_v25 = vld [vmem:[#allocation45_spill] sm:$0xff] }
 0x185   :  { %v1116_v48 = vsel %vm1102_vm1, %v1967_v34, %v1977_v50  ;;  %v1132_v36 = vsel %vm1102_vm1, %v1968_v19, %v1978_v63  ;;  %v466_v57 = vrot.slane %v3452_v45, 7  ;;  %v608_v59 = vsub.f32 %v3303_v5, %v499_v18  ;;  %v3463_v19 = vld [vmem:[#allocation2] sm:$0xff]  ;;  %v3466_v34 = vld [vmem:[#allocation2 + $0x8] sm:$0xff]  ;;  %v4143_v5 = vld [vmem:[#allocation53_spill] sm:$0xff] }
 0x186   :  { %1471 = vmatpush.msra.mxu0 %v1116_v48  ;;  %1491 = vmatpush.msra.mxu1 %v1132_v36  ;;  %v1131_v26 = vsel %vm1102_vm1, %v1997_v53, %v2002_v21  ;;  %v1145_v46 = vsel %vm1102_vm1, %v1998_v11, %v2003_v31  ;;  %v464_v50 = vrot.slane %v3458_v38, 7  ;;  %v1988_v44 = vunpack.i.h.bf16 %v3364_v55  ;;  %v4142_v11 = vld [vmem:[#allocation51_spill] sm:$0xff]  ;;  %v4149_v31 = vld [vmem:[#allocation38_spill] sm:$0xff] }
 0x187   :  { %v1115_v7 = vsel %vm1102_vm1, %v1973_v62, %v1983_v35  ;;  %1514 = vmatpush.msra.mxu2 %v1145_v46  ;;  %v431_v48 = vrot.slane %v3463_v19, 7  ;;  %v432_v21 = vrot.slane %v3466_v34, 7  ;;  %v4144_v18 = vpack.i.bf16 %v4142_v11, %v4143_v5  ;;  %v4147_v62 = vld [vmem:[#allocation44_spill] sm:$0xff]  ;;  %v4150_v46 = vld [vmem:[#allocation37_spill] sm:$0xff] }
 0x188   :  { %1472 = vmatpush.msra.mxu0 %v1115_v7  ;;  %v3475_v55 = vsel %vm1391_vm2, %v3001_v12, %v2012_v32  ;;  %v3480_v35 = vsel %vm430_vm0, %v464_v50, %v466_v57  ;;  %v4145_v36 = vrot.slane %v2590_v30, 7  ;;  %1492 = vmatpush.msra.mxu1 %v1131_v26  ;;  %v4148_v63 = vpack.i.bf16 %v4146_v25, %v4147_v62 }
 0x189   :  { %2200 = vrot.lane.b32.xlu1 %v4144_v18, %s2423_s4  ;;  %v2214_v53 = vpack.i.bf16 %v3416_v24, %v3412_v6  ;;  %v3491_v12 = vand.u32 2147483647, %v578_v54  ;;  %v4151_v7 = vpack.i.bf16 %v4149_v31, %v4150_v46  ;;  %v3497_v30 = vand.u32 2147483647, %v594_v17 }
 0x18a   :  { %v497_v49 = vsel %vm430_vm0, %v4145_v36, %v496_v37  ;;  %2225 = vrot.lane.b32.xlu0 %v4148_v63, %s2424_s17  ;;  %v1991_v32 = vpop.permute.xlu1 %1990  ;;  %v3499_v37 = vand.u32 2147483647, %v577_v39  ;;  %v3501_v26 = vand.u32 2147483647, %v608_v59  ;;  %v4152_v11 = vrot.slane %v3366_v60, 7 }
 0x18b   :  { %2205 = vrot.lane.b32.xlu2 %v4151_v7, %s2424_s17  ;;  %v1993_v18 = vunpack.i.h.bf16 %v1991_v32  ;;  %v1992_v6 = vunpack.i.l.bf16 %v1991_v32  ;;  %v2016_v24 = vpop.permute.xlu0 %2015  ;;  %v1721_v54 = vrot.slane %v3475_v55, 1  ;;  %v1423_v36 = vsel %vm1391_vm2, %v2930_v22, %v1988_v44 }
 0x18c   :  { %v469_v5 = vsel %vm430_vm0, %v466_v57, %v4152_v11  ;;  %v2028_v25 = vunpack.i.h.bf16 %v2026_v52  ;;  %v2027_v62 = vunpack.i.l.bf16 %v2026_v52  ;;  %v3509_v17 = vpop.permute.xlu2 %2040  ;;  %v2018_v39 = vunpack.i.h.bf16 %v2016_v24 }
 0x18d   :  { %v2017_v63 = vunpack.i.l.bf16 %v2016_v24  ;;  %v607_v59 = vsub.f32 %v3377_v13, %v497_v49  ;;  %v2013_v31 = vunpack.i.h.bf16 %v3374_v14  ;;  %v593_v57 = vsub.f32 %v3366_v60, %v469_v5 }
 0x18e   :  { %v1437_v32 = vsel %vm1391_vm2, %v2972_v20, %v1993_v18  ;;  %v1130_v7 = vsel %vm1102_vm1, %v2018_v39, %v2028_v25  ;;  %v3520_v52 = vsel %vm1391_vm2, %v2970_v15, %v1992_v6  ;;  %v1155_v13 = vmul.f32 %v3491_v12, %v3491_v12  ;;  %v4154_v18 = vld [vmem:[#allocation32_spill] sm:$0xff]  ;;  %v4155_v6 = vld [vmem:[#allocation25_spill] sm:$0xff]  ;;  %v4157_v39 = vld [vmem:[#allocation42_spill] sm:$0xff] }
 0x18f   :  { %v1114_v46 = vsel %vm1102_vm1, %v2017_v63, %v2027_v62  ;;  %v1723_v22 = vrot.slane %v1437_v32, 1  ;;  %1493 = vmatpush.msra.mxu1 %v1130_v7  ;;  %v1171_v60 = vmul.f32 %v3497_v30, %v3497_v30  ;;  %v1695_v14 = vrot.slane %v1423_v36, 1  ;;  %v4158_v63 = vld [vmem:[#allocation40_spill] sm:$0xff] }
 0x190   :  { %1473 = vmatpush.msra.mxu0 %v1114_v46  ;;  %v4028_v20 = vrot.slane %v3520_v52, 1  ;;  %v1154_v44 = vmul.f32 %v3499_v37, %v3499_v37  ;;  %v1185_v15 = vmul.f32 %v3501_v26, %v3501_v26  ;;  %v4153_v49 = vrot.slane %v3386_v56, 1 }
 0x191   :  { %2215 = vrot.lane.b32.xlu1 %v2214_v53, %s2425_s18  ;;  %v3540_v5 = vsel %vm1633_vm3, %v1721_v54, %v1723_v22  ;;  %v4156_v53 = vpack.i.bf16 %v4154_v18, %v4155_v6  ;;  %v3546_v24 = vand.u32 2147483647, %v593_v57  ;;  %v3548_v36 = vand.u32 2147483647, %v607_v59 }
 0x192   :  { %v3535_v11 = vsel %vm1633_vm3, %v1723_v22, %v4153_v49  ;;  %v3553_v56 = vsel %vm1633_vm3, %v1695_v14, %v4028_v20  ;;  %v3557_v25 = vsel %vm1391_vm2, %v2999_v23, %v2013_v31  ;;  %v2006_v62 = vpop.permute.xlu1 %2005  ;;  %v4159_v32 = vpack.i.bf16 %v4157_v39, %v4158_v63 }
 0x193   :  { %2240 = vrot.lane.b32.xlu0 %v4156_v53, %s2423_s4  ;;  %v433_v59 = vsel %vm430_vm0, %v431_v48, %v432_v21  ;;  %v2008_v57 = vunpack.i.h.bf16 %v2006_v62  ;;  %v2007_v46 = vunpack.i.l.bf16 %v2006_v62  ;;  %v2031_v7 = vpop.permute.xlu0 %2030  ;;  %v4160_v22 = vrot.slane %v3335_v9, 7 }
 0x194   :  { %2220 = vrot.lane.b32.xlu2 %v4159_v32, %s2423_s4  ;;  %v592_v23 = vsub.f32 %v3452_v45, %v3480_v35  ;;  %v3571_v31 = vpop.permute.xlu2 %2055  ;;  %v2229_v18 = vpack.i.bf16 %v1171_v60, %v1155_v13  ;;  %v2234_v6 = vpack.i.bf16 %v1154_v44, %v1185_v15  ;;  %v1659_v53 = vrot.slane %v3557_v25, 1  ;;  %v4164_v32 = vld [vmem:[#allocation33_spill] sm:$0xff] }
 0x195   :  { %v435_v49 = vsel %vm430_vm0, %v432_v21, %v4160_v22  ;;  %v1170_v39 = vmul.f32 %v3546_v24, %v3546_v24  ;;  %v1184_v62 = vmul.f32 %v3548_v36, %v3548_v36  ;;  %v1406_v63 = vsel %vm1391_vm2, %v2993_v58, %v2007_v46 }
 0x196   :  { %v3582_v21 = vsel %vm1391_vm2, %v2995_v3, %v2008_v57  ;;  %v4161_v45 = vrot.slane %v2532_v16, 7  ;;  %v576_v13 = vsub.f32 %v3335_v9, %v435_v49  ;;  %v1661_v60 = vrot.slane %v1406_v63, 1 }
 0x197   :  { %v1693_v44 = vrot.slane %v3582_v21, 1  ;;  %v4162_v15 = vrot.slane %v3390_v2, 1  ;;  %v575_v9 = vsub.f32 %v3466_v34, %v433_v59  ;;  %v2249_v2 = vpack.i.bf16 %v1184_v62, %v1170_v39 }
 0x198   :  { %v465_v35 = vsel %vm430_vm0, %v4161_v45, %v464_v50  ;;  %v3605_v16 = vsel %vm1633_vm3, %v1659_v53, %v1661_v60  ;;  %v4163_v50 = vld [vmem:[#allocation34_spill] sm:$0xff]  ;;  %v2043_v22 = vunpack.i.h.bf16 %v3509_v17  ;;  %v2033_v49 = vunpack.i.h.bf16 %v2031_v7 }
 0x199   :  { %2230 = vrot.lane.b32.xlu1 %v2229_v18, %s2425_s18  ;;  %v3595_v58 = vsel %vm1633_vm3, %v1661_v60, %v4162_v15  ;;  %v3600_v3 = vsel %vm1633_vm3, %v1693_v44, %v1695_v14  ;;  %v4165_v57 = vpack.i.bf16 %v4163_v50, %v4164_v32  ;;  %v591_v46 = vsub.f32 %v3458_v38, %v465_v35 }
 0x19a   :  { %v574_v14 = vsub.f32 %v3463_v19, %v431_v48  ;;  %v2021_v18 = vpop.permute.xlu1 %2020  ;;  %v3618_v63 = vand.u32 2147483647, %v576_v13  ;;  %v3620_v34 = vand.u32 2147483647, %v592_v23  ;;  %v2032_v59 = vunpack.i.l.bf16 %v2031_v7 }
 0x19b   :  { %2255 = vrot.lane.b32.xlu0 %v4165_v57, %s2424_s17  ;;  %v2023_v45 = vunpack.i.h.bf16 %v2021_v18  ;;  %v2022_v60 = vunpack.i.l.bf16 %v2021_v18  ;;  %v2046_v39 = vpop.permute.xlu0 %2045  ;;  %v2042_v38 = vunpack.i.l.bf16 %v3509_v17  ;;  %v2057_v19 = vunpack.i.l.bf16 %v3571_v31 }
 0x19c   :  { %2235 = vrot.lane.b32.xlu2 %v2234_v6, %s2425_s18  ;;  %v3622_v62 = vand.u32 2147483647, %v574_v14  ;;  %v2071_v48 = vpop.permute.xlu2 %2070  ;;  %v2048_v35 = vunpack.i.h.bf16 %v2046_v39  ;;  %v2047_v15 = vunpack.i.l.bf16 %v2046_v39  ;;  %v3628_v13 = vand.u32 2147483647, %v575_v9  ;;  %v4166_v9 = vld [vmem:[#allocation27_spill] sm:$0xff] }
 0x19d   :  { %v1113_v50 = vsel %vm1102_vm1, %v2023_v45, %v2033_v49  ;;  %v1144_v6 = vsel %vm1102_vm1, %v2022_v60, %v2032_v59  ;;  %v3630_v23 = vand.u32 2147483647, %v591_v46  ;;  %v1153_v57 = vmul.f32 %v3618_v63, %v3618_v63  ;;  %v4167_v46 = vld [vmem:[#allocation26_spill] sm:$0xff] }
 0x19e   :  { %1474 = vmatpush.msra.mxu0 %v1113_v50  ;;  %1515 = vmatpush.msra.mxu2 %v1144_v6  ;;  %v1129_v7 = vsel %vm1102_vm1, %v2042_v38, %v2047_v15  ;;  %v1143_v32 = vsel %vm1102_vm1, %v2043_v22, %v2048_v35  ;;  %v1151_v17 = vmul.f32 %v3622_v62, %v3622_v62  ;;  %v2073_v50 = vunpack.i.h.bf16 %v2071_v48 }
 0x19f   :  { %1494 = vmatpush.msra.mxu1 %v1129_v7  ;;  %v1169_v14 = vmul.f32 %v3620_v34, %v3620_v34  ;;  %v4168_v49 = vpack.i.bf16 %v4166_v9, %v4167_v46  ;;  %v3646_v18 = vsel %vm1391_vm2, %v3070_v42, %v2057_v19  ;;  %v1152_v22 = vmul.f32 %v3628_v13, %v3628_v13 }
 0x1a0   :  { %1516 = vmatpush.msra.mxu2 %v1143_v32  ;;  %v1168_v59 = vmul.f32 %v3630_v23, %v3630_v23  ;;  %v1717_v15 = vrot.slane %v3646_v18, 1  ;;  %v2072_v42 = vunpack.i.l.bf16 %v2071_v48  ;;  %v2058_v32 = vunpack.i.h.bf16 %v3571_v31 }
 0x1a1   :  { %2245 = vrot.lane.b32.xlu1 %v4168_v49, %s2424_s17  ;;  %v2259_v35 = vpack.i.bf16 %v1169_v14, %v1153_v57 }
 0x1a2   :  { %v2036_v45 = vpop.permute.xlu1 %2035  ;;  %v2264_v9 = vpack.i.bf16 %v1168_v59, %v1152_v22  ;;  %v3680_v48 = vsel %vm1391_vm2, %v3068_v40, %v2058_v32 }
 0x1a3   :  { %1247 = vrot.lane.b32.xlu0 %v1151_v17, %s2425_s18  ;;  %v2038_v60 = vunpack.i.h.bf16 %v2036_v45  ;;  %v2037_v39 = vunpack.i.l.bf16 %v2036_v45  ;;  %v2061_v38 = vpop.permute.xlu0 %2060 }
 0x1a4   :  { %2250 = vrot.lane.b32.xlu2 %v2249_v2, %s2425_s18  ;;  %v2086_v19 = vpop.permute.xlu2 %2085  ;;  %v2063_v6 = vunpack.i.h.bf16 %v2061_v38  ;;  %v2062_v7 = vunpack.i.l.bf16 %v2061_v38 }
 0x1a5   :  { %v1435_v17 = vsel %vm1391_vm2, %v3037_v43, %v2038_v60  ;;  %v1421_v2 = vsel %vm1391_vm2, %v3035_v51, %v2037_v39  ;;  %v1655_v60 = vrot.slane %v3680_v48, 1 }
 0x1a6   :  { %v1112_v46 = vsel %vm1102_vm1, %v2062_v7, %v2072_v42  ;;  %v1128_v57 = vsel %vm1102_vm1, %v2063_v6, %v2073_v50  ;;  %v1719_v14 = vrot.slane %v1435_v17, 1  ;;  %v1691_v49 = vrot.slane %v1421_v2, 1 }
 0x1a7   :  { %1475 = vmatpush.msra.mxu0 %v1112_v46  ;;  %1495 = vmatpush.msra.mxu1 %v1128_v57  ;;  %v2088_v42 = vunpack.i.h.bf16 %v2086_v19  ;;  %v2087_v17 = vunpack.i.l.bf16 %v2086_v19 }
 0x1a8   :  { %v3666_v31 = vsel %vm1633_vm3, %v1719_v14, %v1721_v54  ;;  %v3671_v43 = vsel %vm1633_vm3, %v1717_v15, %v1719_v14  ;;  %v3676_v51 = vsel %vm1633_vm3, %v1691_v49, %v1693_v44 }
 0x1a9   :  { %2260 = vrot.lane.b32.xlu1 %v2259_v35, %s2425_s18 }
 0x1aa   :  { %v2051_v22 = vpop.permute.xlu1 %2050 }
 0x1ab   :  { %v2053_v55 = vunpack.i.h.bf16 %v2051_v22  ;;  %v2052_v54 = vunpack.i.l.bf16 %v2051_v22  ;;  %v2076_v59 = vpop.permute.xlu0 %2075 }
 0x1ac   :  { %2265 = vrot.lane.b32.xlu2 %v2264_v9, %s2425_s18  ;;  %v2101_v45 = vpop.permute.xlu2 %2100  ;;  %v2078_v6 = vunpack.i.h.bf16 %v2076_v59  ;;  %v2077_v7 = vunpack.i.l.bf16 %v2076_v59 }
 0x1ad   :  { %v1404_v39 = vsel %vm1391_vm2, %v3062_v1, %v2052_v54  ;;  %v1420_v21 = vsel %vm1391_vm2, %v3064_v4, %v2053_v55  ;;  %v2102_v25 = vunpack.i.l.bf16 %v2101_v45 }
 0x1ae   :  { %v1657_v44 = vrot.slane %v1404_v39, 1  ;;  %v1689_v38 = vrot.slane %v1420_v21, 1 }
 0x1af   :  { %v3707_v55 = vsel %vm1391_vm2, %v3139_v47, %v2102_v25 }
 0x1b0   :  { %v3691_v40 = vsel %vm1633_vm3, %v1657_v44, %v1659_v53  ;;  %v3694_v35 = vsel %vm1633_vm3, %v1689_v38, %v1691_v49  ;;  %v3699_v50 = vsel %vm1633_vm3, %v1655_v60, %v1657_v44  ;;  %v1713_v21 = vrot.slane %v3707_v55, 1 }
 0x1b2   :  { %v2066_v1 = vpop.permute.xlu1 %2065 }
 0x1b3   :  { %v2068_v4 = vunpack.i.h.bf16 %v2066_v1  ;;  %v2067_v32 = vunpack.i.l.bf16 %v2066_v1  ;;  %v2091_v9 = vpop.permute.xlu0 %2090 }
 0x1b4   :  { %v2116_v2 = vpop.permute.xlu2 %2115  ;;  %v2093_v53 = vunpack.i.h.bf16 %v2091_v9  ;;  %v2092_v46 = vunpack.i.l.bf16 %v2091_v9 }
 0x1b5   :  { %v1111_v57 = vsel %vm1102_vm1, %v2068_v4, %v2078_v6  ;;  %v1142_v14 = vsel %vm1102_vm1, %v2067_v32, %v2077_v7  ;;  %v2118_v44 = vunpack.i.h.bf16 %v2116_v2  ;;  %v2117_v1 = vunpack.i.l.bf16 %v2116_v2 }
 0x1b6   :  { %1476 = vmatpush.msra.mxu0 %v1111_v57  ;;  %1517 = vmatpush.msra.mxu2 %v1142_v14  ;;  %v1127_v49 = vsel %vm1102_vm1, %v2087_v17, %v2092_v46  ;;  %v1141_v22 = vsel %vm1102_vm1, %v2088_v42, %v2093_v53  ;;  %v2103_v32 = vunpack.i.h.bf16 %v2101_v45 }
 0x1b7   :  { %1496 = vmatpush.msra.mxu1 %v1127_v49 }
 0x1b8   :  { %1518 = vmatpush.msra.mxu2 %v1141_v22  ;;  %v1401_v45 = vsel %vm1391_vm2, %v3137_v33, %v2103_v32 }
 0x1b9   :  { %v1651_v18 = vrot.slane %v1401_v45, 1 }
 0x1ba   :  { %v2081_v19 = vpop.permute.xlu1 %2080 }
 0x1bb   :  { %v2083_v54 = vunpack.i.h.bf16 %v2081_v19  ;;  %v2082_v59 = vunpack.i.l.bf16 %v2081_v19  ;;  %v2106_v39 = vpop.permute.xlu0 %2105 }
 0x1bc   :  { %v2131_v6 = vpop.permute.xlu2 %2130  ;;  %v2108_v7 = vunpack.i.h.bf16 %v2106_v39  ;;  %v2107_v4 = vunpack.i.l.bf16 %v2106_v39 }
 0x1bd   :  { %v1433_v42 = vsel %vm1391_vm2, %v3104_v29, %v2083_v54  ;;  %v1419_v9 = vsel %vm1391_vm2, %v3102_v0, %v2082_v59 }
 0x1be   :  { %v1110_v47 = vsel %vm1102_vm1, %v2107_v4, %v2117_v1  ;;  %v1126_v17 = vsel %vm1102_vm1, %v2108_v7, %v2118_v44  ;;  %v1715_v25 = vrot.slane %v1433_v42, 1  ;;  %v1687_v53 = vrot.slane %v1419_v9, 1 }
 0x1bf   :  { %1477 = vmatpush.msra.mxu0 %v1110_v47  ;;  %1497 = vmatpush.msra.mxu1 %v1126_v17  ;;  %v2132_v42 = vunpack.i.l.bf16 %v2131_v6 }
 0x1c0   :  { %v3719_v2 = vsel %vm1633_vm3, %v1715_v25, %v1717_v15  ;;  %v3724_v29 = vsel %vm1633_vm3, %v1713_v21, %v1715_v25  ;;  %v3727_v0 = vsel %vm1633_vm3, %v1687_v53, %v1689_v38 }
 0x1c2   :  { %v2096_v46 = vpop.permute.xlu1 %2095 }
 0x1c3   :  { %v2098_v57 = vunpack.i.h.bf16 %v2096_v46  ;;  %v2097_v14 = vunpack.i.l.bf16 %v2096_v46  ;;  %v2121_v49 = vpop.permute.xlu0 %2120 }
 0x1c4   :  { %v3731_v22 = vpop.permute.xlu2 %2145  ;;  %v2123_v1 = vunpack.i.h.bf16 %v2121_v49  ;;  %v2122_v7 = vunpack.i.l.bf16 %v2121_v49 }
 0x1c5   :  { %v1402_v15 = vsel %vm1391_vm2, %v3131_v61, %v2097_v14  ;;  %v1418_v19 = vsel %vm1391_vm2, %v3133_v10, %v2098_v57  ;;  %v2133_v10 = vunpack.i.h.bf16 %v2131_v6 }
 0x1c6   :  { %v1653_v54 = vrot.slane %v1402_v15, 1  ;;  %v1685_v59 = vrot.slane %v1418_v19, 1  ;;  %v2148_v19 = vunpack.i.h.bf16 %v3731_v22 }
 0x1c8   :  { %v3740_v38 = vsel %vm1633_vm3, %v1653_v54, %v1655_v60  ;;  %v3743_v33 = vsel %vm1633_vm3, %v1685_v59, %v1687_v53  ;;  %v3746_v39 = vsel %vm1633_vm3, %v1651_v18, %v1653_v54 }
 0x1ca   :  { %v2111_v44 = vpop.permute.xlu1 %2110 }
 0x1cb   :  { %v2113_v61 = vunpack.i.h.bf16 %v2111_v44  ;;  %v2112_v4 = vunpack.i.l.bf16 %v2111_v44  ;;  %v2136_v32 = vpop.permute.xlu0 %2135 }
 0x1cc   :  { %v2138_v47 = vunpack.i.h.bf16 %v2136_v32  ;;  %v2137_v48 = vunpack.i.l.bf16 %v2136_v32  ;;  %v3765_v32 = vsel %vm1391_vm2, %v3226_v28, %v2148_v19 }
 0x1cd   :  { %v2161_v9 = vpop.permute.xlu2 %2160  ;;  %v1109_v60 = vsel %vm1102_vm1, %v2113_v61, %v2123_v1  ;;  %v1140_v17 = vsel %vm1102_vm1, %v2112_v4, %v2122_v7 }
 0x1ce   :  { %1478 = vmatpush.msra.mxu0 %v1109_v60  ;;  %1519 = vmatpush.msra.mxu2 %v1140_v17  ;;  %v1125_v25 = vsel %vm1102_vm1, %v2132_v42, %v2137_v48  ;;  %v1139_v53 = vsel %vm1102_vm1, %v2133_v10, %v2138_v47  ;;  %v2163_v57 = vunpack.i.h.bf16 %v2161_v9  ;;  %v2162_v14 = vunpack.i.l.bf16 %v2161_v9 }
 0x1cf   :  { %1498 = vmatpush.msra.mxu1 %v1125_v25 }
 0x1d0   :  { %1520 = vmatpush.msra.mxu2 %v1139_v53 }
 0x1d2   :  { %v3752_v45 = vpop.permute.xlu1 %2125 }
 0x1d3   :  { %v2127_v46 = vunpack.i.l.bf16 %v3752_v45  ;;  %v2151_v6 = vpop.permute.xlu0 %2150 }
 0x1d4   :  { %v2153_v49 = vunpack.i.h.bf16 %v2151_v6  ;;  %v2152_v15 = vunpack.i.l.bf16 %v2151_v6 }
 0x1d5   :  { %v2176_v54 = vpop.permute.xlu2 %2175  ;;  %v1417_v44 = vsel %vm1391_vm2, %v3186_v27, %v2127_v46  ;;  %v4026_v27 = vrot.slane %v3765_v32, 1 }
 0x1d6   :  { %v1108_v1 = vsel %vm1102_vm1, %v2152_v15, %v2162_v14  ;;  %v1124_v7 = vsel %vm1102_vm1, %v2153_v49, %v2163_v57  ;;  %v1683_v61 = vrot.slane %v1417_v44, 1  ;;  %v2178_v15 = vunpack.i.h.bf16 %v2176_v54 }
 0x1d7   :  { %1479 = vmatpush.msra.mxu0 %v1108_v1  ;;  %1499 = vmatpush.msra.mxu1 %v1124_v7  ;;  %v2177_v19 = vunpack.i.l.bf16 %v2176_v54 }
 0x1d8   :  { %v3761_v4 = vsel %vm1633_vm3, %v1683_v61, %v1685_v59 }
 0x1da   :  { %v2141_v10 = vpop.permute.xlu1 %2140 }
 0x1db   :  { %v2143_v42 = vunpack.i.h.bf16 %v2141_v10  ;;  %v2142_v9 = vunpack.i.l.bf16 %v2141_v10  ;;  %v2166_v47 = vpop.permute.xlu0 %2165 }
 0x1dc   :  { %v2168_v46 = vunpack.i.h.bf16 %v2166_v47  ;;  %v2167_v6 = vunpack.i.l.bf16 %v2166_v47 }
 0x1dd   :  { %v1400_v48 = vsel %vm1391_vm2, %v3215_v8, %v2142_v9  ;;  %v3772_v60 = vsel %vm1391_vm2, %v3217_v41, %v2143_v42  ;;  %v3775_v25 = vpop.permute.xlu2 %2190 }
 0x1de   :  { %v1649_v17 = vrot.slane %v1400_v48, 1  ;;  %v4027_v59 = vrot.slane %v3772_v60, 1 }
 0x1e0   :  { %v3778_v28 = vsel %vm1633_vm3, %v1649_v17, %v1651_v18  ;;  %v3783_v53 = vsel %vm1633_vm3, %v4027_v59, %v1683_v61  ;;  %v3788_v8 = vsel %vm1633_vm3, %v4026_v27, %v1649_v17 }
 0x1e2   :  { %v2156_v41 = vpop.permute.xlu1 %2155 }
 0x1e3   :  { %v2158_v57 = vunpack.i.h.bf16 %v2156_v41  ;;  %v2157_v14 = vunpack.i.l.bf16 %v2156_v41  ;;  %v2181_v49 = vpop.permute.xlu0 %2180 }
 0x1e4   :  { %v2183_v18 = vunpack.i.h.bf16 %v2181_v49  ;;  %v2182_v44 = vunpack.i.l.bf16 %v2181_v49  ;;  %v1441_v49 = vld [vmem:[#allocation4 + $0x8] sm:$0xf] }
 0x1e5   :  { %v1107_v1 = vsel %vm1102_vm1, %v2158_v57, %v2168_v46  ;;  %v1138_v7 = vsel %vm1102_vm1, %v2157_v14, %v2167_v6  ;;  %v2206_v42 = vpop.permute.xlu2 %2205  ;;  %1462 = vst [vmem:[#allocation1 + $0x10] ss:$2 sm:$0xff] %v1441_v49  ;;  %v1440_v57 = vld [vmem:[#allocation4] sm:$0xff] }
 0x1e6   :  { %1480 = vmatpush.msra.mxu0 %v1107_v1  ;;  %1521 = vmatpush.msra.mxu2 %v1138_v7  ;;  %v1123_v61 = vsel %vm1102_vm1, %v2177_v19, %v2182_v44  ;;  %v1137_v10 = vsel %vm1102_vm1, %v2178_v15, %v2183_v18  ;;  %v2208_v48 = vunpack.i.h.bf16 %v2206_v42  ;;  %v2207_v54 = vunpack.i.l.bf16 %v2206_v42  ;;  %1460 = vst [vmem:[#allocation1] ss:$2 sm:$0xff] %v1440_v57  ;;  %v1558_v19 = vld [vmem:[#allocation6 + $0x8] sm:$0xf] }
 0x1e7   :  { %1500 = vmatpush.msra.mxu1 %v1123_v61 }
 0x1e8   :  { %1522 = vmatpush.msra.mxu2 %v1137_v10  ;;  %v1557_v10 = vld [vmem:[#allocation6] sm:$0xff] }
 0x1ea   :  { %v3794_v9 = vpop.permute.xlu1 %2170 }
 0x1ec   :  { %v2196_v47 = vpop.permute.xlu0 %2195  ;;  %v1465_v18 = vld.sshfl [vmem:[#allocation1 + $0x10] sm:$0xff pattern:$0x75316420] }
 0x1ed   :  { %v2198_v17 = vunpack.i.h.bf16 %v2196_v47  ;;  %v2197_v41 = vunpack.i.l.bf16 %v2196_v47  ;;  %1579 = vst [vmem:[#allocation1 + $0x10] ss:$2 sm:$0xff] %v1558_v19  ;;  %v3800_v1 = vld.sshfl [vmem:[#allocation1] sm:$0xff pattern:$0x75316420] }
 0x1ee   :  { %v2221_v44 = vpop.permute.xlu2 %2220  ;;  %v3802_v61 = vld.sshfl [vmem:[#allocation1 + $0x8] sm:$0xff pattern:$0x75316420] }
 0x1ef   :  { %v1106_v46 = vsel %vm1102_vm1, %v2197_v41, %v2207_v54  ;;  %v1122_v6 = vsel %vm1102_vm1, %v2198_v17, %v2208_v48  ;;  %1577 = vst [vmem:[#allocation1] ss:$2 sm:$0xff] %v1557_v10  ;;  %v2223_v41 = vunpack.i.h.bf16 %v2221_v44  ;;  %v2222_v49 = vunpack.i.l.bf16 %v2221_v44  ;;  %v4171_v44 = vld [vmem:[#allocation16_spill] sm:$0xff] }
 0x1f0   :  { %1481 = vmatpush.msra.mxu0 %v1106_v46  ;;  %1501 = vmatpush.msra.mxu1 %v1122_v6 }
 0x1f2   :  { %v3798_v14 = vpop.permute.xlu1 %2185 }
 0x1f4   :  { %v2211_v15 = vpop.permute.xlu0 %2210 }
 0x1f5   :  { %v2213_v42 = vunpack.i.h.bf16 %v2211_v15  ;;  %v2212_v47 = vunpack.i.l.bf16 %v2211_v15  ;;  %v4169_v15 = vld [vmem:[#allocation28_spill] sm:$0xff] }
 0x1fb   :  { %v2201_v7 = vpop.permute.xlu1 %2200 }
 0x1fc   :  { %v2203_v48 = vunpack.i.h.bf16 %v2201_v7  ;;  %v2202_v54 = vunpack.i.l.bf16 %v2201_v7  ;;  %v2226_v17 = vpop.permute.xlu0 %2225  ;;  %v4170_v7 = vrot.slane %v4169_v15, 1 }
 0x1fd   :  { %v2228_v46 = vunpack.i.h.bf16 %v2226_v17  ;;  %v2227_v6 = vunpack.i.l.bf16 %v2226_v17 }
 0x1fe   :  { %v1105_v57 = vsel %vm1102_vm1, %v2203_v48, %v2213_v42  ;;  %v1136_v19 = vsel %vm1102_vm1, %v2202_v54, %v2212_v47  ;;  %v2128_v42 = vunpack.i.h.bf16 %v3752_v45  ;;  %v3815_v47 = vpop.permute.xlu2 %2235  ;;  %v2147_v48 = vunpack.i.l.bf16 %v3731_v22  ;;  %v4174_v22 = vld [vmem:[#allocation48_spill] sm:$0xff] }
 0x1ff   :  { %1482 = vmatpush.msra.mxu0 %v1105_v57  ;;  %1523 = vmatpush.msra.mxu2 %v1136_v19  ;;  %v1121_v27 = vsel %vm1102_vm1, %v2222_v49, %v2227_v6  ;;  %v1135_v59 = vsel %vm1102_vm1, %v2223_v41, %v2228_v46  ;;  %v4173_v41 = vld [vmem:[#allocation18_spill] sm:$0xff]  ;;  %v2192_v49 = vunpack.i.l.bf16 %v3775_v25  ;;  %v4175_v57 = vld [vmem:[#allocation29_spill] sm:$0xff] }
 0x200   :  { %1502 = vmatpush.msra.mxu1 %v1121_v27  ;;  %v2173_v27 = vunpack.i.h.bf16 %v3794_v9  ;;  %v1430_v45 = vsel %vm1391_vm2, %v4173_v41, %v2147_v48  ;;  %v4177_v41 = vld [vmem:[#allocation39_spill] sm:$0xff] }
 0x201   :  { %1524 = vmatpush.msra.mxu2 %v1135_v59  ;;  %v4172_v59 = vld [vmem:[#allocation15_spill] sm:$0xff]  ;;  %v1428_v19 = vsel %vm1391_vm2, %v4175_v57, %v2192_v49 }
 0x202   :  { %1525 = vmatmul.f32.vlgmr.msra.gmra.mxu2 %v1465_v18  ;;  %v1431_v18 = vsel %vm1391_vm2, %v4172_v59, %v2128_v42  ;;  %v1429_v46 = vsel %vm1391_vm2, %v4174_v22, %v2173_v27  ;;  %v2237_v42 = vunpack.i.l.bf16 %v3815_v47 }
 0x203   :  { %1899 = vmatpush.msk.msrb.mxu2 %vm1633_vm3, %v4170_v7  ;;  %v3811_v10 = vpop.permute.xlu1 %2215  ;;  %v1707_v7 = vrot.slane %v1429_v46, 1 }
 0x205   :  { %1822 = vmatpush.msrb.mxu2 %v4171_v44  ;;  %v2241_v54 = vpop.permute.xlu0 %2240 }
 0x206   :  { %v3834_v6 = vpop.permute.xlu2 %2250  ;;  %v2242_v59 = vunpack.i.l.bf16 %v2241_v54 }
 0x207   :  { %1823 = vmatpush.msrb.mxu2 %v3535_v11  ;;  %v1711_v11 = vrot.slane %v1431_v18, 1  ;;  %v2253_v27 = vunpack.i.h.bf16 %v3834_v6  ;;  %v1705_v18 = vrot.slane %v1428_v19, 1  ;;  %v1426_v19 = vsel %vm1391_vm2, %v3501_v26, %v2237_v42  ;;  %v1457_v26 = vld [vmem:[#allocation7 + $0x78] sm:$0x3f]  ;;  %v1456_v42 = vld [vmem:[#allocation7 + $0x70] sm:$0xff] }
 0x208   :  { %1897 = vmatpush.msk.msra.mxu3 %vm1533_vm4, %v1457_v26 }
 0x209   :  { %1824 = vmatpush.msrb.mxu2 %v3540_v5  ;;  %v1709_v5 = vrot.slane %v1430_v45, 1 }
 0x20a   :  { %1538 = vmatpush.msra.mxu3 %v1456_v42 }
 0x20b   :  { %1825 = vmatpush.msrb.mxu2 %v3666_v31  ;;  %v3824_v17 = vpop.permute.xlu1 %2230  ;;  %v2218_v31 = vunpack.i.h.bf16 %v3811_v10  ;;  %v1712_v48 = vsel %vm1633_vm3, %v1709_v5, %v1711_v11  ;;  %v1710_v57 = vsel %vm1633_vm3, %v1707_v7, %v1709_v5  ;;  %v1701_v5 = vrot.slane %v1426_v19, 1 }
 0x20d   :  { %1826 = vmatpush.msrb.mxu2 %v3671_v43  ;;  %v2256_v15 = vpop.permute.xlu0 %2255  ;;  %v1714_v43 = vsel %vm1633_vm3, %v1711_v11, %v1713_v21  ;;  %v1427_v45 = vsel %vm1391_vm2, %v4177_v41, %v2218_v31  ;;  %v1708_v31 = vsel %vm1633_vm3, %v1705_v18, %v1707_v7  ;;  %v2232_v41 = vunpack.i.l.bf16 %v3824_v17 }
 0x20e   :  { %v2258_v49 = vunpack.i.h.bf16 %v2256_v15  ;;  %v2257_v55 = vunpack.i.l.bf16 %v2256_v15  ;;  %v1703_v15 = vrot.slane %v1427_v45, 1  ;;  %v1451_v45 = vld [vmem:[#allocation7 + $0x48] sm:$0xff] }
 0x20f   :  { %1827 = vmatpush.msrb.mxu2 %v3719_v2  ;;  %v4176_v2 = vld [vmem:[#allocation19_spill] sm:$0xff] }
 0x210   :  { %v1918_v44 = vunpack.i.h.bf16 %v4176_v2  ;;  %v1917_v46 = vunpack.i.l.bf16 %v4176_v2  ;;  %v1706_v7 = vsel %vm1633_vm3, %v1703_v15, %v1705_v18  ;;  %v2217_v18 = vunpack.i.l.bf16 %v3811_v10 }
 0x211   :  { %1828 = vmatpush.msrb.mxu2 %v3724_v29 }
 0x213   :  { %1829 = vmatpush.msrb.mxu2 %v1714_v43  ;;  %v2246_v29 = vpop.permute.xlu1 %2245  ;;  %v2243_v43 = vunpack.i.h.bf16 %v2241_v54  ;;  %v1425_v54 = vsel %vm1391_vm2, %v3548_v36, %v2253_v27  ;;  %v1704_v36 = vsel %vm1633_vm3, %v1701_v5, %v1703_v15  ;;  %v2172_v27 = vunpack.i.l.bf16 %v3794_v9  ;;  %v1582_v9 = vld.sshfl [vmem:[#allocation1 + $0x10] sm:$0xff pattern:$0x75316420] }
 0x214   :  { %v2248_v22 = vunpack.i.h.bf16 %v2246_v29  ;;  %v2247_v21 = vunpack.i.l.bf16 %v2246_v29  ;;  %v4185_v15 = vrot.slane %v3772_v60, 1 }
 0x215   :  { %1830 = vmatpush.msrb.mxu2 %v1712_v48  ;;  %v1103_v48 = vsel %vm1102_vm1, %v1917_v46, %v2257_v55  ;;  %v1119_v2 = vsel %vm1102_vm1, %v2243_v43, %v2258_v49 }
 0x216   :  { %v1104_v11 = vsel %vm1102_vm1, %v1918_v44, %v2247_v21  ;;  %v1120_v20 = vsel %vm1102_vm1, %v2242_v59, %v2248_v22  ;;  %v1699_v44 = vrot.slane %v1425_v54, 1  ;;  %v4179_v59 = vrot.slane %v3520_v52, 1 }
 0x217   :  { %1831 = vmatpush.msrb.mxu2 %v1710_v57  ;;  %1483 = vmatpush.msra.mxu0 %v1104_v11  ;;  %v2233_v52 = vunpack.i.h.bf16 %v3824_v17  ;;  %v2238_v22 = vunpack.i.h.bf16 %v3815_v47  ;;  %v2252_v21 = vunpack.i.l.bf16 %v3834_v6  ;;  %v4184_v17 = vld [vmem:[#allocation22_spill] sm:$0xff]  ;;  %v1450_v57 = vld [vmem:[#allocation7 + $0x40] sm:$0xff]  ;;  %v1449_v47 = vld [vmem:[#allocation7 + $0x38] sm:$0xff]  ;;  %v2266_v6 = vpop.permute.xlu2 %2265 }
 0x218   :  { %1503 = vmatpush.msra.mxu1 %v1120_v20  ;;  %v4178_v20 = vld [vmem:[#allocation13_spill] sm:$0xff]  ;;  %v1700_v29 = vsel %vm1633_vm3, %v4179_v59, %v1699_v44  ;;  %v1413_v46 = vsel %vm1391_vm2, %v4184_v17, %v2217_v18  ;;  %v1570_v17 = vld [vmem:[#allocation9 + $0x58] sm:$0xff] }
 0x219   :  { %1832 = vmatpush.msrb.mxu2 %v1708_v31  ;;  %1484 = vmatpush.msra.mxu0 %v1103_v48  ;;  %v1675_v54 = vrot.slane %v1413_v46, 1  ;;  %v1569_v46 = vld [vmem:[#allocation9 + $0x50] sm:$0xff] }
 0x21a   :  { %1504 = vmatpush.msra.mxu1 %v1119_v2  ;;  %1485 = vmatmul.f32.vlgmr.msra.gmra.mxu0 %v3800_v1  ;;  %v1702_v1 = vsel %vm1633_vm3, %v1699_v44, %v1701_v5  ;;  %v2267_v5 = vunpack.i.l.bf16 %v2266_v6  ;;  %v2268_v44 = vunpack.i.h.bf16 %v2266_v6 }
 0x21b   :  { %1505 = vmatmul.f32.vlgmr.msra.gmra.mxu1 %v3802_v61  ;;  %1781 = vmatpush.msrb.mxu0 %v4178_v20  ;;  %v1455_v61 = vld [vmem:[#allocation7 + $0x68] sm:$0xff]  ;;  %v2261_v49 = vpop.permute.xlu1 %2260 }
 0x21c   :  { %1801 = vmatpush.msrb.mxu1 %v3553_v56  ;;  %1833 = vmatpush.msrb.mxu2 %v1706_v7  ;;  %v1454_v56 = vld [vmem:[#allocation7 + $0x60] sm:$0xff]  ;;  %v2263_v19 = vunpack.i.h.bf16 %v2261_v49  ;;  %v2262_v31 = vunpack.i.l.bf16 %v2261_v49  ;;  %v1443_v49 = vld [vmem:[#allocation7 + $0x8] sm:$0xff] }
 0x21d   :  { %1782 = vmatpush.msrb.mxu0 %v3595_v58  ;;  %1539 = vmatpush.msra.mxu3 %v1455_v61  ;;  %v2188_v58 = vunpack.i.h.bf16 %v3798_v14 }
 0x21e   :  { %1802 = vmatpush.msrb.mxu1 %v3600_v3  ;;  %1834 = vmatpush.msrb.mxu2 %v1704_v36  ;;  %v2187_v3 = vunpack.i.l.bf16 %v3798_v14  ;;  %v1452_v14 = vld [vmem:[#allocation7 + $0x50] sm:$0xff]  ;;  %v1248_v36 = vpop.permute.xlu0 %1247 }
 0x21f   :  { %1783 = vmatpush.msrb.mxu0 %v3605_v16  ;;  %v1453_v16 = vld [vmem:[#allocation7 + $0x58] sm:$0xff]  ;;  %1540 = vmatpush.msra.mxu3 %v1454_v56  ;;  %v1446_v56 = vld [vmem:[#allocation7 + $0x20] sm:$0xff]  ;;  %v1392_v59 = vsel %vm1391_vm2, %v3622_v62, %v1248_v36 }
 0x220   :  { %1803 = vmatpush.msrb.mxu1 %v3676_v51  ;;  %1835 = vmatpush.msrb.mxu2 %v1702_v1  ;;  %v2193_v51 = vunpack.i.h.bf16 %v3775_v25  ;;  %v4181_v25 = vld [vmem:[#allocation23_spill] sm:$0xff]  ;;  %v1634_v18 = vrot.slane %v1392_v59, 1 }
 0x221   :  { %1784 = vmatpush.msrb.mxu0 %v3691_v40  ;;  %v4180_v40 = vld [vmem:[#allocation49_spill] sm:$0xff]  ;;  %1541 = vmatpush.msra.mxu3 %v1453_v16  ;;  %v1398_v10 = vsel %vm1391_vm2, %v4181_v25, %v2187_v3 }
 0x222   :  { %1804 = vmatpush.msrb.mxu1 %v3694_v35  ;;  %1836 = vmatpush.msrb.mxu2 %v1700_v29  ;;  %v1415_v35 = vsel %vm1391_vm2, %v4180_v40, %v2172_v27  ;;  %v1645_v43 = vrot.slane %v1398_v10, 1  ;;  %v1393_v27 = vsel %vm1391_vm2, %v3628_v13, %v2267_v5  ;;  %v1409_v29 = vsel %vm1391_vm2, %v3630_v23, %v2268_v44  ;;  %v4187_v10 = vld [vmem:[#allocation17_spill] sm:$0xff] }
 0x223   :  { %1785 = vmatpush.msrb.mxu0 %v3699_v50  ;;  %1900 = vmatmul.msk.f32.vlgmr.msrb.gmra.mxu2 %vm1776_vm5, %v1582_v9  ;;  %v4182_v50 = vld [vmem:[#allocation24_spill] sm:$0xff]  ;;  %v1679_v55 = vrot.slane %v1415_v35, 1 }
 0x224   :  { %1805 = vmatpush.msrb.mxu1 %v3727_v0  ;;  %v1414_v0 = vsel %vm1391_vm2, %v4182_v50, %v2188_v58  ;;  %1542 = vmatpush.msra.mxu3 %v1452_v14  ;;  %v1445_v9 = vld [vmem:[#allocation7 + $0x18] sm:$0xff]  ;;  %v1667_v14 = vrot.slane %v1409_v29, 1  ;;  %v4188_v50 = vrot.slane %v4187_v10, 1 }
 0x225   :  { %1786 = vmatpush.msrb.mxu0 %v3740_v38  ;;  %v4183_v38 = vld [vmem:[#allocation14_spill] sm:$0xff]  ;;  %v1677_v11 = vrot.slane %v1414_v0, 1  ;;  %v1682_v48 = vsel %vm1633_vm3, %v1679_v55, %v4185_v15 }
 0x226   :  { %1806 = vmatpush.msrb.mxu1 %v3743_v33  ;;  %v1397_v33 = vsel %vm1391_vm2, %v4183_v38, %v2193_v51  ;;  %1543 = vmatpush.msra.mxu3 %v1451_v45  ;;  %v1635_v51 = vrot.slane %v1393_v27, 1  ;;  %v1668_v0 = vsel %vm1633_vm3, %v4188_v50, %v1667_v14  ;;  %v1444_v45 = vld [vmem:[#allocation7 + $0x10] sm:$0xff]  ;;  %v1572_v38 = vld [vmem:[#allocation9 + $0x68] sm:$0xff] }
 0x227   :  { %1787 = vmatpush.msrb.mxu0 %v3746_v39  ;;  %v1396_v39 = vsel %vm1391_vm2, %v3491_v12, %v2232_v41  ;;  %v1643_v2 = vrot.slane %v1397_v33, 1  ;;  %v1411_v12 = vsel %vm1391_vm2, %v3546_v24, %v2252_v21  ;;  %v1680_v26 = vsel %vm1633_vm3, %v1677_v11, %v1679_v55  ;;  %v1447_v24 = vld [vmem:[#allocation7 + $0x28] sm:$0xff]  ;;  %v1442_v55 = vld [vmem:[#allocation7] sm:$0xff]  ;;  %v1573_v21 = vld [vmem:[#allocation9 + $0x70] sm:$0xff] }
 0x228   :  { %1807 = vmatpush.msrb.mxu1 %v3761_v4  ;;  %v1412_v4 = vsel %vm1391_vm2, %v3497_v30, %v2233_v52  ;;  %1544 = vmatpush.msra.mxu3 %v1450_v57  ;;  %v1448_v30 = vld [vmem:[#allocation7 + $0x30] sm:$0xff]  ;;  %v1641_v20 = vrot.slane %v1396_v39, 1  ;;  %v1671_v61 = vrot.slane %v1411_v12, 1  ;;  %v1580_v52 = vld.sshfl [vmem:[#allocation1] sm:$0xff pattern:$0x75316420]  ;;  %v1636_v25 = vsel %vm1633_vm3, %v1634_v18, %v1635_v51 }
 0x229   :  { %1788 = vmatpush.msrb.mxu0 %v3778_v28  ;;  %v1395_v28 = vsel %vm1391_vm2, %v3499_v37, %v2238_v22  ;;  %v1673_v7 = vrot.slane %v1412_v4, 1  ;;  %v1410_v37 = vsel %vm1391_vm2, %v3620_v34, %v2263_v19  ;;  %v1646_v42 = vsel %vm1633_vm3, %v1643_v2, %v1645_v43  ;;  %v1581_v41 = vld.sshfl [vmem:[#allocation1 + $0x8] sm:$0xff pattern:$0x75316420]  ;;  %v1574_v22 = vld [vmem:[#allocation9 + $0x78] sm:$0xff]  ;;  %v1571_v33 = vld [vmem:[#allocation9 + $0x60] sm:$0xff] }
 0x22a   :  { %1808 = vmatpush.msrb.mxu1 %v3783_v53  ;;  %v4186_v53 = vrot.slane %v3765_v32, 1  ;;  %1545 = vmatpush.msra.mxu3 %v1449_v47  ;;  %v1678_v32 = vsel %vm1633_vm3, %v1675_v54, %v1677_v11  ;;  %v1639_v1 = vrot.slane %v1395_v28, 1  ;;  %v1669_v3 = vrot.slane %v1410_v37, 1  ;;  %v1568_v57 = vld [vmem:[#allocation9 + $0x48] sm:$0xff]  ;;  %v1566_v11 = vld [vmem:[#allocation9 + $0x38] sm:$0xff]  ;;  %v1565_v19 = vld [vmem:[#allocation9 + $0x30] sm:$0xff] }
 0x22b   :  { %1789 = vmatpush.msrb.mxu0 %v3788_v8  ;;  %v1394_v8 = vsel %vm1391_vm2, %v3618_v63, %v2262_v31  ;;  %v1644_v63 = vsel %vm1633_vm3, %v1641_v20, %v1643_v2  ;;  %v1676_v58 = vsel %vm1633_vm3, %v1673_v7, %v1675_v54  ;;  %v1674_v13 = vsel %vm1633_vm3, %v1671_v61, %v1673_v7  ;;  %v1564_v31 = vld [vmem:[#allocation9 + $0x28] sm:$0xff]  ;;  %v1563_v39 = vld [vmem:[#allocation9 + $0x20] sm:$0xff]  ;;  %v1562_v4 = vld [vmem:[#allocation9 + $0x18] sm:$0xff] }
 0x22c   :  { %1809 = vmatpush.msrb.mxu1 %v1682_v48  ;;  %v1648_v60 = vsel %vm1633_vm3, %v1645_v43, %v4186_v53  ;;  %1546 = vmatpush.msra.mxu3 %v1448_v30  ;;  %v1637_v34 = vrot.slane %v1394_v8, 1  ;;  %v1642_v16 = vsel %vm1633_vm3, %v1639_v1, %v1641_v20  ;;  %v1672_v35 = vsel %vm1633_vm3, %v1669_v3, %v1671_v61  ;;  %v1567_v43 = vld [vmem:[#allocation9 + $0x40] sm:$0xff]  ;;  %v1561_v48 = vld [vmem:[#allocation9 + $0x10] sm:$0xff]  ;;  %v1560_v54 = vld [vmem:[#allocation9 + $0x8] sm:$0xff] }
 0x22d   :  { %1790 = vmatpush.msrb.mxu0 %v1648_v60  ;;  %v1670_v23 = vsel %vm1633_vm3, %v1667_v14, %v1669_v3  ;;  %v1559_v28 = vld [vmem:[#allocation9] sm:$0xff] }
 0x22e   :  { %1810 = vmatpush.msrb.mxu1 %v1680_v26  ;;  %1547 = vmatpush.msra.mxu3 %v1447_v24  ;;  %v1640_v40 = vsel %vm1633_vm3, %v1637_v34, %v1639_v1  ;;  %v1638_v62 = vsel %vm1633_vm3, %v1635_v51, %v1637_v34 }
 0x22f   :  { %1791 = vmatpush.msrb.mxu0 %v1646_v42 }
 0x230   :  { %1811 = vmatpush.msrb.mxu1 %v1678_v32  ;;  %1548 = vmatpush.msra.mxu3 %v1446_v56 }
 0x231   :  { %1792 = vmatpush.msrb.mxu0 %v1644_v63 }
 0x232   :  { %1812 = vmatpush.msrb.mxu1 %v1676_v58  ;;  %1549 = vmatpush.msra.mxu3 %v1445_v9 }
 0x233   :  { %1793 = vmatpush.msrb.mxu0 %v1642_v16 }
 0x234   :  { %1813 = vmatpush.msrb.mxu1 %v1674_v13  ;;  %1550 = vmatpush.msra.mxu3 %v1444_v45 }
 0x235   :  { %1794 = vmatpush.msrb.mxu0 %v1640_v40 }
 0x236   :  { %1814 = vmatpush.msrb.mxu1 %v1672_v35  ;;  %1551 = vmatpush.msra.mxu3 %v1443_v49 }
 0x237   :  { %1795 = vmatpush.msrb.mxu0 %v1638_v62 }
 0x238   :  { %1815 = vmatpush.msrb.mxu1 %v1670_v23  ;;  %1552 = vmatpush.msra.mxu3 %v1442_v55 }
 0x239   :  { %1796 = vmatpush.msrb.mxu0 %v1636_v25 }
 0x23a   :  { %1816 = vmatpush.msrb.mxu1 %v1668_v0  ;;  %1797 = vmatmul.f32.vlgmr.msrb.gmra.mxu0 %v1580_v52 }
 0x23b   :  { %1817 = vmatmul.f32.vlgmr.msrb.gmra.mxu1 %v1581_v41  ;;  %1841 = vmatpush.msrb.mxu3 %v1574_v22 }
 0x23d   :  { %1842 = vmatpush.msrb.mxu3 %v1573_v21 }
 0x23f   :  { %1843 = vmatpush.msrb.mxu3 %v1572_v38 }
 0x241   :  { %1844 = vmatpush.msrb.mxu3 %v1571_v33 }
 0x243   :  { %1845 = vmatpush.msrb.mxu3 %v1570_v17 }
 0x245   :  { %1846 = vmatpush.msrb.mxu3 %v1569_v46 }
 0x247   :  { %1847 = vmatpush.msrb.mxu3 %v1568_v57 }
 0x249   :  { %1848 = vmatpush.msrb.mxu3 %v1567_v43 }
 0x24b   :  { %1849 = vmatpush.msrb.mxu3 %v1566_v11 }
 0x24d   :  { %1850 = vmatpush.msrb.mxu3 %v1565_v19 }
 0x24f   :  { %1851 = vmatpush.msrb.mxu3 %v1564_v31 }
 0x251   :  { %1852 = vmatpush.msrb.mxu3 %v1563_v39 }
 0x253   :  { %1853 = vmatpush.msrb.mxu3 %v1562_v4 }
 0x255   :  { %1854 = vmatpush.msrb.mxu3 %v1561_v48 }
 0x257   :  { %1855 = vmatpush.msrb.mxu3 %v1560_v54 }
 0x259   :  { %1856 = vmatpush.msrb.mxu3 %v1559_v28 }
 0x285   :  { %v1526_v47 = vpop.f32.mrf.mxu2 }
 0x297   :  { %v1486_v6 = vpop.f32.mrf.mxu0 }
 0x298   :  { %v1506_v15 = vpop.f32.mrf.mxu1 }
 0x299   :  { %v1507_v2 = vadd.f32 %v1506_v15, %v1486_v6 }
 0x29b   :  { %v1527_v5 = vadd.f32 %v1526_v47, %v1507_v2 }
 0x29d   :  { %1898 = vmatmul.msk.f32.vlgmr.msra.gmra.mxu3 %vm1529_vm6, %v1527_v5 }
 0x2a6   :  { %v1838_v12 = vpop.f32.mrf.mxu2 }
 0x2b7   :  { %v1798_v30 = vpop.f32.mrf.mxu0 }
 0x2b8   :  { %v1818_v53 = vpop.f32.mrf.mxu1 }
 0x2b9   :  { %v1819_v60 = vadd.f32 %v1818_v53, %v1798_v30 }
 0x2bb   :  { %v1839_v26 = vadd.f32 %v1838_v12, %v1819_v60 }
 0x2bd   :  { %1857 = vmatmul.f32.vlgmr.msrb.gmra.mxu3 %v1839_v26 }
 0x320   :  { %v1554_v20 = vpop.f32.mrf.mxu3 }
 0x321   :  { %v1863_v7 = vmul.f32 %v1554_v20, %v1554_v20  ;;  %v1861_v34 = vmul.f32 0.00069444446, %v1554_v20 }
 0x323   :  { %v1864_v44 = vmul.f32 0.00069444446, %v1863_v7 }
 0x325   :  { %1866 = vrot.lane.b32.xlu1 %v1864_v44, %s2426_s19 }
 0x340   :  { %v1858_v8 = vpop.f32.mrf.mxu3 }
 0x341   :  { %v1871_v37 = vmul.f32 %v1858_v8, %v1858_v8  ;;  %v1862_v58 = vmul.f32 0.00069444446, %v1858_v8 }
 0x343   :  { %v1872_v24 = vmul.f32 0.00069444446, %v1871_v37  ;;  %v1879_v3 = vadd.f32 %v1862_v58, %v1861_v34 }
 0x345   :  { %1874 = vrot.lane.b32.xlu2 %v1872_v24, %s2426_s19  ;;  %v1880_v59 = vmul.f32 0.5, %v1879_v3 }
 0x397   :  { %v1867_v42 = vpop.permute.xlu1 %1866 }
 0x398   :  { %v1869_v32 = vsub.f32 %v1554_v20, %v1867_v42 }
 0x39a   :  { %v1870_v61 = vmul.f32 0.00069492706, %v1869_v32 }
 0x39f   :  { %v1875_v36 = vpop.permute.xlu2 %1874 }
 0x3a0   :  { %v1877_v1 = vsub.f32 %v1858_v8, %v1875_v36 }
 0x3a2   :  { %v1878_v27 = vmul.f32 0.00069492706, %v1877_v1 }
 0x3a4   :  { %v1881_v56 = vadd.f32 %v1878_v27, %v1870_v61 }
 0x3a6   :  { %v1882_v63 = vmul.f32 0.5, %v1881_v56 }
 0x3a8   :  { %1884 = vrot.lane.b32.xlu0 %v1882_v63, %s2427_s20 }
 0x41a   :  { %v1885_v29 = vpop.permute.xlu0 %1884 }
 0x41b   :  { %v1887_v9 = vmul.f32 %v1885_v29, %v1880_v59 }
 0x41d   :  { %1889 = vst.msk [vmem:[%s3950_s5] sm:$0xf] %vm1888_vm7, %v1887_v9 }
 0x41e   :  { %1894 = vsyncpa [#allocation3], 1 }
 0x41f   :  { %1895 = vsyncpa [#allocation5], 1 }
 0x420   :  { %1896 = vsyncpa [#allocation8], 1 }

// kernel: texture_analysis_forward.3
= control target key start
LH: loop header
LB: loop body
LE: loop exit
PB: predicated region body
PF: predicated region fallthrough
CT: control target
= control target key end

     0   :  { %vm99_vm0 = vcmask 130048   ;;  %vm553_vm1 = vcmask 523264   ;;  %vm714_vm2 = vcmask 1040384   ;;  %vm715_vm3 = vcmask 1041408   ;;  %s21190_s3 = inlined_call_operand.vmem [shape: f32[144,3], index: 3, kind: input, shape index: {}]   ;;  %s21191_s4 = inlined_call_operand.vmem [shape: f32[144,3], index: 4, kind: input, shape index: {}]   ;;  %s21192_s0 = inlined_call_operand.vmem [shape: f32[192,144], index: 0, kind: input, shape index: {}]   ;;  %s21193_s2 = inlined_call_operand.vmem [shape: f32[4,192], index: 2, kind: input, shape index: {}]   ;;  %s21194_s1 = inlined_call_operand.vmem [shape: f32[4,192], index: 1, kind: input, shape index: {}]   ;;  %s21195_s5 = inlined_call_operand.vmem [shape: bf16[3,2048], index: 5, kind: input, shape index: {}]   ;;  %s21196_s7 = inlined_call_operand.vmem [shape: bf16[2048,1024], index: 7, kind: input, shape index: {}]   ;;  %s21197_s6 = inlined_call_operand.vmem [shape: f32[1,2048], index: 6, kind: input, shape index: {}]   ;;  %s21198_s8 = inlined_call_operand.vmem [shape: f32[1,1024], index: 8, kind: input, shape index: {}]   ;;  %s21199_s9 = inlined_call_operand.vmem [shape: f32[4,1024], index: 9, kind: output, shape index: {}]  }
   0x1   :  { %v96_v0 = vld [vmem:[%s21190_s3 + $0x78] sm:$0xff]  ;;  %v95_v2 = vld [vmem:[%s21190_s3 + $0x70] sm:$0xff]  ;;  %v94_v4 = vld [vmem:[%s21190_s3 + $0x68] sm:$0xff]  ;;  %vm710_vm4 = vcmask 23552   ;;  %vm8828_vm5 = vcmask 1043456  }
   0x2   :  { %v365_v1 = vld [vmem:[%s21191_s4 + $0x78] sm:$0xff]  ;;  %172 = vmatpush.msra.mxu0 %v96_v0  ;;  %v364_v3 = vld [vmem:[%s21191_s4 + $0x70] sm:$0xff]  ;;  %v363_v5 = vld [vmem:[%s21191_s4 + $0x68] sm:$0xff] }
   0x3   :  { %368 = vmatpush.msra.mxu2 %v365_v1  ;;  %v93_v6 = vld [vmem:[%s21190_s3 + $0x60] sm:$0xff]  ;;  %v92_v8 = vld [vmem:[%s21190_s3 + $0x58] sm:$0xff]  ;;  %v91_v10 = vld [vmem:[%s21190_s3 + $0x50] sm:$0xff] }
   0x4   :  { %173 = vmatpush.msra.mxu0 %v95_v2  ;;  %v362_v7 = vld [vmem:[%s21191_s4 + $0x60] sm:$0xff]  ;;  %v361_v9 = vld [vmem:[%s21191_s4 + $0x58] sm:$0xff]  ;;  %v360_v11 = vld [vmem:[%s21191_s4 + $0x50] sm:$0xff] }
   0x5   :  { %369 = vmatpush.msra.mxu2 %v364_v3  ;;  %v98_v12 = vld [vmem:[%s21190_s3 + $0x88] sm:$0xff]  ;;  %v97_v16 = vld [vmem:[%s21190_s3 + $0x80] sm:$0xff]  ;;  %v88_v21 = vld [vmem:[%s21190_s3 + $0x38] sm:$0xff] }
   0x6   :  { %174 = vmatpush.msra.mxu0 %v94_v4  ;;  %v90_v13 = vld [vmem:[%s21190_s3 + $0x48] sm:$0xff]  ;;  %275 = vmatpush.msra.mxu1 %v98_v12  ;;  %v366_v17 = vld [vmem:[%s21191_s4 + $0x80] sm:$0xff]  ;;  %v357_v22 = vld [vmem:[%s21191_s4 + $0x38] sm:$0xff] }
   0x7   :  { %370 = vmatpush.msra.mxu2 %v363_v5  ;;  %v359_v14 = vld [vmem:[%s21191_s4 + $0x48] sm:$0xff]  ;;  %v89_v18 = vld [vmem:[%s21190_s3 + $0x40] sm:$0xff]  ;;  %v87_v23 = vld [vmem:[%s21190_s3 + $0x30] sm:$0xff] }
   0x8   :  { %175 = vmatpush.msra.mxu0 %v93_v6  ;;  %v367_v15 = vld [vmem:[%s21191_s4 + $0x88] sm:$0xff]  ;;  %v358_v19 = vld [vmem:[%s21191_s4 + $0x40] sm:$0xff]  ;;  %276 = vmatpush.msra.mxu1 %v97_v16  ;;  %v356_v24 = vld [vmem:[%s21191_s4 + $0x30] sm:$0xff] }
   0x9   :  { %371 = vmatpush.msra.mxu2 %v362_v7  ;;  %471 = vmatpush.msra.mxu3 %v367_v15  ;;  %v34_v20 = vld [vmem:[%s21192_s0 + $0x8] sm:$0xff]  ;;  %v36_v27 = vld [vmem:[%s21192_s0 + $0x18] sm:$0xff]  ;;  %v85_v28 = vld [vmem:[%s21190_s3 + $0x20] sm:$0xff] }
   0xa   :  { %176 = vmatpush.msra.mxu0 %v92_v8  ;;  %8845 = vmatmul.msk.f32.vlgmr.msra.gmra.mxu1 %vm99_vm0, %v34_v20  ;;  %v86_v25 = vld [vmem:[%s21190_s3 + $0x28] sm:$0xff]  ;;  %v354_v29 = vld [vmem:[%s21191_s4 + $0x20] sm:$0xff]  ;;  %v84_v30 = vld [vmem:[%s21190_s3 + $0x18] sm:$0xff] }
   0xb   :  { %372 = vmatpush.msra.mxu2 %v361_v9  ;;  %472 = vmatpush.msra.mxu3 %v366_v17  ;;  %v355_v26 = vld [vmem:[%s21191_s4 + $0x28] sm:$0xff]  ;;  %v353_v31 = vld [vmem:[%s21191_s4 + $0x18] sm:$0xff]  ;;  %v83_v32 = vld [vmem:[%s21190_s3 + $0x10] sm:$0xff] }
   0xc   :  { %177 = vmatpush.msra.mxu0 %v91_v10  ;;  %8869 = vmatmul.msk.f32.vlgmr.msra.gmra.mxu3 %vm99_vm0, %v34_v20  ;;  %v352_v33 = vld [vmem:[%s21191_s4 + $0x10] sm:$0xff]  ;;  %v82_v34 = vld [vmem:[%s21190_s3 + $0x8] sm:$0xff]  ;;  %v81_v37 = vld [vmem:[%s21190_s3] sm:$0xff] }
   0xd   :  { %373 = vmatpush.msra.mxu2 %v360_v11  ;;  %v351_v35 = vld [vmem:[%s21191_s4 + $0x8] sm:$0xff]  ;;  %v350_v38 = vld [vmem:[%s21191_s4] sm:$0xff]  ;;  %v40_v40 = vld [vmem:[%s21192_s0 + $0x38] sm:$0xff] }
   0xe   :  { %178 = vmatpush.msra.mxu0 %v90_v13  ;;  %v38_v36 = vld [vmem:[%s21192_s0 + $0x28] sm:$0xff]  ;;  %v33_v39 = vld [vmem:[%s21192_s0] sm:$0xff]  ;;  %v35_v41 = vld [vmem:[%s21192_s0 + $0x10] sm:$0xff] }
   0xf   :  { %374 = vmatpush.msra.mxu2 %v359_v14  ;;  %v42_v42 = vld [vmem:[%s21192_s0 + $0x48] sm:$0xff]  ;;  %v37_v43 = vld [vmem:[%s21192_s0 + $0x20] sm:$0xff]  ;;  %v44_v44 = vld [vmem:[%s21192_s0 + $0x58] sm:$0xff] }
  0x10   :  { %179 = vmatpush.msra.mxu0 %v89_v18  ;;  %v39_v45 = vld [vmem:[%s21192_s0 + $0x30] sm:$0xff]  ;;  %v46_v46 = vld [vmem:[%s21192_s0 + $0x68] sm:$0xff]  ;;  %v41_v47 = vld [vmem:[%s21192_s0 + $0x40] sm:$0xff] }
  0x11   :  { %375 = vmatpush.msra.mxu2 %v358_v19  ;;  %v48_v48 = vld [vmem:[%s21192_s0 + $0x78] sm:$0xff]  ;;  %v43_v49 = vld [vmem:[%s21192_s0 + $0x50] sm:$0xff]  ;;  %v50_v50 = vld [vmem:[%s21192_s0 + $0x88] sm:$0xff] }
  0x12   :  { %180 = vmatpush.msra.mxu0 %v88_v21  ;;  %8846 = vmatmul.msk.f32.gmra.mxu1 %vm99_vm0, %v36_v27  ;;  %v45_v51 = vld [vmem:[%s21192_s0 + $0x60] sm:$0xff]  ;;  %v52_v52 = vld [vmem:[%s21192_s0 + $0x98] sm:$0xff]  ;;  %v47_v53 = vld [vmem:[%s21192_s0 + $0x70] sm:$0xff] }
  0x13   :  { %376 = vmatpush.msra.mxu2 %v357_v22  ;;  %v54_v54 = vld [vmem:[%s21192_s0 + $0xa8] sm:$0xff]  ;;  %v49_v55 = vld [vmem:[%s21192_s0 + $0x80] sm:$0xff]  ;;  %v56_v56 = vld [vmem:[%s21192_s0 + $0xb8] sm:$0xff] }
  0x14   :  { %181 = vmatpush.msra.mxu0 %v87_v23  ;;  %8870 = vmatmul.msk.f32.gmra.mxu3 %vm99_vm0, %v36_v27  ;;  %v51_v57 = vld [vmem:[%s21192_s0 + $0x90] sm:$0xff]  ;;  %v58_v58 = vld [vmem:[%s21192_s0 + $0xc8] sm:$0xff]  ;;  %v53_v59 = vld [vmem:[%s21192_s0 + $0xa0] sm:$0xff] }
  0x15   :  { %377 = vmatpush.msra.mxu2 %v356_v24  ;;  %v60_v60 = vld [vmem:[%s21192_s0 + $0xd8] sm:$0xff]  ;;  %v55_v61 = vld [vmem:[%s21192_s0 + $0xb0] sm:$0xff]  ;;  %v62_v62 = vld [vmem:[%s21192_s0 + $0xe8] sm:$0xff] }
  0x16   :  { %182 = vmatpush.msra.mxu0 %v86_v25  ;;  %v57_v63 = vld [vmem:[%s21192_s0 + $0xc0] sm:$0xff]  ;;  %v64_v0 = vld [vmem:[%s21192_s0 + $0xf8] sm:$0xff]  ;;  %v59_v1 = vld [vmem:[%s21192_s0 + $0xd0] sm:$0xff] }
  0x17   :  { %378 = vmatpush.msra.mxu2 %v355_v26  ;;  %v66_v3 = vld [vmem:[%s21192_s0 + $0x108] sm:$0xff]  ;;  %v61_v4 = vld [vmem:[%s21192_s0 + $0xe0] sm:$0xff]  ;;  %v68_v7 = vld [vmem:[%s21192_s0 + $0x118] sm:$0xff] }
  0x18   :  { %183 = vmatpush.msra.mxu0 %v85_v28  ;;  %v63_v8 = vld [vmem:[%s21192_s0 + $0xf0] sm:$0xff]  ;;  %v70_v11 = vld [vmem:[%s21192_s0 + $0x128] sm:$0xff]  ;;  %v65_v13 = vld [vmem:[%s21192_s0 + $0x100] sm:$0xff] }
  0x19   :  { %379 = vmatpush.msra.mxu2 %v354_v29  ;;  %v72_v16 = vld [vmem:[%s21192_s0 + $0x138] sm:$0xff]  ;;  %v67_v19 = vld [vmem:[%s21192_s0 + $0x110] sm:$0xff]  ;;  %v74_v22 = vld [vmem:[%s21192_s0 + $0x148] sm:$0xff] }
  0x1a   :  { %184 = vmatpush.msra.mxu0 %v84_v30  ;;  %8847 = vmatmul.msk.f32.gmra.mxu1 %vm99_vm0, %v38_v36  ;;  %v69_v25 = vld [vmem:[%s21192_s0 + $0x120] sm:$0xff]  ;;  %v76_v28 = vld [vmem:[%s21192_s0 + $0x158] sm:$0xff] }
  0x1b   :  { %380 = vmatpush.msra.mxu2 %v353_v31  ;;  %v71_v31 = vld [vmem:[%s21192_s0 + $0x130] sm:$0xff] }
  0x1c   :  { %185 = vmatpush.msra.mxu0 %v83_v32  ;;  %8871 = vmatmul.msk.f32.gmra.mxu3 %vm99_vm0, %v38_v36 }
  0x1d   :  { %381 = vmatpush.msra.mxu2 %v352_v33 }
  0x1e   :  { %186 = vmatpush.msra.mxu0 %v82_v34  ;;  %v78_v34 = vld [vmem:[%s21192_s0 + $0x168] sm:$0xff] }
  0x1f   :  { %382 = vmatpush.msra.mxu2 %v351_v35 }
  0x20   :  { %187 = vmatpush.msra.mxu0 %v81_v37  ;;  %v73_v37 = vld [vmem:[%s21192_s0 + $0x140] sm:$0xff] }
  0x21   :  { %383 = vmatpush.msra.mxu2 %v350_v38  ;;  %188 = vmatmul.f32.vlgmr.msra.gmra.mxu0 %v33_v39 }
  0x22   :  { %384 = vmatmul.f32.vlgmr.msra.gmra.mxu2 %v33_v39  ;;  %8848 = vmatmul.msk.f32.gmra.mxu1 %vm99_vm0, %v40_v40 }
  0x24   :  { %8872 = vmatmul.msk.f32.gmra.mxu3 %vm99_vm0, %v40_v40  ;;  %v80_v40 = vld [vmem:[%s21192_s0 + $0x178] sm:$0xff] }
  0x29   :  { %191 = vmatmul.f32.gmra.mxu0 %v35_v41 }
  0x2a   :  { %387 = vmatmul.f32.gmra.mxu2 %v35_v41  ;;  %8849 = vmatmul.msk.f32.gmra.mxu1 %vm99_vm0, %v42_v42 }
  0x2c   :  { %8873 = vmatmul.msk.f32.gmra.mxu3 %vm99_vm0, %v42_v42 }
  0x31   :  { %194 = vmatmul.f32.gmra.mxu0 %v37_v43 }
  0x32   :  { %390 = vmatmul.f32.gmra.mxu2 %v37_v43  ;;  %8850 = vmatmul.msk.f32.gmra.mxu1 %vm99_vm0, %v44_v44  ;;  %v75_v43 = vld [vmem:[%s21192_s0 + $0x150] sm:$0xff] }
  0x34   :  { %8874 = vmatmul.msk.f32.gmra.mxu3 %vm99_vm0, %v44_v44 }
  0x39   :  { %197 = vmatmul.f32.gmra.mxu0 %v39_v45 }
  0x3a   :  { %393 = vmatmul.f32.gmra.mxu2 %v39_v45  ;;  %8851 = vmatmul.msk.f32.gmra.mxu1 %vm99_vm0, %v46_v46 }
  0x3c   :  { %8875 = vmatmul.msk.f32.gmra.mxu3 %vm99_vm0, %v46_v46 }
  0x41   :  { %200 = vmatmul.f32.gmra.mxu0 %v41_v47 }
  0x42   :  { %396 = vmatmul.f32.gmra.mxu2 %v41_v47  ;;  %8852 = vmatmul.msk.f32.gmra.mxu1 %vm99_vm0, %v48_v48 }
  0x44   :  { %8876 = vmatmul.msk.f32.gmra.mxu3 %vm99_vm0, %v48_v48  ;;  %v77_v48 = vld [vmem:[%s21192_s0 + $0x160] sm:$0xff] }
  0x49   :  { %203 = vmatmul.f32.gmra.mxu0 %v43_v49 }
  0x4a   :  { %399 = vmatmul.f32.gmra.mxu2 %v43_v49  ;;  %8853 = vmatmul.msk.f32.gmra.mxu1 %vm99_vm0, %v50_v50 }
  0x4c   :  { %8877 = vmatmul.msk.f32.gmra.mxu3 %vm99_vm0, %v50_v50 }
  0x51   :  { %206 = vmatmul.f32.gmra.mxu0 %v45_v51 }
  0x52   :  { %402 = vmatmul.f32.gmra.mxu2 %v45_v51  ;;  %8854 = vmatmul.msk.f32.gmra.mxu1 %vm99_vm0, %v52_v52 }
  0x54   :  { %8878 = vmatmul.msk.f32.gmra.mxu3 %vm99_vm0, %v52_v52 }
  0x59   :  { %209 = vmatmul.f32.gmra.mxu0 %v47_v53 }
  0x5a   :  { %405 = vmatmul.f32.gmra.mxu2 %v47_v53  ;;  %8855 = vmatmul.msk.f32.gmra.mxu1 %vm99_vm0, %v54_v54  ;;  %v79_v53 = vld [vmem:[%s21192_s0 + $0x170] sm:$0xff] }
  0x5c   :  { %8879 = vmatmul.msk.f32.gmra.mxu3 %vm99_vm0, %v54_v54 }
  0x61   :  { %212 = vmatmul.f32.gmra.mxu0 %v49_v55 }
  0x62   :  { %408 = vmatmul.f32.gmra.mxu2 %v49_v55  ;;  %8856 = vmatmul.msk.f32.gmra.mxu1 %vm99_vm0, %v56_v56 }
  0x64   :  { %8880 = vmatmul.msk.f32.gmra.mxu3 %vm99_vm0, %v56_v56 }
  0x69   :  { %215 = vmatmul.f32.gmra.mxu0 %v51_v57 }
  0x6a   :  { %411 = vmatmul.f32.gmra.mxu2 %v51_v57  ;;  %8857 = vmatmul.msk.f32.gmra.mxu1 %vm99_vm0, %v58_v58 }
  0x6c   :  { %8881 = vmatmul.msk.f32.gmra.mxu3 %vm99_vm0, %v58_v58 }
  0x71   :  { %218 = vmatmul.f32.gmra.mxu0 %v53_v59 }
  0x72   :  { %414 = vmatmul.f32.gmra.mxu2 %v53_v59  ;;  %8858 = vmatmul.msk.f32.gmra.mxu1 %vm99_vm0, %v60_v60 }
  0x74   :  { %8882 = vmatmul.msk.f32.gmra.mxu3 %vm99_vm0, %v60_v60 }
  0x79   :  { %221 = vmatmul.f32.gmra.mxu0 %v55_v61 }
  0x7a   :  { %417 = vmatmul.f32.gmra.mxu2 %v55_v61  ;;  %8859 = vmatmul.msk.f32.gmra.mxu1 %vm99_vm0, %v62_v62 }
  0x7c   :  { %8883 = vmatmul.msk.f32.gmra.mxu3 %vm99_vm0, %v62_v62 }
  0x81   :  { %224 = vmatmul.f32.gmra.mxu0 %v57_v63 }
  0x82   :  { %420 = vmatmul.f32.gmra.mxu2 %v57_v63  ;;  %8860 = vmatmul.msk.f32.gmra.mxu1 %vm99_vm0, %v64_v0 }
  0x84   :  { %8884 = vmatmul.msk.f32.gmra.mxu3 %vm99_vm0, %v64_v0 }
  0x87   :  { %v14318_v2 = vpop.f32.mrf.mxu1 }
  0x88   :  { %21200 = vst [vmem:[#allocation2_spill] sm:$0xff] %v14318_v2 }
  0x89   :  { %227 = vmatmul.f32.gmra.mxu0 %v59_v1 }
  0x8a   :  { %423 = vmatmul.f32.gmra.mxu2 %v59_v1  ;;  %8861 = vmatmul.msk.f32.gmra.mxu1 %vm99_vm0, %v66_v3 }
  0x8c   :  { %8885 = vmatmul.msk.f32.gmra.mxu3 %vm99_vm0, %v66_v3 }
  0x8f   :  { %v14328_v5 = vpop.f32.mrf.mxu3  ;;  %v14330_v6 = vpop.f32.mrf.mxu1 }
  0x90   :  { %21201 = vst [vmem:[#allocation3_spill] sm:$0xff] %v14328_v5 }
  0x91   :  { %230 = vmatmul.f32.gmra.mxu0 %v61_v4  ;;  %21202 = vst [vmem:[#allocation4_spill] sm:$0xff] %v14330_v6 }
  0x92   :  { %426 = vmatmul.f32.gmra.mxu2 %v61_v4  ;;  %8862 = vmatmul.msk.f32.gmra.mxu1 %vm99_vm0, %v68_v7 }
  0x94   :  { %8886 = vmatmul.msk.f32.gmra.mxu3 %vm99_vm0, %v68_v7 }
  0x97   :  { %v14340_v9 = vpop.f32.mrf.mxu3  ;;  %v14342_v10 = vpop.f32.mrf.mxu1 }
  0x98   :  { %21203 = vst [vmem:[#allocation5_spill] sm:$0xff] %v14340_v9 }
  0x99   :  { %233 = vmatmul.f32.gmra.mxu0 %v63_v8 }
  0x9a   :  { %429 = vmatmul.f32.gmra.mxu2 %v63_v8  ;;  %8863 = vmatmul.msk.f32.gmra.mxu1 %vm99_vm0, %v70_v11 }
  0x9c   :  { %8887 = vmatmul.msk.f32.gmra.mxu3 %vm99_vm0, %v70_v11 }
  0x9e   :  { %v14347_v12 = vpop.f32.mrf.mxu0 }
  0x9f   :  { %21204 = vst [vmem:[#allocation6_spill] sm:$0xff] %v14347_v12  ;;  %v14356_v15 = vpop.f32.mrf.mxu1  ;;  %v14361_v17 = vpop.f32.mrf.mxu3 }
  0xa0   :  { %21206 = vst [vmem:[#allocation8_spill] sm:$0xff] %v14361_v17 }
  0xa1   :  { %236 = vmatmul.f32.gmra.mxu0 %v65_v13 }
  0xa2   :  { %432 = vmatmul.f32.gmra.mxu2 %v65_v13  ;;  %8864 = vmatmul.msk.f32.gmra.mxu1 %vm99_vm0, %v72_v16 }
  0xa4   :  { %8888 = vmatmul.msk.f32.gmra.mxu3 %vm99_vm0, %v72_v16 }
  0xa5   :  { %v14354_v14 = vpop.f32.mrf.mxu2 }
  0xa6   :  { %21205 = vst [vmem:[#allocation7_spill] sm:$0xff] %v14354_v14  ;;  %v14363_v18 = vpop.f32.mrf.mxu0 }
  0xa7   :  { %v14372_v21 = vpop.f32.mrf.mxu1  ;;  %v14377_v23 = vpop.f32.mrf.mxu3 }
  0xa8   :  { %21208 = vst [vmem:[#allocation10_spill] sm:$0xff] %v14377_v23 }
  0xa9   :  { %239 = vmatmul.f32.gmra.mxu0 %v67_v19 }
  0xaa   :  { %435 = vmatmul.f32.gmra.mxu2 %v67_v19  ;;  %8865 = vmatmul.msk.f32.gmra.mxu1 %vm99_vm0, %v74_v22 }
  0xac   :  { %8889 = vmatmul.msk.f32.gmra.mxu3 %vm99_vm0, %v74_v22 }
  0xad   :  { %v14370_v20 = vpop.f32.mrf.mxu2 }
  0xae   :  { %21207 = vst [vmem:[#allocation9_spill] sm:$0xff] %v14370_v20  ;;  %v14379_v24 = vpop.f32.mrf.mxu0 }
  0xaf   :  { %v14388_v27 = vpop.f32.mrf.mxu1  ;;  %v14393_v29 = vpop.f32.mrf.mxu3 }
  0xb1   :  { %242 = vmatmul.f32.gmra.mxu0 %v69_v25 }
  0xb2   :  { %438 = vmatmul.f32.gmra.mxu2 %v69_v25  ;;  %8866 = vmatmul.msk.f32.gmra.mxu1 %vm99_vm0, %v76_v28 }
  0xb4   :  { %8890 = vmatmul.msk.f32.gmra.mxu3 %vm99_vm0, %v76_v28 }
  0xb5   :  { %v14386_v26 = vpop.f32.mrf.mxu2 }
  0xb6   :  { %21209 = vst [vmem:[#allocation11_spill] sm:$0xff] %v14386_v26  ;;  %v14395_v30 = vpop.f32.mrf.mxu0 }
  0xb7   :  { %v14404_v33 = vpop.f32.mrf.mxu1  ;;  %v14409_v35 = vpop.f32.mrf.mxu3 }
  0xb9   :  { %245 = vmatmul.f32.gmra.mxu0 %v71_v31 }
  0xba   :  { %441 = vmatmul.f32.gmra.mxu2 %v71_v31  ;;  %8867 = vmatmul.msk.f32.gmra.mxu1 %vm99_vm0, %v78_v34 }
  0xbc   :  { %8891 = vmatmul.msk.f32.gmra.mxu3 %vm99_vm0, %v78_v34 }
  0xbd   :  { %v14402_v32 = vpop.f32.mrf.mxu2 }
  0xbe   :  { %21210 = vst [vmem:[#allocation12_spill] sm:$0xff] %v14402_v32  ;;  %v14411_v36 = vpop.f32.mrf.mxu0 }
  0xbf   :  { %v14420_v39 = vpop.f32.mrf.mxu1  ;;  %v14425_v41 = vpop.f32.mrf.mxu3 }
  0xc1   :  { %248 = vmatmul.f32.gmra.mxu0 %v73_v37 }
  0xc2   :  { %444 = vmatmul.f32.gmra.mxu2 %v73_v37  ;;  %8868 = vmatmul.msk.f32.gmra.mxu1 %vm99_vm0, %v80_v40 }
  0xc4   :  { %8892 = vmatmul.msk.f32.gmra.mxu3 %vm99_vm0, %v80_v40 }
  0xc5   :  { %v14418_v38 = vpop.f32.mrf.mxu2 }
  0xc6   :  { %v14427_v42 = vpop.f32.mrf.mxu0 }
  0xc7   :  { %v14436_v45 = vpop.f32.mrf.mxu1  ;;  %v14438_v46 = vpop.f32.mrf.mxu3 }
  0xc9   :  { %251 = vmatmul.f32.gmra.mxu0 %v75_v43 }
  0xca   :  { %447 = vmatmul.f32.gmra.mxu2 %v75_v43 }
  0xcd   :  { %v14434_v44 = vpop.f32.mrf.mxu2 }
  0xce   :  { %v14440_v47 = vpop.f32.mrf.mxu0 }
  0xcf   :  { %v305_v50 = vpop.f32.mrf.mxu1  ;;  %v14447_v51 = vpop.f32.mrf.mxu3 }
  0xd1   :  { %254 = vmatmul.f32.gmra.mxu0 %v77_v48 }
  0xd2   :  { %450 = vmatmul.f32.gmra.mxu2 %v77_v48 }
  0xd5   :  { %v14445_v49 = vpop.f32.mrf.mxu2 }
  0xd6   :  { %v14449_v52 = vpop.f32.mrf.mxu0 }
  0xd7   :  { %v308_v55 = vpop.f32.mrf.mxu1  ;;  %v14456_v56 = vpop.f32.mrf.mxu3 }
  0xd9   :  { %257 = vmatmul.f32.gmra.mxu0 %v79_v53 }
  0xda   :  { %453 = vmatmul.f32.gmra.mxu2 %v79_v53 }
  0xdd   :  { %v14454_v54 = vpop.f32.mrf.mxu2 }
  0xde   :  { %v213_v57 = vpop.f32.mrf.mxu0 }
  0xdf   :  { %v311_v59 = vpop.f32.mrf.mxu1  ;;  %v504_v60 = vpop.f32.mrf.mxu3 }
  0xe5   :  { %v14458_v58 = vpop.f32.mrf.mxu2 }
  0xe6   :  { %v216_v61 = vpop.f32.mrf.mxu0 }
  0xe7   :  { %v314_v63 = vpop.f32.mrf.mxu1  ;;  %v507_v0 = vpop.f32.mrf.mxu3 }
  0xed   :  { %v412_v62 = vpop.f32.mrf.mxu2 }
  0xee   :  { %v219_v1 = vpop.f32.mrf.mxu0 }
  0xef   :  { %v317_v4 = vpop.f32.mrf.mxu1  ;;  %v510_v7 = vpop.f32.mrf.mxu3  ;;  %v309_v6 = vadd.f32 %v308_v55, %v219_v1  ;;  %v300_v55 = vadd.f32 %v14420_v39, %v14449_v52  ;;  %v291_v52 = vadd.f32 %v14372_v21, %v14411_v36  ;;  %v490_v21 = vadd.f32 %v14409_v35, %v14434_v44  ;;  %v21217_v35 = vld [vmem:[#allocation2_spill] sm:$0xff]  ;;  %v21222_v1 = vld [vmem:[#allocation7_spill] sm:$0xff] }
  0xf5   :  { %v415_v3 = vpop.f32.mrf.mxu2 }
  0xf6   :  { %v222_v8 = vpop.f32.mrf.mxu0 }
  0xf7   :  { %v320_v13 = vpop.f32.mrf.mxu1  ;;  %v513_v16 = vpop.f32.mrf.mxu3 }
  0xfd   :  { %v418_v11 = vpop.f32.mrf.mxu2 }
  0xfe   :  { %v225_v19 = vpop.f32.mrf.mxu0 }
  0xff   :  { %v323_v25 = vpop.f32.mrf.mxu1  ;;  %v516_v28 = vpop.f32.mrf.mxu3  ;;  %v315_v2 = vadd.f32 %v314_v63, %v225_v19  ;;  %v508_v63 = vadd.f32 %v507_v0, %v418_v11  ;;  %v21221_v0 = vld [vmem:[#allocation5_spill] sm:$0xff] }
 0x105   :  { %v421_v22 = vpop.f32.mrf.mxu2 }
 0x106   :  { %v228_v31 = vpop.f32.mrf.mxu0 }
 0x107   :  { %v519_v37 = vpop.f32.mrf.mxu3  ;;  %v14460_v43 = vpop.f32.mrf.mxu1  ;;  %v318_v17 = vadd.f32 %v317_v4, %v228_v31 }
 0x108   :  { %21211 = vst [vmem:[#allocation13_spill] sm:$0xff] %v14460_v43 }
 0x10d   :  { %v424_v34 = vpop.f32.mrf.mxu2 }
 0x10e   :  { %v231_v40 = vpop.f32.mrf.mxu0 }
 0x10f   :  { %v14462_v53 = vpop.f32.mrf.mxu3  ;;  %v321_v14 = vadd.f32 %v320_v13, %v231_v40  ;;  %v14464_v20 = vpop.f32.mrf.mxu1  ;;  %v514_v13 = vadd.f32 %v513_v16, %v424_v34  ;;  %v546_v40 = vld [vmem:[%s21194_s1] sm:$0xff] }
 0x110   :  { %21212 = vst [vmem:[#allocation14_spill] sm:$0xff] %v14462_v53  ;;  %v312_v53 = vadd.f32 %v311_v59, %v222_v8 }
 0x115   :  { %v427_v48 = vpop.f32.mrf.mxu2 }
 0x116   :  { %v234_v5 = vpop.f32.mrf.mxu0  ;;  %v517_v43 = vadd.f32 %v516_v28, %v427_v48 }
 0x117   :  { %v324_v9 = vadd.f32 %v323_v25, %v234_v5  ;;  %v14468_v32 = vpop.f32.mrf.mxu3  ;;  %v14470_v5 = vpop.f32.mrf.mxu1 }
 0x119   :  { %603 = vmatpush.msrb.mxu0 %v324_v9  ;;  %v511_v9 = vadd.f32 %v510_v7, %v421_v22  ;;  %v547_v22 = vld [vmem:[%s21193_s2] sm:$0xff] }
 0x11a   :  { %549 = vst [vmem:[#allocation1] ss:$2 sm:$0xff] %v547_v22 }
 0x11b   :  { %604 = vmatpush.msrb.mxu0 %v321_v14  ;;  %v306_v14 = vadd.f32 %v305_v50, %v216_v61  ;;  %v502_v50 = vadd.f32 %v14456_v56, %v412_v62  ;;  %v21218_v61 = vld [vmem:[#allocation11_spill] sm:$0xff]  ;;  %v21219_v62 = vld [vmem:[#allocation8_spill] sm:$0xff] }
 0x11d   :  { %v430_v26 = vpop.f32.mrf.mxu2  ;;  %605 = vmatpush.msrb.mxu0 %v318_v17  ;;  %v303_v17 = vadd.f32 %v14436_v45, %v213_v57  ;;  %v499_v45 = vadd.f32 %v14447_v51, %v14458_v58  ;;  %v294_v57 = vadd.f32 %v14388_v27, %v14427_v42  ;;  %v493_v51 = vadd.f32 %v14425_v41, %v14445_v49  ;;  %v21213_v41 = vld [vmem:[#allocation4_spill] sm:$0xff] }
 0x11e   :  { %v520_v12 = vadd.f32 %v519_v37, %v430_v26  ;;  %v14466_v23 = vpop.f32.mrf.mxu0  ;;  %v288_v27 = vadd.f32 %v14356_v15, %v14395_v30  ;;  %v285_v42 = vadd.f32 %v14342_v10, %v14379_v24  ;;  %v282_v49 = vadd.f32 %v21213_v41, %v14363_v18  ;;  %v21214_v15 = vld [vmem:[#allocation12_spill] sm:$0xff]  ;;  %v21215_v30 = vld [vmem:[#allocation10_spill] sm:$0xff] }
 0x11f   :  { %606 = vmatpush.msrb.mxu0 %v315_v2  ;;  %v14479_v59 = vpop.f32.mrf.mxu3  ;;  %v14490_v39 = vpop.f32.mrf.mxu1  ;;  %v484_v10 = vadd.f32 %v21215_v30, %v21214_v15  ;;  %v21216_v24 = vld [vmem:[#allocation6_spill] sm:$0xff]  ;;  %v21224_v15 = vld [vmem:[#allocation13_spill] sm:$0xff] }
 0x120   :  { %556 = vmatpush.msrb.mxu1 %v520_v12  ;;  %v505_v12 = vadd.f32 %v504_v60, %v415_v3  ;;  %v279_v44 = vadd.f32 %v21217_v35, %v21216_v24  ;;  %v21223_v3 = vld [vmem:[#allocation3_spill] sm:$0xff]  ;;  %v327_v30 = vadd.f32 %v21224_v15, %v14466_v23  ;;  %v14037_v23 = vmov 65535  }
 0x121   :  { %607 = vmatpush.msrb.mxu0 %v312_v53  ;;  %v475_v4 = vadd.f32 %v21223_v3, %v21222_v1  ;;  %v551_v37 = vld.sshfl [vmem:[#allocation1 + $0x8] sm:$0xff pattern:$0x75316420]  ;;  %v550_v48 = vld.sshfl [vmem:[#allocation1] sm:$0xff pattern:$0x75316420] }
 0x122   :  { %557 = vmatpush.msrb.mxu1 %v517_v43  ;;  %v646_v53 = vld [vmem:[%s21195_s5 + $0x8] sm:$0xff]  ;;  %597 = vst [vmem:[#allocation1] ss:$2 sm:$0xff] %v546_v40 }
 0x123   :  { %608 = vmatpush.msrb.mxu0 %v309_v6  ;;  %v297_v6 = vadd.f32 %v14404_v33, %v14440_v47  ;;  %v496_v33 = vadd.f32 %v14438_v46, %v14454_v54  ;;  %v487_v46 = vadd.f32 %v14393_v29, %v14418_v38  ;;  %v481_v29 = vadd.f32 %v21219_v62, %v21218_v61  ;;  %v21220_v38 = vld [vmem:[#allocation9_spill] sm:$0xff] }
 0x124   :  { %558 = vmatpush.msrb.mxu1 %v514_v13  ;;  %v478_v18 = vadd.f32 %v21221_v0, %v21220_v38  ;;  %689 = vst [vmem:[#allocation1 + $0x20] ss:$4 sm:$0xff] %v646_v53 }
 0x125   :  { %v14472_v26 = vpop.f32.mrf.mxu2  ;;  %609 = vmatpush.msrb.mxu0 %v306_v14 }
 0x126   :  { %559 = vmatpush.msrb.mxu1 %v511_v9  ;;  %v14475_v2 = vpop.f32.mrf.mxu0 }
 0x127   :  { %610 = vmatpush.msrb.mxu0 %v303_v17  ;;  %v14506_v36 = vpop.f32.mrf.mxu3  ;;  %v338_v58 = vpop.f32.mrf.mxu1  ;;  %v645_v17 = vld [vmem:[%s21195_s5] sm:$0xff]  ;;  %v330_v41 = vadd.f32 %v14464_v20, %v14475_v2  ;;  %v21225_v2 = vld [vmem:[#allocation14_spill] sm:$0xff] }
 0x128   :  { %560 = vmatpush.msrb.mxu1 %v508_v63 }
 0x129   :  { %611 = vmatpush.msrb.mxu0 %v300_v55  ;;  %v599_v55 = vld.sshfl [vmem:[#allocation1 + $0x8] sm:$0xff pattern:$0x75316420] }
 0x12a   :  { %561 = vmatpush.msrb.mxu1 %v505_v12  ;;  %v598_v12 = vld.sshfl [vmem:[#allocation1] sm:$0xff pattern:$0x75316420] }
 0x12b   :  { %612 = vmatpush.msrb.mxu0 %v297_v6  ;;  %686 = vst [vmem:[#allocation1] ss:$4 sm:$0xff] %v645_v17  ;;  %v695_v61 = vld.sshfl [vmem:[#allocation1 + $0x28] sm:$0xff pattern:$0x73625140] }
 0x12c   :  { %562 = vmatpush.msrb.mxu1 %v502_v50  ;;  %v697_v38 = vld.sshfl [vmem:[#allocation1 + $0x38] sm:$0xff pattern:$0x73625140] }
 0x12d   :  { %v14488_v60 = vpop.f32.mrf.mxu2  ;;  %613 = vmatpush.msrb.mxu0 %v294_v57 }
 0x12e   :  { %563 = vmatpush.msrb.mxu1 %v499_v45  ;;  %v14496_v47 = vpop.f32.mrf.mxu0  ;;  %v526_v20 = vadd.f32 %v14468_v32, %v14488_v60 }
 0x12f   :  { %614 = vmatpush.msrb.mxu0 %v291_v52  ;;  %v534_v8 = vpop.f32.mrf.mxu3  ;;  %v341_v16 = vpop.f32.mrf.mxu1 }
 0x130   :  { %564 = vmatpush.msrb.mxu1 %v496_v33 }
 0x131   :  { %615 = vmatpush.msrb.mxu0 %v288_v27 }
 0x132   :  { %565 = vmatpush.msrb.mxu1 %v493_v51  ;;  %v693_v35 = vld.sshfl [vmem:[#allocation1 + $0x18] sm:$0xff pattern:$0x73625140] }
 0x133   :  { %616 = vmatpush.msrb.mxu0 %v285_v42 }
 0x134   :  { %566 = vmatpush.msrb.mxu1 %v490_v21  ;;  %v333_v21 = vadd.f32 %v14470_v5, %v14496_v47  ;;  %v523_v47 = vadd.f32 %v21225_v2, %v14472_v26 }
 0x135   :  { %v14512_v54 = vpop.f32.mrf.mxu2  ;;  %617 = vmatpush.msrb.mxu0 %v282_v49 }
 0x136   :  { %567 = vmatpush.msrb.mxu1 %v487_v46  ;;  %v246_v56 = vpop.f32.mrf.mxu0  ;;  %v529_v5 = vadd.f32 %v14479_v59, %v14512_v54  ;;  %v691_v54 = vld.sshfl [vmem:[#allocation1 + $0x8] sm:$0xff pattern:$0x73625140] }
 0x137   :  { %618 = vmatpush.msrb.mxu0 %v279_v44  ;;  %v537_v28 = vpop.f32.mrf.mxu3  ;;  %v344_v31 = vpop.f32.mrf.mxu1  ;;  %v336_v27 = vadd.f32 %v14490_v39, %v246_v56  ;;  %v694_v44 = vld.sshfl [vmem:[#allocation1 + $0x20] sm:$0xff pattern:$0x73625140]  ;;  %v647_v56 = vld [vmem:[%s21195_s5 + $0x10] sm:$0xff] }
 0x138   :  { %568 = vmatpush.msrb.mxu1 %v484_v10  ;;  %619 = vmatmul.f32.vlgmr.msrb.gmra.mxu0 %v598_v12  ;;  %v690_v10 = vld.sshfl [vmem:[#allocation1] sm:$0xff pattern:$0x73625140] }
 0x13a   :  { %569 = vmatpush.msrb.mxu1 %v481_v29 }
 0x13c   :  { %570 = vmatpush.msrb.mxu1 %v478_v18 }
 0x13d   :  { %v442_v7 = vpop.f32.mrf.mxu2 }
 0x13e   :  { %571 = vmatpush.msrb.mxu1 %v475_v4  ;;  %v249_v11 = vpop.f32.mrf.mxu0  ;;  %v532_v39 = vadd.f32 %v14506_v36, %v442_v7  ;;  %v716_v36 = vsel %vm714_vm2, 4294967295, %v14037_v23  ;;  %v648_v4 = vld [vmem:[%s21195_s5 + $0x18] sm:$0xff]  ;;  %v696_v7 = vld.sshfl [vmem:[#allocation1 + $0x30] sm:$0xff pattern:$0x73625140] }
 0x13f   :  { %572 = vmatmul.f32.vlgmr.msrb.gmra.mxu1 %v550_v48  ;;  %v540_v13 = vpop.f32.mrf.mxu3  ;;  %v347_v14 = vpop.f32.mrf.mxu1  ;;  %v339_v33 = vadd.f32 %v338_v58, %v249_v11  ;;  %v14550_v24 = vsel %vm715_vm3, %v716_v36, 0  ;;  %v692_v58 = vld.sshfl [vmem:[#allocation1 + $0x10] sm:$0xff pattern:$0x73625140]  ;;  %701 = vst [vmem:[#allocation1 + $0x20] ss:$4 sm:$0xff] %v648_v4 }
 0x140   :  { %v718_v59 = vand.u32 %v14550_v24, %v690_v10  ;;  %v720_v32 = vand.u32 %v14550_v24, %v691_v54  ;;  %v724_v60 = vand.u32 %v14550_v24, %v693_v35  ;;  %v726_v26 = vand.u32 %v14550_v24, %v694_v44  ;;  %699 = vst [vmem:[#allocation1] ss:$4 sm:$0xff] %v647_v56  ;;  %v13251_v23 = vld [vmem:[%s21196_s7 + $0x79c] sm:$0xf0] }
 0x141   :  { %v722_v62 = vand.u32 %v14550_v24, %v692_v58  ;;  %v728_v29 = vand.u32 %v14550_v24, %v695_v61  ;;  %v732_v0 = vand.u32 %v14550_v24, %v697_v38  ;;  %v9073_v10 = vld [vmem:[%s21196_s7 + $0x140] sm:$0xf] }
 0x142   :  { %796 = vmatpush.bf16.msrb.mxu2 %v724_v60  ;;  %809 = vmatpush.bf16.msra.mxu0 %v726_v26  ;;  %v13243_v54 = vld [vmem:[%s21196_s7 + $0x75c] sm:$0xf0] }
 0x143   :  { %v13107_v60 = vld [vmem:[%s21196_s7 + $0x31c] sm:$0xf0] }
 0x144   :  { %v9041_v56 = vld [vmem:[%s21196_s7 + $0x100] sm:$0xf] }
 0x145   :  { %v445_v19 = vpop.f32.mrf.mxu2  ;;  %v13043_v58 = vld [vmem:[%s21196_s7 + $0x11c] sm:$0xf0] }
 0x146   :  { %v252_v25 = vpop.f32.mrf.mxu0  ;;  %v535_v49 = vadd.f32 %v534_v8, %v445_v19  ;;  %848 = vmatpush.bf16.msra.mxu2 %v732_v0  ;;  %v709_v17 = vld.sshfl [vmem:[#allocation1 + $0x38] sm:$0xff pattern:$0x73625140]  ;;  %v9809_v61 = vld [vmem:[%s21196_s7 + $0x700] sm:$0xf] }
 0x147   :  { %v543_v45 = vpop.f32.mrf.mxu3  ;;  %v342_v57 = vadd.f32 %v341_v16, %v252_v25  ;;  %v702_v18 = vld.sshfl [vmem:[#allocation1] sm:$0xff pattern:$0x73625140] }
 0x148   :  { %v734_v1 = vand.u32 %v14550_v24, %v702_v18  ;;  %v9649_v38 = vld [vmem:[%s21196_s7 + $0x5c0] sm:$0xf] }
 0x149   :  { %v13195_v0 = vld [vmem:[%s21196_s7 + $0x5dc] sm:$0xf0] }
 0x14a   :  { %861 = vmatpush.bf16.msrb.mxu0 %v734_v1  ;;  %v9265_v18 = vld [vmem:[%s21196_s7 + $0x2c0] sm:$0xf] }
 0x14b   :  { %v13099_v1 = vld [vmem:[%s21196_s7 + $0x2dc] sm:$0xf0] }
 0x14d   :  { %v448_v34 = vpop.f32.mrf.mxu2 }
 0x14e   :  { %v255_v43 = vpop.f32.mrf.mxu0  ;;  %v538_v46 = vadd.f32 %v537_v28, %v448_v34  ;;  %v703_v28 = vld.sshfl [vmem:[#allocation1 + $0x8] sm:$0xff pattern:$0x73625140] }
 0x14f   :  { %v345_v6 = vadd.f32 %v344_v31, %v255_v43  ;;  %v705_v31 = vld.sshfl [vmem:[#allocation1 + $0x18] sm:$0xff pattern:$0x73625140]  ;;  %v730_v43 = vand.u32 %v14550_v24, %v696_v7  ;;  %v736_v48 = vand.u32 %v14550_v24, %v703_v28  ;;  %v9009_v7 = vld [vmem:[%s21196_s7 + $0xc0] sm:$0xf] }
 0x150   :  { %v740_v53 = vand.u32 %v14550_v24, %v705_v31  ;;  %v13187_v28 = vld [vmem:[%s21196_s7 + $0x59c] sm:$0xf0] }
 0x151   :  { %v9233_v31 = vld [vmem:[%s21196_s7 + $0x280] sm:$0xf] }
 0x155   :  { %v451_v9 = vpop.f32.mrf.mxu2 }
 0x156   :  { %v258_v63 = vpop.f32.mrf.mxu0  ;;  %v541_v42 = vadd.f32 %v540_v13, %v451_v9  ;;  %v704_v9 = vld.sshfl [vmem:[#allocation1 + $0x10] sm:$0xff pattern:$0x73625140] }
 0x157   :  { %v348_v50 = vadd.f32 %v347_v14, %v258_v63  ;;  %v707_v14 = vld.sshfl [vmem:[#allocation1 + $0x28] sm:$0xff pattern:$0x73625140]  ;;  %v738_v63 = vand.u32 %v14550_v24, %v704_v9  ;;  %v9745_v9 = vld [vmem:[%s21196_s7 + $0x680] sm:$0xf] }
 0x158   :  { %v744_v12 = vand.u32 %v14550_v24, %v707_v14 }
 0x159   :  { %631 = vmatpush.msra.mxu1 %v348_v50 }
 0x15b   :  { %632 = vmatpush.msra.mxu1 %v345_v6  ;;  %v708_v6 = vld.sshfl [vmem:[#allocation1 + $0x30] sm:$0xff pattern:$0x73625140] }
 0x15c   :  { %v746_v50 = vand.u32 %v14550_v24, %v708_v6  ;;  %v13083_v6 = vld [vmem:[%s21196_s7 + $0x25c] sm:$0xf0] }
 0x15d   :  { %v454_v52 = vpop.f32.mrf.mxu2  ;;  %633 = vmatpush.msra.mxu1 %v342_v57  ;;  %v13131_v57 = vld [vmem:[%s21196_s7 + $0x3dc] sm:$0xf0] }
 0x15e   :  { %v544_v51 = vadd.f32 %v543_v45, %v454_v52  ;;  %v9393_v45 = vld [vmem:[%s21196_s7 + $0x3c0] sm:$0xf] }
 0x15f   :  { %634 = vmatpush.msra.mxu1 %v339_v33  ;;  %v9361_v52 = vld [vmem:[%s21196_s7 + $0x380] sm:$0xf]  ;;  %v9394_v33 = vor.u32 %v13131_v57, %v9393_v45 }
 0x160   :  { %584 = vmatpush.msrb.mxu3 %v544_v51  ;;  %v13123_v51 = vld [vmem:[%s21196_s7 + $0x39c] sm:$0xf0] }
 0x161   :  { %635 = vmatpush.msra.mxu1 %v336_v27  ;;  %v9137_v27 = vld [vmem:[%s21196_s7 + $0x1c0] sm:$0xf] }
 0x162   :  { %585 = vmatpush.msrb.mxu3 %v541_v42  ;;  %v13067_v42 = vld [vmem:[%s21196_s7 + $0x1dc] sm:$0xf0] }
 0x163   :  { %636 = vmatpush.msra.mxu1 %v333_v21  ;;  %v9138_v21 = vor.u32 %v13067_v42, %v9137_v27  ;;  %v8945_v57 = vld [vmem:[%s21196_s7 + $0x40] sm:$0xf] }
 0x164   :  { %586 = vmatpush.msrb.mxu3 %v538_v46  ;;  %v9905_v46 = vld [vmem:[%s21196_s7 + $0x7c0] sm:$0xf] }
 0x165   :  { %637 = vmatpush.msra.mxu1 %v330_v41  ;;  %v13259_v41 = vld [vmem:[%s21196_s7 + $0x7dc] sm:$0xf0] }
 0x166   :  { %587 = vmatpush.msrb.mxu3 %v535_v49  ;;  %v9362_v49 = vor.u32 %v13123_v51, %v9361_v52  ;;  %v9906_v15 = vor.u32 %v13259_v41, %v9905_v46  ;;  %v13019_v52 = vld [vmem:[%s21196_s7 + $0x5c] sm:$0xf0] }
 0x167   :  { %638 = vmatpush.msra.mxu1 %v327_v30  ;;  %v9329_v30 = vld [vmem:[%s21196_s7 + $0x340] sm:$0xf] }
 0x168   :  { %588 = vmatpush.msrb.mxu3 %v532_v39  ;;  %8894 = vmatmul.msk.f32.vlgmr.msra.gmra.mxu1 %vm553_vm1, %v599_v55  ;;  %v748_v55 = vand.u32 %v14550_v24, %v709_v17  ;;  %v9105_v39 = vld [vmem:[%s21196_s7 + $0x180] sm:$0xf] }
 0x169   :  { %770 = vmatpush.bf16.msrb.mxu1 %v720_v32  ;;  %v9297_v32 = vld [vmem:[%s21196_s7 + $0x300] sm:$0xf] }
 0x16a   :  { %589 = vmatpush.msrb.mxu3 %v529_v5  ;;  %v13059_v5 = vld [vmem:[%s21196_s7 + $0x19c] sm:$0xf0] }
 0x16b   :  { %v9106_v2 = vor.u32 %v13059_v5, %v9105_v39  ;;  %v13219_v17 = vld [vmem:[%s21196_s7 + $0x69c] sm:$0xf0]  ;;  %v8946_v39 = vor.u32 %v13019_v52, %v8945_v57 }
 0x16c   :  { %590 = vmatpush.msrb.mxu3 %v526_v20  ;;  %v13115_v20 = vld [vmem:[%s21196_s7 + $0x35c] sm:$0xf0]  ;;  %v9746_v45 = vor.u32 %v13219_v17, %v9745_v9 }
 0x16d   :  { %822 = vmatpush.bf16.msra.mxu1 %v728_v29  ;;  %v9330_v35 = vor.u32 %v13115_v20, %v9329_v30  ;;  %v13235_v29 = vld [vmem:[%s21196_s7 + $0x71c] sm:$0xf0] }
 0x16e   :  { %591 = vmatpush.msrb.mxu3 %v523_v47  ;;  %v9873_v47 = vld [vmem:[%s21196_s7 + $0x780] sm:$0xf]  ;;  %v9810_v4 = vor.u32 %v13235_v29, %v9809_v61 }
 0x16f   :  { %8893 = vmatmul.msk.f32.vlgmr.msrb.gmra.mxu3 %vm553_vm1, %v551_v37  ;;  %v706_v37 = vld.sshfl [vmem:[#allocation1 + $0x20] sm:$0xff pattern:$0x73625140]  ;;  %v9874_v36 = vor.u32 %v13251_v23, %v9873_v47 }
 0x170   :  { %757 = vmatpush.bf16.msra.mxu3 %v718_v59  ;;  %v742_v13 = vand.u32 %v14550_v24, %v706_v37  ;;  %v13051_v24 = vld [vmem:[%s21196_s7 + $0x15c] sm:$0xf0] }
 0x171   :  { %v9841_v59 = vld [vmem:[%s21196_s7 + $0x740] sm:$0xf]  ;;  %v9074_v44 = vor.u32 %v13051_v24, %v9073_v10 }
 0x172   :  { %v9842_v26 = vor.u32 %v13243_v54, %v9841_v59  ;;  %v9713_v51 = vld [vmem:[%s21196_s7 + $0x640] sm:$0xf] }
 0x173   :  { %v13211_v42 = vld [vmem:[%s21196_s7 + $0x65c] sm:$0xf0] }
 0x174   :  { %783 = vmatpush.bf16.msrb.mxu3 %v722_v62  ;;  %v9298_v62 = vor.u32 %v13107_v60, %v9297_v32  ;;  %v13171_v46 = vld [vmem:[%s21196_s7 + $0x51c] sm:$0xf0]  ;;  %v9714_v20 = vor.u32 %v13211_v42, %v9713_v51 }
 0x175   :  { %v9169_v41 = vld [vmem:[%s21196_s7 + $0x200] sm:$0xf] }
 0x176   :  { %v13387_v30 = vld [vmem:[%s21196_s7 + $0xbdc] sm:$0xf0] }
 0x177   :  { %v8913_v5 = vld [vmem:[%s21196_s7] sm:$0xf] }
 0x178   :  { %v9681_v23 = vld [vmem:[%s21196_s7 + $0x600] sm:$0xf] }
 0x179   :  { %v10161_v24 = vld [vmem:[%s21196_s7 + $0x9c0] sm:$0xf] }
 0x17a   :  { %v13323_v59 = vld [vmem:[%s21196_s7 + $0x9dc] sm:$0xf0] }
 0x17b   :  { %v10929_v54 = vld [vmem:[%s21196_s7 + $0xfc0] sm:$0xf] }
 0x17c   :  { %v13515_v32 = vld [vmem:[%s21196_s7 + $0xfdc] sm:$0xf0] }
 0x17d   :  { %v9521_v60 = vld [vmem:[%s21196_s7 + $0x4c0] sm:$0xf]  ;;  %v10930_v29 = vor.u32 %v13515_v32, %v10929_v54 }
 0x17e   :  { %v13139_v57 = vld [vmem:[%s21196_s7 + $0x41c] sm:$0xf0] }
 0x17f   :  { %v10289_v52 = vld [vmem:[%s21196_s7 + $0xac0] sm:$0xf] }
 0x180   :  { %v10001_v54 = vld [vmem:[%s21196_s7 + $0x880] sm:$0xf] }
 0x181   :  { %v10641_v32 = vld [vmem:[%s21196_s7 + $0xd80] sm:$0xf] }
 0x1b5   :  { %v620_v11 = vpop.f32.mrf.mxu0 }
 0x1bc   :  { %v573_v3 = vpop.f32.mrf.mxu1 }
 0x1e5   :  { %v640_v19 = vpop.f32.mrf.mxu1 }
 0x1f2   :  { %v593_v8 = vpop.f32.mrf.mxu3 }
 0x1f3   :  { %v594_v16 = vadd.f32 %v593_v8, %v573_v3  ;;  %v9042_v3 = vor.u32 %v13043_v58, %v9041_v56  ;;  %v13035_v8 = vld [vmem:[%s21196_s7 + $0xdc] sm:$0xf0] }
 0x1f4   :  { %v9010_v37 = vor.u32 %v13035_v8, %v9009_v7  ;;  %v13379_v56 = vld [vmem:[%s21196_s7 + $0xb9c] sm:$0xf0] }
 0x1f5   :  { %v621_v22 = vadd.f32 %v620_v11, %v594_v16  ;;  %v9650_v11 = vor.u32 %v13195_v0, %v9649_v38  ;;  %v9777_v16 = vld [vmem:[%s21196_s7 + $0x6c0] sm:$0xf] }
 0x1f6   :  { %v10129_v0 = vld [vmem:[%s21196_s7 + $0x980] sm:$0xf] }
 0x1f7   :  { %v641_v25 = vadd.f32 %v640_v19, %v621_v22  ;;  %v9266_v19 = vor.u32 %v13099_v1, %v9265_v18  ;;  %v13227_v22 = vld [vmem:[%s21196_s7 + $0x6dc] sm:$0xf0] }
 0x1f8   :  { %v13315_v18 = vld [vmem:[%s21196_s7 + $0x99c] sm:$0xf0] }
 0x1f9   :  { %v643_v34 = vmul.f32 0.00024414063, %v641_v25  ;;  %v9617_v25 = vld [vmem:[%s21196_s7 + $0x580] sm:$0xf] }
 0x1fa   :  { %v10897_v1 = vld [vmem:[%s21196_s7 + $0xf80] sm:$0xf] }
 0x1fb   :  { %v14566_v40 = vpack.c.bf16 %v643_v34, %v643_v34  ;;  %v13091_v34 = vld [vmem:[%s21196_s7 + $0x29c] sm:$0xf0] }
 0x1fc   :  { %v9234_v14 = vor.u32 %v13091_v34, %v9233_v31  ;;  %v9489_v7 = vld [vmem:[%s21196_s7 + $0x480] sm:$0xf] }
 0x1fd   :  { %8895 = vmatmul.msk.bf16.vlgmr.msra.gmra.mxu3 %vm710_vm4, %v14566_v40  ;;  %8896 = vmatmul.msk.bf16.vlgmr.msrb.gmra.mxu1 %vm710_vm4, %v14566_v40  ;;  %v13155_v8 = vld [vmem:[%s21196_s7 + $0x49c] sm:$0xf0] }
 0x1fe   :  { %8898 = vmatmul.msk.bf16.vlgmr.msrb.gmra.mxu2 %vm710_vm4, %v14566_v40  ;;  %8899 = vmatmul.msk.bf16.vlgmr.msra.gmra.mxu0 %vm710_vm4, %v14566_v40  ;;  %v10865_v31 = vld [vmem:[%s21196_s7 + $0xf40] sm:$0xf] }
 0x1ff   :  { %835 = vmatpush.bf16.msra.mxu3 %v730_v43  ;;  %874 = vmatpush.bf16.msrb.mxu1 %v736_v48  ;;  %v9778_v43 = vor.u32 %v13227_v22, %v9777_v16  ;;  %v8977_v48 = vld [vmem:[%s21196_s7 + $0x80] sm:$0xf]  ;;  %v10130_v16 = vor.u32 %v13315_v18, %v10129_v0  ;;  %v9490_v22 = vor.u32 %v13155_v8, %v9489_v7 }
 0x200   :  { %900 = vmatpush.bf16.msrb.mxu2 %v740_v53  ;;  %913 = vmatpush.bf16.msra.mxu0 %v742_v13  ;;  %v13027_v53 = vld [vmem:[%s21196_s7 + $0x9c] sm:$0xf0]  ;;  %v9618_v13 = vor.u32 %v13187_v28, %v9617_v25 }
 0x201   :  { %v10097_v25 = vld [vmem:[%s21196_s7 + $0x940] sm:$0xf] }
 0x202   :  { %v13307_v28 = vld [vmem:[%s21196_s7 + $0x95c] sm:$0xf0] }
 0x203   :  { %v10098_v9 = vor.u32 %v13307_v28, %v10097_v25  ;;  %v9969_v0 = vld [vmem:[%s21196_s7 + $0x840] sm:$0xf] }
 0x204   :  { %v13275_v18 = vld [vmem:[%s21196_s7 + $0x85c] sm:$0xf0] }
 0x205   :  { %v10737_v7 = vld [vmem:[%s21196_s7 + $0xe40] sm:$0xf] }
 0x206   :  { %v13427_v28 = vld [vmem:[%s21196_s7 + $0xd1c] sm:$0xf0] }
 0x20d   :  { %8897 = vmatmul.msk.bf16.vlgmr.msrb.gmra.mxu3 %vm710_vm4, %v14566_v40  ;;  %8900 = vmatmul.msk.bf16.vlgmr.msra.gmra.mxu1 %vm710_vm4, %v14566_v40 }
 0x20e   :  { %8902 = vmatmul.msk.bf16.vlgmr.msra.gmra.mxu2 %vm710_vm4, %v14566_v40  ;;  %8903 = vmatmul.msk.bf16.vlgmr.msrb.gmra.mxu0 %vm710_vm4, %v14566_v40 }
 0x20f   :  { %887 = vmatpush.bf16.msrb.mxu3 %v738_v63  ;;  %926 = vmatpush.bf16.msra.mxu1 %v744_v12  ;;  %v9585_v63 = vld [vmem:[%s21196_s7 + $0x540] sm:$0xf] }
 0x210   :  { %952 = vmatpush.bf16.msra.mxu2 %v748_v55  ;;  %7152 = vmatpush.bf16.msrb.mxu0 %v9138_v21  ;;  %v13179_v12 = vld [vmem:[%s21196_s7 + $0x55c] sm:$0xf0] }
 0x211   :  { %v9201_v55 = vld [vmem:[%s21196_s7 + $0x240] sm:$0xf] }
 0x212   :  { %v9202_v27 = vor.u32 %v13083_v6, %v9201_v55  ;;  %v9553_v21 = vld [vmem:[%s21196_s7 + $0x500] sm:$0xf] }
 0x213   :  { %v9554_v47 = vor.u32 %v13171_v46, %v9553_v21  ;;  %v10833_v55 = vld [vmem:[%s21196_s7 + $0xf00] sm:$0xf] }
 0x214   :  { %7153 = vmatpush.bf16.msrb.mxu0 %v9106_v2  ;;  %v13011_v2 = vld [vmem:[%s21196_s7 + $0x1c] sm:$0xf0] }
 0x215   :  { %v8914_v58 = vor.u32 %v13011_v2, %v8913_v5  ;;  %v10257_v46 = vld [vmem:[%s21196_s7 + $0xa80] sm:$0xf] }
 0x216   :  { %v10801_v2 = vld [vmem:[%s21196_s7 + $0xec0] sm:$0xf] }
 0x218   :  { %7154 = vmatpush.bf16.msrb.mxu0 %v9074_v44  ;;  %v13163_v44 = vld [vmem:[%s21196_s7 + $0x4dc] sm:$0xf0] }
 0x219   :  { %v9522_v38 = vor.u32 %v13163_v44, %v9521_v60  ;;  %v13443_v44 = vld [vmem:[%s21196_s7 + $0xd9c] sm:$0xf0] }
 0x21c   :  { %7155 = vmatpush.bf16.msrb.mxu0 %v9042_v3 }
 0x21d   :  { %8901 = vmatmul.msk.bf16.vlgmr.msra.gmra.mxu3 %vm710_vm4, %v14566_v40  ;;  %8904 = vmatmul.msk.bf16.vlgmr.msrb.gmra.mxu1 %vm710_vm4, %v14566_v40 }
 0x21e   :  { %8906 = vmatmul.msk.bf16.vlgmr.msrb.gmra.mxu2 %vm710_vm4, %v14566_v40  ;;  %8907 = vmatmul.msk.bf16.vlgmr.msra.gmra.mxu0 %vm710_vm4, %v14566_v40 }
 0x21f   :  { %939 = vmatpush.bf16.msra.mxu3 %v746_v50  ;;  %7165 = vmatpush.bf16.msrb.mxu1 %v9394_v33  ;;  %v8978_v50 = vor.u32 %v13027_v53, %v8977_v48  ;;  %v9586_v33 = vor.u32 %v13179_v12, %v9585_v63  ;;  %v13147_v48 = vld [vmem:[%s21196_s7 + $0x45c] sm:$0xf0] }
 0x220   :  { %7191 = vmatpush.bf16.msrb.mxu2 %v9906_v15  ;;  %7156 = vmatpush.bf16.msrb.mxu0 %v9010_v37  ;;  %v10417_v15 = vld [vmem:[%s21196_s7 + $0xbc0] sm:$0xf] }
 0x221   :  { %v13499_v37 = vld [vmem:[%s21196_s7 + $0xf5c] sm:$0xf0] }
 0x222   :  { %v10321_v53 = vld [vmem:[%s21196_s7 + $0xb00] sm:$0xf] }
 0x223   :  { %7166 = vmatpush.bf16.msrb.mxu1 %v9362_v49  ;;  %v13075_v49 = vld [vmem:[%s21196_s7 + $0x21c] sm:$0xf0] }
 0x224   :  { %7192 = vmatpush.bf16.msrb.mxu2 %v9874_v36  ;;  %7157 = vmatpush.bf16.msrb.mxu0 %v8978_v50  ;;  %v13203_v36 = vld [vmem:[%s21196_s7 + $0x61c] sm:$0xf0]  ;;  %v9170_v10 = vor.u32 %v13075_v49, %v9169_v41 }
 0x225   :  { %v9682_v61 = vor.u32 %v13203_v36, %v9681_v23  ;;  %v10065_v63 = vld [vmem:[%s21196_s7 + $0x900] sm:$0xf] }
 0x226   :  { %v13299_v12 = vld [vmem:[%s21196_s7 + $0x91c] sm:$0xf0] }
 0x227   :  { %7167 = vmatpush.bf16.msrb.mxu1 %v9330_v35  ;;  %v10418_v35 = vor.u32 %v13387_v30, %v10417_v15  ;;  %v13491_v50 = vld [vmem:[%s21196_s7 + $0xf1c] sm:$0xf0]  ;;  %v10066_v51 = vor.u32 %v13299_v12, %v10065_v63 }
 0x228   :  { %7193 = vmatpush.bf16.msrb.mxu2 %v9842_v26  ;;  %7158 = vmatpush.bf16.msrb.mxu0 %v8946_v39  ;;  %v10385_v26 = vld [vmem:[%s21196_s7 + $0xb80] sm:$0xf] }
 0x229   :  { %v10386_v3 = vor.u32 %v13379_v56, %v10385_v26  ;;  %v13347_v41 = vld [vmem:[%s21196_s7 + $0xa9c] sm:$0xf0] }
 0x22a   :  { %v10258_v49 = vor.u32 %v13347_v41, %v10257_v46  ;;  %v10033_v15 = vld [vmem:[%s21196_s7 + $0x8c0] sm:$0xf] }
 0x22b   :  { %7168 = vmatpush.bf16.msrb.mxu1 %v9298_v62  ;;  %v10162_v62 = vor.u32 %v13323_v59, %v10161_v24  ;;  %v13291_v30 = vld [vmem:[%s21196_s7 + $0x8dc] sm:$0xf0] }
 0x22c   :  { %7194 = vmatpush.bf16.msrb.mxu2 %v9810_v4  ;;  %v13507_v4 = vld [vmem:[%s21196_s7 + $0xf9c] sm:$0xf0]  ;;  %7159 = vmatpush.bf16.msrb.mxu0 %v8914_v58  ;;  %v10034_v5 = vor.u32 %v13291_v30, %v10033_v15  ;;  %v10642_v58 = vor.u32 %v13443_v44, %v10641_v32 }
 0x22d   :  { %8905 = vmatmul.msk.bf16.vlgmr.msrb.gmra.mxu3 %vm710_vm4, %v14566_v40  ;;  %8908 = vmatmul.msk.bf16.vlgmr.msra.gmra.mxu1 %vm710_vm4, %v14566_v40  ;;  %v10673_v39 = vld [vmem:[%s21196_s7 + $0xdc0] sm:$0xf] }
 0x22e   :  { %8910 = vmatmul.msk.bf16.vlgmr.msra.gmra.mxu2 %vm710_vm4, %v14566_v40  ;;  %7178 = vmatpush.bf16.msrb.mxu3 %v9650_v11  ;;  %v10353_v11 = vld [vmem:[%s21196_s7 + $0xb40] sm:$0xf] }
 0x22f   :  { %7169 = vmatpush.bf16.msrb.mxu1 %v9266_v19  ;;  %v10898_v19 = vor.u32 %v13507_v4, %v10897_v1  ;;  %v13339_v24 = vld [vmem:[%s21196_s7 + $0xa5c] sm:$0xf0]  ;;  %v9970_v1 = vor.u32 %v13275_v18, %v9969_v0 }
 0x230   :  { %7195 = vmatpush.bf16.msrb.mxu2 %v9778_v43  ;;  %7204 = vmatpush.bf16.msra.mxu0 %v10162_v62  ;;  %v9457_v43 = vld [vmem:[%s21196_s7 + $0x440] sm:$0xf] }
 0x231   :  { %v9458_v17 = vor.u32 %v13147_v48, %v9457_v43  ;;  %v10769_v26 = vld [vmem:[%s21196_s7 + $0xe80] sm:$0xf] }
 0x232   :  { %7179 = vmatpush.bf16.msrb.mxu3 %v9618_v13  ;;  %v13363_v13 = vld [vmem:[%s21196_s7 + $0xb1c] sm:$0xf0] }
 0x233   :  { %7170 = vmatpush.bf16.msrb.mxu1 %v9234_v14  ;;  %v10866_v14 = vor.u32 %v13499_v37, %v10865_v31  ;;  %v10322_v6 = vor.u32 %v13363_v13, %v10321_v53  ;;  %v13475_v56 = vld [vmem:[%s21196_s7 + $0xe9c] sm:$0xf0] }
 0x234   :  { %7196 = vmatpush.bf16.msrb.mxu2 %v9746_v45  ;;  %7205 = vmatpush.bf16.msra.mxu0 %v10130_v16  ;;  %v9425_v45 = vld [vmem:[%s21196_s7 + $0x400] sm:$0xf] }
 0x235   :  { %v9426_v42 = vor.u32 %v13139_v57, %v9425_v45  ;;  %v10193_v62 = vld [vmem:[%s21196_s7 + $0xa00] sm:$0xf] }
 0x236   :  { %7180 = vmatpush.bf16.msrb.mxu3 %v9586_v33  ;;  %v13355_v33 = vld [vmem:[%s21196_s7 + $0xadc] sm:$0xf0] }
 0x237   :  { %7171 = vmatpush.bf16.msrb.mxu1 %v9202_v27  ;;  %v10834_v27 = vor.u32 %v13491_v50, %v10833_v55  ;;  %v10290_v21 = vor.u32 %v13355_v33, %v10289_v52  ;;  %v13435_v4 = vld [vmem:[%s21196_s7 + $0xd5c] sm:$0xf0] }
 0x238   :  { %7197 = vmatpush.bf16.msrb.mxu2 %v9714_v20  ;;  %7206 = vmatpush.bf16.msra.mxu0 %v10098_v9  ;;  %v13451_v20 = vld [vmem:[%s21196_s7 + $0xddc] sm:$0xf0] }
 0x239   :  { %v10674_v23 = vor.u32 %v13451_v20, %v10673_v39  ;;  %v9937_v16 = vld [vmem:[%s21196_s7 + $0x800] sm:$0xf] }
 0x23a   :  { %7181 = vmatpush.bf16.msrb.mxu3 %v9554_v47  ;;  %v13483_v47 = vld [vmem:[%s21196_s7 + $0xedc] sm:$0xf0] }
 0x23b   :  { %7172 = vmatpush.bf16.msrb.mxu1 %v9170_v10  ;;  %v10802_v36 = vor.u32 %v13483_v47, %v10801_v2  ;;  %v10225_v10 = vld [vmem:[%s21196_s7 + $0xa40] sm:$0xf] }
 0x23c   :  { %7198 = vmatpush.bf16.msrb.mxu2 %v9682_v61  ;;  %7207 = vmatpush.bf16.msra.mxu0 %v10066_v51  ;;  %v10226_v59 = vor.u32 %v13339_v24, %v10225_v10  ;;  %v10770_v61 = vor.u32 %v13475_v56, %v10769_v26  ;;  %v10705_v31 = vld [vmem:[%s21196_s7 + $0xe00] sm:$0xf] }
 0x23d   :  { %8909 = vmatmul.msk.bf16.vlgmr.msra.gmra.mxu3 %vm710_vm4, %v14566_v40  ;;  %v13371_v40 = vld [vmem:[%s21196_s7 + $0xb5c] sm:$0xf0] }
 0x23e   :  { %7182 = vmatpush.bf16.msrb.mxu3 %v9522_v38  ;;  %v10354_v34 = vor.u32 %v13371_v40, %v10353_v11  ;;  %v13467_v11 = vld [vmem:[%s21196_s7 + $0xe5c] sm:$0xf0] }
 0x23f   :  { %7217 = vmatpush.bf16.msra.mxu1 %v10418_v35  ;;  %v13283_v35 = vld [vmem:[%s21196_s7 + $0x89c] sm:$0xf0]  ;;  %v10738_v40 = vor.u32 %v13467_v11, %v10737_v7 }
 0x240   :  { %7243 = vmatpush.bf16.msra.mxu2 %v10930_v29  ;;  %7208 = vmatpush.bf16.msra.mxu0 %v10034_v5  ;;  %v10002_v60 = vor.u32 %v13283_v35, %v10001_v54  ;;  %v13331_v29 = vld [vmem:[%s21196_s7 + $0xa1c] sm:$0xf0] }
 0x241   :  { %v10194_v38 = vor.u32 %v13331_v29, %v10193_v62  ;;  %v10545_v48 = vld [vmem:[%s21196_s7 + $0xcc0] sm:$0xf] }
 0x242   :  { %7183 = vmatpush.bf16.msrb.mxu3 %v9490_v22  ;;  %v10577_v22 = vld [vmem:[%s21196_s7 + $0xd00] sm:$0xf] }
 0x243   :  { %7218 = vmatpush.bf16.msra.mxu1 %v10386_v3  ;;  %v10609_v3 = vld [vmem:[%s21196_s7 + $0xd40] sm:$0xf]  ;;  %v10578_v37 = vor.u32 %v13427_v28, %v10577_v22 }
 0x244   :  { %7244 = vmatpush.bf16.msra.mxu2 %v10898_v19  ;;  %7209 = vmatpush.bf16.msra.mxu0 %v10002_v60  ;;  %v10610_v8 = vor.u32 %v13435_v4, %v10609_v3  ;;  %v13267_v19 = vld [vmem:[%s21196_s7 + $0x81c] sm:$0xf0] }
 0x245   :  { %v9938_v25 = vor.u32 %v13267_v19, %v9937_v16  ;;  %v13419_v53 = vld [vmem:[%s21196_s7 + $0xcdc] sm:$0xf0] }
 0x246   :  { %7184 = vmatpush.bf16.msrb.mxu3 %v9458_v17  ;;  %v10546_v13 = vor.u32 %v13419_v53, %v10545_v48  ;;  %v10513_v9 = vld [vmem:[%s21196_s7 + $0xc80] sm:$0xf] }
 0x247   :  { %7219 = vmatpush.bf16.msra.mxu1 %v10354_v34  ;;  %v13459_v34 = vld [vmem:[%s21196_s7 + $0xe1c] sm:$0xf0] }
 0x248   :  { %7245 = vmatpush.bf16.msra.mxu2 %v10866_v14  ;;  %7210 = vmatpush.bf16.msra.mxu0 %v9970_v1  ;;  %v10706_v43 = vor.u32 %v13459_v34, %v10705_v31  ;;  %v13411_v14 = vld [vmem:[%s21196_s7 + $0xc9c] sm:$0xf0] }
 0x249   :  { %v10514_v17 = vor.u32 %v13411_v14, %v10513_v9  ;;  %v10481_v63 = vld [vmem:[%s21196_s7 + $0xc40] sm:$0xf] }
 0x24a   :  { %7185 = vmatpush.bf16.msrb.mxu3 %v9426_v42  ;;  %v13403_v12 = vld [vmem:[%s21196_s7 + $0xc5c] sm:$0xf0] }
 0x24b   :  { %7220 = vmatpush.bf16.msra.mxu1 %v10322_v6  ;;  %v10482_v55 = vor.u32 %v13403_v12, %v10481_v63  ;;  %v14989_v6 = vld [vmem:[%s21197_s6] sm:$0xff] }
 0x24c   :  { %7246 = vmatpush.bf16.msra.mxu2 %v10834_v27  ;;  %7211 = vmatpush.bf16.msra.mxu0 %v9938_v25  ;;  %v10449_v50 = vld [vmem:[%s21196_s7 + $0xc00] sm:$0xf]  ;;  %v654_v52 = vperm.slane %v14989_v6, 1  ;;  %v653_v41 = vperm.slane %v14989_v6, 0  ;;  %v658_v4 = vperm.slane %v14989_v6, 5  ;;  %v657_v16 = vperm.slane %v14989_v6, 4 }
 0x24d   :  { %v13395_v45 = vld [vmem:[%s21196_s7 + $0xc1c] sm:$0xf0] }
 0x24e   :  { %7230 = vmatpush.bf16.msra.mxu3 %v10674_v23  ;;  %v10450_v57 = vor.u32 %v13395_v45, %v10449_v50  ;;  %v11441_v42 = vld [vmem:[%s21196_s7 + $0x13c0] sm:$0xf] }
 0x24f   :  { %7221 = vmatpush.bf16.msra.mxu1 %v10290_v21  ;;  %v13643_v21 = vld [vmem:[%s21196_s7 + $0x13dc] sm:$0xf0] }
 0x250   :  { %7247 = vmatpush.bf16.msra.mxu2 %v10802_v36  ;;  %v11442_v15 = vor.u32 %v13643_v21, %v11441_v42  ;;  %v11409_v39 = vld [vmem:[%s21196_s7 + $0x1380] sm:$0xf] }
 0x251   :  { %v13635_v5 = vld [vmem:[%s21196_s7 + $0x139c] sm:$0xf0] }
 0x252   :  { %7231 = vmatpush.bf16.msra.mxu3 %v10642_v58  ;;  %v11185_v23 = vld [vmem:[%s21196_s7 + $0x11c0] sm:$0xf] }
 0x253   :  { %7222 = vmatpush.bf16.msra.mxu1 %v10258_v49  ;;  %v656_v49 = vperm.slane %v14989_v6, 3  ;;  %v13579_v36 = vld [vmem:[%s21196_s7 + $0x11dc] sm:$0xf0] }
 0x254   :  { %7248 = vmatpush.bf16.msra.mxu2 %v10770_v61  ;;  %v11953_v54 = vld [vmem:[%s21196_s7 + $0x17c0] sm:$0xf]  ;;  %v11186_v58 = vor.u32 %v13579_v36, %v11185_v23 }
 0x255   :  { %v13771_v35 = vld [vmem:[%s21196_s7 + $0x17dc] sm:$0xf0] }
 0x256   :  { %7232 = vmatpush.bf16.msra.mxu3 %v10610_v8  ;;  %v11377_v44 = vld [vmem:[%s21196_s7 + $0x1340] sm:$0xf]  ;;  %v11954_v62 = vor.u32 %v13771_v35, %v11953_v54 }
 0x257   :  { %7223 = vmatpush.bf16.msra.mxu1 %v10226_v59  ;;  %v11410_v59 = vor.u32 %v13635_v5, %v11409_v39  ;;  %v13627_v26 = vld [vmem:[%s21196_s7 + $0x135c] sm:$0xf0] }
 0x258   :  { %7249 = vmatpush.bf16.msra.mxu2 %v10738_v40  ;;  %v11153_v29 = vld [vmem:[%s21196_s7 + $0x1180] sm:$0xf]  ;;  %v11378_v18 = vor.u32 %v13627_v26, %v11377_v44  ;;  %v15129_v26 = vld [vmem:[%s21197_s6 + $0x8] sm:$0xff] }
 0x259   :  { %v11921_v1 = vld [vmem:[%s21196_s7 + $0x1780] sm:$0xf] }
 0x25a   :  { %7233 = vmatpush.bf16.msra.mxu3 %v10578_v37  ;;  %v13763_v3 = vld [vmem:[%s21196_s7 + $0x179c] sm:$0xf0] }
 0x25b   :  { %7224 = vmatpush.bf16.msra.mxu1 %v10194_v38  ;;  %v13571_v38 = vld [vmem:[%s21196_s7 + $0x119c] sm:$0xf0]  ;;  %v11922_v22 = vor.u32 %v13763_v3, %v11921_v1 }
 0x25c   :  { %7250 = vmatpush.bf16.msra.mxu2 %v10706_v43  ;;  %v11345_v7 = vld [vmem:[%s21196_s7 + $0x1300] sm:$0xf]  ;;  %v11154_v40 = vor.u32 %v13571_v38, %v11153_v29 }
 0x25d   :  { %v13619_v8 = vld [vmem:[%s21196_s7 + $0x131c] sm:$0xf0] }
 0x25e   :  { %7234 = vmatpush.bf16.msra.mxu3 %v10546_v13  ;;  %v11121_v25 = vld [vmem:[%s21196_s7 + $0x1140] sm:$0xf]  ;;  %v11346_v34 = vor.u32 %v13619_v8, %v11345_v7 }
 0x25f   :  { %v13563_v28 = vld [vmem:[%s21196_s7 + $0x115c] sm:$0xf0] }
 0x260   :  { %v11889_v37 = vld [vmem:[%s21196_s7 + $0x1740] sm:$0xf]  ;;  %v11122_v14 = vor.u32 %v13563_v28, %v11121_v25  ;;  %v661_v28 = vperm.slane %v15129_v26, 0 }
 0x261   :  { %v13755_v43 = vld [vmem:[%s21196_s7 + $0x175c] sm:$0xf0] }
 0x262   :  { %7235 = vmatpush.bf16.msra.mxu3 %v10514_v17  ;;  %v11313_v13 = vld [vmem:[%s21196_s7 + $0x12c0] sm:$0xf]  ;;  %v11890_v12 = vor.u32 %v13755_v43, %v11889_v37 }
 0x263   :  { %v13611_v9 = vld [vmem:[%s21196_s7 + $0x12dc] sm:$0xf0] }
 0x264   :  { %v11089_v50 = vld [vmem:[%s21196_s7 + $0x1100] sm:$0xf] }
 0x265   :  { %v13555_v45 = vld [vmem:[%s21196_s7 + $0x111c] sm:$0xf0] }
 0x266   :  { %7236 = vmatpush.bf16.msra.mxu3 %v10482_v55  ;;  %v655_v55 = vperm.slane %v14989_v6, 2  ;;  %v11281_v42 = vld [vmem:[%s21196_s7 + $0x1280] sm:$0xf] }
 0x267   :  { %v13603_v21 = vld [vmem:[%s21196_s7 + $0x129c] sm:$0xf0] }
 0x268   :  { %v13739_v54 = vld [vmem:[%s21196_s7 + $0x16dc] sm:$0xf0] }
 0x269   :  { %v13595_v44 = vld [vmem:[%s21196_s7 + $0x125c] sm:$0xf0] }
 0x26a   :  { %7237 = vmatpush.bf16.msra.mxu3 %v10450_v57  ;;  %v660_v57 = vperm.slane %v14989_v6, 7  ;;  %v11025_v1 = vld [vmem:[%s21196_s7 + $0x1080] sm:$0xf] }
 0x26b   :  { %v13539_v3 = vld [vmem:[%s21196_s7 + $0x109c] sm:$0xf0] }
 0x26c   :  { %v13587_v25 = vld [vmem:[%s21196_s7 + $0x121c] sm:$0xf0] }
 0x26d   :  { %v12465_v37 = vld [vmem:[%s21196_s7 + $0x1bc0] sm:$0xf] }
 0x26e   :  { %v13899_v43 = vld [vmem:[%s21196_s7 + $0x1bdc] sm:$0xf0] }
 0x27a   :  { %v772_v33 = vpop.f32.mrf.mxu1 }
 0x27b   :  { %v773_v51 = vadd.f32 %v772_v33, %v654_v52  ;;  %v811_v27 = vpop.f32.mrf.mxu0  ;;  %v11314_v52 = vor.u32 %v13611_v9, %v11313_v13  ;;  %v11857_v33 = vld [vmem:[%s21196_s7 + $0x1700] sm:$0xf] }
 0x27c   :  { %v812_v17 = vadd.f32 %v811_v27, %v657_v16  ;;  %v13731_v16 = vld [vmem:[%s21196_s7 + $0x169c] sm:$0xf0] }
 0x27d   :  { %v959_v46 = vmax.f32 %v773_v51, 0.0  ;;  %v13747_v51 = vld [vmem:[%s21196_s7 + $0x171c] sm:$0xf0] }
 0x27f   :  { %v15006_v30 = vpack.c.bf16 %v959_v46, %v959_v46 }
 0x280   :  { %v759_v20 = vpop.f32.mrf.mxu3 }
 0x281   :  { %v760_v2 = vadd.f32 %v759_v20, %v653_v41  ;;  %v798_v47 = vpop.f32.mrf.mxu2  ;;  %7173 = vmatmul.bf16.vlgmr.msrb.gmra.mxu1 %v15006_v30  ;;  %v11090_v41 = vor.u32 %v13555_v45, %v11089_v50  ;;  %v11858_v20 = vor.u32 %v13747_v51, %v11857_v33  ;;  %v13691_v50 = vld [vmem:[%s21196_s7 + $0x155c] sm:$0xf0]  ;;  %v12466_v51 = vor.u32 %v13899_v43, %v12465_v37 }
 0x282   :  { %v799_v10 = vadd.f32 %v798_v47, %v656_v49  ;;  %7269 = vmatpush.bf16.msrb.mxu1 %v11442_v15  ;;  %v774_v24 = vpop.f32.mrf.mxu1  ;;  %v11057_v49 = vld [vmem:[%s21196_s7 + $0x10c0] sm:$0xf]  ;;  %v962_v15 = vmax.f32 %v812_v17, 0.0 }
 0x283   :  { %v958_v32 = vmax.f32 %v760_v2, 0.0  ;;  %v813_v60 = vpop.f32.mrf.mxu0  ;;  %v13547_v2 = vld [vmem:[%s21196_s7 + $0x10dc] sm:$0xf0] }
 0x284   :  { %v961_v56 = vmax.f32 %v799_v10, 0.0  ;;  %v11697_v47 = vld [vmem:[%s21196_s7 + $0x15c0] sm:$0xf]  ;;  %v11282_v10 = vor.u32 %v13603_v21, %v11281_v42  ;;  %v659_v42 = vperm.slane %v14989_v6, 6 }
 0x285   :  { %v15033_v61 = vpack.c.bf16 %v958_v32, %v958_v32  ;;  %v13707_v24 = vld [vmem:[%s21196_s7 + $0x15dc] sm:$0xf0] }
 0x286   :  { %v15041_v0 = vpack.c.bf16 %v961_v56, %v961_v56  ;;  %7270 = vmatpush.bf16.msrb.mxu1 %v11410_v59  ;;  %v11825_v59 = vld [vmem:[%s21196_s7 + $0x16c0] sm:$0xf]  ;;  %v11698_v38 = vor.u32 %v13707_v24, %v11697_v47 }
 0x287   :  { %7160 = vmatmul.bf16.vlgmr.msrb.gmra.mxu0 %v15033_v61  ;;  %v11249_v60 = vld [vmem:[%s21196_s7 + $0x1240] sm:$0xf] }
 0x288   :  { %7199 = vmatmul.bf16.vlgmr.msrb.gmra.mxu2 %v15041_v0  ;;  %7256 = vmatpush.bf16.msrb.mxu0 %v11186_v58  ;;  %v761_v11 = vpop.f32.mrf.mxu3  ;;  %v11058_v58 = vor.u32 %v13547_v2, %v11057_v49  ;;  %v11250_v8 = vor.u32 %v13595_v44, %v11249_v60  ;;  %v13531_v17 = vld [vmem:[%s21196_s7 + $0x105c] sm:$0xf0] }
 0x289   :  { %7295 = vmatpush.bf16.msrb.mxu2 %v11954_v62  ;;  %v800_v19 = vpop.f32.mrf.mxu2  ;;  %v15131_v62 = vpack.c.bf16 %v962_v15, %v962_v15  ;;  %v13699_v11 = vld [vmem:[%s21196_s7 + $0x159c] sm:$0xf0] }
 0x28a   :  { %7271 = vmatpush.bf16.msrb.mxu1 %v11378_v18  ;;  %v824_v31 = vpop.f32.mrf.mxu1  ;;  %v11826_v18 = vor.u32 %v13739_v54, %v11825_v59  ;;  %v662_v19 = vperm.slane %v15129_v26, 1  ;;  %v11761_v45 = vld [vmem:[%s21196_s7 + $0x1640] sm:$0xf] }
 0x28b   :  { %v825_v48 = vadd.f32 %v824_v31, %v658_v4  ;;  %v15071_v53 = vpop.f32.mrf.mxu0  ;;  %v11665_v4 = vld [vmem:[%s21196_s7 + $0x1580] sm:$0xf] }
 0x28c   :  { %7257 = vmatpush.bf16.msrb.mxu0 %v11154_v40  ;;  %v11793_v40 = vld [vmem:[%s21196_s7 + $0x1680] sm:$0xf]  ;;  %v11666_v13 = vor.u32 %v13699_v11, %v11665_v4 }
 0x28d   :  { %v963_v63 = vmax.f32 %v825_v48, 0.0  ;;  %7296 = vmatpush.bf16.msrb.mxu2 %v11922_v22  ;;  %v11217_v22 = vld [vmem:[%s21196_s7 + $0x1200] sm:$0xf]  ;;  %v11794_v9 = vor.u32 %v13731_v16, %v11793_v40 }
 0x28e   :  { %7272 = vmatpush.bf16.msrb.mxu1 %v11346_v34  ;;  %v11026_v34 = vor.u32 %v13539_v3, %v11025_v1  ;;  %v12433_v21 = vld [vmem:[%s21196_s7 + $0x1b80] sm:$0xf] }
 0x28f   :  { %v15093_v27 = vpack.c.bf16 %v963_v63, %v963_v63  ;;  %v11633_v63 = vld [vmem:[%s21196_s7 + $0x1540] sm:$0xf] }
 0x290   :  { %7258 = vmatpush.bf16.msrb.mxu0 %v11122_v14  ;;  %v785_v46 = vpop.f32.mrf.mxu3  ;;  %v10993_v14 = vld [vmem:[%s21196_s7 + $0x1040] sm:$0xf]  ;;  %v11634_v6 = vor.u32 %v13691_v50, %v11633_v63 }
 0x291   :  { %7297 = vmatpush.bf16.msrb.mxu2 %v11890_v12  ;;  %v786_v39 = vadd.f32 %v785_v46, %v655_v55  ;;  %v850_v5 = vpop.f32.mrf.mxu2  ;;  %7225 = vmatmul.bf16.vlgmr.msra.gmra.mxu1 %v15093_v27  ;;  %v11218_v55 = vor.u32 %v13587_v25, %v11217_v22  ;;  %v10994_v46 = vor.u32 %v13531_v17, %v10993_v14  ;;  %v10961_v49 = vld [vmem:[%s21196_s7 + $0x1000] sm:$0xf] }
 0x292   :  { %v851_v23 = vadd.f32 %v850_v5, %v660_v57  ;;  %7273 = vmatpush.bf16.msrb.mxu1 %v11314_v52  ;;  %v826_v36 = vpop.f32.mrf.mxu1  ;;  %v13723_v57 = vld [vmem:[%s21196_s7 + $0x165c] sm:$0xf0] }
 0x293   :  { %v960_v35 = vmax.f32 %v786_v39, 0.0  ;;  %v865_v32 = vpop.f32.mrf.mxu0  ;;  %v13523_v15 = vld [vmem:[%s21196_s7 + $0x101c] sm:$0xf0]  ;;  %v11762_v5 = vor.u32 %v13723_v57, %v11761_v45 }
 0x294   :  { %v965_v56 = vmax.f32 %v851_v23, 0.0  ;;  %7259 = vmatpush.bf16.msrb.mxu0 %v11090_v41  ;;  %v13891_v41 = vld [vmem:[%s21196_s7 + $0x1b9c] sm:$0xf0]  ;;  %v864_v23 = vadd.f32 %v15071_v53, %v661_v28  ;;  %v10962_v44 = vor.u32 %v13523_v15, %v10961_v49 }
 0x295   :  { %v15133_v29 = vpack.c.bf16 %v960_v35, %v960_v35  ;;  %7298 = vmatpush.bf16.msrb.mxu2 %v11858_v20  ;;  %v664_v20 = vperm.slane %v15129_v26, 3  ;;  %v11601_v2 = vld [vmem:[%s21196_s7 + $0x1500] sm:$0xf]  ;;  %v12434_v54 = vor.u32 %v13891_v41, %v12433_v21 }
 0x296   :  { %v15144_v7 = vpack.c.bf16 %v965_v56, %v965_v56  ;;  %7274 = vmatpush.bf16.msrb.mxu1 %v11282_v10  ;;  %v13683_v47 = vld [vmem:[%s21196_s7 + $0x151c] sm:$0xf0]  ;;  %v966_v11 = vmax.f32 %v864_v23, 0.0 }
 0x297   :  { %7186 = vmatmul.bf16.vlgmr.msrb.gmra.mxu3 %v15133_v29  ;;  %7212 = vmatmul.bf16.vlgmr.msra.gmra.mxu0 %v15131_v62  ;;  %v11729_v36 = vld [vmem:[%s21196_s7 + $0x1600] sm:$0xf]  ;;  %v11602_v1 = vor.u32 %v13683_v47, %v11601_v2 }
 0x298   :  { %7251 = vmatmul.bf16.vlgmr.msra.gmra.mxu2 %v15144_v7  ;;  %7260 = vmatpush.bf16.msrb.mxu0 %v11058_v58  ;;  %v787_v31 = vpop.f32.mrf.mxu3  ;;  %v13715_v10 = vld [vmem:[%s21196_s7 + $0x161c] sm:$0xf0] }
 0x299   :  { %7282 = vmatpush.bf16.msrb.mxu3 %v11698_v38  ;;  %7299 = vmatpush.bf16.msrb.mxu2 %v11826_v18  ;;  %v852_v48 = vpop.f32.mrf.mxu2  ;;  %v12209_v24 = vld [vmem:[%s21196_s7 + $0x19c0] sm:$0xf]  ;;  %v11730_v3 = vor.u32 %v13715_v10, %v11729_v36 }
 0x29a   :  { %7275 = vmatpush.bf16.msrb.mxu1 %v11250_v8  ;;  %v876_v12 = vpop.f32.mrf.mxu1  ;;  %v13835_v53 = vld [vmem:[%s21196_s7 + $0x19dc] sm:$0xf0] }
 0x29b   :  { %v877_v52 = vadd.f32 %v876_v12, %v662_v19  ;;  %v15190_v33 = vpop.f32.mrf.mxu0  ;;  %v12977_v35 = vld [vmem:[%s21196_s7 + $0x1fc0] sm:$0xf]  ;;  %v12210_v19 = vor.u32 %v13835_v53, %v12209_v24 }
 0x29c   :  { %7261 = vmatpush.bf16.msrb.mxu0 %v11026_v34  ;;  %v14027_v32 = vld [vmem:[%s21196_s7 + $0x1fdc] sm:$0xf0] }
 0x29d   :  { %v967_v39 = vmax.f32 %v877_v52, 0.0  ;;  %7283 = vmatpush.bf16.msrb.mxu3 %v11666_v13  ;;  %7300 = vmatpush.bf16.msrb.mxu2 %v11794_v9  ;;  %v12401_v56 = vld [vmem:[%s21196_s7 + $0x1b40] sm:$0xf]  ;;  %v12978_v22 = vor.u32 %v14027_v32, %v12977_v35 }
 0x29e   :  { %7276 = vmatpush.bf16.msrb.mxu1 %v11218_v55  ;;  %v13883_v58 = vld [vmem:[%s21196_s7 + $0x1b5c] sm:$0xf0]  ;;  %v15266_v55 = vpack.c.bf16 %v966_v11, %v966_v11 }
 0x29f   :  { %v15222_v59 = vpack.c.bf16 %v967_v39, %v967_v39  ;;  %v11569_v4 = vld [vmem:[%s21196_s7 + $0x14c0] sm:$0xf]  ;;  %v12402_v37 = vor.u32 %v13883_v58, %v12401_v56  ;;  %v663_v56 = vperm.slane %v15129_v26, 2 }
 0x2a0   :  { %7262 = vmatpush.bf16.msrb.mxu0 %v10994_v46  ;;  %v837_v60 = vpop.f32.mrf.mxu3  ;;  %v13675_v8 = vld [vmem:[%s21196_s7 + $0x14dc] sm:$0xf0] }
 0x2a1   :  { %7284 = vmatpush.bf16.msrb.mxu3 %v11634_v6  ;;  %7301 = vmatpush.bf16.msrb.mxu2 %v11762_v5  ;;  %v838_v38 = vadd.f32 %v837_v60, %v659_v42  ;;  %v902_v18 = vpop.f32.mrf.mxu2  ;;  %v12177_v25 = vld [vmem:[%s21196_s7 + $0x1980] sm:$0xf]  ;;  %v11570_v63 = vor.u32 %v13675_v8, %v11569_v4 }
 0x2a2   :  { %7321 = vmatpush.bf16.msra.mxu1 %v12466_v51  ;;  %v903_v40 = vadd.f32 %v902_v18, %v664_v20  ;;  %v878_v16 = vpop.f32.mrf.mxu1  ;;  %v13827_v28 = vld [vmem:[%s21196_s7 + $0x199c] sm:$0xf0] }
 0x2a3   :  { %7277 = vmatmul.bf16.vlgmr.msrb.gmra.mxu1 %v15222_v59  ;;  %v964_v31 = vmax.f32 %v838_v38, 0.0  ;;  %v917_v34 = vpop.f32.mrf.mxu0  ;;  %v12945_v43 = vld [vmem:[%s21196_s7 + $0x1f80] sm:$0xf]  ;;  %v12178_v12 = vor.u32 %v13827_v28, %v12177_v25 }
 0x2a4   :  { %v14019_v48 = vld [vmem:[%s21196_s7 + $0x1f9c] sm:$0xf0]  ;;  %v969_v13 = vmax.f32 %v903_v40, 0.0  ;;  %7263 = vmatpush.bf16.msrb.mxu0 %v10962_v44 }
 0x2a5   :  { %v12369_v9 = vld [vmem:[%s21196_s7 + $0x1b00] sm:$0xf]  ;;  %v15264_v17 = vpack.c.bf16 %v964_v31, %v964_v31  ;;  %7285 = vmatpush.bf16.msrb.mxu3 %v11602_v1  ;;  %7302 = vmatpush.bf16.msrb.mxu2 %v11730_v3  ;;  %v12946_v45 = vor.u32 %v14019_v48, %v12945_v43  ;;  %v666_v31 = vperm.slane %v15129_v26, 5 }
 0x2a6   :  { %7322 = vmatpush.bf16.msra.mxu1 %v12434_v54  ;;  %v13875_v14 = vld [vmem:[%s21196_s7 + $0x1b1c] sm:$0xf0]  ;;  %v15268_v50 = vpack.c.bf16 %v969_v13, %v969_v13 }
 0x2a7   :  { %v11537_v57 = vld [vmem:[%s21196_s7 + $0x1480] sm:$0xf]  ;;  %7238 = vmatmul.bf16.vlgmr.msra.gmra.mxu3 %v15264_v17  ;;  %v12370_v42 = vor.u32 %v13875_v14, %v12369_v9  ;;  %7264 = vmatmul.bf16.vlgmr.msrb.gmra.mxu0 %v15266_v55 }
 0x2a8   :  { %7308 = vmatpush.bf16.msra.mxu0 %v12210_v19  ;;  %v13667_v52 = vld [vmem:[%s21196_s7 + $0x149c] sm:$0xf0]  ;;  %7303 = vmatmul.bf16.vlgmr.msrb.gmra.mxu2 %v15268_v50  ;;  %v839_v49 = vpop.f32.mrf.mxu3 }
 0x2a9   :  { %7347 = vmatpush.bf16.msra.mxu2 %v12978_v22  ;;  %v12145_v51 = vld [vmem:[%s21196_s7 + $0x1940] sm:$0xf]  ;;  %7286 = vmatpush.bf16.msrb.mxu3 %v11570_v63  ;;  %v904_v6 = vpop.f32.mrf.mxu2  ;;  %v11538_v5 = vor.u32 %v13667_v52, %v11537_v57 }
 0x2aa   :  { %7323 = vmatpush.bf16.msra.mxu1 %v12402_v37  ;;  %v13819_v21 = vld [vmem:[%s21196_s7 + $0x195c] sm:$0xf0]  ;;  %v928_v20 = vpop.f32.mrf.mxu1  ;;  %v9395_v6 = vld [vmem:[%s21196_s7 + $0x3e0] sm:$0xf0] }
 0x2ab   :  { %v12913_v46 = vld [vmem:[%s21196_s7 + $0x1f40] sm:$0xf]  ;;  %v12146_v2 = vor.u32 %v13819_v21, %v12145_v51  ;;  %v929_v49 = vadd.f32 %v928_v20, %v666_v31  ;;  %v13063_v31 = vld [vmem:[%s21196_s7 + $0x1c4] sm:$0xf] }
 0x2ac   :  { %v14011_v41 = vld [vmem:[%s21196_s7 + $0x1f5c] sm:$0xf0]  ;;  %7309 = vmatpush.bf16.msra.mxu0 %v12178_v12 }
 0x2ad   :  { %v12337_v15 = vld [vmem:[%s21196_s7 + $0x1ac0] sm:$0xf]  ;;  %7348 = vmatpush.bf16.msra.mxu2 %v12946_v45  ;;  %v12914_v47 = vor.u32 %v14011_v41, %v12913_v46  ;;  %7287 = vmatpush.bf16.msrb.mxu3 %v11538_v5  ;;  %v665_v5 = vperm.slane %v15129_v26, 4 }
 0x2ae   :  { %v13867_v39 = vld [vmem:[%s21196_s7 + $0x1adc] sm:$0xf0]  ;;  %7324 = vmatpush.bf16.msra.mxu1 %v12370_v42 }
 0x2af   :  { %v11505_v23 = vld [vmem:[%s21196_s7 + $0x1440] sm:$0xf]  ;;  %v12338_v24 = vor.u32 %v13867_v39, %v12337_v15  ;;  %v13127_v39 = vld [vmem:[%s21196_s7 + $0x3c4] sm:$0xf] }
 0x2b0   :  { %v13659_v36 = vld [vmem:[%s21196_s7 + $0x145c] sm:$0xf0]  ;;  %7310 = vmatpush.bf16.msra.mxu0 %v12146_v2  ;;  %v889_v19 = vpop.f32.mrf.mxu3 }
 0x2b1   :  { %v12113_v10 = vld [vmem:[%s21196_s7 + $0x1900] sm:$0xf]  ;;  %v11506_v44 = vor.u32 %v13659_v36, %v11505_v23  ;;  %7349 = vmatpush.bf16.msra.mxu2 %v12914_v47  ;;  %v890_v34 = vadd.f32 %v889_v19, %v663_v56  ;;  %v954_v37 = vpop.f32.mrf.mxu2  ;;  %v971_v56 = vmax.f32 %v929_v49, 0.0 }
 0x2b2   :  { %v13811_v54 = vld [vmem:[%s21196_s7 + $0x191c] sm:$0xf0]  ;;  %7325 = vmatpush.bf16.msra.mxu1 %v12338_v24  ;;  %v930_v48 = vpop.f32.mrf.mxu1 }
 0x2b3   :  { %v12881_v53 = vld [vmem:[%s21196_s7 + $0x1f00] sm:$0xf]  ;;  %v12114_v38 = vor.u32 %v13811_v54, %v12113_v10  ;;  %7288 = vmatpush.bf16.msrb.mxu3 %v11506_v44  ;;  %v968_v45 = vmax.f32 %v890_v34, 0.0  ;;  %v9139_v34 = vld [vmem:[%s21196_s7 + $0x1e0] sm:$0xf0]  ;;  %v15440_v48 = vpack.c.bf16 %v971_v56, %v971_v56 }
 0x2b4   :  { %v14003_v35 = vld [vmem:[%s21196_s7 + $0x1f1c] sm:$0xf0]  ;;  %v9843_v56 = vld [vmem:[%s21196_s7 + $0x760] sm:$0xf0] }
 0x2b5   :  { %v12305_v32 = vld [vmem:[%s21196_s7 + $0x1a80] sm:$0xf]  ;;  %v12882_v18 = vor.u32 %v14003_v35, %v12881_v53  ;;  %7311 = vmatpush.bf16.msra.mxu0 %v12114_v38  ;;  %v15377_v15 = vpack.c.bf16 %v968_v45, %v968_v45  ;;  %v668_v53 = vperm.slane %v15129_v26, 7  ;;  %v13119_v38 = vld [vmem:[%s21196_s7 + $0x384] sm:$0xf] }
 0x2b6   :  { %v13859_v60 = vld [vmem:[%s21196_s7 + $0x1a9c] sm:$0xf0] }
 0x2b7   :  { %v11473_v58 = vld [vmem:[%s21196_s7 + $0x1400] sm:$0xf]  ;;  %v12306_v8 = vor.u32 %v13859_v60, %v12305_v32  ;;  %7350 = vmatpush.bf16.msra.mxu2 %v12882_v18  ;;  %v9398_v32 = vor.u32 %v13127_v39, %v9395_v6  ;;  %v9363_v18 = vld [vmem:[%s21196_s7 + $0x3a0] sm:$0xf0] }
 0x2b8   :  { %v13651_v1 = vld [vmem:[%s21196_s7 + $0x141c] sm:$0xf0]  ;;  %v891_v35 = vpop.f32.mrf.mxu3  ;;  %v9107_v39 = vld [vmem:[%s21196_s7 + $0x1a0] sm:$0xf0] }
 0x2b9   :  { %v12081_v3 = vld [vmem:[%s21196_s7 + $0x18c0] sm:$0xf]  ;;  %v11474_v43 = vor.u32 %v13651_v1, %v11473_v58  ;;  %7326 = vmatpush.bf16.msra.mxu1 %v12306_v8  ;;  %v956_v58 = vpop.f32.mrf.mxu2  ;;  %v916_v1 = vadd.f32 %v15190_v33, %v665_v5  ;;  %v13247_v6 = vld [vmem:[%s21196_s7 + $0x784] sm:$0xf] }
 0x2ba   :  { %v13803_v4 = vld [vmem:[%s21196_s7 + $0x18dc] sm:$0xf0]  ;;  %v9875_v5 = vld [vmem:[%s21196_s7 + $0x7a0] sm:$0xf0] }
 0x2bb   :  { %v12721_v11 = vld [vmem:[%s21196_s7 + $0x1dc0] sm:$0xf]  ;;  %v12082_v13 = vor.u32 %v13803_v4, %v12081_v3  ;;  %7289 = vmatpush.bf16.msrb.mxu3 %v11474_v43  ;;  %v13255_v43 = vld [vmem:[%s21196_s7 + $0x7c4] sm:$0xf] }
 0x2bc   :  { %v13963_v40 = vld [vmem:[%s21196_s7 + $0x1ddc] sm:$0xf0]  ;;  %v13095_v58 = vld [vmem:[%s21196_s7 + $0x2c4] sm:$0xf] }
 0x2bd   :  { %v12849_v16 = vld [vmem:[%s21196_s7 + $0x1ec0] sm:$0xf]  ;;  %v12722_v9 = vor.u32 %v13963_v40, %v12721_v11  ;;  %7312 = vmatpush.bf16.msra.mxu0 %v12082_v13  ;;  %v13111_v13 = vld [vmem:[%s21196_s7 + $0x344] sm:$0xf] }
 0x2be   :  { %v13995_v22 = vld [vmem:[%s21196_s7 + $0x1edc] sm:$0xf0]  ;;  %7290 = vmatmul.bf16.vlgmr.msrb.gmra.mxu3 %v15377_v15 }
 0x2bf   :  { %v12273_v25 = vld [vmem:[%s21196_s7 + $0x1a40] sm:$0xf]  ;;  %v12850_v57 = vor.u32 %v13995_v22, %v12849_v16  ;;  %7334 = vmatpush.bf16.msra.mxu3 %v12722_v9  ;;  %v9331_v9 = vld [vmem:[%s21196_s7 + $0x360] sm:$0xf0] }
 0x2c0   :  { %v13851_v28 = vld [vmem:[%s21196_s7 + $0x1a5c] sm:$0xf0]  ;;  %v9334_v49 = vor.u32 %v13111_v13, %v9331_v9  ;;  %v13031_v9 = vld [vmem:[%s21196_s7 + $0xc4] sm:$0xf] }
 0x2c1   :  { %v12049_v14 = vld [vmem:[%s21196_s7 + $0x1880] sm:$0xf]  ;;  %v12274_v52 = vor.u32 %v13851_v28, %v12273_v25  ;;  %7351 = vmatpush.bf16.msra.mxu2 %v12850_v57  ;;  %v955_v25 = vadd.f32 %v954_v37, %v668_v53  ;;  %v9366_v28 = vor.u32 %v13119_v38, %v9363_v18  ;;  %v9907_v37 = vld [vmem:[%s21196_s7 + $0x7e0] sm:$0xf0]  ;;  %v9142_v57 = vor.u32 %v13063_v31, %v9139_v34 }
 0x2c2   :  { %v13795_v63 = vld [vmem:[%s21196_s7 + $0x189c] sm:$0xf0]  ;;  %v9878_v53 = vor.u32 %v13247_v6, %v9875_v5  ;;  %v9267_v38 = vld [vmem:[%s21196_s7 + $0x2e0] sm:$0xf0] }
 0x2c3   :  { %v12689_v12 = vld [vmem:[%s21196_s7 + $0x1d80] sm:$0xf]  ;;  %v12050_v2 = vor.u32 %v13795_v63, %v12049_v14  ;;  %7327 = vmatpush.bf16.msra.mxu1 %v12274_v52  ;;  %v970_v14 = vmax.f32 %v916_v1, 0.0  ;;  %v667_v1 = vperm.slane %v15129_v26, 6  ;;  %v9043_v26 = vld [vmem:[%s21196_s7 + $0x120] sm:$0xf0] }
 0x2c4   :  { %v13955_v51 = vld [vmem:[%s21196_s7 + $0x1d9c] sm:$0xf0]  ;;  %v13023_v6 = vld [vmem:[%s21196_s7 + $0x84] sm:$0xf] }
 0x2c5   :  { %v12817_v42 = vld [vmem:[%s21196_s7 + $0x1e80] sm:$0xf]  ;;  %v12690_v47 = vor.u32 %v13955_v51, %v12689_v12  ;;  %7313 = vmatpush.bf16.msra.mxu0 %v12050_v2  ;;  %v13103_v2 = vld [vmem:[%s21196_s7 + $0x304] sm:$0xf] }
 0x2c6   :  { %v13987_v21 = vld [vmem:[%s21196_s7 + $0x1e9c] sm:$0xf0]  ;;  %v8979_v5 = vld [vmem:[%s21196_s7 + $0xa0] sm:$0xf0] }
 0x2c7   :  { %v12241_v46 = vld [vmem:[%s21196_s7 + $0x1a00] sm:$0xf]  ;;  %v12818_v23 = vor.u32 %v13987_v21, %v12817_v42  ;;  %7335 = vmatpush.bf16.msra.mxu3 %v12690_v47  ;;  %v13055_v42 = vld [vmem:[%s21196_s7 + $0x184] sm:$0xf]  ;;  %v973_v21 = vmax.f32 %v955_v25, 0.0 }
 0x2c8   :  { %v13843_v41 = vld [vmem:[%s21196_s7 + $0x1a1c] sm:$0xf0]  ;;  %v9299_v47 = vld [vmem:[%s21196_s7 + $0x320] sm:$0xf0] }
 0x2c9   :  { %v12017_v20 = vld [vmem:[%s21196_s7 + $0x1840] sm:$0xf]  ;;  %v12242_v36 = vor.u32 %v13843_v41, %v12241_v46  ;;  %7352 = vmatpush.bf16.msra.mxu2 %v12818_v23  ;;  %v941_v46 = vpop.f32.mrf.mxu3  ;;  %v9910_v41 = vor.u32 %v13255_v43, %v9907_v37  ;;  %v15476_v23 = vpack.c.bf16 %v970_v14, %v970_v14  ;;  %v9302_v35 = vor.u32 %v13103_v2, %v9299_v47  ;;  %v13087_v25 = vld [vmem:[%s21196_s7 + $0x284] sm:$0xf] }
 0x2ca   :  { %v13787_v10 = vld [vmem:[%s21196_s7 + $0x185c] sm:$0xf0]  ;;  %v942_v43 = vadd.f32 %v941_v46, %v667_v1  ;;  %v9011_v14 = vld [vmem:[%s21196_s7 + $0xe0] sm:$0xf0] }
 0x2cb   :  { %v12657_v24 = vld [vmem:[%s21196_s7 + $0x1d40] sm:$0xf]  ;;  %v12018_v3 = vor.u32 %v13787_v10, %v12017_v20  ;;  %7328 = vmatpush.bf16.msra.mxu1 %v12242_v36  ;;  %v9110_v36 = vor.u32 %v13055_v42, %v9107_v39  ;;  %v13079_v42 = vld [vmem:[%s21196_s7 + $0x244] sm:$0xf] }
 0x2cc   :  { %v13947_v54 = vld [vmem:[%s21196_s7 + $0x1d5c] sm:$0xf0] }
 0x2cd   :  { %v12785_v60 = vld [vmem:[%s21196_s7 + $0x1e40] sm:$0xf]  ;;  %v12658_v4 = vor.u32 %v13947_v54, %v12657_v24  ;;  %7314 = vmatpush.bf16.msra.mxu0 %v12018_v3  ;;  %v15484_v54 = vpack.c.bf16 %v973_v21, %v973_v21  ;;  %v9203_v21 = vld [vmem:[%s21196_s7 + $0x260] sm:$0xf0] }
 0x2ce   :  { %v13979_v44 = vld [vmem:[%s21196_s7 + $0x1e5c] sm:$0xf0]  ;;  %7329 = vmatmul.bf16.vlgmr.msra.gmra.mxu1 %v15440_v48  ;;  %v9206_v47 = vor.u32 %v13079_v42, %v9203_v21 }
 0x2cf   :  { %v11985_v8 = vld [vmem:[%s21196_s7 + $0x1800] sm:$0xf]  ;;  %v12786_v16 = vor.u32 %v13979_v44, %v12785_v60  ;;  %7373 = vmatpush.bf16.msrb.mxu1 %v9398_v32  ;;  %7336 = vmatpush.bf16.msra.mxu3 %v12658_v4  ;;  %v13047_v32 = vld [vmem:[%s21196_s7 + $0x144] sm:$0xf] }
 0x2d0   :  { %v13779_v11 = vld [vmem:[%s21196_s7 + $0x181c] sm:$0xf0]  ;;  %v9075_v60 = vld [vmem:[%s21196_s7 + $0x160] sm:$0xf0] }
 0x2d1   :  { %v12625_v40 = vld [vmem:[%s21196_s7 + $0x1d00] sm:$0xf]  ;;  %v11986_v63 = vor.u32 %v13779_v11, %v11985_v8  ;;  %7353 = vmatpush.bf16.msra.mxu2 %v12786_v16  ;;  %v13239_v44 = vld [vmem:[%s21196_s7 + $0x744] sm:$0xf]  ;;  %v9078_v3 = vor.u32 %v13047_v32, %v9075_v60  ;;  %v943_v11 = vpop.f32.mrf.mxu3  ;;  %v9270_v16 = vor.u32 %v13095_v58, %v9267_v38 }
 0x2d2   :  { %v13939_v33 = vld [vmem:[%s21196_s7 + $0x1d1c] sm:$0xf0]  ;;  %v13383_v32 = vld [vmem:[%s21196_s7 + $0xbc4] sm:$0xf] }
 0x2d3   :  { %v12753_v19 = vld [vmem:[%s21196_s7 + $0x1e00] sm:$0xf]  ;;  %v12626_v12 = vor.u32 %v13939_v33, %v12625_v40  ;;  %7374 = vmatpush.bf16.msrb.mxu1 %v9366_v28  ;;  %7315 = vmatpush.bf16.msra.mxu0 %v11986_v63  ;;  %v9846_v40 = vor.u32 %v13239_v44, %v9843_v56  ;;  %v13039_v33 = vld [vmem:[%s21196_s7 + $0x104] sm:$0xf]  ;;  %v8982_v56 = vor.u32 %v13023_v6, %v8979_v5 }
 0x2d4   :  { %v13971_v22 = vld [vmem:[%s21196_s7 + $0x1e1c] sm:$0xf0]  ;;  %v9235_v28 = vld [vmem:[%s21196_s7 + $0x2a0] sm:$0xf0]  ;;  %v9046_v37 = vor.u32 %v13039_v33, %v9043_v26 }
 0x2d5   :  { %v12754_v45 = vor.u32 %v13971_v22, %v12753_v19  ;;  %v12593_v52 = vld [vmem:[%s21196_s7 + $0x1cc0] sm:$0xf]  ;;  %7337 = vmatpush.bf16.msra.mxu3 %v12626_v12  ;;  %v13231_v19 = vld [vmem:[%s21196_s7 + $0x704] sm:$0xf]  ;;  %v9238_v12 = vor.u32 %v13087_v25, %v9235_v28 }
 0x2d6   :  { %v13931_v51 = vld [vmem:[%s21196_s7 + $0x1cdc] sm:$0xf0]  ;;  %7316 = vmatmul.bf16.vlgmr.msra.gmra.mxu0 %v15476_v23  ;;  %v9811_v22 = vld [vmem:[%s21196_s7 + $0x720] sm:$0xf0] }
 0x2d7   :  { %v12594_v20 = vor.u32 %v13931_v51, %v12593_v52  ;;  %7354 = vmatpush.bf16.msra.mxu2 %v12754_v45  ;;  %7360 = vmatpush.bf16.msrb.mxu0 %v9142_v57  ;;  %v12561_v10 = vld [vmem:[%s21196_s7 + $0x1c80] sm:$0xf]  ;;  %v9814_v63 = vor.u32 %v13231_v19, %v9811_v22  ;;  %v13191_v45 = vld [vmem:[%s21196_s7 + $0x5c4] sm:$0xf] }
 0x2d8   :  { %v13923_v24 = vld [vmem:[%s21196_s7 + $0x1c9c] sm:$0xf0]  ;;  %7375 = vmatpush.bf16.msrb.mxu1 %v9334_v49  ;;  %v9651_v57 = vld [vmem:[%s21196_s7 + $0x5e0] sm:$0xf0]  ;;  %v9014_v49 = vor.u32 %v13031_v9, %v9011_v14 }
 0x2d9   :  { %7338 = vmatpush.bf16.msra.mxu3 %v12594_v20  ;;  %v12562_v18 = vor.u32 %v13923_v24, %v12561_v10  ;;  %v12529_v4 = vld [vmem:[%s21196_s7 + $0x1c40] sm:$0xf]  ;;  %v13223_v52 = vld [vmem:[%s21196_s7 + $0x6c4] sm:$0xf]  ;;  %v9654_v39 = vor.u32 %v13191_v45, %v9651_v57 }
 0x2da   :  { %7355 = vmatmul.bf16.vlgmr.msra.gmra.mxu2 %v15484_v54  ;;  %v13915_v8 = vld [vmem:[%s21196_s7 + $0x1c5c] sm:$0xf0]  ;;  %v9779_v51 = vld [vmem:[%s21196_s7 + $0x6e0] sm:$0xf0] }
 0x2db   :  { %7399 = vmatpush.bf16.msrb.mxu2 %v9910_v41  ;;  %7361 = vmatpush.bf16.msrb.mxu0 %v9110_v36  ;;  %v12530_v31 = vor.u32 %v13915_v8, %v12529_v4  ;;  %v12497_v34 = vld [vmem:[%s21196_s7 + $0x1c00] sm:$0xf]  ;;  %v972_v41 = vmax.f32 %v942_v43, 0.0  ;;  %v9782_v2 = vor.u32 %v13223_v52, %v9779_v51  ;;  %v13183_v20 = vld [vmem:[%s21196_s7 + $0x584] sm:$0xf] }
 0x2dc   :  { %7376 = vmatpush.bf16.msrb.mxu1 %v9302_v35  ;;  %v13907_v13 = vld [vmem:[%s21196_s7 + $0x1c1c] sm:$0xf0]  ;;  %v9619_v36 = vld [vmem:[%s21196_s7 + $0x5a0] sm:$0xf0] }
 0x2dd   :  { %7339 = vmatpush.bf16.msra.mxu3 %v12562_v18  ;;  %v12498_v46 = vor.u32 %v13907_v13, %v12497_v34  ;;  %v13215_v10 = vld [vmem:[%s21196_s7 + $0x684] sm:$0xf]  ;;  %v15591_v44 = vpack.c.bf16 %v972_v41, %v972_v41  ;;  %v9622_v58 = vor.u32 %v13183_v20, %v9619_v36 }
 0x2de   :  { %v9747_v24 = vld [vmem:[%s21196_s7 + $0x6a0] sm:$0xf0] }
 0x2df   :  { %7400 = vmatpush.bf16.msrb.mxu2 %v9878_v53  ;;  %7362 = vmatpush.bf16.msrb.mxu0 %v9078_v3  ;;  %v13071_v53 = vld [vmem:[%s21196_s7 + $0x204] sm:$0xf]  ;;  %v9750_v18 = vor.u32 %v13215_v10, %v9747_v24 }
 0x2e0   :  { %7377 = vmatpush.bf16.msrb.mxu1 %v9270_v16  ;;  %v9171_v35 = vld [vmem:[%s21196_s7 + $0x220] sm:$0xf0] }
 0x2e1   :  { %7340 = vmatpush.bf16.msra.mxu3 %v12530_v31  ;;  %v10419_v60 = vld [vmem:[%s21196_s7 + $0xbe0] sm:$0xf0]  ;;  %v9174_v1 = vor.u32 %v13071_v53, %v9171_v35 }
 0x2e2   :  { %v13015_v38 = vld [vmem:[%s21196_s7 + $0x44] sm:$0xf]  ;;  %v10422_v11 = vor.u32 %v13383_v32, %v10419_v60 }
 0x2e3   :  { %7401 = vmatpush.bf16.msrb.mxu2 %v9846_v40  ;;  %7363 = vmatpush.bf16.msrb.mxu0 %v9046_v37  ;;  %v8947_v3 = vld [vmem:[%s21196_s7 + $0x60] sm:$0xf0] }
 0x2e4   :  { %7378 = vmatpush.bf16.msrb.mxu1 %v9238_v12  ;;  %v13175_v4 = vld [vmem:[%s21196_s7 + $0x544] sm:$0xf]  ;;  %v8950_v19 = vor.u32 %v13015_v38, %v8947_v3 }
 0x2e5   :  { %7341 = vmatpush.bf16.msra.mxu3 %v12498_v46  ;;  %v9587_v8 = vld [vmem:[%s21196_s7 + $0x560] sm:$0xf0] }
 0x2e6   :  { %v13207_v40 = vld [vmem:[%s21196_s7 + $0x644] sm:$0xf]  ;;  %v9590_v22 = vor.u32 %v13175_v4, %v9587_v8 }
 0x2e7   :  { %7402 = vmatpush.bf16.msrb.mxu2 %v9814_v63  ;;  %7364 = vmatpush.bf16.msrb.mxu0 %v9014_v49  ;;  %v9715_v16 = vld [vmem:[%s21196_s7 + $0x660] sm:$0xf0] }
 0x2e8   :  { %7379 = vmatpush.bf16.msrb.mxu1 %v9206_v47  ;;  %7342 = vmatmul.bf16.vlgmr.msra.gmra.mxu3 %v15591_v44  ;;  %v13375_v33 = vld [vmem:[%s21196_s7 + $0xb84] sm:$0xf]  ;;  %v9718_v34 = vor.u32 %v13207_v40, %v9715_v16 }
 0x2e9   :  { %7386 = vmatpush.bf16.msrb.mxu3 %v9654_v39  ;;  %v10387_v26 = vld [vmem:[%s21196_s7 + $0xba0] sm:$0xf0] }
 0x2ea   :  { %v13007_v25 = vld [vmem:[%s21196_s7 + $0x4] sm:$0xf]  ;;  %v10390_v9 = vor.u32 %v13375_v33, %v10387_v26 }
 0x2eb   :  { %7403 = vmatpush.bf16.msrb.mxu2 %v9782_v2  ;;  %7365 = vmatpush.bf16.msrb.mxu0 %v8982_v56  ;;  %v8915_v28 = vld [vmem:[%s21196_s7 + $0x20] sm:$0xf0] }
 0x2ec   :  { %v13167_v31 = vld [vmem:[%s21196_s7 + $0x504] sm:$0xf]  ;;  %7380 = vmatpush.bf16.msrb.mxu1 %v9174_v1  ;;  %v8918_v51 = vor.u32 %v13007_v25, %v8915_v28 }
 0x2ed   :  { %7387 = vmatpush.bf16.msrb.mxu3 %v9622_v58  ;;  %v9555_v43 = vld [vmem:[%s21196_s7 + $0x520] sm:$0xf0] }
 0x2ee   :  { %v13199_v37 = vld [vmem:[%s21196_s7 + $0x604] sm:$0xf]  ;;  %v9558_v42 = vor.u32 %v13167_v31, %v9555_v43 }
 0x2ef   :  { %7404 = vmatpush.bf16.msrb.mxu2 %v9750_v18  ;;  %v9683_v13 = vld [vmem:[%s21196_s7 + $0x620] sm:$0xf0]  ;;  %7366 = vmatpush.bf16.msrb.mxu0 %v8950_v19 }
 0x2f0   :  { %7425 = vmatpush.bf16.msra.mxu1 %v10422_v11  ;;  %v13319_v14 = vld [vmem:[%s21196_s7 + $0x9c4] sm:$0xf]  ;;  %v9686_v21 = vor.u32 %v13199_v37, %v9683_v13 }
 0x2f1   :  { %v10163_v63 = vld [vmem:[%s21196_s7 + $0x9e0] sm:$0xf0]  ;;  %7388 = vmatpush.bf16.msrb.mxu3 %v9590_v22  ;;  %7381 = vmatmul.bf16.vlgmr.msrb.gmra.mxu1 %v15006_v30 }
 0x2f2   :  { %v13511_v12 = vld [vmem:[%s21196_s7 + $0xfc4] sm:$0xf]  ;;  %v10166_v46 = vor.u32 %v13319_v14, %v10163_v63 }
 0x2f3   :  { %v10931_v45 = vld [vmem:[%s21196_s7 + $0xfe0] sm:$0xf0]  ;;  %7405 = vmatpush.bf16.msrb.mxu2 %v9718_v34  ;;  %7367 = vmatpush.bf16.msrb.mxu0 %v8918_v51 }
 0x2f4   :  { %v13367_v57 = vld [vmem:[%s21196_s7 + $0xb44] sm:$0xf]  ;;  %7426 = vmatpush.bf16.msra.mxu1 %v10390_v9  ;;  %v10934_v39 = vor.u32 %v13511_v12, %v10931_v45 }
 0x2f5   :  { %v10355_v52 = vld [vmem:[%s21196_s7 + $0xb60] sm:$0xf0]  ;;  %7389 = vmatpush.bf16.msrb.mxu3 %v9558_v42 }
 0x2f6   :  { %v13159_v41 = vld [vmem:[%s21196_s7 + $0x4c4] sm:$0xf]  ;;  %v10358_v6 = vor.u32 %v13367_v57, %v10355_v52  ;;  %7368 = vmatmul.bf16.vlgmr.msrb.gmra.mxu0 %v15033_v61 }
 0x2f7   :  { %v9523_v49 = vld [vmem:[%s21196_s7 + $0x4e0] sm:$0xf0]  ;;  %7406 = vmatpush.bf16.msrb.mxu2 %v9686_v21  ;;  %7412 = vmatpush.bf16.msra.mxu0 %v10166_v46 }
 0x2f8   :  { %v13311_v5 = vld [vmem:[%s21196_s7 + $0x984] sm:$0xf]  ;;  %v9526_v24 = vor.u32 %v13159_v41, %v9523_v49  ;;  %7427 = vmatpush.bf16.msra.mxu1 %v10358_v6 }
 0x2f9   :  { %v10131_v2 = vld [vmem:[%s21196_s7 + $0x9a0] sm:$0xf0] }
 0x2fa   :  { %v13503_v47 = vld [vmem:[%s21196_s7 + $0xf84] sm:$0xf]  ;;  %v10134_v53 = vor.u32 %v13311_v5, %v10131_v2  ;;  %7407 = vmatmul.bf16.vlgmr.msrb.gmra.mxu2 %v15041_v0  ;;  %7390 = vmatpush.bf16.msrb.mxu3 %v9526_v24 }
 0x2fb   :  { %v10899_v20 = vld [vmem:[%s21196_s7 + $0xfa0] sm:$0xf0]  ;;  %7451 = vmatpush.bf16.msra.mxu2 %v10934_v39 }
 0x2fc   :  { %v13359_v36 = vld [vmem:[%s21196_s7 + $0xb04] sm:$0xf]  ;;  %v10902_v60 = vor.u32 %v13503_v47, %v10899_v20  ;;  %7413 = vmatpush.bf16.msra.mxu0 %v10134_v53 }
 0x2fd   :  { %v10323_v10 = vld [vmem:[%s21196_s7 + $0xb20] sm:$0xf0] }
 0x2fe   :  { %v13151_v35 = vld [vmem:[%s21196_s7 + $0x484] sm:$0xf]  ;;  %v10326_v56 = vor.u32 %v13359_v36, %v10323_v10 }
 0x2ff   :  { %v9491_v32 = vld [vmem:[%s21196_s7 + $0x4a0] sm:$0xf0]  ;;  %7452 = vmatpush.bf16.msra.mxu2 %v10902_v60 }
 0x300   :  { %v13303_v58 = vld [vmem:[%s21196_s7 + $0x944] sm:$0xf]  ;;  %v9494_v8 = vor.u32 %v13151_v35, %v9491_v32  ;;  %7428 = vmatpush.bf16.msra.mxu1 %v10326_v56 }
 0x301   :  { %v10099_v38 = vld [vmem:[%s21196_s7 + $0x960] sm:$0xf0] }
 0x302   :  { %v13495_v18 = vld [vmem:[%s21196_s7 + $0xf44] sm:$0xf]  ;;  %v10102_v11 = vor.u32 %v13303_v58, %v10099_v38  ;;  %7391 = vmatpush.bf16.msrb.mxu3 %v9494_v8 }
 0x303   :  { %v10867_v1 = vld [vmem:[%s21196_s7 + $0xf60] sm:$0xf0] }
 0x304   :  { %v13351_v3 = vld [vmem:[%s21196_s7 + $0xac4] sm:$0xf]  ;;  %v10870_v33 = vor.u32 %v13495_v18, %v10867_v1  ;;  %7414 = vmatpush.bf16.msra.mxu0 %v10102_v11 }
 0x305   :  { %v10291_v4 = vld [vmem:[%s21196_s7 + $0xae0] sm:$0xf0] }
 0x306   :  { %v13143_v40 = vld [vmem:[%s21196_s7 + $0x444] sm:$0xf]  ;;  %v10294_v26 = vor.u32 %v13351_v3, %v10291_v4  ;;  %7453 = vmatpush.bf16.msra.mxu2 %v10870_v33 }
 0x307   :  { %v9459_v16 = vld [vmem:[%s21196_s7 + $0x460] sm:$0xf0] }
 0x308   :  { %v13295_v19 = vld [vmem:[%s21196_s7 + $0x904] sm:$0xf]  ;;  %v9462_v43 = vor.u32 %v13143_v40, %v9459_v16  ;;  %7429 = vmatpush.bf16.msra.mxu1 %v10294_v26 }
 0x309   :  { %v10067_v22 = vld [vmem:[%s21196_s7 + $0x920] sm:$0xf0] }
 0x30a   :  { %v13487_v25 = vld [vmem:[%s21196_s7 + $0xf04] sm:$0xf]  ;;  %v10070_v13 = vor.u32 %v13295_v19, %v10067_v22  ;;  %7392 = vmatpush.bf16.msrb.mxu3 %v9462_v43 }
 0x30b   :  { %v10835_v28 = vld [vmem:[%s21196_s7 + $0xf20] sm:$0xf0] }
 0x30c   :  { %v13343_v31 = vld [vmem:[%s21196_s7 + $0xa84] sm:$0xf]  ;;  %v10838_v12 = vor.u32 %v13487_v25, %v10835_v28  ;;  %7415 = vmatpush.bf16.msra.mxu0 %v10070_v13 }
 0x30d   :  { %v10259_v34 = vld [vmem:[%s21196_s7 + $0xaa0] sm:$0xf0] }
 0x30e   :  { %v13135_v37 = vld [vmem:[%s21196_s7 + $0x404] sm:$0xf]  ;;  %v10262_v45 = vor.u32 %v13343_v31, %v10259_v34  ;;  %7454 = vmatpush.bf16.msra.mxu2 %v10838_v12 }
 0x30f   :  { %v9427_v9 = vld [vmem:[%s21196_s7 + $0x420] sm:$0xf0] }
 0x310   :  { %v13287_v14 = vld [vmem:[%s21196_s7 + $0x8c4] sm:$0xf]  ;;  %v9430_v41 = vor.u32 %v13135_v37, %v9427_v9  ;;  %7430 = vmatpush.bf16.msra.mxu1 %v10262_v45 }
 0x311   :  { %v10035_v63 = vld [vmem:[%s21196_s7 + $0x8e0] sm:$0xf0] }
 0x312   :  { %v13447_v57 = vld [vmem:[%s21196_s7 + $0xdc4] sm:$0xf]  ;;  %v10038_v49 = vor.u32 %v13287_v14, %v10035_v63  ;;  %7393 = vmatpush.bf16.msrb.mxu3 %v9430_v41 }
 0x313   :  { %v10675_v52 = vld [vmem:[%s21196_s7 + $0xde0] sm:$0xf0] }
 0x314   :  { %v13479_v51 = vld [vmem:[%s21196_s7 + $0xec4] sm:$0xf]  ;;  %v10678_v39 = vor.u32 %v13447_v57, %v10675_v52  ;;  %7416 = vmatpush.bf16.msra.mxu0 %v10038_v49 }
 0x315   :  { %v10803_v42 = vld [vmem:[%s21196_s7 + $0xee0] sm:$0xf0]  ;;  %7394 = vmatmul.bf16.vlgmr.msrb.gmra.mxu3 %v15133_v29 }
 0x316   :  { %v13335_v21 = vld [vmem:[%s21196_s7 + $0xa44] sm:$0xf]  ;;  %v10806_v2 = vor.u32 %v13479_v51, %v10803_v42  ;;  %7438 = vmatpush.bf16.msra.mxu3 %v10678_v39 }
 0x317   :  { %v10227_v46 = vld [vmem:[%s21196_s7 + $0xa60] sm:$0xf0] }
 0x318   :  { %v13279_v6 = vld [vmem:[%s21196_s7 + $0x884] sm:$0xf]  ;;  %v10230_v47 = vor.u32 %v13335_v21, %v10227_v46  ;;  %7455 = vmatpush.bf16.msra.mxu2 %v10806_v2 }
 0x319   :  { %v10003_v5 = vld [vmem:[%s21196_s7 + $0x8a0] sm:$0xf0] }
 0x31a   :  { %v13439_v20 = vld [vmem:[%s21196_s7 + $0xd84] sm:$0xf]  ;;  %v10006_v56 = vor.u32 %v13279_v6, %v10003_v5  ;;  %7431 = vmatpush.bf16.msra.mxu1 %v10230_v47 }
 0x31b   :  { %v10643_v36 = vld [vmem:[%s21196_s7 + $0xda0] sm:$0xf0] }
 0x31c   :  { %v13471_v10 = vld [vmem:[%s21196_s7 + $0xe84] sm:$0xf]  ;;  %v10646_v58 = vor.u32 %v13439_v20, %v10643_v36  ;;  %7417 = vmatpush.bf16.msra.mxu0 %v10006_v56  ;;  %v7174_v56 = vpop.f32.mrf.mxu1 }
 0x31d   :  { %v10771_v24 = vld [vmem:[%s21196_s7 + $0xea0] sm:$0xf0] }
 0x31e   :  { %v13327_v53 = vld [vmem:[%s21196_s7 + $0xa04] sm:$0xf]  ;;  %v10774_v18 = vor.u32 %v13471_v10, %v10771_v24  ;;  %7439 = vmatpush.bf16.msra.mxu3 %v10646_v58 }
 0x31f   :  { %v10195_v35 = vld [vmem:[%s21196_s7 + $0xa20] sm:$0xf0] }
 0x320   :  { %v13639_v32 = vld [vmem:[%s21196_s7 + $0x13c4] sm:$0xf]  ;;  %v10198_v1 = vor.u32 %v13327_v53, %v10195_v35  ;;  %7456 = vmatpush.bf16.msra.mxu2 %v10774_v18 }
 0x321   :  { %v11443_v60 = vld [vmem:[%s21196_s7 + $0x13e0] sm:$0xf0] }
 0x322   :  { %v13271_v38 = vld [vmem:[%s21196_s7 + $0x844] sm:$0xf]  ;;  %v11446_v11 = vor.u32 %v13639_v32, %v11443_v60  ;;  %7432 = vmatpush.bf16.msra.mxu1 %v10198_v1 }
 0x323   :  { %v9971_v3 = vld [vmem:[%s21196_s7 + $0x860] sm:$0xf0] }
 0x324   :  { %v13431_v4 = vld [vmem:[%s21196_s7 + $0xd44] sm:$0xf]  ;;  %v9974_v19 = vor.u32 %v13271_v38, %v9971_v3 }
 0x325   :  { %v10611_v8 = vld [vmem:[%s21196_s7 + $0xd60] sm:$0xf0]  ;;  %7433 = vmatmul.bf16.vlgmr.msra.gmra.mxu1 %v15093_v27 }
 0x326   :  { %v13463_v40 = vld [vmem:[%s21196_s7 + $0xe44] sm:$0xf]  ;;  %v10614_v22 = vor.u32 %v13431_v4, %v10611_v8  ;;  %7477 = vmatpush.bf16.msrb.mxu1 %v11446_v11  ;;  %7418 = vmatpush.bf16.msra.mxu0 %v9974_v19 }
 0x327   :  { %v10739_v16 = vld [vmem:[%s21196_s7 + $0xe60] sm:$0xf0] }
 0x328   :  { %v13631_v33 = vld [vmem:[%s21196_s7 + $0x1384] sm:$0xf]  ;;  %v10742_v34 = vor.u32 %v13463_v40, %v10739_v16  ;;  %7440 = vmatpush.bf16.msra.mxu3 %v10614_v22 }
 0x329   :  { %v11411_v26 = vld [vmem:[%s21196_s7 + $0x13a0] sm:$0xf0] }
 0x32a   :  { %v13263_v25 = vld [vmem:[%s21196_s7 + $0x804] sm:$0xf]  ;;  %v11414_v9 = vor.u32 %v13631_v33, %v11411_v26  ;;  %7457 = vmatpush.bf16.msra.mxu2 %v10742_v34 }
 0x32b   :  { %v9939_v28 = vld [vmem:[%s21196_s7 + $0x820] sm:$0xf0] }
 0x32c   :  { %v13423_v31 = vld [vmem:[%s21196_s7 + $0xd04] sm:$0xf]  ;;  %v9942_v51 = vor.u32 %v13263_v25, %v9939_v28  ;;  %7478 = vmatpush.bf16.msrb.mxu1 %v11414_v9  ;;  %v7161_v9 = vpop.f32.mrf.mxu0 }
 0x32d   :  { %v10579_v43 = vld [vmem:[%s21196_s7 + $0xd20] sm:$0xf0] }
 0x32e   :  { %v13455_v37 = vld [vmem:[%s21196_s7 + $0xe04] sm:$0xf]  ;;  %v10582_v42 = vor.u32 %v13423_v31, %v10579_v43  ;;  %7419 = vmatpush.bf16.msra.mxu0 %v9942_v51 }
 0x32f   :  { %v10707_v13 = vld [vmem:[%s21196_s7 + $0xe20] sm:$0xf0] }
 0x330   :  { %v13575_v14 = vld [vmem:[%s21196_s7 + $0x11c4] sm:$0xf]  ;;  %v10710_v21 = vor.u32 %v13455_v37, %v10707_v13  ;;  %7441 = vmatpush.bf16.msra.mxu3 %v10582_v42  ;;  %v7176_v42 = vpop.f32.mrf.mxu1 }
 0x331   :  { %v11187_v63 = vld [vmem:[%s21196_s7 + $0x11e0] sm:$0xf0]  ;;  %7420 = vmatmul.bf16.vlgmr.msra.gmra.mxu0 %v15131_v62 }
 0x332   :  { %v13767_v12 = vld [vmem:[%s21196_s7 + $0x17c4] sm:$0xf]  ;;  %v11190_v46 = vor.u32 %v13575_v14, %v11187_v63  ;;  %7458 = vmatpush.bf16.msra.mxu2 %v10710_v21 }
 0x333   :  { %v11955_v45 = vld [vmem:[%s21196_s7 + $0x17e0] sm:$0xf0] }
 0x334   :  { %v13623_v57 = vld [vmem:[%s21196_s7 + $0x1344] sm:$0xf]  ;;  %v11958_v39 = vor.u32 %v13767_v12, %v11955_v45  ;;  %7464 = vmatpush.bf16.msrb.mxu0 %v11190_v46 }
 0x335   :  { %v11379_v52 = vld [vmem:[%s21196_s7 + $0x1360] sm:$0xf0]  ;;  %7459 = vmatmul.bf16.vlgmr.msra.gmra.mxu2 %v15144_v7 }
 0x336   :  { %v13415_v41 = vld [vmem:[%s21196_s7 + $0xcc4] sm:$0xf]  ;;  %v11382_v6 = vor.u32 %v13623_v57, %v11379_v52  ;;  %7503 = vmatpush.bf16.msrb.mxu2 %v11958_v39 }
 0x337   :  { %v10547_v49 = vld [vmem:[%s21196_s7 + $0xce0] sm:$0xf0] }
 0x338   :  { %v13567_v5 = vld [vmem:[%s21196_s7 + $0x1184] sm:$0xf]  ;;  %v10550_v24 = vor.u32 %v13415_v41, %v10547_v49  ;;  %7479 = vmatpush.bf16.msrb.mxu1 %v11382_v6 }
 0x339   :  { %v11155_v2 = vld [vmem:[%s21196_s7 + $0x11a0] sm:$0xf0] }
 0x33a   :  { %v13759_v47 = vld [vmem:[%s21196_s7 + $0x1784] sm:$0xf]  ;;  %v11158_v53 = vor.u32 %v13567_v5, %v11155_v2  ;;  %7442 = vmatpush.bf16.msra.mxu3 %v10550_v24 }
 0x33b   :  { %v11923_v20 = vld [vmem:[%s21196_s7 + $0x17a0] sm:$0xf0] }
 0x33c   :  { %v13615_v36 = vld [vmem:[%s21196_s7 + $0x1304] sm:$0xf]  ;;  %v11926_v58 = vor.u32 %v13759_v47, %v11923_v20  ;;  %7465 = vmatpush.bf16.msrb.mxu0 %v11158_v53 }
 0x33d   :  { %v11347_v10 = vld [vmem:[%s21196_s7 + $0x1320] sm:$0xf0] }
 0x33e   :  { %v13407_v35 = vld [vmem:[%s21196_s7 + $0xc84] sm:$0xf]  ;;  %v11350_v38 = vor.u32 %v13615_v36, %v11347_v10  ;;  %7504 = vmatpush.bf16.msrb.mxu2 %v11926_v58 }
 0x33f   :  { %v10515_v32 = vld [vmem:[%s21196_s7 + $0xca0] sm:$0xf0] }
 0x340   :  { %v13559_v60 = vld [vmem:[%s21196_s7 + $0x1144] sm:$0xf]  ;;  %v10518_v40 = vor.u32 %v13407_v35, %v10515_v32  ;;  %7480 = vmatpush.bf16.msrb.mxu1 %v11350_v38  ;;  %v15978_v38 = vpop.f32.mrf.mxu2 }
 0x341   :  { %v11123_v18 = vld [vmem:[%s21196_s7 + $0x1160] sm:$0xf0] }
 0x342   :  { %v13751_v1 = vld [vmem:[%s21196_s7 + $0x1744] sm:$0xf]  ;;  %v11126_v16 = vor.u32 %v13559_v60, %v11123_v18  ;;  %7443 = vmatpush.bf16.msra.mxu3 %v10518_v40 }
 0x343   :  { %v15893_v3 = vld [vmem:[%s21198_s8] sm:$0xff] }
 0x344   :  { %v11891_v4 = vld [vmem:[%s21196_s7 + $0x1760] sm:$0xf0]  ;;  %v2016_v33 = vperm.slane %v15893_v3, 0  ;;  %7466 = vmatpush.bf16.msrb.mxu0 %v11126_v16 }
 0x345   :  { %v13607_v8 = vld [vmem:[%s21196_s7 + $0x12c4] sm:$0xf]  ;;  %v11894_v22 = vor.u32 %v13751_v1, %v11891_v4 }
 0x346   :  { %v11315_v11 = vld [vmem:[%s21196_s7 + $0x12e0] sm:$0xf0]  ;;  %v7162_v12 = vadd.f32 %v7161_v9, %v2016_v33 }
 0x347   :  { %v13399_v26 = vld [vmem:[%s21196_s7 + $0xc44] sm:$0xf]  ;;  %v11318_v25 = vor.u32 %v13607_v8, %v11315_v11  ;;  %7505 = vmatpush.bf16.msrb.mxu2 %v11894_v22  ;;  %v7163_v8 = vpop.f32.mrf.mxu0 }
 0x348   :  { %v10483_v19 = vld [vmem:[%s21196_s7 + $0xc60] sm:$0xf0]  ;;  %v15961_v47 = vadd.f32 %v7174_v56, %v7162_v12 }
 0x349   :  { %v13551_v28 = vld [vmem:[%s21196_s7 + $0x1104] sm:$0xf]  ;;  %v10486_v14 = vor.u32 %v13399_v26, %v10483_v19  ;;  %7481 = vmatpush.bf16.msrb.mxu1 %v11318_v25  ;;  %v15998_v19 = vpop.f32.mrf.mxu1 }
 0x34a   :  { %v11091_v31 = vld [vmem:[%s21196_s7 + $0x1120] sm:$0xf0] }
 0x34b   :  { %v13743_v34 = vld [vmem:[%s21196_s7 + $0x1704] sm:$0xf]  ;;  %v11094_v45 = vor.u32 %v13551_v28, %v11091_v31  ;;  %7444 = vmatpush.bf16.msra.mxu3 %v10486_v14 }
 0x34c   :  { %v11859_v43 = vld [vmem:[%s21196_s7 + $0x1720] sm:$0xf0] }
 0x34d   :  { %v13599_v37 = vld [vmem:[%s21196_s7 + $0x1284] sm:$0xf]  ;;  %v11862_v21 = vor.u32 %v13743_v34, %v11859_v43  ;;  %7467 = vmatpush.bf16.msrb.mxu0 %v11094_v45 }
 0x34e   :  { %v11283_v13 = vld [vmem:[%s21196_s7 + $0x12a0] sm:$0xf0] }
 0x34f   :  { %v13391_v63 = vld [vmem:[%s21196_s7 + $0xc04] sm:$0xf]  ;;  %v11286_v46 = vor.u32 %v13599_v37, %v11283_v13  ;;  %7506 = vmatpush.bf16.msrb.mxu2 %v11862_v21 }
 0x350   :  { %v10451_v57 = vld [vmem:[%s21196_s7 + $0xc20] sm:$0xf0] }
 0x351   :  { %v13543_v52 = vld [vmem:[%s21196_s7 + $0x10c4] sm:$0xf]  ;;  %v10454_v20 = vor.u32 %v13391_v63, %v10451_v57  ;;  %7482 = vmatpush.bf16.msrb.mxu1 %v11286_v46 }
 0x352   :  { %v11059_v51 = vld [vmem:[%s21196_s7 + $0x10e0] sm:$0xf0] }
 0x353   :  { %v13703_v41 = vld [vmem:[%s21196_s7 + $0x15c4] sm:$0xf]  ;;  %v11062_v36 = vor.u32 %v13543_v52, %v11059_v51  ;;  %7445 = vmatpush.bf16.msra.mxu3 %v10454_v20 }
 0x354   :  { %v11699_v49 = vld [vmem:[%s21196_s7 + $0x15e0] sm:$0xf0] }
 0x355   :  { %v13735_v39 = vld [vmem:[%s21196_s7 + $0x16c4] sm:$0xf]  ;;  %v11702_v10 = vor.u32 %v13703_v41, %v11699_v49  ;;  %7468 = vmatpush.bf16.msrb.mxu0 %v11062_v36  ;;  %v7202_v41 = vpop.f32.mrf.mxu2 }
 0x356   :  { %v11827_v6 = vld [vmem:[%s21196_s7 + $0x16e0] sm:$0xf0]  ;;  %7446 = vmatmul.bf16.vlgmr.msra.gmra.mxu3 %v15264_v17 }
 0x357   :  { %v13591_v5 = vld [vmem:[%s21196_s7 + $0x1244] sm:$0xf]  ;;  %v11830_v35 = vor.u32 %v13735_v39, %v11827_v6  ;;  %7490 = vmatpush.bf16.msrb.mxu3 %v11702_v10 }
 0x358   :  { %v11251_v2 = vld [vmem:[%s21196_s7 + $0x1260] sm:$0xf0] }
 0x359   :  { %v13535_v24 = vld [vmem:[%s21196_s7 + $0x1084] sm:$0xf]  ;;  %v11254_v32 = vor.u32 %v13591_v5, %v11251_v2  ;;  %7507 = vmatpush.bf16.msrb.mxu2 %v11830_v35  ;;  %v16049_v2 = vpop.f32.mrf.mxu0  ;;  %v7228_v35 = vpop.f32.mrf.mxu1 }
 0x35a   :  { %v11027_v53 = vld [vmem:[%s21196_s7 + $0x10a0] sm:$0xf0] }
 0x35b   :  { %v13695_v60 = vld [vmem:[%s21196_s7 + $0x1584] sm:$0xf]  ;;  %v11030_v16 = vor.u32 %v13535_v24, %v11027_v53  ;;  %7483 = vmatpush.bf16.msrb.mxu1 %v11254_v32 }
 0x35c   :  { %v11667_v56 = vld [vmem:[%s21196_s7 + $0x15a0] sm:$0xf0] }
 0x35d   :  { %v13727_v58 = vld [vmem:[%s21196_s7 + $0x1684] sm:$0xf]  ;;  %v11670_v33 = vor.u32 %v13695_v60, %v11667_v56  ;;  %7469 = vmatpush.bf16.msrb.mxu0 %v11030_v16 }
 0x35e   :  { %v11795_v18 = vld [vmem:[%s21196_s7 + $0x16a0] sm:$0xf0] }
 0x35f   :  { %v13583_v1 = vld [vmem:[%s21196_s7 + $0x1204] sm:$0xf]  ;;  %v11798_v22 = vor.u32 %v13727_v58, %v11795_v18  ;;  %7491 = vmatpush.bf16.msrb.mxu3 %v11670_v33 }
 0x360   :  { %v11219_v4 = vld [vmem:[%s21196_s7 + $0x1220] sm:$0xf0] }
 0x361   :  { %v13895_v11 = vld [vmem:[%s21196_s7 + $0x1bc4] sm:$0xf]  ;;  %v11222_v25 = vor.u32 %v13583_v1, %v11219_v4  ;;  %7508 = vmatpush.bf16.msrb.mxu2 %v11798_v22  ;;  %v7187_v22 = vpop.f32.mrf.mxu3  ;;  %v16121_v41 = vpop.f32.mrf.mxu1 }
 0x362   :  { %v12467_v40 = vld [vmem:[%s21196_s7 + $0x1be0] sm:$0xf0] }
 0x363   :  { %v13527_v26 = vld [vmem:[%s21196_s7 + $0x1044] sm:$0xf]  ;;  %v12470_v43 = vor.u32 %v13895_v11, %v12467_v40  ;;  %7484 = vmatpush.bf16.msrb.mxu1 %v11222_v25 }
 0x364   :  { %v10995_v28 = vld [vmem:[%s21196_s7 + $0x1060] sm:$0xf0] }
 0x365   :  { %v13687_v31 = vld [vmem:[%s21196_s7 + $0x1544] sm:$0xf]  ;;  %v10998_v63 = vor.u32 %v13527_v26, %v10995_v28 }
 0x366   :  { %v11635_v34 = vld [vmem:[%s21196_s7 + $0x1560] sm:$0xf0]  ;;  %7485 = vmatmul.bf16.vlgmr.msrb.gmra.mxu1 %v15222_v59 }
 0x367   :  { %v13719_v37 = vld [vmem:[%s21196_s7 + $0x1644] sm:$0xf]  ;;  %v11638_v12 = vor.u32 %v13687_v31, %v11635_v34  ;;  %7529 = vmatpush.bf16.msra.mxu1 %v12470_v43  ;;  %7470 = vmatpush.bf16.msrb.mxu0 %v10998_v63  ;;  %v7188_v34 = vadd.f32 %v7187_v22, %v15961_v47  ;;  %v16092_v43 = vpop.f32.mrf.mxu2  ;;  %v7215_v47 = vpop.f32.mrf.mxu0 }
 0x368   :  { %v11763_v13 = vld [vmem:[%s21196_s7 + $0x1660] sm:$0xf0] }
 0x369   :  { %v13887_v9 = vld [vmem:[%s21196_s7 + $0x1b84] sm:$0xf]  ;;  %v11766_v51 = vor.u32 %v13719_v37, %v11763_v13  ;;  %7492 = vmatpush.bf16.msrb.mxu3 %v11638_v12 }
 0x36a   :  { %v12435_v14 = vld [vmem:[%s21196_s7 + $0x1ba0] sm:$0xf0] }
 0x36b   :  { %v13519_v45 = vld [vmem:[%s21196_s7 + $0x1004] sm:$0xf]  ;;  %v12438_v49 = vor.u32 %v13887_v9, %v12435_v14  ;;  %7509 = vmatpush.bf16.msrb.mxu2 %v11766_v51 }
 0x36c   :  { %v10963_v57 = vld [vmem:[%s21196_s7 + $0x1020] sm:$0xf0] }
 0x36d   :  { %v13679_v52 = vld [vmem:[%s21196_s7 + $0x1504] sm:$0xf]  ;;  %v10966_v24 = vor.u32 %v13519_v45, %v10963_v57  ;;  %7530 = vmatpush.bf16.msra.mxu1 %v12438_v49 }
 0x36e   :  { %v11603_v42 = vld [vmem:[%s21196_s7 + $0x1520] sm:$0xf0] }
 0x36f   :  { %v13711_v21 = vld [vmem:[%s21196_s7 + $0x1604] sm:$0xf]  ;;  %v11606_v53 = vor.u32 %v13679_v52, %v11603_v42  ;;  %7471 = vmatpush.bf16.msrb.mxu0 %v10966_v24  ;;  %v7201_v52 = vadd.f32 %v15978_v38, %v7188_v34  ;;  %v7265_v22 = vpop.f32.mrf.mxu0 }
 0x370   :  { %v11731_v46 = vld [vmem:[%s21196_s7 + $0x1620] sm:$0xf0] }
 0x371   :  { %v13831_v39 = vld [vmem:[%s21196_s7 + $0x19c4] sm:$0xf]  ;;  %v11734_v32 = vor.u32 %v13711_v21, %v11731_v46  ;;  %7493 = vmatpush.bf16.msrb.mxu3 %v11606_v53 }
 0x372   :  { %v12211_v6 = vld [vmem:[%s21196_s7 + $0x19e0] sm:$0xf0]  ;;  %7472 = vmatmul.bf16.vlgmr.msrb.gmra.mxu0 %v15266_v55 }
 0x373   :  { %v14023_v5 = vld [vmem:[%s21196_s7 + $0x1fc4] sm:$0xf]  ;;  %v12214_v60 = vor.u32 %v13831_v39, %v12211_v6  ;;  %7510 = vmatpush.bf16.msrb.mxu2 %v11734_v32  ;;  %v7189_v32 = vpop.f32.mrf.mxu3 }
 0x374   :  { %v12979_v20 = vld [vmem:[%s21196_s7 + $0x1fe0] sm:$0xf0] }
 0x375   :  { %v13879_v36 = vld [vmem:[%s21196_s7 + $0x1b44] sm:$0xf]  ;;  %v12982_v18 = vor.u32 %v14023_v5, %v12979_v20  ;;  %7516 = vmatpush.bf16.msra.mxu0 %v12214_v60  ;;  %v7214_v20 = vadd.f32 %v16049_v2, %v7201_v52 }
 0x376   :  { %v12403_v10 = vld [vmem:[%s21196_s7 + $0x1b60] sm:$0xf0]  ;;  %7511 = vmatmul.bf16.vlgmr.msrb.gmra.mxu2 %v15268_v50 }
 0x377   :  { %v13671_v56 = vld [vmem:[%s21196_s7 + $0x14c4] sm:$0xf]  ;;  %v12406_v1 = vor.u32 %v13879_v36, %v12403_v10  ;;  %7555 = vmatpush.bf16.msra.mxu2 %v12982_v18  ;;  %v7227_v2 = vadd.f32 %v15998_v19, %v7214_v20 }
 0x378   :  { %v11571_v58 = vld [vmem:[%s21196_s7 + $0x14e0] sm:$0xf0] }
 0x379   :  { %v13823_v4 = vld [vmem:[%s21196_s7 + $0x1984] sm:$0xf]  ;;  %v11574_v26 = vor.u32 %v13671_v56, %v11571_v58  ;;  %7531 = vmatpush.bf16.msra.mxu1 %v12406_v1  ;;  %v7254_v1 = vpop.f32.mrf.mxu2 }
 0x37a   :  { %v12179_v8 = vld [vmem:[%s21196_s7 + $0x19a0] sm:$0xf0] }
 0x37b   :  { %v14015_v11 = vld [vmem:[%s21196_s7 + $0x1f84] sm:$0xf]  ;;  %v12182_v25 = vor.u32 %v13823_v4, %v12179_v8  ;;  %7494 = vmatpush.bf16.msrb.mxu3 %v11574_v26 }
 0x37c   :  { %v12947_v40 = vld [vmem:[%s21196_s7 + $0x1fa0] sm:$0xf0] }
 0x37d   :  { %v13871_v16 = vld [vmem:[%s21196_s7 + $0x1b04] sm:$0xf]  ;;  %v12950_v37 = vor.u32 %v14015_v11, %v12947_v40  ;;  %7517 = vmatpush.bf16.msra.mxu0 %v12182_v25 }
 0x37e   :  { %v12371_v33 = vld [vmem:[%s21196_s7 + $0x1b20] sm:$0xf0] }
 0x37f   :  { %v13663_v28 = vld [vmem:[%s21196_s7 + $0x1484] sm:$0xf]  ;;  %v12374_v13 = vor.u32 %v13871_v16, %v12371_v33  ;;  %7556 = vmatpush.bf16.msra.mxu2 %v12950_v37 }
 0x380   :  { %v11539_v31 = vld [vmem:[%s21196_s7 + $0x14a0] sm:$0xf0] }
 0x381   :  { %v13815_v9 = vld [vmem:[%s21196_s7 + $0x1944] sm:$0xf]  ;;  %v11542_v51 = vor.u32 %v13663_v28, %v11539_v31  ;;  %7532 = vmatpush.bf16.msra.mxu1 %v12374_v13  ;;  %v7280_v13 = vpop.f32.mrf.mxu1 }
 0x382   :  { %v12147_v14 = vld [vmem:[%s21196_s7 + $0x1960] sm:$0xf0] }
 0x383   :  { %v14007_v63 = vld [vmem:[%s21196_s7 + $0x1f44] sm:$0xf]  ;;  %v12150_v42 = vor.u32 %v13815_v9, %v12147_v14  ;;  %7495 = vmatpush.bf16.msrb.mxu3 %v11542_v51  ;;  %v9401_v51 = vld [vmem:[%s21196_s7 + $0x3c8] sm:$0xf] }
 0x384   :  { %v12915_v12 = vld [vmem:[%s21196_s7 + $0x1f60] sm:$0xf0] }
 0x385   :  { %v13863_v45 = vld [vmem:[%s21196_s7 + $0x1ac4] sm:$0xf]  ;;  %v12918_v49 = vor.u32 %v14007_v63, %v12915_v12  ;;  %7518 = vmatpush.bf16.msra.mxu0 %v12150_v42  ;;  %v13132_v42 = vld [vmem:[%s21196_s7 + $0x3e4] sm:$0xf0] }
 0x386   :  { %v12339_v57 = vld [vmem:[%s21196_s7 + $0x1ae0] sm:$0xf0] }
 0x387   :  { %v13655_v21 = vld [vmem:[%s21196_s7 + $0x1444] sm:$0xf]  ;;  %v12342_v38 = vor.u32 %v13863_v45, %v12339_v57  ;;  %7557 = vmatpush.bf16.msra.mxu2 %v12918_v49 }
 0x388   :  { %v11507_v46 = vld [vmem:[%s21196_s7 + $0x1460] sm:$0xf0] }
 0x389   :  { %v13807_v39 = vld [vmem:[%s21196_s7 + $0x1904] sm:$0xf]  ;;  %v11510_v53 = vor.u32 %v13655_v21, %v11507_v46  ;;  %7533 = vmatpush.bf16.msra.mxu1 %v12342_v38  ;;  %v7239_v21 = vpop.f32.mrf.mxu3 }
 0x38a   :  { %v12115_v6 = vld [vmem:[%s21196_s7 + $0x1920] sm:$0xf0] }
 0x38b   :  { %v13999_v5 = vld [vmem:[%s21196_s7 + $0x1f04] sm:$0xf]  ;;  %v12118_v60 = vor.u32 %v13807_v39, %v12115_v6  ;;  %7496 = vmatpush.bf16.msrb.mxu3 %v11510_v53  ;;  %v7240_v39 = vadd.f32 %v7239_v21, %v7227_v2  ;;  %v16206_v6 = vpop.f32.mrf.mxu2  ;;  %v9402_v53 = vor.u32 %v13132_v42, %v9401_v51  ;;  %v9113_v42 = vld [vmem:[%s21196_s7 + $0x188] sm:$0xf] }
 0x38c   :  { %v12883_v36 = vld [vmem:[%s21196_s7 + $0x1f20] sm:$0xf0]  ;;  %v13060_v21 = vld [vmem:[%s21196_s7 + $0x1a4] sm:$0xf0] }
 0x38d   :  { %v13855_v10 = vld [vmem:[%s21196_s7 + $0x1a84] sm:$0xf]  ;;  %v12886_v4 = vor.u32 %v13999_v5, %v12883_v36  ;;  %7519 = vmatpush.bf16.msra.mxu0 %v12118_v60  ;;  %v7253_v32 = vadd.f32 %v16092_v43, %v7240_v39  ;;  %v7267_v60 = vpop.f32.mrf.mxu0  ;;  %v13108_v39 = vld [vmem:[%s21196_s7 + $0x324] sm:$0xf0] }
 0x38e   :  { %v12307_v24 = vld [vmem:[%s21196_s7 + $0x1aa0] sm:$0xf0]  ;;  %v13244_v60 = vld [vmem:[%s21196_s7 + $0x764] sm:$0xf0] }
 0x38f   :  { %v13647_v35 = vld [vmem:[%s21196_s7 + $0x1404] sm:$0xf]  ;;  %v12310_v19 = vor.u32 %v13855_v10, %v12307_v24  ;;  %7558 = vmatpush.bf16.msra.mxu2 %v12886_v4 }
 0x390   :  { %v11475_v56 = vld [vmem:[%s21196_s7 + $0x1420] sm:$0xf0] }
 0x391   :  { %v13799_v58 = vld [vmem:[%s21196_s7 + $0x18c4] sm:$0xf]  ;;  %v11478_v25 = vor.u32 %v13647_v35, %v11475_v56  ;;  %7534 = vmatpush.bf16.msra.mxu1 %v12310_v19  ;;  %v9369_v56 = vld [vmem:[%s21196_s7 + $0x388] sm:$0xf] }
 0x392   :  { %v12083_v18 = vld [vmem:[%s21196_s7 + $0x18e0] sm:$0xf0] }
 0x393   :  { %v13959_v8 = vld [vmem:[%s21196_s7 + $0x1dc4] sm:$0xf]  ;;  %v12086_v28 = vor.u32 %v13799_v58, %v12083_v18  ;;  %7497 = vmatpush.bf16.msrb.mxu3 %v11478_v25  ;;  %v13124_v58 = vld [vmem:[%s21196_s7 + $0x3a4] sm:$0xf0] }
 0x394   :  { %v12723_v11 = vld [vmem:[%s21196_s7 + $0x1de0] sm:$0xf0]  ;;  %v9145_v25 = vld [vmem:[%s21196_s7 + $0x1c8] sm:$0xf] }
 0x395   :  { %v13991_v40 = vld [vmem:[%s21196_s7 + $0x1ec4] sm:$0xf]  ;;  %v12726_v31 = vor.u32 %v13959_v8, %v12723_v11  ;;  %7520 = vmatpush.bf16.msra.mxu0 %v12086_v28  ;;  %v13068_v28 = vld [vmem:[%s21196_s7 + $0x1e4] sm:$0xf0] }
 0x396   :  { %v12851_v16 = vld [vmem:[%s21196_s7 + $0x1ee0] sm:$0xf0]  ;;  %7498 = vmatmul.bf16.vlgmr.msrb.gmra.mxu3 %v15377_v15 }
 0x397   :  { %v13847_v33 = vld [vmem:[%s21196_s7 + $0x1a44] sm:$0xf]  ;;  %v12854_v9 = vor.u32 %v13991_v40, %v12851_v16  ;;  %7542 = vmatpush.bf16.msra.mxu3 %v12726_v31  ;;  %v9913_v31 = vld [vmem:[%s21196_s7 + $0x7c8] sm:$0xf] }
 0x398   :  { %v12275_v26 = vld [vmem:[%s21196_s7 + $0x1a60] sm:$0xf0] }
 0x399   :  { %v13791_v34 = vld [vmem:[%s21196_s7 + $0x1884] sm:$0xf]  ;;  %v12278_v14 = vor.u32 %v13847_v33, %v12275_v26  ;;  %7559 = vmatpush.bf16.msra.mxu2 %v12854_v9  ;;  %v7266_v33 = vadd.f32 %v7265_v22, %v7253_v32  ;;  %v9370_v26 = vor.u32 %v13124_v58, %v9369_v56  ;;  %v9337_v22 = vld [vmem:[%s21196_s7 + $0x348] sm:$0xf]  ;;  %v7241_v9 = vpop.f32.mrf.mxu3 }
 0x39a   :  { %v12051_v37 = vld [vmem:[%s21196_s7 + $0x18a0] sm:$0xf0]  ;;  %v9849_v32 = vld [vmem:[%s21196_s7 + $0x748] sm:$0xf] }
 0x39b   :  { %v13951_v63 = vld [vmem:[%s21196_s7 + $0x1d84] sm:$0xf]  ;;  %v12054_v46 = vor.u32 %v13791_v34, %v12051_v37  ;;  %7535 = vmatpush.bf16.msra.mxu1 %v12278_v14  ;;  %v13260_v34 = vld [vmem:[%s21196_s7 + $0x7e4] sm:$0xf0]  ;;  %v7279_v13 = vadd.f32 %v16121_v41, %v7266_v33 }
 0x39c   :  { %v12691_v47 = vld [vmem:[%s21196_s7 + $0x1da0] sm:$0xf0]  ;;  %v13116_v37 = vld [vmem:[%s21196_s7 + $0x364] sm:$0xf0]  ;;  %v9914_v41 = vor.u32 %v13260_v34, %v9913_v31 }
 0x39d   :  { %v13983_v12 = vld [vmem:[%s21196_s7 + $0x1e84] sm:$0xf]  ;;  %v12694_v49 = vor.u32 %v13951_v63, %v12691_v47  ;;  %7521 = vmatpush.bf16.msra.mxu0 %v12054_v46  ;;  %v7306_v47 = vpop.f32.mrf.mxu2  ;;  %v9338_v51 = vor.u32 %v13116_v37, %v9337_v22  ;;  %v9881_v46 = vld [vmem:[%s21196_s7 + $0x788] sm:$0xf] }
 0x39e   :  { %v12819_v45 = vld [vmem:[%s21196_s7 + $0x1ea0] sm:$0xf0]  ;;  %v9273_v56 = vld [vmem:[%s21196_s7 + $0x2c8] sm:$0xf] }
 0x39f   :  { %v13839_v57 = vld [vmem:[%s21196_s7 + $0x1a04] sm:$0xf]  ;;  %v12822_v5 = vor.u32 %v13983_v12, %v12819_v45  ;;  %7543 = vmatpush.bf16.msra.mxu3 %v12694_v49  ;;  %v9146_v45 = vor.u32 %v13068_v28, %v9145_v25  ;;  %v13252_v49 = vld [vmem:[%s21196_s7 + $0x7a4] sm:$0xf0] }
 0x3a0   :  { %v12243_v52 = vld [vmem:[%s21196_s7 + $0x1a20] sm:$0xf0]  ;;  %v13100_v58 = vld [vmem:[%s21196_s7 + $0x2e4] sm:$0xf0] }
 0x3a1   :  { %v13783_v38 = vld [vmem:[%s21196_s7 + $0x1844] sm:$0xf]  ;;  %v12246_v20 = vor.u32 %v13839_v57, %v12243_v52  ;;  %7560 = vmatpush.bf16.msra.mxu2 %v12822_v5  ;;  %v9049_v33 = vld [vmem:[%s21196_s7 + $0x108] sm:$0xf] }
 0x3a2   :  { %v12019_v36 = vld [vmem:[%s21196_s7 + $0x1860] sm:$0xf0]  ;;  %v9817_v25 = vld [vmem:[%s21196_s7 + $0x708] sm:$0xf] }
 0x3a3   :  { %v13943_v10 = vld [vmem:[%s21196_s7 + $0x1d44] sm:$0xf]  ;;  %v12022_v18 = vor.u32 %v13783_v38, %v12019_v36  ;;  %7536 = vmatpush.bf16.msra.mxu1 %v12246_v20  ;;  %v9305_v38 = vld [vmem:[%s21196_s7 + $0x308] sm:$0xf]  ;;  %v9114_v20 = vor.u32 %v13060_v21, %v9113_v42  ;;  %v7317_v21 = vpop.f32.mrf.mxu0 }
 0x3a4   :  { %v12659_v24 = vld [vmem:[%s21196_s7 + $0x1d60] sm:$0xf0]  ;;  %v13236_v28 = vld [vmem:[%s21196_s7 + $0x724] sm:$0xf0] }
 0x3a5   :  { %v13975_v35 = vld [vmem:[%s21196_s7 + $0x1e44] sm:$0xf]  ;;  %v12662_v1 = vor.u32 %v13943_v10, %v12659_v24  ;;  %7522 = vmatpush.bf16.msra.mxu0 %v12022_v18  ;;  %v9882_v24 = vor.u32 %v13252_v49, %v9881_v46  ;;  %v9241_v31 = vld [vmem:[%s21196_s7 + $0x288] sm:$0xf] }
 0x3a6   :  { %v12787_v2 = vld [vmem:[%s21196_s7 + $0x1e60] sm:$0xf0]  ;;  %7537 = vmatmul.bf16.vlgmr.msra.gmra.mxu1 %v15440_v48  ;;  %v13092_v34 = vld [vmem:[%s21196_s7 + $0x2a4] sm:$0xf0] }
 0x3a7   :  { %v13775_v4 = vld [vmem:[%s21196_s7 + $0x1804] sm:$0xf]  ;;  %v12790_v8 = vor.u32 %v13975_v35, %v12787_v2  ;;  %7581 = vmatpush.bf16.msrb.mxu1 %v9402_v53  ;;  %7544 = vmatpush.bf16.msra.mxu3 %v12662_v1  ;;  %v9306_v53 = vor.u32 %v13108_v39, %v9305_v38  ;;  %v9081_v35 = vld [vmem:[%s21196_s7 + $0x148] sm:$0xf]  ;;  %v7291_v1 = vpop.f32.mrf.mxu3 }
 0x3a8   :  { %v11987_v43 = vld [vmem:[%s21196_s7 + $0x1820] sm:$0xf0]  ;;  %v13052_v2 = vld [vmem:[%s21196_s7 + $0x164] sm:$0xf0] }
 0x3a9   :  { %v13935_v19 = vld [vmem:[%s21196_s7 + $0x1d04] sm:$0xf]  ;;  %v11990_v14 = vor.u32 %v13775_v4, %v11987_v43  ;;  %7561 = vmatpush.bf16.msra.mxu2 %v12790_v8  ;;  %v9082_v4 = vor.u32 %v13052_v2, %v9081_v35  ;;  %v7292_v8 = vadd.f32 %v7291_v1, %v7279_v13  ;;  %v13036_v47 = vld [vmem:[%s21196_s7 + $0xe4] sm:$0xf0] }
 0x3aa   :  { %v12627_v11 = vld [vmem:[%s21196_s7 + $0x1d20] sm:$0xf0]  ;;  %v13084_v42 = vld [vmem:[%s21196_s7 + $0x264] sm:$0xf0] }
 0x3ab   :  { %v13967_v40 = vld [vmem:[%s21196_s7 + $0x1e04] sm:$0xf]  ;;  %v12630_v63 = vor.u32 %v13935_v19, %v12627_v11  ;;  %7582 = vmatpush.bf16.msrb.mxu1 %v9370_v26  ;;  %7523 = vmatpush.bf16.msra.mxu0 %v11990_v14  ;;  %v7330_v11 = vpop.f32.mrf.mxu1  ;;  %v13044_v26 = vld [vmem:[%s21196_s7 + $0x124] sm:$0xf0]  ;;  %v7305_v22 = vadd.f32 %v16206_v6, %v7292_v8  ;;  %v9818_v6 = vor.u32 %v13236_v28, %v9817_v25  ;;  %v16418_v25 = vpop.f32.mrf.mxu2 }
 0x3ac   :  { %v12755_v16 = vld [vmem:[%s21196_s7 + $0x1e20] sm:$0xf0]  ;;  %v9050_v9 = vor.u32 %v13044_v26, %v9049_v33  ;;  %v9625_v35 = vld [vmem:[%s21196_s7 + $0x588] sm:$0xf] }
 0x3ad   :  { %v12758_v12 = vor.u32 %v13967_v40, %v12755_v16  ;;  %v13927_v57 = vld [vmem:[%s21196_s7 + $0x1cc4] sm:$0xf]  ;;  %7545 = vmatpush.bf16.msra.mxu3 %v12630_v63  ;;  %v9850_v40 = vor.u32 %v13244_v60, %v9849_v32  ;;  %v9274_v16 = vor.u32 %v13100_v58, %v9273_v56  ;;  %v9017_v63 = vld [vmem:[%s21196_s7 + $0xc8] sm:$0xf]  ;;  %v7318_v49 = vadd.f32 %v7317_v21, %v7305_v22  ;;  %v7319_v22 = vpop.f32.mrf.mxu0 }
 0x3ae   :  { %v12595_v52 = vld [vmem:[%s21196_s7 + $0x1ce0] sm:$0xf0]  ;;  %7524 = vmatmul.bf16.vlgmr.msra.gmra.mxu0 %v15476_v23  ;;  %v9018_v39 = vor.u32 %v13036_v47, %v9017_v63  ;;  %v13188_v2 = vld [vmem:[%s21196_s7 + $0x5a4] sm:$0xf0] }
 0x3af   :  { %v12598_v5 = vor.u32 %v13927_v57, %v12595_v52  ;;  %7562 = vmatpush.bf16.msra.mxu2 %v12758_v12  ;;  %7568 = vmatpush.bf16.msrb.mxu0 %v9146_v45  ;;  %v13919_v36 = vld [vmem:[%s21196_s7 + $0x1c84] sm:$0xf]  ;;  %v9242_v12 = vor.u32 %v13092_v34, %v9241_v31  ;;  %v9657_v45 = vld [vmem:[%s21196_s7 + $0x5c8] sm:$0xf]  ;;  %v7293_v38 = vpop.f32.mrf.mxu3 }
 0x3b0   :  { %v12563_v10 = vld [vmem:[%s21196_s7 + $0x1ca0] sm:$0xf0]  ;;  %7583 = vmatpush.bf16.msrb.mxu1 %v9338_v51  ;;  %v13196_v57 = vld [vmem:[%s21196_s7 + $0x5e4] sm:$0xf0] }
 0x3b1   :  { %7546 = vmatpush.bf16.msra.mxu3 %v12598_v5  ;;  %v12566_v18 = vor.u32 %v13919_v36, %v12563_v10  ;;  %v13911_v43 = vld [vmem:[%s21196_s7 + $0x1c44] sm:$0xf]  ;;  %v9785_v52 = vld [vmem:[%s21196_s7 + $0x6c8] sm:$0xf]  ;;  %v9658_v5 = vor.u32 %v13196_v57, %v9657_v45 }
 0x3b2   :  { %7563 = vmatmul.bf16.vlgmr.msra.gmra.mxu2 %v15484_v54  ;;  %v12531_v19 = vld [vmem:[%s21196_s7 + $0x1c60] sm:$0xf0]  ;;  %v9209_v51 = vld [vmem:[%s21196_s7 + $0x248] sm:$0xf] }
 0x3b3   :  { %7607 = vmatpush.bf16.msrb.mxu2 %v9914_v41  ;;  %7569 = vmatpush.bf16.msrb.mxu0 %v9114_v20  ;;  %v12534_v37 = vor.u32 %v13911_v43, %v12531_v19  ;;  %v13903_v13 = vld [vmem:[%s21196_s7 + $0x1c04] sm:$0xf]  ;;  %v13228_v41 = vld [vmem:[%s21196_s7 + $0x6e4] sm:$0xf0]  ;;  %v7332_v10 = vpop.f32.mrf.mxu1  ;;  %v9626_v19 = vor.u32 %v13188_v2, %v9625_v35 }
 0x3b4   :  { %7584 = vmatpush.bf16.msrb.mxu1 %v9306_v53  ;;  %v12499_v14 = vld [vmem:[%s21196_s7 + $0x1c20] sm:$0xf0]  ;;  %v8985_v20 = vld [vmem:[%s21196_s7 + $0x88] sm:$0xf]  ;;  %v9210_v53 = vor.u32 %v13084_v42, %v9209_v51 }
 0x3b5   :  { %7547 = vmatpush.bf16.msra.mxu3 %v12566_v18  ;;  %v12502_v46 = vor.u32 %v13903_v13, %v12499_v14  ;;  %v13028_v36 = vld [vmem:[%s21196_s7 + $0xa4] sm:$0xf0]  ;;  %v16398_v18 = vadd.f32 %v7330_v11, %v7318_v49 }
 0x3b6   :  { %v9753_v32 = vld [vmem:[%s21196_s7 + $0x688] sm:$0xf]  ;;  %v8986_v43 = vor.u32 %v13028_v36, %v8985_v20 }
 0x3b7   :  { %7608 = vmatpush.bf16.msrb.mxu2 %v9882_v24  ;;  %7570 = vmatpush.bf16.msrb.mxu0 %v9082_v4  ;;  %v9786_v24 = vor.u32 %v13228_v41, %v9785_v52  ;;  %v13220_v60 = vld [vmem:[%s21196_s7 + $0x6a4] sm:$0xf0] }
 0x3b8   :  { %7585 = vmatpush.bf16.msrb.mxu1 %v9274_v16  ;;  %v9177_v56 = vld [vmem:[%s21196_s7 + $0x208] sm:$0xf]  ;;  %v9754_v11 = vor.u32 %v13220_v60, %v9753_v32 }
 0x3b9   :  { %7548 = vmatpush.bf16.msra.mxu3 %v12534_v37  ;;  %v13076_v58 = vld [vmem:[%s21196_s7 + $0x224] sm:$0xf0] }
 0x3ba   :  { %v10425_v1 = vld [vmem:[%s21196_s7 + $0xbc8] sm:$0xf] }
 0x3bb   :  { %7609 = vmatpush.bf16.msrb.mxu2 %v9850_v40  ;;  %7571 = vmatpush.bf16.msrb.mxu0 %v9050_v9  ;;  %v13388_v4 = vld [vmem:[%s21196_s7 + $0xbe4] sm:$0xf0]  ;;  %v9178_v40 = vor.u32 %v13076_v58, %v9177_v56 }
 0x3bc   :  { %7586 = vmatpush.bf16.msrb.mxu1 %v9242_v12  ;;  %v8953_v8 = vld [vmem:[%s21196_s7 + $0x48] sm:$0xf]  ;;  %v10426_v28 = vor.u32 %v13388_v4, %v10425_v1 }
 0x3bd   :  { %7549 = vmatpush.bf16.msra.mxu3 %v12502_v46  ;;  %v13020_v16 = vld [vmem:[%s21196_s7 + $0x64] sm:$0xf0] }
 0x3be   :  { %v9593_v33 = vld [vmem:[%s21196_s7 + $0x548] sm:$0xf]  ;;  %v8954_v9 = vor.u32 %v13020_v16, %v8953_v8 }
 0x3bf   :  { %7610 = vmatpush.bf16.msrb.mxu2 %v9818_v6  ;;  %7572 = vmatpush.bf16.msrb.mxu0 %v9018_v39  ;;  %v13180_v26 = vld [vmem:[%s21196_s7 + $0x564] sm:$0xf0] }
 0x3c0   :  { %7587 = vmatpush.bf16.msrb.mxu1 %v9210_v53  ;;  %7550 = vmatmul.bf16.vlgmr.msra.gmra.mxu3 %v15591_v44  ;;  %v9721_v31 = vld [vmem:[%s21196_s7 + $0x648] sm:$0xf]  ;;  %v9594_v14 = vor.u32 %v13180_v26, %v9593_v33  ;;  %v7358_v53 = vpop.f32.mrf.mxu2 }
 0x3c1   :  { %7594 = vmatpush.bf16.msrb.mxu3 %v9658_v5  ;;  %v13212_v34 = vld [vmem:[%s21196_s7 + $0x664] sm:$0xf0] }
 0x3c2   :  { %v10393_v37 = vld [vmem:[%s21196_s7 + $0xb88] sm:$0xf]  ;;  %v9722_v12 = vor.u32 %v13212_v34, %v9721_v31 }
 0x3c3   :  { %7611 = vmatpush.bf16.msrb.mxu2 %v9786_v24  ;;  %v13380_v13 = vld [vmem:[%s21196_s7 + $0xba4] sm:$0xf0]  ;;  %7573 = vmatpush.bf16.msrb.mxu0 %v8986_v43 }
 0x3c4   :  { %v8921_v63 = vld [vmem:[%s21196_s7 + $0x8] sm:$0xf]  ;;  %7588 = vmatpush.bf16.msrb.mxu1 %v9178_v40  ;;  %v10394_v41 = vor.u32 %v13380_v13, %v10393_v37  ;;  %v7343_v13 = vpop.f32.mrf.mxu3 }
 0x3c5   :  { %7595 = vmatpush.bf16.msrb.mxu3 %v9626_v19  ;;  %v13012_v47 = vld [vmem:[%s21196_s7 + $0x24] sm:$0xf0] }
 0x3c6   :  { %v9561_v6 = vld [vmem:[%s21196_s7 + $0x508] sm:$0xf]  ;;  %v8922_v39 = vor.u32 %v13012_v47, %v8921_v63  ;;  %v7344_v47 = vadd.f32 %v7343_v13, %v16398_v18 }
 0x3c7   :  { %7612 = vmatpush.bf16.msrb.mxu2 %v9754_v11  ;;  %v13172_v45 = vld [vmem:[%s21196_s7 + $0x524] sm:$0xf0]  ;;  %7574 = vmatpush.bf16.msrb.mxu0 %v8954_v9 }
 0x3c8   :  { %v9689_v57 = vld [vmem:[%s21196_s7 + $0x608] sm:$0xf]  ;;  %7633 = vmatpush.bf16.msra.mxu1 %v10426_v28  ;;  %v9562_v5 = vor.u32 %v13172_v45, %v9561_v6  ;;  %v7382_v6 = vpop.f32.mrf.mxu1 }
 0x3c9   :  { %v13204_v52 = vld [vmem:[%s21196_s7 + $0x624] sm:$0xf0]  ;;  %7596 = vmatpush.bf16.msrb.mxu3 %v9594_v14  ;;  %7589 = vmatmul.bf16.vlgmr.msrb.gmra.mxu1 %v15006_v30 }
 0x3ca   :  { %v10169_v51 = vld [vmem:[%s21196_s7 + $0x9c8] sm:$0xf]  ;;  %v9690_v20 = vor.u32 %v13204_v52, %v9689_v57 }
 0x3cb   :  { %v13324_v42 = vld [vmem:[%s21196_s7 + $0x9e4] sm:$0xf0]  ;;  %7613 = vmatpush.bf16.msrb.mxu2 %v9722_v12  ;;  %7575 = vmatpush.bf16.msrb.mxu0 %v8922_v39 }
 0x3cc   :  { %v10937_v21 = vld [vmem:[%s21196_s7 + $0xfc8] sm:$0xf]  ;;  %v10170_v36 = vor.u32 %v13324_v42, %v10169_v51  ;;  %7634 = vmatpush.bf16.msra.mxu1 %v10394_v41 }
 0x3cd   :  { %v13516_v46 = vld [vmem:[%s21196_s7 + $0xfe4] sm:$0xf0]  ;;  %7597 = vmatpush.bf16.msrb.mxu3 %v9562_v5 }
 0x3ce   :  { %v10361_v49 = vld [vmem:[%s21196_s7 + $0xb48] sm:$0xf]  ;;  %v10938_v35 = vor.u32 %v13516_v46, %v10937_v21  ;;  %7576 = vmatmul.bf16.vlgmr.msrb.gmra.mxu0 %v15033_v61  ;;  %v16546_v21 = vadd.f32 %v16418_v25, %v7344_v47  ;;  %v2017_v46 = vperm.slane %v15893_v3, 1 }
 0x3cf   :  { %v13372_v38 = vld [vmem:[%s21196_s7 + $0xb64] sm:$0xf0]  ;;  %7614 = vmatpush.bf16.msrb.mxu2 %v9690_v20  ;;  %7620 = vmatpush.bf16.msra.mxu0 %v10170_v36 }
 0x3d0   :  { %v9529_v10 = vld [vmem:[%s21196_s7 + $0x4c8] sm:$0xf]  ;;  %v10362_v2 = vor.u32 %v13372_v38, %v10361_v49 }
 0x3d1   :  { %v13164_v24 = vld [vmem:[%s21196_s7 + $0x4e4] sm:$0xf0] }
 0x3d2   :  { %v10137_v32 = vld [vmem:[%s21196_s7 + $0x988] sm:$0xf]  ;;  %v9530_v43 = vor.u32 %v13164_v24, %v9529_v10  ;;  %7635 = vmatpush.bf16.msra.mxu1 %v10362_v2  ;;  %7615 = vmatmul.bf16.vlgmr.msrb.gmra.mxu2 %v15041_v0 }
 0x3d3   :  { %v13316_v60 = vld [vmem:[%s21196_s7 + $0x9a4] sm:$0xf0]  ;;  %7659 = vmatpush.bf16.msra.mxu2 %v10938_v35 }
 0x3d4   :  { %v10905_v56 = vld [vmem:[%s21196_s7 + $0xf88] sm:$0xf]  ;;  %v10138_v19 = vor.u32 %v13316_v60, %v10137_v32  ;;  %7598 = vmatpush.bf16.msrb.mxu3 %v9530_v43  ;;  %v7369_v60 = vpop.f32.mrf.mxu0 }
 0x3d5   :  { %v13508_v58 = vld [vmem:[%s21196_s7 + $0xfa4] sm:$0xf0] }
 0x3d6   :  { %v10329_v1 = vld [vmem:[%s21196_s7 + $0xb08] sm:$0xf]  ;;  %v10906_v40 = vor.u32 %v13508_v58, %v10905_v56  ;;  %7621 = vmatpush.bf16.msra.mxu0 %v10138_v19  ;;  %v7370_v58 = vadd.f32 %v7369_v60, %v2017_v46 }
 0x3d7   :  { %v13364_v4 = vld [vmem:[%s21196_s7 + $0xb24] sm:$0xf0] }
 0x3d8   :  { %v9497_v8 = vld [vmem:[%s21196_s7 + $0x488] sm:$0xf]  ;;  %v10330_v16 = vor.u32 %v13364_v4, %v10329_v1  ;;  %7660 = vmatpush.bf16.msra.mxu2 %v10906_v40  ;;  %v7345_v1 = vpop.f32.mrf.mxu3 }
 0x3d9   :  { %v13156_v11 = vld [vmem:[%s21196_s7 + $0x4a4] sm:$0xf0] }
 0x3da   :  { %v10105_v33 = vld [vmem:[%s21196_s7 + $0x948] sm:$0xf]  ;;  %v9498_v37 = vor.u32 %v13156_v11, %v9497_v8  ;;  %7636 = vmatpush.bf16.msra.mxu1 %v10330_v16  ;;  %v7384_v11 = vpop.f32.mrf.mxu1 }
 0x3db   :  { %v13308_v26 = vld [vmem:[%s21196_s7 + $0x964] sm:$0xf0] }
 0x3dc   :  { %v10873_v28 = vld [vmem:[%s21196_s7 + $0xf48] sm:$0xf]  ;;  %v10106_v9 = vor.u32 %v13308_v26, %v10105_v33  ;;  %7599 = vmatpush.bf16.msrb.mxu3 %v9498_v37  ;;  %v16603_v37 = vadd.f32 %v7382_v6, %v7370_v58  ;;  %v7371_v46 = vpop.f32.mrf.mxu0 }
 0x3dd   :  { %v13500_v31 = vld [vmem:[%s21196_s7 + $0xf64] sm:$0xf0] }
 0x3de   :  { %v10297_v34 = vld [vmem:[%s21196_s7 + $0xac8] sm:$0xf]  ;;  %v10874_v12 = vor.u32 %v13500_v31, %v10873_v28  ;;  %7622 = vmatpush.bf16.msra.mxu0 %v10106_v9 }
 0x3df   :  { %v13356_v22 = vld [vmem:[%s21196_s7 + $0xae4] sm:$0xf0] }
 0x3e0   :  { %v9465_v14 = vld [vmem:[%s21196_s7 + $0x448] sm:$0xf]  ;;  %v10298_v45 = vor.u32 %v13356_v22, %v10297_v34  ;;  %7661 = vmatpush.bf16.msra.mxu2 %v10874_v12 }
 0x3e1   :  { %v13148_v63 = vld [vmem:[%s21196_s7 + $0x464] sm:$0xf0] }
 0x3e2   :  { %v10073_v57 = vld [vmem:[%s21196_s7 + $0x908] sm:$0xf]  ;;  %v9466_v49 = vor.u32 %v13148_v63, %v9465_v14  ;;  %7637 = vmatpush.bf16.msra.mxu1 %v10298_v45 }
 0x3e3   :  { %v13300_v52 = vld [vmem:[%s21196_s7 + $0x924] sm:$0xf0] }
 0x3e4   :  { %v10841_v41 = vld [vmem:[%s21196_s7 + $0xf08] sm:$0xf]  ;;  %v10074_v39 = vor.u32 %v13300_v52, %v10073_v57  ;;  %7600 = vmatpush.bf16.msrb.mxu3 %v9466_v49 }
 0x3e5   :  { %v13492_v18 = vld [vmem:[%s21196_s7 + $0xf24] sm:$0xf0] }
 0x3e6   :  { %v10265_v51 = vld [vmem:[%s21196_s7 + $0xa88] sm:$0xf]  ;;  %v10842_v3 = vor.u32 %v13492_v18, %v10841_v41  ;;  %7623 = vmatpush.bf16.msra.mxu0 %v10074_v39  ;;  %v16623_v41 = vpop.f32.mrf.mxu2 }
 0x3e7   :  { %v13348_v42 = vld [vmem:[%s21196_s7 + $0xaa4] sm:$0xf0] }
 0x3e8   :  { %v9433_v38 = vld [vmem:[%s21196_s7 + $0x408] sm:$0xf]  ;;  %v10266_v36 = vor.u32 %v13348_v42, %v10265_v51  ;;  %7662 = vmatpush.bf16.msra.mxu2 %v10842_v3 }
 0x3e9   :  { %v13140_v5 = vld [vmem:[%s21196_s7 + $0x424] sm:$0xf0] }
 0x3ea   :  { %v10041_v20 = vld [vmem:[%s21196_s7 + $0x8c8] sm:$0xf]  ;;  %v9434_v56 = vor.u32 %v13140_v5, %v9433_v38  ;;  %7638 = vmatpush.bf16.msra.mxu1 %v10266_v36 }
 0x3eb   :  { %v13292_v25 = vld [vmem:[%s21196_s7 + $0x8e4] sm:$0xf0] }
 0x3ec   :  { %v10681_v10 = vld [vmem:[%s21196_s7 + $0xdc8] sm:$0xf]  ;;  %v10042_v4 = vor.u32 %v13292_v25, %v10041_v20  ;;  %7601 = vmatpush.bf16.msrb.mxu3 %v9434_v56 }
 0x3ed   :  { %v13452_v24 = vld [vmem:[%s21196_s7 + $0xde4] sm:$0xf0] }
 0x3ee   :  { %v10809_v53 = vld [vmem:[%s21196_s7 + $0xec8] sm:$0xf]  ;;  %v10682_v43 = vor.u32 %v13452_v24, %v10681_v10  ;;  %7624 = vmatpush.bf16.msra.mxu0 %v10042_v4 }
 0x3ef   :  { %v13484_v35 = vld [vmem:[%s21196_s7 + $0xee4] sm:$0xf0]  ;;  %7602 = vmatmul.bf16.vlgmr.msrb.gmra.mxu3 %v15133_v29 }
 0x3f0   :  { %v10233_v2 = vld [vmem:[%s21196_s7 + $0xa48] sm:$0xf]  ;;  %v10810_v40 = vor.u32 %v13484_v35, %v10809_v53  ;;  %7646 = vmatpush.bf16.msra.mxu3 %v10682_v43 }
 0x3f1   :  { %v13340_v32 = vld [vmem:[%s21196_s7 + $0xa64] sm:$0xf0] }
 0x3f2   :  { %v10009_v19 = vld [vmem:[%s21196_s7 + $0x888] sm:$0xf]  ;;  %v10234_v16 = vor.u32 %v13340_v32, %v10233_v2  ;;  %7663 = vmatpush.bf16.msra.mxu2 %v10810_v40 }
 0x3f3   :  { %v13284_v8 = vld [vmem:[%s21196_s7 + $0x8a4] sm:$0xf0] }
 0x3f4   :  { %v10649_v33 = vld [vmem:[%s21196_s7 + $0xd88] sm:$0xf]  ;;  %v10010_v14 = vor.u32 %v13284_v8, %v10009_v19  ;;  %7639 = vmatpush.bf16.msra.mxu1 %v10234_v16  ;;  %v7410_v16 = vpop.f32.mrf.mxu2 }
 0x3f5   :  { %v13444_v26 = vld [vmem:[%s21196_s7 + $0xda4] sm:$0xf0] }
 0x3f6   :  { %v10777_v28 = vld [vmem:[%s21196_s7 + $0xe88] sm:$0xf]  ;;  %v10650_v63 = vor.u32 %v13444_v26, %v10649_v33  ;;  %7625 = vmatpush.bf16.msra.mxu0 %v10010_v14 }
 0x3f7   :  { %v13476_v31 = vld [vmem:[%s21196_s7 + $0xea4] sm:$0xf0] }
 0x3f8   :  { %v10201_v34 = vld [vmem:[%s21196_s7 + $0xa08] sm:$0xf]  ;;  %v10778_v6 = vor.u32 %v13476_v31, %v10777_v28  ;;  %7647 = vmatpush.bf16.msra.mxu3 %v10650_v63 }
 0x3f9   :  { %v13332_v22 = vld [vmem:[%s21196_s7 + $0xa24] sm:$0xf0] }
 0x3fa   :  { %v11449_v13 = vld [vmem:[%s21196_s7 + $0x13c8] sm:$0xf]  ;;  %v10202_v12 = vor.u32 %v13332_v22, %v10201_v34  ;;  %7664 = vmatpush.bf16.msra.mxu2 %v10778_v6 }
 0x3fb   :  { %v13644_v9 = vld [vmem:[%s21196_s7 + $0x13e4] sm:$0xf0] }
 0x3fc   :  { %v9977_v47 = vld [vmem:[%s21196_s7 + $0x848] sm:$0xf]  ;;  %v11450_v18 = vor.u32 %v13644_v9, %v11449_v13  ;;  %7640 = vmatpush.bf16.msra.mxu1 %v10202_v12 }
 0x3fd   :  { %v13276_v45 = vld [vmem:[%s21196_s7 + $0x864] sm:$0xf0] }
 0x3fe   :  { %v10617_v57 = vld [vmem:[%s21196_s7 + $0xd48] sm:$0xf]  ;;  %v9978_v39 = vor.u32 %v13276_v45, %v9977_v47 }
 0x3ff   :  { %v13436_v52 = vld [vmem:[%s21196_s7 + $0xd64] sm:$0xf0]  ;;  %7641 = vmatmul.bf16.vlgmr.msra.gmra.mxu1 %v15093_v27 }
 0x400   :  { %v10745_v51 = vld [vmem:[%s21196_s7 + $0xe48] sm:$0xf]  ;;  %v10618_v5 = vor.u32 %v13436_v52, %v10617_v57  ;;  %7685 = vmatpush.bf16.msrb.mxu1 %v11450_v18  ;;  %7626 = vmatpush.bf16.msra.mxu0 %v9978_v39 }
 0x401   :  { %v13468_v42 = vld [vmem:[%s21196_s7 + $0xe64] sm:$0xf0] }
 0x402   :  { %v11417_v49 = vld [vmem:[%s21196_s7 + $0x1388] sm:$0xf]  ;;  %v10746_v36 = vor.u32 %v13468_v42, %v10745_v51  ;;  %7648 = vmatpush.bf16.msra.mxu3 %v10618_v5 }
 0x403   :  { %v13636_v38 = vld [vmem:[%s21196_s7 + $0x13a4] sm:$0xf0] }
 0x404   :  { %v9945_v20 = vld [vmem:[%s21196_s7 + $0x808] sm:$0xf]  ;;  %v11418_v35 = vor.u32 %v13636_v38, %v11417_v49  ;;  %7665 = vmatpush.bf16.msra.mxu2 %v10746_v36  ;;  %v7395_v38 = vpop.f32.mrf.mxu3 }
 0x405   :  { %v13268_v25 = vld [vmem:[%s21196_s7 + $0x824] sm:$0xf0] }
 0x406   :  { %v10585_v3 = vld [vmem:[%s21196_s7 + $0xd08] sm:$0xf]  ;;  %v9946_v4 = vor.u32 %v13268_v25, %v9945_v20  ;;  %7686 = vmatpush.bf16.msrb.mxu1 %v11418_v35  ;;  %v7396_v25 = vadd.f32 %v7395_v38, %v16603_v37 }
 0x407   :  { %v13428_v10 = vld [vmem:[%s21196_s7 + $0xd24] sm:$0xf0] }
 0x408   :  { %v10713_v24 = vld [vmem:[%s21196_s7 + $0xe08] sm:$0xf]  ;;  %v10586_v43 = vor.u32 %v13428_v10, %v10585_v3  ;;  %7627 = vmatpush.bf16.msra.mxu0 %v9946_v4  ;;  %v7434_v3 = vpop.f32.mrf.mxu1 }
 0x409   :  { %v13460_v53 = vld [vmem:[%s21196_s7 + $0xe24] sm:$0xf0] }
 0x40a   :  { %v11193_v2 = vld [vmem:[%s21196_s7 + $0x11c8] sm:$0xf]  ;;  %v10714_v19 = vor.u32 %v13460_v53, %v10713_v24  ;;  %7649 = vmatpush.bf16.msra.mxu3 %v10586_v43 }
 0x40b   :  { %v13580_v32 = vld [vmem:[%s21196_s7 + $0x11e4] sm:$0xf0]  ;;  %7628 = vmatmul.bf16.vlgmr.msra.gmra.mxu0 %v15131_v62 }
 0x40c   :  { %v11961_v60 = vld [vmem:[%s21196_s7 + $0x17c8] sm:$0xf]  ;;  %v11194_v8 = vor.u32 %v13580_v32, %v11193_v2  ;;  %7666 = vmatpush.bf16.msra.mxu2 %v10714_v19 }
 0x40d   :  { %v13772_v56 = vld [vmem:[%s21196_s7 + $0x17e4] sm:$0xf0] }
 0x40e   :  { %v11385_v58 = vld [vmem:[%s21196_s7 + $0x1348] sm:$0xf]  ;;  %v11962_v33 = vor.u32 %v13772_v56, %v11961_v60  ;;  %7672 = vmatpush.bf16.msrb.mxu0 %v11194_v8  ;;  %v7409_v60 = vadd.f32 %v16623_v41, %v7396_v25 }
 0x40f   :  { %v13628_v1 = vld [vmem:[%s21196_s7 + $0x1364] sm:$0xf0]  ;;  %7667 = vmatmul.bf16.vlgmr.msra.gmra.mxu2 %v15144_v7 }
 0x410   :  { %v10553_v11 = vld [vmem:[%s21196_s7 + $0xcc8] sm:$0xf]  ;;  %v11386_v26 = vor.u32 %v13628_v1, %v11385_v58  ;;  %7711 = vmatpush.bf16.msrb.mxu2 %v11962_v33 }
 0x411   :  { %v13420_v40 = vld [vmem:[%s21196_s7 + $0xce4] sm:$0xf0] }
 0x412   :  { %v11161_v28 = vld [vmem:[%s21196_s7 + $0x1188] sm:$0xf]  ;;  %v10554_v14 = vor.u32 %v13420_v40, %v10553_v11  ;;  %7687 = vmatpush.bf16.msrb.mxu1 %v11386_v26 }
 0x413   :  { %v13572_v31 = vld [vmem:[%s21196_s7 + $0x11a4] sm:$0xf0] }
 0x414   :  { %v11929_v34 = vld [vmem:[%s21196_s7 + $0x1788] sm:$0xf]  ;;  %v11162_v63 = vor.u32 %v13572_v31, %v11161_v28  ;;  %7650 = vmatpush.bf16.msra.mxu3 %v10554_v14  ;;  %v7421_v31 = vpop.f32.mrf.mxu0 }
 0x415   :  { %v13764_v22 = vld [vmem:[%s21196_s7 + $0x17a4] sm:$0xf0] }
 0x416   :  { %v11353_v13 = vld [vmem:[%s21196_s7 + $0x1308] sm:$0xf]  ;;  %v11930_v12 = vor.u32 %v13764_v22, %v11929_v34  ;;  %7673 = vmatpush.bf16.msrb.mxu0 %v11162_v63  ;;  %v7422_v22 = vadd.f32 %v7421_v31, %v7409_v60 }
 0x417   :  { %v13620_v9 = vld [vmem:[%s21196_s7 + $0x1324] sm:$0xf0] }
 0x418   :  { %v10521_v47 = vld [vmem:[%s21196_s7 + $0xc88] sm:$0xf]  ;;  %v11354_v45 = vor.u32 %v13620_v9, %v11353_v13  ;;  %7712 = vmatpush.bf16.msrb.mxu2 %v11930_v12  ;;  %v7397_v13 = vpop.f32.mrf.mxu3 }
 0x419   :  { %v13412_v6 = vld [vmem:[%s21196_s7 + $0xca4] sm:$0xf0] }
 0x41a   :  { %v11129_v57 = vld [vmem:[%s21196_s7 + $0x1148] sm:$0xf]  ;;  %v10522_v49 = vor.u32 %v13412_v6, %v10521_v47  ;;  %7688 = vmatpush.bf16.msrb.mxu1 %v11354_v45  ;;  %v7436_v6 = vpop.f32.mrf.mxu1 }
 0x41b   :  { %v13564_v52 = vld [vmem:[%s21196_s7 + $0x1164] sm:$0xf0] }
 0x41c   :  { %v11897_v18 = vld [vmem:[%s21196_s7 + $0x1748] sm:$0xf]  ;;  %v11130_v39 = vor.u32 %v13564_v52, %v11129_v57  ;;  %7651 = vmatpush.bf16.msra.mxu3 %v10522_v49  ;;  %v16805_v49 = vadd.f32 %v7434_v3, %v7422_v22  ;;  %v7423_v60 = vpop.f32.mrf.mxu0 }
 0x41d   :  { %v13756_v51 = vld [vmem:[%s21196_s7 + $0x1764] sm:$0xf0] }
 0x41e   :  { %v11321_v42 = vld [vmem:[%s21196_s7 + $0x12c8] sm:$0xf]  ;;  %v11898_v36 = vor.u32 %v13756_v51, %v11897_v18  ;;  %7674 = vmatpush.bf16.msrb.mxu0 %v11130_v39 }
 0x41f   :  { %v13612_v46 = vld [vmem:[%s21196_s7 + $0x12e4] sm:$0xf0] }
 0x420   :  { %v10489_v5 = vld [vmem:[%s21196_s7 + $0xc48] sm:$0xf]  ;;  %v11322_v10 = vor.u32 %v13612_v46, %v11321_v42  ;;  %7713 = vmatpush.bf16.msrb.mxu2 %v11898_v36 }
 0x421   :  { %v13404_v20 = vld [vmem:[%s21196_s7 + $0xc64] sm:$0xf0] }
 0x422   :  { %v11097_v24 = vld [vmem:[%s21196_s7 + $0x1108] sm:$0xf]  ;;  %v10490_v56 = vor.u32 %v13404_v20, %v10489_v5  ;;  %7689 = vmatpush.bf16.msrb.mxu1 %v11322_v10 }
 0x423   :  { %v13556_v53 = vld [vmem:[%s21196_s7 + $0x1124] sm:$0xf0] }
 0x424   :  { %v11865_v35 = vld [vmem:[%s21196_s7 + $0x1708] sm:$0xf]  ;;  %v11098_v1 = vor.u32 %v13556_v53, %v11097_v24  ;;  %7652 = vmatpush.bf16.msra.mxu3 %v10490_v56 }
 0x425   :  { %v13748_v37 = vld [vmem:[%s21196_s7 + $0x1724] sm:$0xf0] }
 0x426   :  { %v11289_v2 = vld [vmem:[%s21196_s7 + $0x1288] sm:$0xf]  ;;  %v11866_v41 = vor.u32 %v13748_v37, %v11865_v35  ;;  %7675 = vmatpush.bf16.msrb.mxu0 %v11098_v1  ;;  %v16825_v35 = vpop.f32.mrf.mxu2 }
 0x427   :  { %v13604_v32 = vld [vmem:[%s21196_s7 + $0x12a4] sm:$0xf0] }
 0x428   :  { %v10457_v58 = vld [vmem:[%s21196_s7 + $0xc08] sm:$0xf]  ;;  %v11290_v8 = vor.u32 %v13604_v32, %v11289_v2  ;;  %7714 = vmatpush.bf16.msrb.mxu2 %v11866_v41 }
 0x429   :  { %v13396_v4 = vld [vmem:[%s21196_s7 + $0xc24] sm:$0xf0] }
 0x42a   :  { %v11065_v43 = vld [vmem:[%s21196_s7 + $0x10c8] sm:$0xf]  ;;  %v10458_v34 = vor.u32 %v13396_v4, %v10457_v58  ;;  %7690 = vmatpush.bf16.msrb.mxu1 %v11290_v8 }
 0x42b   :  { %v13548_v19 = vld [vmem:[%s21196_s7 + $0x10e4] sm:$0xf0] }
 0x42c   :  { %v11705_v11 = vld [vmem:[%s21196_s7 + $0x15c8] sm:$0xf]  ;;  %v11066_v9 = vor.u32 %v13548_v19, %v11065_v43  ;;  %7653 = vmatpush.bf16.msra.mxu3 %v10458_v34 }
 0x42d   :  { %v13708_v40 = vld [vmem:[%s21196_s7 + $0x15e4] sm:$0xf0] }
 0x42e   :  { %v11833_v16 = vld [vmem:[%s21196_s7 + $0x16c8] sm:$0xf]  ;;  %v11706_v14 = vor.u32 %v13708_v40, %v11705_v11  ;;  %7676 = vmatpush.bf16.msrb.mxu0 %v11066_v9 }
 0x42f   :  { %v13740_v33 = vld [vmem:[%s21196_s7 + $0x16e4] sm:$0xf0]  ;;  %7654 = vmatmul.bf16.vlgmr.msra.gmra.mxu3 %v15264_v17 }
 0x430   :  { %v11257_v26 = vld [vmem:[%s21196_s7 + $0x1248] sm:$0xf]  ;;  %v11834_v12 = vor.u32 %v13740_v33, %v11833_v16  ;;  %7698 = vmatpush.bf16.msrb.mxu3 %v11706_v14 }
 0x431   :  { %v13596_v28 = vld [vmem:[%s21196_s7 + $0x1264] sm:$0xf0] }
 0x432   :  { %v11033_v63 = vld [vmem:[%s21196_s7 + $0x1088] sm:$0xf]  ;;  %v11258_v45 = vor.u32 %v13596_v28, %v11257_v26  ;;  %7715 = vmatpush.bf16.msrb.mxu2 %v11834_v12 }
 0x433   :  { %v13540_v47 = vld [vmem:[%s21196_s7 + $0x10a4] sm:$0xf0] }
 0x434   :  { %v11673_v57 = vld [vmem:[%s21196_s7 + $0x1588] sm:$0xf]  ;;  %v11034_v5 = vor.u32 %v13540_v47, %v11033_v63  ;;  %7691 = vmatpush.bf16.msrb.mxu1 %v11258_v45  ;;  %v7462_v45 = vpop.f32.mrf.mxu2 }
 0x435   :  { %v13700_v52 = vld [vmem:[%s21196_s7 + $0x15a4] sm:$0xf0] }
 0x436   :  { %v11801_v18 = vld [vmem:[%s21196_s7 + $0x1688] sm:$0xf]  ;;  %v11674_v20 = vor.u32 %v13700_v52, %v11673_v57  ;;  %7677 = vmatpush.bf16.msrb.mxu0 %v11034_v5 }
 0x437   :  { %v13732_v51 = vld [vmem:[%s21196_s7 + $0x16a4] sm:$0xf0] }
 0x438   :  { %v11225_v42 = vld [vmem:[%s21196_s7 + $0x1208] sm:$0xf]  ;;  %v11802_v3 = vor.u32 %v13732_v51, %v11801_v18  ;;  %7699 = vmatpush.bf16.msrb.mxu3 %v11674_v20 }
 0x439   :  { %v13588_v46 = vld [vmem:[%s21196_s7 + $0x1224] sm:$0xf0] }
 0x43a   :  { %v12473_v38 = vld [vmem:[%s21196_s7 + $0x1bc8] sm:$0xf]  ;;  %v11226_v36 = vor.u32 %v13588_v46, %v11225_v42  ;;  %7716 = vmatpush.bf16.msrb.mxu2 %v11802_v3 }
 0x43b   :  { %v13900_v39 = vld [vmem:[%s21196_s7 + $0x1be4] sm:$0xf0] }
 0x43c   :  { %v11001_v25 = vld [vmem:[%s21196_s7 + $0x1048] sm:$0xf]  ;;  %v12474_v37 = vor.u32 %v13900_v39, %v12473_v38  ;;  %7692 = vmatpush.bf16.msrb.mxu1 %v11226_v36 }
 0x43d   :  { %v13532_v10 = vld [vmem:[%s21196_s7 + $0x1064] sm:$0xf0] }
 0x43e   :  { %v11641_v24 = vld [vmem:[%s21196_s7 + $0x1548] sm:$0xf]  ;;  %v11002_v1 = vor.u32 %v13532_v10, %v11001_v25 }
 0x43f   :  { %v13692_v53 = vld [vmem:[%s21196_s7 + $0x1564] sm:$0xf0]  ;;  %7693 = vmatmul.bf16.vlgmr.msrb.gmra.mxu1 %v15222_v59 }
 0x440   :  { %v11769_v2 = vld [vmem:[%s21196_s7 + $0x1648] sm:$0xf]  ;;  %v11642_v4 = vor.u32 %v13692_v53, %v11641_v24  ;;  %7737 = vmatpush.bf16.msra.mxu1 %v12474_v37  ;;  %7678 = vmatpush.bf16.msrb.mxu0 %v11002_v1 }
 0x441   :  { %v13724_v32 = vld [vmem:[%s21196_s7 + $0x1664] sm:$0xf0] }
 0x442   :  { %v12441_v56 = vld [vmem:[%s21196_s7 + $0x1b88] sm:$0xf]  ;;  %v11770_v8 = vor.u32 %v13724_v32, %v11769_v2  ;;  %7700 = vmatpush.bf16.msrb.mxu3 %v11642_v4 }
 0x443   :  { %v13892_v58 = vld [vmem:[%s21196_s7 + $0x1ba4] sm:$0xf0] }
 0x444   :  { %v10969_v43 = vld [vmem:[%s21196_s7 + $0x1008] sm:$0xf]  ;;  %v12442_v33 = vor.u32 %v13892_v58, %v12441_v56  ;;  %7717 = vmatpush.bf16.msrb.mxu2 %v11770_v8  ;;  %v16927_v58 = vpop.f32.mrf.mxu3 }
 0x445   :  { %v13524_v19 = vld [vmem:[%s21196_s7 + $0x1024] sm:$0xf0] }
 0x446   :  { %v11609_v41 = vld [vmem:[%s21196_s7 + $0x1508] sm:$0xf]  ;;  %v10970_v9 = vor.u32 %v13524_v19, %v10969_v43  ;;  %7738 = vmatpush.bf16.msra.mxu1 %v12442_v33  ;;  %v16935_v19 = vpop.f32.mrf.mxu1 }
 0x447   :  { %v13684_v11 = vld [vmem:[%s21196_s7 + $0x1524] sm:$0xf0] }
 0x448   :  { %v11737_v40 = vld [vmem:[%s21196_s7 + $0x1608] sm:$0xf]  ;;  %v11610_v14 = vor.u32 %v13684_v11, %v11609_v41  ;;  %7679 = vmatpush.bf16.msrb.mxu0 %v10970_v9 }
 0x449   :  { %v13716_v16 = vld [vmem:[%s21196_s7 + $0x1624] sm:$0xf0] }
 0x44a   :  { %v12217_v26 = vld [vmem:[%s21196_s7 + $0x19c8] sm:$0xf]  ;;  %v11738_v63 = vor.u32 %v13716_v16, %v11737_v40  ;;  %7701 = vmatpush.bf16.msrb.mxu3 %v11610_v14 }
 0x44b   :  { %v13836_v28 = vld [vmem:[%s21196_s7 + $0x19e4] sm:$0xf0]  ;;  %7680 = vmatmul.bf16.vlgmr.msrb.gmra.mxu0 %v15266_v55 }
 0x44c   :  { %v12985_v31 = vld [vmem:[%s21196_s7 + $0x1fc8] sm:$0xf]  ;;  %v12218_v47 = vor.u32 %v13836_v28, %v12217_v26  ;;  %7718 = vmatpush.bf16.msrb.mxu2 %v11738_v63 }
 0x44d   :  { %v14028_v34 = vld [vmem:[%s21196_s7 + $0x1fe4] sm:$0xf0] }
 0x44e   :  { %v12409_v22 = vld [vmem:[%s21196_s7 + $0x1b48] sm:$0xf]  ;;  %v12986_v57 = vor.u32 %v14028_v34, %v12985_v31  ;;  %7724 = vmatpush.bf16.msra.mxu0 %v12218_v47 }
 0x44f   :  { %v13884_v13 = vld [vmem:[%s21196_s7 + $0x1b64] sm:$0xf0]  ;;  %7719 = vmatmul.bf16.vlgmr.msrb.gmra.mxu2 %v15268_v50 }
 0x450   :  { %v11577_v6 = vld [vmem:[%s21196_s7 + $0x14c8] sm:$0xf]  ;;  %v12410_v52 = vor.u32 %v13884_v13, %v12409_v22  ;;  %7763 = vmatpush.bf16.msra.mxu2 %v12986_v57 }
 0x451   :  { %v13676_v12 = vld [vmem:[%s21196_s7 + $0x14e4] sm:$0xf0] }
 0x452   :  { %v12185_v18 = vld [vmem:[%s21196_s7 + $0x1988] sm:$0xf]  ;;  %v11578_v5 = vor.u32 %v13676_v12, %v11577_v6  ;;  %7739 = vmatpush.bf16.msra.mxu1 %v12410_v52 }
 0x453   :  { %v13828_v51 = vld [vmem:[%s21196_s7 + $0x19a4] sm:$0xf0] }
 0x454   :  { %v12953_v42 = vld [vmem:[%s21196_s7 + $0x1f88] sm:$0xf]  ;;  %v12186_v20 = vor.u32 %v13828_v51, %v12185_v18  ;;  %7702 = vmatpush.bf16.msrb.mxu3 %v11578_v5  ;;  %v16985_v51 = vpop.f32.mrf.mxu0 }
 0x455   :  { %v14020_v46 = vld [vmem:[%s21196_s7 + $0x1fa4] sm:$0xf0] }
 0x456   :  { %v12377_v38 = vld [vmem:[%s21196_s7 + $0x1b08] sm:$0xf]  ;;  %v12954_v36 = vor.u32 %v14020_v46, %v12953_v42  ;;  %7725 = vmatpush.bf16.msra.mxu0 %v12186_v20  ;;  %v7449_v46 = vpop.f32.mrf.mxu3 }
 0x457   :  { %v13876_v39 = vld [vmem:[%s21196_s7 + $0x1b24] sm:$0xf0]  ;;  %v9147_v46 = vld [vmem:[%s21196_s7 + $0x1e8] sm:$0xf0] }
 0x458   :  { %v11545_v25 = vld [vmem:[%s21196_s7 + $0x1488] sm:$0xf]  ;;  %v12378_v10 = vor.u32 %v13876_v39, %v12377_v38  ;;  %7764 = vmatpush.bf16.msra.mxu2 %v12954_v36 }
 0x459   :  { %v13668_v3 = vld [vmem:[%s21196_s7 + $0x14a4] sm:$0xf0] }
 0x45a   :  { %v12153_v24 = vld [vmem:[%s21196_s7 + $0x1948] sm:$0xf]  ;;  %v11546_v56 = vor.u32 %v13668_v3, %v11545_v25  ;;  %7740 = vmatpush.bf16.msra.mxu1 %v12378_v10  ;;  %v7488_v25 = vpop.f32.mrf.mxu1 }
 0x45b   :  { %v13820_v53 = vld [vmem:[%s21196_s7 + $0x1964] sm:$0xf0] }
 0x45c   :  { %v12921_v37 = vld [vmem:[%s21196_s7 + $0x1f48] sm:$0xf]  ;;  %v12154_v1 = vor.u32 %v13820_v53, %v12153_v24  ;;  %7703 = vmatpush.bf16.msrb.mxu3 %v11546_v56  ;;  %v9403_v56 = vld [vmem:[%s21196_s7 + $0x3e8] sm:$0xf0] }
 0x45d   :  { %v14012_v2 = vld [vmem:[%s21196_s7 + $0x1f64] sm:$0xf0] }
 0x45e   :  { %v12345_v32 = vld [vmem:[%s21196_s7 + $0x1ac8] sm:$0xf]  ;;  %v12922_v41 = vor.u32 %v14012_v2, %v12921_v37  ;;  %7726 = vmatpush.bf16.msra.mxu0 %v12154_v1 }
 0x45f   :  { %v13868_v60 = vld [vmem:[%s21196_s7 + $0x1ae4] sm:$0xf0] }
 0x460   :  { %v11513_v4 = vld [vmem:[%s21196_s7 + $0x1448] sm:$0xf]  ;;  %v12346_v8 = vor.u32 %v13868_v60, %v12345_v32  ;;  %7765 = vmatpush.bf16.msra.mxu2 %v12922_v41  ;;  %v13128_v60 = vld [vmem:[%s21196_s7 + $0x3cc] sm:$0xf] }
 0x461   :  { %v13660_v43 = vld [vmem:[%s21196_s7 + $0x1464] sm:$0xf0] }
 0x462   :  { %v12121_v11 = vld [vmem:[%s21196_s7 + $0x1908] sm:$0xf]  ;;  %v11514_v31 = vor.u32 %v13660_v43, %v11513_v4  ;;  %7741 = vmatpush.bf16.msra.mxu1 %v12346_v8 }
 0x463   :  { %v13812_v40 = vld [vmem:[%s21196_s7 + $0x1924] sm:$0xf0] }
 0x464   :  { %v12889_v16 = vld [vmem:[%s21196_s7 + $0x1f08] sm:$0xf]  ;;  %v12122_v22 = vor.u32 %v13812_v40, %v12121_v11  ;;  %7704 = vmatpush.bf16.msrb.mxu3 %v11514_v31 }
 0x465   :  { %v14004_v33 = vld [vmem:[%s21196_s7 + $0x1f24] sm:$0xf0] }
 0x466   :  { %v12313_v26 = vld [vmem:[%s21196_s7 + $0x1a88] sm:$0xf]  ;;  %v12890_v63 = vor.u32 %v14004_v33, %v12889_v16  ;;  %7727 = vmatpush.bf16.msra.mxu0 %v12122_v22  ;;  %v17029_v33 = vpop.f32.mrf.mxu2  ;;  %v13120_v22 = vld [vmem:[%s21196_s7 + $0x38c] sm:$0xf] }
 0x467   :  { %v13860_v28 = vld [vmem:[%s21196_s7 + $0x1aa4] sm:$0xf0] }
 0x468   :  { %v11481_v34 = vld [vmem:[%s21196_s7 + $0x1408] sm:$0xf]  ;;  %v12314_v47 = vor.u32 %v13860_v28, %v12313_v26  ;;  %7766 = vmatpush.bf16.msra.mxu2 %v12890_v63  ;;  %v9406_v26 = vor.u32 %v13128_v60, %v9403_v56  ;;  %v13056_v60 = vld [vmem:[%s21196_s7 + $0x18c] sm:$0xf] }
 0x469   :  { %v13652_v13 = vld [vmem:[%s21196_s7 + $0x1424] sm:$0xf0]  ;;  %v9115_v56 = vld [vmem:[%s21196_s7 + $0x1a8] sm:$0xf0] }
 0x46a   :  { %v12089_v9 = vld [vmem:[%s21196_s7 + $0x18c8] sm:$0xf]  ;;  %v11482_v42 = vor.u32 %v13652_v13, %v11481_v34  ;;  %7742 = vmatpush.bf16.msra.mxu1 %v12314_v47  ;;  %v7475_v34 = vpop.f32.mrf.mxu0  ;;  %v9371_v13 = vld [vmem:[%s21196_s7 + $0x3a8] sm:$0xf0] }
 0x46b   :  { %v13804_v14 = vld [vmem:[%s21196_s7 + $0x18e4] sm:$0xf0]  ;;  %v9083_v34 = vld [vmem:[%s21196_s7 + $0x168] sm:$0xf0] }
 0x46c   :  { %v12729_v6 = vld [vmem:[%s21196_s7 + $0x1dc8] sm:$0xf]  ;;  %v12090_v38 = vor.u32 %v13804_v14, %v12089_v9  ;;  %7705 = vmatpush.bf16.msrb.mxu3 %v11482_v42  ;;  %v13064_v42 = vld [vmem:[%s21196_s7 + $0x1cc] sm:$0xf] }
 0x46d   :  { %v13964_v12 = vld [vmem:[%s21196_s7 + $0x1de4] sm:$0xf0] }
 0x46e   :  { %v12857_v45 = vld [vmem:[%s21196_s7 + $0x1ec8] sm:$0xf]  ;;  %v12730_v39 = vor.u32 %v13964_v12, %v12729_v6  ;;  %7728 = vmatpush.bf16.msra.mxu0 %v12090_v38  ;;  %v13256_v38 = vld [vmem:[%s21196_s7 + $0x7cc] sm:$0xf] }
 0x46f   :  { %v13996_v57 = vld [vmem:[%s21196_s7 + $0x1ee4] sm:$0xf0]  ;;  %7706 = vmatmul.bf16.vlgmr.msrb.gmra.mxu3 %v15377_v15 }
 0x470   :  { %v12281_v52 = vld [vmem:[%s21196_s7 + $0x1a48] sm:$0xf]  ;;  %v12858_v3 = vor.u32 %v13996_v57, %v12857_v45  ;;  %7750 = vmatpush.bf16.msra.mxu3 %v12730_v39  ;;  %v9915_v39 = vld [vmem:[%s21196_s7 + $0x7e8] sm:$0xf0] }
 0x471   :  { %v13852_v18 = vld [vmem:[%s21196_s7 + $0x1a64] sm:$0xf0] }
 0x472   :  { %v12057_v5 = vld [vmem:[%s21196_s7 + $0x1888] sm:$0xf]  ;;  %v12282_v36 = vor.u32 %v13852_v18, %v12281_v52  ;;  %7767 = vmatpush.bf16.msra.mxu2 %v12858_v3  ;;  %v9374_v18 = vor.u32 %v13120_v22, %v9371_v13  ;;  %v13240_v22 = vld [vmem:[%s21196_s7 + $0x74c] sm:$0xf] }
 0x473   :  { %v13796_v20 = vld [vmem:[%s21196_s7 + $0x18a4] sm:$0xf0]  ;;  %v9851_v13 = vld [vmem:[%s21196_s7 + $0x768] sm:$0xf0] }
 0x474   :  { %v12697_v10 = vld [vmem:[%s21196_s7 + $0x1d88] sm:$0xf]  ;;  %v12058_v1 = vor.u32 %v13796_v20, %v12057_v5  ;;  %7743 = vmatpush.bf16.msra.mxu1 %v12282_v36  ;;  %v13112_v5 = vld [vmem:[%s21196_s7 + $0x34c] sm:$0xf] }
 0x475   :  { %v13956_v24 = vld [vmem:[%s21196_s7 + $0x1da4] sm:$0xf0]  ;;  %v9339_v20 = vld [vmem:[%s21196_s7 + $0x368] sm:$0xf0] }
 0x476   :  { %v12825_v53 = vld [vmem:[%s21196_s7 + $0x1e88] sm:$0xf]  ;;  %v12698_v4 = vor.u32 %v13956_v24, %v12697_v10  ;;  %7729 = vmatpush.bf16.msra.mxu0 %v12058_v1  ;;  %v9150_v10 = vor.u32 %v13064_v42, %v9147_v46  ;;  %v13248_v1 = vld [vmem:[%s21196_s7 + $0x78c] sm:$0xf] }
 0x477   :  { %v13988_v37 = vld [vmem:[%s21196_s7 + $0x1ea4] sm:$0xf0]  ;;  %v13040_v42 = vld [vmem:[%s21196_s7 + $0x10c] sm:$0xf] }
 0x478   :  { %v12249_v2 = vld [vmem:[%s21196_s7 + $0x1a08] sm:$0xf]  ;;  %v12826_v41 = vor.u32 %v13988_v37, %v12825_v53  ;;  %7751 = vmatpush.bf16.msra.mxu3 %v12698_v4  ;;  %v7514_v37 = vpop.f32.mrf.mxu2  ;;  %v9883_v4 = vld [vmem:[%s21196_s7 + $0x7a8] sm:$0xf0] }
 0x479   :  { %v13844_v32 = vld [vmem:[%s21196_s7 + $0x1a24] sm:$0xf0]  ;;  %v9051_v46 = vld [vmem:[%s21196_s7 + $0x128] sm:$0xf0] }
 0x47a   :  { %v12025_v43 = vld [vmem:[%s21196_s7 + $0x1848] sm:$0xf]  ;;  %v12250_v8 = vor.u32 %v13844_v32, %v12249_v2  ;;  %7768 = vmatpush.bf16.msra.mxu2 %v12826_v41  ;;  %v9918_v2 = vor.u32 %v13256_v38, %v9915_v39  ;;  %v9342_v32 = vor.u32 %v13112_v5, %v9339_v20  ;;  %v9307_v41 = vld [vmem:[%s21196_s7 + $0x328] sm:$0xf0] }
 0x47b   :  { %v13788_v11 = vld [vmem:[%s21196_s7 + $0x1864] sm:$0xf0]  ;;  %v13232_v38 = vld [vmem:[%s21196_s7 + $0x70c] sm:$0xf] }
 0x47c   :  { %v12665_v40 = vld [vmem:[%s21196_s7 + $0x1d48] sm:$0xf]  ;;  %v12026_v9 = vor.u32 %v13788_v11, %v12025_v43  ;;  %7744 = vmatpush.bf16.msra.mxu1 %v12250_v8  ;;  %v13104_v43 = vld [vmem:[%s21196_s7 + $0x30c] sm:$0xf]  ;;  %v9118_v11 = vor.u32 %v13056_v60, %v9115_v56 }
 0x47d   :  { %v13948_v16 = vld [vmem:[%s21196_s7 + $0x1d64] sm:$0xf0]  ;;  %v9819_v39 = vld [vmem:[%s21196_s7 + $0x728] sm:$0xf0] }
 0x47e   :  { %v12793_v28 = vld [vmem:[%s21196_s7 + $0x1e48] sm:$0xf]  ;;  %v12666_v14 = vor.u32 %v13948_v16, %v12665_v40  ;;  %7730 = vmatpush.bf16.msra.mxu0 %v12026_v9  ;;  %v13096_v9 = vld [vmem:[%s21196_s7 + $0x2cc] sm:$0xf]  ;;  %v9822_v37 = vor.u32 %v13232_v38, %v9819_v39 }
 0x47f   :  { %v13980_v31 = vld [vmem:[%s21196_s7 + $0x1e64] sm:$0xf0]  ;;  %7745 = vmatmul.bf16.vlgmr.msra.gmra.mxu1 %v15440_v48  ;;  %v13088_v5 = vld [vmem:[%s21196_s7 + $0x28c] sm:$0xf] }
 0x480   :  { %v11993_v63 = vld [vmem:[%s21196_s7 + $0x1808] sm:$0xf]  ;;  %v12794_v12 = vor.u32 %v13980_v31, %v12793_v28  ;;  %7789 = vmatpush.bf16.msrb.mxu1 %v9406_v26  ;;  %7752 = vmatpush.bf16.msra.mxu3 %v12666_v14  ;;  %v9886_v26 = vor.u32 %v13248_v1, %v9883_v4  ;;  %v9310_v28 = vor.u32 %v13104_v43, %v9307_v41  ;;  %v13048_v31 = vld [vmem:[%s21196_s7 + $0x14c] sm:$0xf] }
 0x481   :  { %v13780_v47 = vld [vmem:[%s21196_s7 + $0x1824] sm:$0xf0]  ;;  %v9275_v14 = vld [vmem:[%s21196_s7 + $0x2e8] sm:$0xf0]  ;;  %v7448_v1 = vadd.f32 %v16927_v58, %v16805_v49 }
 0x482   :  { %v12633_v6 = vld [vmem:[%s21196_s7 + $0x1d08] sm:$0xf]  ;;  %v11994_v25 = vor.u32 %v13780_v47, %v11993_v63  ;;  %7769 = vmatpush.bf16.msra.mxu2 %v12794_v12  ;;  %v17131_v47 = vpop.f32.mrf.mxu3  ;;  %v9243_v20 = vld [vmem:[%s21196_s7 + $0x2a8] sm:$0xf0] }
 0x483   :  { %v13940_v45 = vld [vmem:[%s21196_s7 + $0x1d24] sm:$0xf0]  ;;  %v9659_v60 = vld [vmem:[%s21196_s7 + $0x5e8] sm:$0xf0] }
 0x484   :  { %v12761_v57 = vld [vmem:[%s21196_s7 + $0x1e08] sm:$0xf]  ;;  %v12634_v3 = vor.u32 %v13940_v45, %v12633_v6  ;;  %7790 = vmatpush.bf16.msrb.mxu1 %v9374_v18  ;;  %7731 = vmatpush.bf16.msra.mxu0 %v11994_v25  ;;  %v9086_v6 = vor.u32 %v13048_v31, %v9083_v34  ;;  %v9278_v18 = vor.u32 %v13096_v9, %v9275_v14  ;;  %v13224_v56 = vld [vmem:[%s21196_s7 + $0x6cc] sm:$0xf] }
 0x485   :  { %v13972_v52 = vld [vmem:[%s21196_s7 + $0x1e24] sm:$0xf0]  ;;  %v9787_v4 = vld [vmem:[%s21196_s7 + $0x6e8] sm:$0xf0]  ;;  %v7461_v14 = vadd.f32 %v16825_v35, %v7448_v1 }
 0x486   :  { %v12762_v36 = vor.u32 %v13972_v52, %v12761_v57  ;;  %v12601_v24 = vld [vmem:[%s21196_s7 + $0x1cc8] sm:$0xf]  ;;  %7753 = vmatpush.bf16.msra.mxu3 %v12634_v3  ;;  %v17139_v57 = vpop.f32.mrf.mxu1  ;;  %v9854_v52 = vor.u32 %v13240_v22, %v9851_v13  ;;  %v13080_v43 = vld [vmem:[%s21196_s7 + $0x24c] sm:$0xf]  ;;  %v9790_v31 = vor.u32 %v13224_v56, %v9787_v4 }
 0x487   :  { %v13932_v53 = vld [vmem:[%s21196_s7 + $0x1ce4] sm:$0xf0]  ;;  %7732 = vmatmul.bf16.vlgmr.msra.gmra.mxu0 %v15476_v23  ;;  %v9211_v41 = vld [vmem:[%s21196_s7 + $0x268] sm:$0xf0] }
 0x488   :  { %v12602_v8 = vor.u32 %v13932_v53, %v12601_v24  ;;  %7770 = vmatpush.bf16.msra.mxu2 %v12762_v36  ;;  %7776 = vmatpush.bf16.msrb.mxu0 %v9150_v10  ;;  %v12569_v40 = vld [vmem:[%s21196_s7 + $0x1c88] sm:$0xf]  ;;  %v9054_v36 = vor.u32 %v13040_v42, %v9051_v46  ;;  %v13032_v24 = vld [vmem:[%s21196_s7 + $0xcc] sm:$0xf]  ;;  %v9214_v34 = vor.u32 %v13080_v43, %v9211_v41 }
 0x489   :  { %v13924_v16 = vld [vmem:[%s21196_s7 + $0x1ca4] sm:$0xf0]  ;;  %7791 = vmatpush.bf16.msrb.mxu1 %v9342_v32  ;;  %v9019_v53 = vld [vmem:[%s21196_s7 + $0xe8] sm:$0xf0] }
 0x48a   :  { %7754 = vmatpush.bf16.msra.mxu3 %v12602_v8  ;;  %v12570_v63 = vor.u32 %v13924_v16, %v12569_v40  ;;  %v12537_v12 = vld [vmem:[%s21196_s7 + $0x1c48] sm:$0xf]  ;;  %v13192_v32 = vld [vmem:[%s21196_s7 + $0x5cc] sm:$0xf]  ;;  %v17191_v8 = vpop.f32.mrf.mxu0  ;;  %v7501_v40 = vpop.f32.mrf.mxu3  ;;  %v9022_v16 = vor.u32 %v13032_v24, %v9019_v53 }
 0x48b   :  { %7771 = vmatmul.bf16.vlgmr.msra.gmra.mxu2 %v15484_v54  ;;  %v13916_v45 = vld [vmem:[%s21196_s7 + $0x1c64] sm:$0xf0]  ;;  %v9662_v49 = vor.u32 %v13192_v32, %v9659_v60  ;;  %v13024_v58 = vld [vmem:[%s21196_s7 + $0x8c] sm:$0xf] }
 0x48c   :  { %7815 = vmatpush.bf16.msrb.mxu2 %v9918_v2  ;;  %7777 = vmatpush.bf16.msrb.mxu0 %v9118_v11  ;;  %v12538_v25 = vor.u32 %v13916_v45, %v12537_v12  ;;  %v12505_v3 = vld [vmem:[%s21196_s7 + $0x1c08] sm:$0xf]  ;;  %v9246_v2 = vor.u32 %v13088_v5, %v9243_v20  ;;  %v13184_v22 = vld [vmem:[%s21196_s7 + $0x58c] sm:$0xf] }
 0x48d   :  { %7792 = vmatpush.bf16.msrb.mxu1 %v9310_v28  ;;  %v13908_v10 = vld [vmem:[%s21196_s7 + $0x1c24] sm:$0xf0]  ;;  %v9627_v13 = vld [vmem:[%s21196_s7 + $0x5a8] sm:$0xf0] }
 0x48e   :  { %7755 = vmatpush.bf16.msra.mxu3 %v12570_v63  ;;  %v12506_v11 = vor.u32 %v13908_v10, %v12505_v3  ;;  %v7540_v28 = vpop.f32.mrf.mxu1  ;;  %v13216_v9 = vld [vmem:[%s21196_s7 + $0x68c] sm:$0xf]  ;;  %v9630_v42 = vor.u32 %v13184_v22, %v9627_v13 }
 0x48f   :  { %v9755_v63 = vld [vmem:[%s21196_s7 + $0x6a8] sm:$0xf0] }
 0x490   :  { %7816 = vmatpush.bf16.msrb.mxu2 %v9886_v26  ;;  %7778 = vmatpush.bf16.msrb.mxu0 %v9086_v6  ;;  %v8987_v26 = vld [vmem:[%s21196_s7 + $0xa8] sm:$0xf0]  ;;  %v9758_v38 = vor.u32 %v13216_v9, %v9755_v63 }
 0x491   :  { %7793 = vmatpush.bf16.msrb.mxu1 %v9278_v18  ;;  %v13072_v6 = vld [vmem:[%s21196_s7 + $0x20c] sm:$0xf]  ;;  %v8990_v18 = vor.u32 %v13024_v58, %v8987_v26 }
 0x492   :  { %7756 = vmatpush.bf16.msra.mxu3 %v12538_v25  ;;  %v9179_v12 = vld [vmem:[%s21196_s7 + $0x228] sm:$0xf0]  ;;  %v17237_v25 = vpop.f32.mrf.mxu2  ;;  %v7527_v24 = vpop.f32.mrf.mxu0 }
 0x493   :  { %v13384_v45 = vld [vmem:[%s21196_s7 + $0xbcc] sm:$0xf]  ;;  %v9182_v39 = vor.u32 %v13072_v6, %v9179_v12 }
 0x494   :  { %7817 = vmatpush.bf16.msrb.mxu2 %v9854_v52  ;;  %7779 = vmatpush.bf16.msrb.mxu0 %v9054_v36  ;;  %v10427_v35 = vld [vmem:[%s21196_s7 + $0xbe8] sm:$0xf0]  ;;  %v7474_v52 = vadd.f32 %v16985_v51, %v7461_v14 }
 0x495   :  { %7794 = vmatpush.bf16.msrb.mxu1 %v9246_v2  ;;  %v13016_v46 = vld [vmem:[%s21196_s7 + $0x4c] sm:$0xf]  ;;  %v10430_v3 = vor.u32 %v13384_v45, %v10427_v35 }
 0x496   :  { %7757 = vmatpush.bf16.msra.mxu3 %v12506_v11  ;;  %v8955_v5 = vld [vmem:[%s21196_s7 + $0x68] sm:$0xf0]  ;;  %v7487_v2 = vadd.f32 %v16935_v19, %v7474_v52 }
 0x497   :  { %v13176_v51 = vld [vmem:[%s21196_s7 + $0x54c] sm:$0xf]  ;;  %v8958_v32 = vor.u32 %v13016_v46, %v8955_v5 }
 0x498   :  { %7818 = vmatpush.bf16.msrb.mxu2 %v9822_v37  ;;  %7780 = vmatpush.bf16.msrb.mxu0 %v9022_v16  ;;  %v9595_v20 = vld [vmem:[%s21196_s7 + $0x568] sm:$0xf0]  ;;  %v7500_v40 = vadd.f32 %v17131_v47, %v7487_v2 }
 0x499   :  { %7795 = vmatpush.bf16.msrb.mxu1 %v9214_v34  ;;  %7758 = vmatmul.bf16.vlgmr.msra.gmra.mxu3 %v15591_v44  ;;  %v13208_v36 = vld [vmem:[%s21196_s7 + $0x64c] sm:$0xf]  ;;  %v9598_v60 = vor.u32 %v13176_v51, %v9595_v20 }
 0x49a   :  { %7802 = vmatpush.bf16.msrb.mxu3 %v9662_v49  ;;  %v9723_v10 = vld [vmem:[%s21196_s7 + $0x668] sm:$0xf0]  ;;  %v7513_v6 = vadd.f32 %v17029_v33, %v7500_v40  ;;  %v7566_v12 = vpop.f32.mrf.mxu2 }
 0x49b   :  { %v13376_v53 = vld [vmem:[%s21196_s7 + $0xb8c] sm:$0xf]  ;;  %v9726_v43 = vor.u32 %v13208_v36, %v9723_v10 }
 0x49c   :  { %7819 = vmatpush.bf16.msrb.mxu2 %v9790_v31  ;;  %v10395_v37 = vld [vmem:[%s21196_s7 + $0xba8] sm:$0xf0]  ;;  %7781 = vmatpush.bf16.msrb.mxu0 %v8990_v18 }
 0x49d   :  { %v13008_v56 = vld [vmem:[%s21196_s7 + $0xc] sm:$0xf]  ;;  %7796 = vmatpush.bf16.msrb.mxu1 %v9182_v39  ;;  %v10398_v16 = vor.u32 %v13376_v53, %v10395_v37  ;;  %v7526_v39 = vadd.f32 %v17191_v8, %v7513_v6 }
 0x49e   :  { %7803 = vmatpush.bf16.msrb.mxu3 %v9630_v42  ;;  %v8923_v1 = vld [vmem:[%s21196_s7 + $0x28] sm:$0xf0] }
 0x49f   :  { %v13168_v4 = vld [vmem:[%s21196_s7 + $0x50c] sm:$0xf]  ;;  %v8926_v34 = vor.u32 %v13008_v56, %v8923_v1  ;;  %v7551_v1 = vpop.f32.mrf.mxu3 }
 0x4a0   :  { %7820 = vmatpush.bf16.msrb.mxu2 %v9758_v38  ;;  %v9563_v19 = vld [vmem:[%s21196_s7 + $0x528] sm:$0xf0]  ;;  %7782 = vmatpush.bf16.msrb.mxu0 %v8958_v32 }
 0x4a1   :  { %v13200_v41 = vld [vmem:[%s21196_s7 + $0x60c] sm:$0xf]  ;;  %7841 = vmatpush.bf16.msra.mxu1 %v10430_v3  ;;  %v9566_v22 = vor.u32 %v13168_v4, %v9563_v19 }
 0x4a2   :  { %v9691_v11 = vld [vmem:[%s21196_s7 + $0x628] sm:$0xf0]  ;;  %7804 = vmatpush.bf16.msrb.mxu3 %v9598_v60  ;;  %7797 = vmatmul.bf16.vlgmr.msrb.gmra.mxu1 %v15006_v30  ;;  %v7539_v60 = vadd.f32 %v17139_v57, %v7526_v39 }
 0x4a3   :  { %v13320_v49 = vld [vmem:[%s21196_s7 + $0x9cc] sm:$0xf]  ;;  %v9694_v13 = vor.u32 %v13200_v41, %v9691_v11  ;;  %v7590_v11 = vpop.f32.mrf.mxu1 }
 0x4a4   :  { %v10171_v58 = vld [vmem:[%s21196_s7 + $0x9e8] sm:$0xf0]  ;;  %7821 = vmatpush.bf16.msrb.mxu2 %v9726_v43  ;;  %7783 = vmatpush.bf16.msrb.mxu0 %v8926_v34  ;;  %v7552_v41 = vadd.f32 %v7551_v1, %v7539_v60  ;;  %v14032_v34 = vld [vmem:[%s21198_s8] sm:$0xff] }
 0x4a5   :  { %v13512_v26 = vld [vmem:[%s21196_s7 + $0xfcc] sm:$0xf]  ;;  %v10174_v9 = vor.u32 %v13320_v49, %v10171_v58  ;;  %7842 = vmatpush.bf16.msra.mxu1 %v10398_v16 }
 0x4a6   :  { %v10939_v28 = vld [vmem:[%s21196_s7 + $0xfe8] sm:$0xf0]  ;;  %7805 = vmatpush.bf16.msrb.mxu3 %v9566_v22  ;;  %v2018_v22 = vperm.slane %v14032_v34, 2 }
 0x4a7   :  { %v13368_v47 = vld [vmem:[%s21196_s7 + $0xb4c] sm:$0xf]  ;;  %v10942_v45 = vor.u32 %v13512_v26, %v10939_v28  ;;  %7784 = vmatmul.bf16.vlgmr.msrb.gmra.mxu0 %v15033_v61 }
 0x4a8   :  { %v10363_v31 = vld [vmem:[%s21196_s7 + $0xb68] sm:$0xf0]  ;;  %7822 = vmatpush.bf16.msrb.mxu2 %v9694_v13  ;;  %7828 = vmatpush.bf16.msra.mxu0 %v10174_v9 }
 0x4a9   :  { %v13160_v14 = vld [vmem:[%s21196_s7 + $0x4cc] sm:$0xf]  ;;  %v10366_v35 = vor.u32 %v13368_v47, %v10363_v31  ;;  %v7565_v31 = vadd.f32 %v17237_v25, %v7552_v41 }
 0x4aa   :  { %v9531_v63 = vld [vmem:[%s21196_s7 + $0x4e8] sm:$0xf0] }
 0x4ab   :  { %v13312_v52 = vld [vmem:[%s21196_s7 + $0x98c] sm:$0xf]  ;;  %v9534_v5 = vor.u32 %v13160_v14, %v9531_v63  ;;  %7843 = vmatpush.bf16.msra.mxu1 %v10366_v35  ;;  %7823 = vmatmul.bf16.vlgmr.msrb.gmra.mxu2 %v15041_v0 }
 0x4ac   :  { %v10139_v18 = vld [vmem:[%s21196_s7 + $0x9a8] sm:$0xf0]  ;;  %7867 = vmatpush.bf16.msra.mxu2 %v10942_v45  ;;  %v8824_v45 = vrot.slane %v7565_v31, 4 }
 0x4ad   :  { %v13504_v42 = vld [vmem:[%s21196_s7 + $0xf8c] sm:$0xf]  ;;  %v10142_v51 = vor.u32 %v13312_v52, %v10139_v18  ;;  %7806 = vmatpush.bf16.msrb.mxu3 %v9534_v5  ;;  %v7577_v5 = vpop.f32.mrf.mxu0 }
 0x4ae   :  { %v10907_v33 = vld [vmem:[%s21196_s7 + $0xfa8] sm:$0xf0]  ;;  %v8829_v39 = vsel %vm8828_vm5, %v16546_v21, %v8824_v45 }
 0x4af   :  { %v13360_v46 = vld [vmem:[%s21196_s7 + $0xb0c] sm:$0xf]  ;;  %v10910_v36 = vor.u32 %v13504_v42, %v10907_v33  ;;  %7829 = vmatpush.bf16.msra.mxu0 %v10142_v51  ;;  %8837 = vst [vmem:[%s21199_s9] sm:$0xff] %v8829_v39 }
 0x4b0   :  { %v10331_v38 = vld [vmem:[%s21196_s7 + $0xb28] sm:$0xf0] }
 0x4b1   :  { %v13152_v20 = vld [vmem:[%s21196_s7 + $0x48c] sm:$0xf]  ;;  %v10334_v10 = vor.u32 %v13360_v46, %v10331_v38  ;;  %7868 = vmatpush.bf16.msra.mxu2 %v10910_v36 }
 0x4b2   :  { %v9499_v3 = vld [vmem:[%s21196_s7 + $0x4a8] sm:$0xf0] }
 0x4b3   :  { %v13304_v8 = vld [vmem:[%s21196_s7 + $0x94c] sm:$0xf]  ;;  %v9502_v56 = vor.u32 %v13152_v20, %v9499_v3  ;;  %7844 = vmatpush.bf16.msra.mxu1 %v10334_v10  ;;  %v7578_v20 = vadd.f32 %v7577_v5, %v2018_v22  ;;  %v7553_v3 = vpop.f32.mrf.mxu3 }
 0x4b4   :  { %v10107_v24 = vld [vmem:[%s21196_s7 + $0x968] sm:$0xf0] }
 0x4b5   :  { %v13496_v53 = vld [vmem:[%s21196_s7 + $0xf4c] sm:$0xf]  ;;  %v10110_v4 = vor.u32 %v13304_v8, %v10107_v24  ;;  %7807 = vmatpush.bf16.msrb.mxu3 %v9502_v56  ;;  %v7592_v24 = vpop.f32.mrf.mxu1 }
 0x4b6   :  { %v10875_v37 = vld [vmem:[%s21196_s7 + $0xf68] sm:$0xf0] }
 0x4b7   :  { %v13352_v2 = vld [vmem:[%s21196_s7 + $0xacc] sm:$0xf]  ;;  %v10878_v40 = vor.u32 %v13496_v53, %v10875_v37  ;;  %7830 = vmatpush.bf16.msra.mxu0 %v10110_v4 }
 0x4b8   :  { %v10299_v32 = vld [vmem:[%s21196_s7 + $0xae8] sm:$0xf0] }
 0x4b9   :  { %v13144_v43 = vld [vmem:[%s21196_s7 + $0x44c] sm:$0xf]  ;;  %v10302_v16 = vor.u32 %v13352_v2, %v10299_v32  ;;  %7869 = vmatpush.bf16.msra.mxu2 %v10878_v40 }
 0x4ba   :  { %v9467_v19 = vld [vmem:[%s21196_s7 + $0x468] sm:$0xf0] }
 0x4bb   :  { %v13296_v57 = vld [vmem:[%s21196_s7 + $0x90c] sm:$0xf]  ;;  %v9470_v13 = vor.u32 %v13144_v43, %v9467_v19  ;;  %7845 = vmatpush.bf16.msra.mxu1 %v10302_v16  ;;  %v17431_v43 = vadd.f32 %v7590_v11, %v7578_v20 }
 0x4bc   :  { %v10075_v49 = vld [vmem:[%s21196_s7 + $0x928] sm:$0xf0] }
 0x4bd   :  { %v13488_v58 = vld [vmem:[%s21196_s7 + $0xf0c] sm:$0xf]  ;;  %v10078_v63 = vor.u32 %v13296_v57, %v10075_v49  ;;  %7808 = vmatpush.bf16.msrb.mxu3 %v9470_v13  ;;  %v7579_v13 = vpop.f32.mrf.mxu0 }
 0x4be   :  { %v10843_v26 = vld [vmem:[%s21196_s7 + $0xf28] sm:$0xf0] }
 0x4bf   :  { %v13344_v28 = vld [vmem:[%s21196_s7 + $0xa8c] sm:$0xf]  ;;  %v10846_v35 = vor.u32 %v13488_v58, %v10843_v26  ;;  %7831 = vmatpush.bf16.msra.mxu0 %v10078_v63 }
 0x4c0   :  { %v10267_v47 = vld [vmem:[%s21196_s7 + $0xaa8] sm:$0xf0] }
 0x4c1   :  { %v13136_v9 = vld [vmem:[%s21196_s7 + $0x40c] sm:$0xf]  ;;  %v10270_v52 = vor.u32 %v13344_v28, %v10267_v47  ;;  %7870 = vmatpush.bf16.msra.mxu2 %v10846_v35  ;;  %v17451_v47 = vpop.f32.mrf.mxu2 }
 0x4c2   :  { %v9435_v14 = vld [vmem:[%s21196_s7 + $0x428] sm:$0xf0] }
 0x4c3   :  { %v13288_v25 = vld [vmem:[%s21196_s7 + $0x8cc] sm:$0xf]  ;;  %v9438_v51 = vor.u32 %v13136_v9, %v9435_v14  ;;  %7846 = vmatpush.bf16.msra.mxu1 %v10270_v52 }
 0x4c4   :  { %v10043_v6 = vld [vmem:[%s21196_s7 + $0x8e8] sm:$0xf0] }
 0x4c5   :  { %v13448_v12 = vld [vmem:[%s21196_s7 + $0xdcc] sm:$0xf]  ;;  %v10046_v36 = vor.u32 %v13288_v25, %v10043_v6  ;;  %7809 = vmatpush.bf16.msrb.mxu3 %v9438_v51 }
 0x4c6   :  { %v10683_v18 = vld [vmem:[%s21196_s7 + $0xde8] sm:$0xf0] }
 0x4c7   :  { %v13480_v42 = vld [vmem:[%s21196_s7 + $0xecc] sm:$0xf]  ;;  %v10686_v10 = vor.u32 %v13448_v12, %v10683_v18  ;;  %7832 = vmatpush.bf16.msra.mxu0 %v10046_v36 }
 0x4c8   :  { %v10811_v33 = vld [vmem:[%s21196_s7 + $0xee8] sm:$0xf0]  ;;  %7810 = vmatmul.bf16.vlgmr.msrb.gmra.mxu3 %v15133_v29 }
 0x4c9   :  { %v13336_v46 = vld [vmem:[%s21196_s7 + $0xa4c] sm:$0xf]  ;;  %v10814_v53 = vor.u32 %v13480_v42, %v10811_v33  ;;  %7854 = vmatpush.bf16.msra.mxu3 %v10686_v10 }
 0x4ca   :  { %v10235_v38 = vld [vmem:[%s21196_s7 + $0xa68] sm:$0xf0] }
 0x4cb   :  { %v13280_v8 = vld [vmem:[%s21196_s7 + $0x88c] sm:$0xf]  ;;  %v10238_v37 = vor.u32 %v13336_v46, %v10235_v38  ;;  %7871 = vmatpush.bf16.msra.mxu2 %v10814_v53  ;;  %v7618_v53 = vpop.f32.mrf.mxu2 }
 0x4cc   :  { %v10011_v21 = vld [vmem:[%s21196_s7 + $0x8a8] sm:$0xf0] }
 0x4cd   :  { %v13440_v2 = vld [vmem:[%s21196_s7 + $0xd8c] sm:$0xf]  ;;  %v10014_v40 = vor.u32 %v13280_v8, %v10011_v21  ;;  %7847 = vmatpush.bf16.msra.mxu1 %v10238_v37 }
 0x4ce   :  { %v10651_v32 = vld [vmem:[%s21196_s7 + $0xda8] sm:$0xf0] }
 0x4cf   :  { %v13472_v60 = vld [vmem:[%s21196_s7 + $0xe8c] sm:$0xf]  ;;  %v10654_v16 = vor.u32 %v13440_v2, %v10651_v32  ;;  %7833 = vmatpush.bf16.msra.mxu0 %v10014_v40 }
 0x4d0   :  { %v10779_v56 = vld [vmem:[%s21196_s7 + $0xea8] sm:$0xf0] }
 0x4d1   :  { %v13328_v1 = vld [vmem:[%s21196_s7 + $0xa0c] sm:$0xf]  ;;  %v10782_v11 = vor.u32 %v13472_v60, %v10779_v56  ;;  %7855 = vmatpush.bf16.msra.mxu3 %v10654_v16 }
 0x4d2   :  { %v10203_v4 = vld [vmem:[%s21196_s7 + $0xa28] sm:$0xf0] }
 0x4d3   :  { %v13640_v19 = vld [vmem:[%s21196_s7 + $0x13cc] sm:$0xf]  ;;  %v10206_v49 = vor.u32 %v13328_v1, %v10203_v4  ;;  %7872 = vmatpush.bf16.msra.mxu2 %v10782_v11 }
 0x4d4   :  { %v11451_v41 = vld [vmem:[%s21196_s7 + $0x13e8] sm:$0xf0] }
 0x4d5   :  { %v13272_v57 = vld [vmem:[%s21196_s7 + $0x84c] sm:$0xf]  ;;  %v11454_v31 = vor.u32 %v13640_v19, %v11451_v41  ;;  %7848 = vmatpush.bf16.msra.mxu1 %v10206_v49 }
 0x4d6   :  { %v9979_v58 = vld [vmem:[%s21196_s7 + $0x868] sm:$0xf0] }
 0x4d7   :  { %v13432_v26 = vld [vmem:[%s21196_s7 + $0xd4c] sm:$0xf]  ;;  %v9982_v63 = vor.u32 %v13272_v57, %v9979_v58 }
 0x4d8   :  { %v10619_v28 = vld [vmem:[%s21196_s7 + $0xd68] sm:$0xf0]  ;;  %7849 = vmatmul.bf16.vlgmr.msra.gmra.mxu1 %v15093_v27 }
 0x4d9   :  { %v13464_v34 = vld [vmem:[%s21196_s7 + $0xe4c] sm:$0xf]  ;;  %v10622_v25 = vor.u32 %v13432_v26, %v10619_v28  ;;  %7893 = vmatpush.bf16.msrb.mxu1 %v11454_v31  ;;  %7834 = vmatpush.bf16.msra.mxu0 %v9982_v63 }
 0x4da   :  { %v10747_v22 = vld [vmem:[%s21196_s7 + $0xe68] sm:$0xf0] }
 0x4db   :  { %v13632_v9 = vld [vmem:[%s21196_s7 + $0x138c] sm:$0xf]  ;;  %v10750_v35 = vor.u32 %v13464_v34, %v10747_v22  ;;  %7856 = vmatpush.bf16.msra.mxu3 %v10622_v25 }
 0x4dc   :  { %v11419_v14 = vld [vmem:[%s21196_s7 + $0x13a8] sm:$0xf0] }
 0x4dd   :  { %v13264_v6 = vld [vmem:[%s21196_s7 + $0x80c] sm:$0xf]  ;;  %v11422_v33 = vor.u32 %v13632_v9, %v11419_v14  ;;  %7873 = vmatpush.bf16.msra.mxu2 %v10750_v35  ;;  %v7603_v9 = vpop.f32.mrf.mxu3 }
 0x4de   :  { %v9947_v12 = vld [vmem:[%s21196_s7 + $0x828] sm:$0xf0] }
 0x4df   :  { %v13424_v45 = vld [vmem:[%s21196_s7 + $0xd0c] sm:$0xf]  ;;  %v9950_v3 = vor.u32 %v13264_v6, %v9947_v12  ;;  %7894 = vmatpush.bf16.msrb.mxu1 %v11422_v33  ;;  %v7604_v6 = vadd.f32 %v7603_v9, %v17431_v43  ;;  %v7642_v12 = vpop.f32.mrf.mxu1 }
 0x4e0   :  { %v10587_v52 = vld [vmem:[%s21196_s7 + $0xd28] sm:$0xf0] }
 0x4e1   :  { %v13456_v18 = vld [vmem:[%s21196_s7 + $0xe0c] sm:$0xf]  ;;  %v10590_v36 = vor.u32 %v13424_v45, %v10587_v52  ;;  %7835 = vmatpush.bf16.msra.mxu0 %v9950_v3 }
 0x4e2   :  { %v10715_v42 = vld [vmem:[%s21196_s7 + $0xe28] sm:$0xf0] }
 0x4e3   :  { %v13576_v46 = vld [vmem:[%s21196_s7 + $0x11cc] sm:$0xf]  ;;  %v10718_v10 = vor.u32 %v13456_v18, %v10715_v42  ;;  %7857 = vmatpush.bf16.msra.mxu3 %v10590_v36 }
 0x4e4   :  { %v11195_v38 = vld [vmem:[%s21196_s7 + $0x11e8] sm:$0xf0]  ;;  %7836 = vmatmul.bf16.vlgmr.msra.gmra.mxu0 %v15131_v62 }
 0x4e5   :  { %v13768_v39 = vld [vmem:[%s21196_s7 + $0x17cc] sm:$0xf]  ;;  %v11198_v8 = vor.u32 %v13576_v46, %v11195_v38  ;;  %7874 = vmatpush.bf16.msra.mxu2 %v10718_v10  ;;  %v7617_v38 = vadd.f32 %v17451_v47, %v7604_v6 }
 0x4e6   :  { %v11963_v5 = vld [vmem:[%s21196_s7 + $0x17e8] sm:$0xf0] }
 0x4e7   :  { %v13624_v51 = vld [vmem:[%s21196_s7 + $0x134c] sm:$0xf]  ;;  %v11966_v37 = vor.u32 %v13768_v39, %v11963_v5  ;;  %7880 = vmatpush.bf16.msrb.mxu0 %v11198_v8 }
 0x4e8   :  { %v11387_v20 = vld [vmem:[%s21196_s7 + $0x1368] sm:$0xf0]  ;;  %7875 = vmatmul.bf16.vlgmr.msra.gmra.mxu2 %v15144_v7 }
 0x4e9   :  { %v13416_v21 = vld [vmem:[%s21196_s7 + $0xccc] sm:$0xf]  ;;  %v11390_v2 = vor.u32 %v13624_v51, %v11387_v20  ;;  %7919 = vmatpush.bf16.msrb.mxu2 %v11966_v37 }
 0x4ea   :  { %v10555_v24 = vld [vmem:[%s21196_s7 + $0xce8] sm:$0xf0] }
 0x4eb   :  { %v13568_v32 = vld [vmem:[%s21196_s7 + $0x118c] sm:$0xf]  ;;  %v10558_v41 = vor.u32 %v13416_v21, %v10555_v24  ;;  %7895 = vmatpush.bf16.msrb.mxu1 %v11390_v2 }
 0x4ec   :  { %v11163_v60 = vld [vmem:[%s21196_s7 + $0x11a8] sm:$0xf0] }
 0x4ed   :  { %v13760_v56 = vld [vmem:[%s21196_s7 + $0x178c] sm:$0xf]  ;;  %v11166_v40 = vor.u32 %v13568_v32, %v11163_v60  ;;  %7858 = vmatpush.bf16.msra.mxu3 %v10558_v41  ;;  %v7629_v32 = vpop.f32.mrf.mxu0 }
 0x4ee   :  { %v11931_v1 = vld [vmem:[%s21196_s7 + $0x17a8] sm:$0xf0] }
 0x4ef   :  { %v13616_v4 = vld [vmem:[%s21196_s7 + $0x130c] sm:$0xf]  ;;  %v11934_v11 = vor.u32 %v13760_v56, %v11931_v1  ;;  %7881 = vmatpush.bf16.msrb.mxu0 %v11166_v40  ;;  %v7630_v56 = vadd.f32 %v7629_v32, %v7617_v38  ;;  %v7605_v1 = vpop.f32.mrf.mxu3 }
 0x4f0   :  { %v11355_v19 = vld [vmem:[%s21196_s7 + $0x1328] sm:$0xf0] }
 0x4f1   :  { %v13408_v16 = vld [vmem:[%s21196_s7 + $0xc8c] sm:$0xf]  ;;  %v11358_v49 = vor.u32 %v13616_v4, %v11355_v19  ;;  %7920 = vmatpush.bf16.msrb.mxu2 %v11934_v11 }
 0x4f2   :  { %v10523_v57 = vld [vmem:[%s21196_s7 + $0xca8] sm:$0xf0] }
 0x4f3   :  { %v13560_v58 = vld [vmem:[%s21196_s7 + $0x114c] sm:$0xf]  ;;  %v10526_v13 = vor.u32 %v13408_v16, %v10523_v57  ;;  %7896 = vmatpush.bf16.msrb.mxu1 %v11358_v49  ;;  %v7644_v16 = vpop.f32.mrf.mxu1 }
 0x4f4   :  { %v11131_v26 = vld [vmem:[%s21196_s7 + $0x1168] sm:$0xf0] }
 0x4f5   :  { %v13752_v28 = vld [vmem:[%s21196_s7 + $0x174c] sm:$0xf]  ;;  %v11134_v14 = vor.u32 %v13560_v58, %v11131_v26  ;;  %7859 = vmatpush.bf16.msra.mxu3 %v10526_v13 }
 0x4f6   :  { %v11899_v31 = vld [vmem:[%s21196_s7 + $0x1768] sm:$0xf0] }
 0x4f7   :  { %v13608_v34 = vld [vmem:[%s21196_s7 + $0x12cc] sm:$0xf]  ;;  %v11902_v45 = vor.u32 %v13752_v28, %v11899_v31  ;;  %7882 = vmatpush.bf16.msrb.mxu0 %v11134_v14 }
 0x4f8   :  { %v11323_v22 = vld [vmem:[%s21196_s7 + $0x12e8] sm:$0xf0] }
 0x4f9   :  { %v13400_v63 = vld [vmem:[%s21196_s7 + $0xc4c] sm:$0xf]  ;;  %v11326_v35 = vor.u32 %v13608_v34, %v11323_v22  ;;  %7921 = vmatpush.bf16.msrb.mxu2 %v11902_v45  ;;  %v17633_v22 = vadd.f32 %v7642_v12, %v7630_v56 }
 0x4fa   :  { %v10491_v25 = vld [vmem:[%s21196_s7 + $0xc68] sm:$0xf0] }
 0x4fb   :  { %v13552_v52 = vld [vmem:[%s21196_s7 + $0x110c] sm:$0xf]  ;;  %v10494_v39 = vor.u32 %v13400_v63, %v10491_v25  ;;  %7897 = vmatpush.bf16.msrb.mxu1 %v11326_v35 }
 0x4fc   :  { %v11099_v18 = vld [vmem:[%s21196_s7 + $0x1128] sm:$0xf0] }
 0x4fd   :  { %v13744_v42 = vld [vmem:[%s21196_s7 + $0x170c] sm:$0xf]  ;;  %v11102_v51 = vor.u32 %v13552_v52, %v11099_v18  ;;  %7860 = vmatpush.bf16.msra.mxu3 %v10494_v39  ;;  %v17653_v18 = vpop.f32.mrf.mxu2 }
 0x4fe   :  { %v11867_v43 = vld [vmem:[%s21196_s7 + $0x1728] sm:$0xf0] }
 0x4ff   :  { %v13600_v33 = vld [vmem:[%s21196_s7 + $0x128c] sm:$0xf]  ;;  %v11870_v47 = vor.u32 %v13744_v42, %v11867_v43  ;;  %7883 = vmatpush.bf16.msrb.mxu0 %v11102_v51 }
 0x500   :  { %v11291_v46 = vld [vmem:[%s21196_s7 + $0x12a8] sm:$0xf0] }
 0x501   :  { %v13392_v5 = vld [vmem:[%s21196_s7 + $0xc0c] sm:$0xf]  ;;  %v11294_v10 = vor.u32 %v13600_v33, %v11291_v46  ;;  %7922 = vmatpush.bf16.msrb.mxu2 %v11870_v47  ;;  %v7631_v46 = vpop.f32.mrf.mxu0 }
 0x502   :  { %v10459_v20 = vld [vmem:[%s21196_s7 + $0xc28] sm:$0xf0] }
 0x503   :  { %v13544_v3 = vld [vmem:[%s21196_s7 + $0x10cc] sm:$0xf]  ;;  %v10462_v60 = vor.u32 %v13392_v5, %v10459_v20  ;;  %7898 = vmatpush.bf16.msrb.mxu1 %v11294_v10 }
 0x504   :  { %v11067_v36 = vld [vmem:[%s21196_s7 + $0x10e8] sm:$0xf0] }
 0x505   :  { %v13704_v8 = vld [vmem:[%s21196_s7 + $0x15cc] sm:$0xf]  ;;  %v11070_v4 = vor.u32 %v13544_v3, %v11067_v36  ;;  %7861 = vmatpush.bf16.msra.mxu3 %v10462_v60 }
 0x506   :  { %v11707_v21 = vld [vmem:[%s21196_s7 + $0x15e8] sm:$0xf0] }
 0x507   :  { %v13736_v24 = vld [vmem:[%s21196_s7 + $0x16cc] sm:$0xf]  ;;  %v11710_v19 = vor.u32 %v13704_v8, %v11707_v21  ;;  %7884 = vmatpush.bf16.msrb.mxu0 %v11070_v4 }
 0x508   :  { %v11835_v53 = vld [vmem:[%s21196_s7 + $0x16e8] sm:$0xf0]  ;;  %7862 = vmatmul.bf16.vlgmr.msra.gmra.mxu3 %v15264_v17 }
 0x509   :  { %v13592_v37 = vld [vmem:[%s21196_s7 + $0x124c] sm:$0xf]  ;;  %v11838_v57 = vor.u32 %v13736_v24, %v11835_v53  ;;  %7906 = vmatpush.bf16.msrb.mxu3 %v11710_v19 }
 0x50a   :  { %v11259_v2 = vld [vmem:[%s21196_s7 + $0x1268] sm:$0xf0] }
 0x50b   :  { %v13536_v41 = vld [vmem:[%s21196_s7 + $0x108c] sm:$0xf]  ;;  %v11262_v11 = vor.u32 %v13592_v37, %v11259_v2  ;;  %7923 = vmatpush.bf16.msrb.mxu2 %v11838_v57  ;;  %v7670_v57 = vpop.f32.mrf.mxu2 }
 0x50c   :  { %v11035_v40 = vld [vmem:[%s21196_s7 + $0x10a8] sm:$0xf0] }
 0x50d   :  { %v13696_v49 = vld [vmem:[%s21196_s7 + $0x158c] sm:$0xf]  ;;  %v11038_v14 = vor.u32 %v13536_v41, %v11035_v40  ;;  %7899 = vmatpush.bf16.msrb.mxu1 %v11262_v11 }
 0x50e   :  { %v11675_v58 = vld [vmem:[%s21196_s7 + $0x15a8] sm:$0xf0] }
 0x50f   :  { %v13728_v26 = vld [vmem:[%s21196_s7 + $0x168c] sm:$0xf]  ;;  %v11678_v63 = vor.u32 %v13696_v49, %v11675_v58  ;;  %7885 = vmatpush.bf16.msrb.mxu0 %v11038_v14 }
 0x510   :  { %v11803_v28 = vld [vmem:[%s21196_s7 + $0x16a8] sm:$0xf0] }
 0x511   :  { %v13584_v31 = vld [vmem:[%s21196_s7 + $0x120c] sm:$0xf]  ;;  %v11806_v6 = vor.u32 %v13728_v26, %v11803_v28  ;;  %7907 = vmatpush.bf16.msrb.mxu3 %v11678_v63 }
 0x512   :  { %v11227_v34 = vld [vmem:[%s21196_s7 + $0x1228] sm:$0xf0] }
 0x513   :  { %v13896_v13 = vld [vmem:[%s21196_s7 + $0x1bcc] sm:$0xf]  ;;  %v11230_v12 = vor.u32 %v13584_v31, %v11227_v34  ;;  %7924 = vmatpush.bf16.msrb.mxu2 %v11806_v6 }
 0x514   :  { %v12475_v9 = vld [vmem:[%s21196_s7 + $0x1be8] sm:$0xf0] }
 0x515   :  { %v13528_v25 = vld [vmem:[%s21196_s7 + $0x104c] sm:$0xf]  ;;  %v12478_v42 = vor.u32 %v13896_v13, %v12475_v9  ;;  %7900 = vmatpush.bf16.msrb.mxu1 %v11230_v12 }
 0x516   :  { %v11003_v45 = vld [vmem:[%s21196_s7 + $0x1068] sm:$0xf0] }
 0x517   :  { %v13688_v35 = vld [vmem:[%s21196_s7 + $0x154c] sm:$0xf]  ;;  %v11006_v5 = vor.u32 %v13528_v25, %v11003_v45 }
 0x518   :  { %v11643_v52 = vld [vmem:[%s21196_s7 + $0x1568] sm:$0xf0]  ;;  %7901 = vmatmul.bf16.vlgmr.msrb.gmra.mxu1 %v15222_v59 }
 0x519   :  { %v13720_v43 = vld [vmem:[%s21196_s7 + $0x164c] sm:$0xf]  ;;  %v11646_v51 = vor.u32 %v13688_v35, %v11643_v52  ;;  %7945 = vmatpush.bf16.msra.mxu1 %v12478_v42  ;;  %7886 = vmatpush.bf16.msrb.mxu0 %v11006_v5 }
 0x51a   :  { %v11771_v33 = vld [vmem:[%s21196_s7 + $0x1668] sm:$0xf0] }
 0x51b   :  { %v13888_v38 = vld [vmem:[%s21196_s7 + $0x1b8c] sm:$0xf]  ;;  %v11774_v47 = vor.u32 %v13720_v43, %v11771_v33  ;;  %7908 = vmatpush.bf16.msrb.mxu3 %v11646_v51 }
 0x51c   :  { %v12443_v39 = vld [vmem:[%s21196_s7 + $0x1ba8] sm:$0xf0] }
 0x51d   :  { %v13520_v20 = vld [vmem:[%s21196_s7 + $0x100c] sm:$0xf]  ;;  %v12446_v24 = vor.u32 %v13888_v38, %v12443_v39  ;;  %7925 = vmatpush.bf16.msrb.mxu2 %v11774_v47  ;;  %v7655_v38 = vpop.f32.mrf.mxu3 }
 0x51e   :  { %v10971_v3 = vld [vmem:[%s21196_s7 + $0x1028] sm:$0xf0] }
 0x51f   :  { %v13680_v36 = vld [vmem:[%s21196_s7 + $0x150c] sm:$0xf]  ;;  %v10974_v1 = vor.u32 %v13520_v20, %v10971_v3  ;;  %7946 = vmatpush.bf16.msra.mxu1 %v12446_v24  ;;  %v7656_v20 = vadd.f32 %v7655_v38, %v17633_v22  ;;  %v7694_v3 = vpop.f32.mrf.mxu1  ;;  %v13133_v38 = vld [vmem:[%s21196_s7 + $0x3ec] sm:$0xf0] }
 0x520   :  { %v11611_v10 = vld [vmem:[%s21196_s7 + $0x1528] sm:$0xf0] }
 0x521   :  { %v13712_v8 = vld [vmem:[%s21196_s7 + $0x160c] sm:$0xf]  ;;  %v11614_v4 = vor.u32 %v13680_v36, %v11611_v10  ;;  %7887 = vmatpush.bf16.msrb.mxu0 %v10974_v1 }
 0x522   :  { %v11739_v21 = vld [vmem:[%s21196_s7 + $0x1628] sm:$0xf0] }
 0x523   :  { %v13832_v53 = vld [vmem:[%s21196_s7 + $0x19cc] sm:$0xf]  ;;  %v11742_v19 = vor.u32 %v13712_v8, %v11739_v21  ;;  %7909 = vmatpush.bf16.msrb.mxu3 %v11614_v4 }
 0x524   :  { %v12219_v37 = vld [vmem:[%s21196_s7 + $0x19e8] sm:$0xf0]  ;;  %7888 = vmatmul.bf16.vlgmr.msrb.gmra.mxu0 %v15266_v55 }
 0x525   :  { %v14024_v2 = vld [vmem:[%s21196_s7 + $0x1fcc] sm:$0xf]  ;;  %v12222_v41 = vor.u32 %v13832_v53, %v12219_v37  ;;  %7926 = vmatpush.bf16.msrb.mxu2 %v11742_v19  ;;  %v7669_v37 = vadd.f32 %v17653_v18, %v7656_v20 }
 0x526   :  { %v12987_v32 = vld [vmem:[%s21196_s7 + $0x1fe8] sm:$0xf0] }
 0x527   :  { %v13880_v60 = vld [vmem:[%s21196_s7 + $0x1b4c] sm:$0xf]  ;;  %v12990_v11 = vor.u32 %v14024_v2, %v12987_v32  ;;  %7932 = vmatpush.bf16.msra.mxu0 %v12222_v41 }
 0x528   :  { %v12411_v56 = vld [vmem:[%s21196_s7 + $0x1b68] sm:$0xf0]  ;;  %7927 = vmatmul.bf16.vlgmr.msrb.gmra.mxu2 %v15268_v50 }
 0x529   :  { %v13672_v40 = vld [vmem:[%s21196_s7 + $0x14cc] sm:$0xf]  ;;  %v12414_v49 = vor.u32 %v13880_v60, %v12411_v56  ;;  %7971 = vmatpush.bf16.msra.mxu2 %v12990_v11 }
 0x52a   :  { %v11579_v16 = vld [vmem:[%s21196_s7 + $0x14e8] sm:$0xf0] }
 0x52b   :  { %v13824_v58 = vld [vmem:[%s21196_s7 + $0x198c] sm:$0xf]  ;;  %v11582_v9 = vor.u32 %v13672_v40, %v11579_v16  ;;  %7947 = vmatpush.bf16.msra.mxu1 %v12414_v49 }
 0x52c   :  { %v12187_v26 = vld [vmem:[%s21196_s7 + $0x19a8] sm:$0xf0] }
 0x52d   :  { %v14016_v28 = vld [vmem:[%s21196_s7 + $0x1f8c] sm:$0xf]  ;;  %v12190_v14 = vor.u32 %v13824_v58, %v12187_v26  ;;  %7910 = vmatpush.bf16.msrb.mxu3 %v11582_v9  ;;  %v7681_v58 = vpop.f32.mrf.mxu0 }
 0x52e   :  { %v12955_v31 = vld [vmem:[%s21196_s7 + $0x1fa8] sm:$0xf0] }
 0x52f   :  { %v13872_v34 = vld [vmem:[%s21196_s7 + $0x1b0c] sm:$0xf]  ;;  %v12958_v6 = vor.u32 %v14016_v28, %v12955_v31  ;;  %7933 = vmatpush.bf16.msra.mxu0 %v12190_v14  ;;  %v7682_v28 = vadd.f32 %v7681_v58, %v7669_v37  ;;  %v7657_v31 = vpop.f32.mrf.mxu3  ;;  %v9377_v37 = vld [vmem:[%s21196_s7 + $0x390] sm:$0xf] }
 0x530   :  { %v12379_v13 = vld [vmem:[%s21196_s7 + $0x1b28] sm:$0xf0]  ;;  %v13261_v58 = vld [vmem:[%s21196_s7 + $0x7ec] sm:$0xf0] }
 0x531   :  { %v13664_v63 = vld [vmem:[%s21196_s7 + $0x148c] sm:$0xf]  ;;  %v12382_v12 = vor.u32 %v13872_v34, %v12379_v13  ;;  %7972 = vmatpush.bf16.msra.mxu2 %v12958_v6 }
 0x532   :  { %v11547_v25 = vld [vmem:[%s21196_s7 + $0x14a8] sm:$0xf0] }
 0x533   :  { %v13816_v45 = vld [vmem:[%s21196_s7 + $0x194c] sm:$0xf]  ;;  %v11550_v46 = vor.u32 %v13664_v63, %v11547_v25  ;;  %7948 = vmatpush.bf16.msra.mxu1 %v12382_v12  ;;  %v7696_v63 = vpop.f32.mrf.mxu1 }
 0x534   :  { %v12155_v35 = vld [vmem:[%s21196_s7 + $0x1968] sm:$0xf0] }
 0x535   :  { %v14008_v52 = vld [vmem:[%s21196_s7 + $0x1f4c] sm:$0xf]  ;;  %v12158_v39 = vor.u32 %v13816_v45, %v12155_v35  ;;  %7911 = vmatpush.bf16.msrb.mxu3 %v11550_v46  ;;  %v9409_v46 = vld [vmem:[%s21196_s7 + $0x3d0] sm:$0xf] }
 0x536   :  { %v12923_v42 = vld [vmem:[%s21196_s7 + $0x1f68] sm:$0xf0] }
 0x537   :  { %v13864_v43 = vld [vmem:[%s21196_s7 + $0x1acc] sm:$0xf]  ;;  %v12926_v36 = vor.u32 %v14008_v52, %v12923_v42  ;;  %7934 = vmatpush.bf16.msra.mxu0 %v12158_v39 }
 0x538   :  { %v12347_v33 = vld [vmem:[%s21196_s7 + $0x1ae8] sm:$0xf0] }
 0x539   :  { %v13656_v5 = vld [vmem:[%s21196_s7 + $0x144c] sm:$0xf]  ;;  %v12350_v47 = vor.u32 %v13864_v43, %v12347_v33  ;;  %7973 = vmatpush.bf16.msra.mxu2 %v12926_v36  ;;  %v17835_v33 = vadd.f32 %v7694_v3, %v7682_v28  ;;  %v13117_v28 = vld [vmem:[%s21196_s7 + $0x36c] sm:$0xf0] }
 0x53a   :  { %v11515_v51 = vld [vmem:[%s21196_s7 + $0x1468] sm:$0xf0] }
 0x53b   :  { %v13808_v10 = vld [vmem:[%s21196_s7 + $0x190c] sm:$0xf]  ;;  %v11518_v2 = vor.u32 %v13656_v5, %v11515_v51  ;;  %7949 = vmatpush.bf16.msra.mxu1 %v12350_v47 }
 0x53c   :  { %v12123_v8 = vld [vmem:[%s21196_s7 + $0x1928] sm:$0xf0] }
 0x53d   :  { %v14000_v21 = vld [vmem:[%s21196_s7 + $0x1f0c] sm:$0xf]  ;;  %v12126_v60 = vor.u32 %v13808_v10, %v12123_v8  ;;  %7912 = vmatpush.bf16.msrb.mxu3 %v11518_v2  ;;  %v17855_v8 = vpop.f32.mrf.mxu2  ;;  %v13125_v2 = vld [vmem:[%s21196_s7 + $0x3ac] sm:$0xf0] }
 0x53e   :  { %v12891_v22 = vld [vmem:[%s21196_s7 + $0x1f28] sm:$0xf0] }
 0x53f   :  { %v13856_v24 = vld [vmem:[%s21196_s7 + $0x1a8c] sm:$0xf]  ;;  %v12894_v18 = vor.u32 %v14000_v21, %v12891_v22  ;;  %7935 = vmatpush.bf16.msra.mxu0 %v12126_v60  ;;  %v9410_v21 = vor.u32 %v13133_v38, %v9409_v46  ;;  %v13109_v46 = vld [vmem:[%s21196_s7 + $0x32c] sm:$0xf0] }
 0x540   :  { %v12315_v53 = vld [vmem:[%s21196_s7 + $0x1aa8] sm:$0xf0] }
 0x541   :  { %v13648_v32 = vld [vmem:[%s21196_s7 + $0x140c] sm:$0xf]  ;;  %v12318_v19 = vor.u32 %v13856_v24, %v12315_v53  ;;  %7974 = vmatpush.bf16.msra.mxu2 %v12894_v18  ;;  %v7683_v53 = vpop.f32.mrf.mxu0 }
 0x542   :  { %v11483_v56 = vld [vmem:[%s21196_s7 + $0x1428] sm:$0xf0] }
 0x543   :  { %v13800_v1 = vld [vmem:[%s21196_s7 + $0x18cc] sm:$0xf]  ;;  %v11486_v26 = vor.u32 %v13648_v32, %v11483_v56  ;;  %7950 = vmatpush.bf16.msra.mxu1 %v12318_v19 }
 0x544   :  { %v12091_v4 = vld [vmem:[%s21196_s7 + $0x18e8] sm:$0xf0] }
 0x545   :  { %v13960_v41 = vld [vmem:[%s21196_s7 + $0x1dcc] sm:$0xf]  ;;  %v12094_v34 = vor.u32 %v13800_v1, %v12091_v4  ;;  %7913 = vmatpush.bf16.msrb.mxu3 %v11486_v26  ;;  %v9345_v26 = vld [vmem:[%s21196_s7 + $0x350] sm:$0xf] }
 0x546   :  { %v12731_v40 = vld [vmem:[%s21196_s7 + $0x1de8] sm:$0xf0] }
 0x547   :  { %v13992_v16 = vld [vmem:[%s21196_s7 + $0x1ecc] sm:$0xf]  ;;  %v12734_v13 = vor.u32 %v13960_v41, %v12731_v40  ;;  %7936 = vmatpush.bf16.msra.mxu0 %v12094_v34 }
 0x548   :  { %v12859_v57 = vld [vmem:[%s21196_s7 + $0x1ee8] sm:$0xf0]  ;;  %7914 = vmatmul.bf16.vlgmr.msrb.gmra.mxu3 %v15377_v15 }
 0x549   :  { %v13848_v11 = vld [vmem:[%s21196_s7 + $0x1a4c] sm:$0xf]  ;;  %v12862_v25 = vor.u32 %v13992_v16, %v12859_v57  ;;  %7958 = vmatpush.bf16.msra.mxu3 %v12734_v13  ;;  %v9378_v16 = vor.u32 %v13125_v2, %v9377_v37  ;;  %v9153_v57 = vld [vmem:[%s21196_s7 + $0x1d0] sm:$0xf]  ;;  %v7707_v37 = vpop.f32.mrf.mxu3 }
 0x54a   :  { %v12283_v49 = vld [vmem:[%s21196_s7 + $0x1a68] sm:$0xf0] }
 0x54b   :  { %v13792_v9 = vld [vmem:[%s21196_s7 + $0x188c] sm:$0xf]  ;;  %v12286_v6 = vor.u32 %v13848_v11, %v12283_v49  ;;  %7975 = vmatpush.bf16.msra.mxu2 %v12862_v25  ;;  %v13069_v11 = vld [vmem:[%s21196_s7 + $0x1ec] sm:$0xf0]  ;;  %v7722_v25 = vpop.f32.mrf.mxu2 }
 0x54c   :  { %v12059_v14 = vld [vmem:[%s21196_s7 + $0x18a8] sm:$0xf0]  ;;  %v9921_v49 = vld [vmem:[%s21196_s7 + $0x7d0] sm:$0xf] }
 0x54d   :  { %v13952_v12 = vld [vmem:[%s21196_s7 + $0x1d8c] sm:$0xf]  ;;  %v12062_v39 = vor.u32 %v13792_v9, %v12059_v14  ;;  %7951 = vmatpush.bf16.msra.mxu1 %v12286_v6  ;;  %v9154_v9 = vor.u32 %v13069_v11, %v9153_v57  ;;  %v9922_v6 = vor.u32 %v13261_v58, %v9921_v49  ;;  %v13093_v57 = vld [vmem:[%s21196_s7 + $0x2ac] sm:$0xf0] }
 0x54e   :  { %v12699_v45 = vld [vmem:[%s21196_s7 + $0x1da8] sm:$0xf0]  ;;  %v13229_v25 = vld [vmem:[%s21196_s7 + $0x6ec] sm:$0xf0] }
 0x54f   :  { %v13984_v35 = vld [vmem:[%s21196_s7 + $0x1e8c] sm:$0xf]  ;;  %v12702_v5 = vor.u32 %v13952_v12, %v12699_v45  ;;  %7937 = vmatpush.bf16.msra.mxu0 %v12062_v39  ;;  %v9346_v12 = vor.u32 %v13117_v28, %v9345_v26  ;;  %v9121_v45 = vld [vmem:[%s21196_s7 + $0x190] sm:$0xf] }
 0x550   :  { %v12827_v52 = vld [vmem:[%s21196_s7 + $0x1ea8] sm:$0xf0] }
 0x551   :  { %v13840_v42 = vld [vmem:[%s21196_s7 + $0x1a0c] sm:$0xf]  ;;  %v12830_v20 = vor.u32 %v13984_v35, %v12827_v52  ;;  %7959 = vmatpush.bf16.msra.mxu3 %v12702_v5  ;;  %v13061_v35 = vld [vmem:[%s21196_s7 + $0x1ac] sm:$0xf0] }
 0x552   :  { %v12251_v43 = vld [vmem:[%s21196_s7 + $0x1a28] sm:$0xf0]  ;;  %v9889_v52 = vld [vmem:[%s21196_s7 + $0x790] sm:$0xf]  ;;  %v9122_v39 = vor.u32 %v13061_v35, %v9121_v45  ;;  %v7733_v45 = vpop.f32.mrf.mxu0 }
 0x553   :  { %v13784_v51 = vld [vmem:[%s21196_s7 + $0x184c] sm:$0xf]  ;;  %v12254_v3 = vor.u32 %v13840_v42, %v12251_v43  ;;  %7976 = vmatpush.bf16.msra.mxu2 %v12830_v20  ;;  %v13253_v42 = vld [vmem:[%s21196_s7 + $0x7ac] sm:$0xf0] }
 0x554   :  { %v12027_v36 = vld [vmem:[%s21196_s7 + $0x1868] sm:$0xf0]  ;;  %v9313_v43 = vld [vmem:[%s21196_s7 + $0x310] sm:$0xf]  ;;  %v9890_v20 = vor.u32 %v13253_v42, %v9889_v52  ;;  %v7709_v42 = vpop.f32.mrf.mxu3 }
 0x555   :  { %v13944_v47 = vld [vmem:[%s21196_s7 + $0x1d4c] sm:$0xf]  ;;  %v12030_v32 = vor.u32 %v13784_v51, %v12027_v36  ;;  %7952 = vmatpush.bf16.msra.mxu1 %v12254_v3  ;;  %v9314_v3 = vor.u32 %v13109_v46, %v9313_v43  ;;  %v9089_v36 = vld [vmem:[%s21196_s7 + $0x150] sm:$0xf] }
 0x556   :  { %v12667_v10 = vld [vmem:[%s21196_s7 + $0x1d68] sm:$0xf0] }
 0x557   :  { %v13976_v22 = vld [vmem:[%s21196_s7 + $0x1e4c] sm:$0xf]  ;;  %v12670_v60 = vor.u32 %v13944_v47, %v12667_v10  ;;  %7938 = vmatpush.bf16.msra.mxu0 %v12030_v32  ;;  %v13053_v47 = vld [vmem:[%s21196_s7 + $0x16c] sm:$0xf0] }
 0x558   :  { %v12795_v24 = vld [vmem:[%s21196_s7 + $0x1e68] sm:$0xf0]  ;;  %7953 = vmatmul.bf16.vlgmr.msra.gmra.mxu1 %v15440_v48  ;;  %v9857_v10 = vld [vmem:[%s21196_s7 + $0x750] sm:$0xf]  ;;  %v9090_v2 = vor.u32 %v13053_v47, %v9089_v36 }
 0x559   :  { %v13776_v56 = vld [vmem:[%s21196_s7 + $0x180c] sm:$0xf]  ;;  %v12798_v18 = vor.u32 %v13976_v22, %v12795_v24  ;;  %7997 = vmatpush.bf16.msrb.mxu1 %v9410_v21  ;;  %7960 = vmatpush.bf16.msra.mxu3 %v12670_v60  ;;  %v13245_v21 = vld [vmem:[%s21196_s7 + $0x76c] sm:$0xf0] }
 0x55a   :  { %v11995_v1 = vld [vmem:[%s21196_s7 + $0x1828] sm:$0xf0]  ;;  %v9281_v22 = vld [vmem:[%s21196_s7 + $0x2d0] sm:$0xf] }
 0x55b   :  { %v13936_v4 = vld [vmem:[%s21196_s7 + $0x1d0c] sm:$0xf]  ;;  %v11998_v31 = vor.u32 %v13776_v56, %v11995_v1  ;;  %7977 = vmatpush.bf16.msra.mxu2 %v12798_v18  ;;  %v13101_v24 = vld [vmem:[%s21196_s7 + $0x2ec] sm:$0xf0]  ;;  %v7708_v56 = vadd.f32 %v7707_v37, %v17835_v33  ;;  %v7746_v1 = vpop.f32.mrf.mxu1 }
 0x55c   :  { %v12635_v19 = vld [vmem:[%s21196_s7 + $0x1d28] sm:$0xf0]  ;;  %v9282_v18 = vor.u32 %v13101_v24, %v9281_v22  ;;  %v13237_v33 = vld [vmem:[%s21196_s7 + $0x72c] sm:$0xf0] }
 0x55d   :  { %v13968_v41 = vld [vmem:[%s21196_s7 + $0x1e0c] sm:$0xf]  ;;  %v12638_v34 = vor.u32 %v13936_v4, %v12635_v19  ;;  %7998 = vmatpush.bf16.msrb.mxu1 %v9378_v16  ;;  %7939 = vmatpush.bf16.msra.mxu0 %v11998_v31  ;;  %v9858_v4 = vor.u32 %v13245_v21, %v9857_v10  ;;  %v9057_v19 = vld [vmem:[%s21196_s7 + $0x110] sm:$0xf]  ;;  %v7721_v11 = vadd.f32 %v17855_v8, %v7708_v56 }
 0x55e   :  { %v12763_v40 = vld [vmem:[%s21196_s7 + $0x1e28] sm:$0xf0]  ;;  %v9249_v16 = vld [vmem:[%s21196_s7 + $0x290] sm:$0xf] }
 0x55f   :  { %v12766_v13 = vor.u32 %v13968_v41, %v12763_v40  ;;  %v13928_v14 = vld [vmem:[%s21196_s7 + $0x1ccc] sm:$0xf]  ;;  %7961 = vmatpush.bf16.msra.mxu3 %v12638_v34  ;;  %v13045_v41 = vld [vmem:[%s21196_s7 + $0x12c] sm:$0xf0]  ;;  %v7734_v52 = vadd.f32 %v7733_v45, %v7721_v11 }
 0x560   :  { %v12603_v63 = vld [vmem:[%s21196_s7 + $0x1ce8] sm:$0xf0]  ;;  %7940 = vmatmul.bf16.vlgmr.msra.gmra.mxu0 %v15476_v23  ;;  %v9825_v40 = vld [vmem:[%s21196_s7 + $0x710] sm:$0xf]  ;;  %v9058_v26 = vor.u32 %v13045_v41, %v9057_v19  ;;  %v18057_v41 = vpop.f32.mrf.mxu2 }
 0x561   :  { %v12606_v38 = vor.u32 %v13928_v14, %v12603_v63  ;;  %7978 = vmatpush.bf16.msra.mxu2 %v12766_v13  ;;  %7984 = vmatpush.bf16.msrb.mxu0 %v9154_v9  ;;  %v13920_v5 = vld [vmem:[%s21196_s7 + $0x1c8c] sm:$0xf]  ;;  %v9025_v31 = vld [vmem:[%s21196_s7 + $0xd0] sm:$0xf]  ;;  %v9826_v8 = vor.u32 %v13237_v33, %v9825_v40  ;;  %v9250_v13 = vor.u32 %v13093_v57, %v9249_v16  ;;  %v7735_v57 = vpop.f32.mrf.mxu0 }
 0x562   :  { %v12571_v51 = vld [vmem:[%s21196_s7 + $0x1ca8] sm:$0xf0]  ;;  %7999 = vmatpush.bf16.msrb.mxu1 %v9346_v12  ;;  %v13037_v34 = vld [vmem:[%s21196_s7 + $0xec] sm:$0xf0]  ;;  %v18037_v24 = vadd.f32 %v7746_v1, %v7734_v52 }
 0x563   :  { %7962 = vmatpush.bf16.msra.mxu3 %v12606_v38  ;;  %v12574_v53 = vor.u32 %v13920_v5, %v12571_v51  ;;  %v13912_v32 = vld [vmem:[%s21196_s7 + $0x1c4c] sm:$0xf]  ;;  %v9665_v9 = vld [vmem:[%s21196_s7 + $0x5d0] sm:$0xf]  ;;  %v9026_v43 = vor.u32 %v13037_v34, %v9025_v31  ;;  %v7748_v5 = vpop.f32.mrf.mxu1 }
 0x564   :  { %7979 = vmatmul.bf16.vlgmr.msra.gmra.mxu2 %v15484_v54  ;;  %v12539_v60 = vld [vmem:[%s21196_s7 + $0x1c68] sm:$0xf0]  ;;  %v13197_v14 = vld [vmem:[%s21196_s7 + $0x5ec] sm:$0xf0] }
 0x565   :  { %8023 = vmatpush.bf16.msrb.mxu2 %v9922_v6  ;;  %7985 = vmatpush.bf16.msrb.mxu0 %v9122_v39  ;;  %v12542_v49 = vor.u32 %v13912_v32, %v12539_v60  ;;  %v13904_v58 = vld [vmem:[%s21196_s7 + $0x1c0c] sm:$0xf]  ;;  %v9793_v63 = vld [vmem:[%s21196_s7 + $0x6d0] sm:$0xf]  ;;  %v9666_v46 = vor.u32 %v13197_v14, %v9665_v9 }
 0x566   :  { %8000 = vmatpush.bf16.msrb.mxu1 %v9314_v3  ;;  %v12507_v28 = vld [vmem:[%s21196_s7 + $0x1c28] sm:$0xf0]  ;;  %v9217_v6 = vld [vmem:[%s21196_s7 + $0x250] sm:$0xf]  ;;  %v9794_v51 = vor.u32 %v13229_v25, %v9793_v63 }
 0x567   :  { %7963 = vmatpush.bf16.msra.mxu3 %v12574_v53  ;;  %v13085_v12 = vld [vmem:[%s21196_s7 + $0x26c] sm:$0xf0]  ;;  %v12510_v35 = vor.u32 %v13904_v58, %v12507_v28 }
 0x568   :  { %v8993_v38 = vld [vmem:[%s21196_s7 + $0x90] sm:$0xf] }
 0x569   :  { %8024 = vmatpush.bf16.msrb.mxu2 %v9890_v20  ;;  %7986 = vmatpush.bf16.msrb.mxu0 %v9090_v2  ;;  %v13029_v39 = vld [vmem:[%s21196_s7 + $0xac] sm:$0xf0]  ;;  %v9218_v20 = vor.u32 %v13085_v12, %v9217_v6 }
 0x56a   :  { %8001 = vmatpush.bf16.msrb.mxu1 %v9282_v18  ;;  %v9633_v3 = vld [vmem:[%s21196_s7 + $0x590] sm:$0xf]  ;;  %v8994_v2 = vor.u32 %v13029_v39, %v8993_v38 }
 0x56b   :  { %7964 = vmatpush.bf16.msra.mxu3 %v12542_v49  ;;  %v13189_v36 = vld [vmem:[%s21196_s7 + $0x5ac] sm:$0xf0] }
 0x56c   :  { %v9761_v47 = vld [vmem:[%s21196_s7 + $0x690] sm:$0xf]  ;;  %v9634_v32 = vor.u32 %v13189_v36, %v9633_v3 }
 0x56d   :  { %8025 = vmatpush.bf16.msrb.mxu2 %v9858_v4  ;;  %7987 = vmatpush.bf16.msrb.mxu0 %v9058_v26  ;;  %v13221_v10 = vld [vmem:[%s21196_s7 + $0x6ac] sm:$0xf0] }
 0x56e   :  { %8002 = vmatpush.bf16.msrb.mxu1 %v9250_v13  ;;  %v9185_v21 = vld [vmem:[%s21196_s7 + $0x210] sm:$0xf]  ;;  %v9762_v56 = vor.u32 %v13221_v10, %v9761_v47 }
 0x56f   :  { %v13077_v22 = vld [vmem:[%s21196_s7 + $0x22c] sm:$0xf0]  ;;  %7965 = vmatpush.bf16.msra.mxu3 %v12510_v35 }
 0x570   :  { %v10433_v53 = vld [vmem:[%s21196_s7 + $0xbd0] sm:$0xf]  ;;  %v9186_v1 = vor.u32 %v13077_v22, %v9185_v21 }
 0x571   :  { %8026 = vmatpush.bf16.msrb.mxu2 %v9826_v8  ;;  %v13389_v37 = vld [vmem:[%s21196_s7 + $0xbec] sm:$0xf0]  ;;  %7988 = vmatpush.bf16.msrb.mxu0 %v9026_v43 }
 0x572   :  { %v8961_v60 = vld [vmem:[%s21196_s7 + $0x50] sm:$0xf]  ;;  %8003 = vmatpush.bf16.msrb.mxu1 %v9218_v20  ;;  %7966 = vmatmul.bf16.vlgmr.msra.gmra.mxu3 %v15591_v44  ;;  %v10434_v40 = vor.u32 %v13389_v37, %v10433_v53 }
 0x573   :  { %8010 = vmatpush.bf16.msrb.mxu3 %v9666_v46  ;;  %v13021_v4 = vld [vmem:[%s21196_s7 + $0x6c] sm:$0xf0] }
 0x574   :  { %v9601_v18 = vld [vmem:[%s21196_s7 + $0x550] sm:$0xf]  ;;  %v8962_v58 = vor.u32 %v13021_v4, %v8961_v60 }
 0x575   :  { %8027 = vmatpush.bf16.msrb.mxu2 %v9794_v51  ;;  %v13181_v19 = vld [vmem:[%s21196_s7 + $0x56c] sm:$0xf0]  ;;  %7989 = vmatpush.bf16.msrb.mxu0 %v8994_v2  ;;  %v7774_v51 = vpop.f32.mrf.mxu2 }
 0x576   :  { %v9729_v33 = vld [vmem:[%s21196_s7 + $0x650] sm:$0xf]  ;;  %v9602_v26 = vor.u32 %v13181_v19, %v9601_v18  ;;  %8004 = vmatpush.bf16.msrb.mxu1 %v9186_v1 }
 0x577   :  { %v13213_v16 = vld [vmem:[%s21196_s7 + $0x66c] sm:$0xf0]  ;;  %8011 = vmatpush.bf16.msrb.mxu3 %v9634_v32 }
 0x578   :  { %v10401_v11 = vld [vmem:[%s21196_s7 + $0xb90] sm:$0xf]  ;;  %v9730_v8 = vor.u32 %v13213_v16, %v9729_v33 }
 0x579   :  { %v13381_v49 = vld [vmem:[%s21196_s7 + $0xbac] sm:$0xf0]  ;;  %8028 = vmatpush.bf16.msrb.mxu2 %v9762_v56  ;;  %7990 = vmatpush.bf16.msrb.mxu0 %v8962_v58 }
 0x57a   :  { %v8929_v28 = vld [vmem:[%s21196_s7 + $0x10] sm:$0xf]  ;;  %8049 = vmatpush.bf16.msra.mxu1 %v10434_v40  ;;  %v10402_v63 = vor.u32 %v13381_v49, %v10401_v11  ;;  %v7759_v11 = vpop.f32.mrf.mxu3 }
 0x57b   :  { %v13013_v31 = vld [vmem:[%s21196_s7 + $0x2c] sm:$0xf0]  ;;  %8012 = vmatpush.bf16.msrb.mxu3 %v9602_v26  ;;  %8005 = vmatmul.bf16.vlgmr.msrb.gmra.mxu1 %v15006_v30 }
 0x57c   :  { %v9569_v34 = vld [vmem:[%s21196_s7 + $0x510] sm:$0xf]  ;;  %v8930_v42 = vor.u32 %v13013_v31, %v8929_v28  ;;  %v7760_v28 = vadd.f32 %v7759_v11, %v18037_v24  ;;  %v7798_v31 = vpop.f32.mrf.mxu1 }
 0x57d   :  { %v13173_v13 = vld [vmem:[%s21196_s7 + $0x52c] sm:$0xf0]  ;;  %8029 = vmatpush.bf16.msrb.mxu2 %v9730_v8 }
 0x57e   :  { %v9697_v9 = vld [vmem:[%s21196_s7 + $0x610] sm:$0xf]  ;;  %v9570_v43 = vor.u32 %v13173_v13, %v9569_v34  ;;  %8050 = vmatpush.bf16.msra.mxu1 %v10402_v63  ;;  %7991 = vmatpush.bf16.msrb.mxu0 %v8930_v42 }
 0x57f   :  { %v13205_v14 = vld [vmem:[%s21196_s7 + $0x62c] sm:$0xf0] }
 0x580   :  { %v10177_v25 = vld [vmem:[%s21196_s7 + $0x9d0] sm:$0xf]  ;;  %v9698_v46 = vor.u32 %v13205_v14, %v9697_v9  ;;  %8013 = vmatpush.bf16.msrb.mxu3 %v9570_v43 }
 0x581   :  { %v13325_v6 = vld [vmem:[%s21196_s7 + $0x9ec] sm:$0xf0]  ;;  %7992 = vmatmul.bf16.vlgmr.msrb.gmra.mxu0 %v15033_v61 }
 0x582   :  { %v10945_v12 = vld [vmem:[%s21196_s7 + $0xfd0] sm:$0xf]  ;;  %v10178_v38 = vor.u32 %v13325_v6, %v10177_v25  ;;  %8030 = vmatpush.bf16.msrb.mxu2 %v9698_v46  ;;  %v18185_v6 = vadd.f32 %v18057_v41, %v7760_v28 }
 0x583   :  { %v13517_v45 = vld [vmem:[%s21196_s7 + $0xfec] sm:$0xf0] }
 0x584   :  { %v10369_v35 = vld [vmem:[%s21196_s7 + $0xb50] sm:$0xf]  ;;  %v10946_v20 = vor.u32 %v13517_v45, %v10945_v12  ;;  %8036 = vmatpush.bf16.msra.mxu0 %v10178_v38  ;;  %v14033_v12 = vld [vmem:[%s21198_s8] sm:$0xff] }
 0x585   :  { %v13373_v52 = vld [vmem:[%s21196_s7 + $0xb6c] sm:$0xf0]  ;;  %8031 = vmatmul.bf16.vlgmr.msrb.gmra.mxu2 %v15041_v0  ;;  %v2019_v45 = vperm.slane %v14033_v12, 3 }
 0x586   :  { %v9537_v39 = vld [vmem:[%s21196_s7 + $0x4d0] sm:$0xf]  ;;  %v10370_v3 = vor.u32 %v13373_v52, %v10369_v35  ;;  %8075 = vmatpush.bf16.msra.mxu2 %v10946_v20 }
 0x587   :  { %v13165_v5 = vld [vmem:[%s21196_s7 + $0x4ec] sm:$0xf0] }
 0x588   :  { %v10145_v36 = vld [vmem:[%s21196_s7 + $0x990] sm:$0xf]  ;;  %v9538_v37 = vor.u32 %v13165_v5, %v9537_v39  ;;  %8051 = vmatpush.bf16.msra.mxu1 %v10370_v3 }
 0x589   :  { %v13317_v47 = vld [vmem:[%s21196_s7 + $0x9ac] sm:$0xf0] }
 0x58a   :  { %v10913_v10 = vld [vmem:[%s21196_s7 + $0xf90] sm:$0xf]  ;;  %v10146_v2 = vor.u32 %v13317_v47, %v10145_v36  ;;  %8014 = vmatpush.bf16.msrb.mxu3 %v9538_v37 }
 0x58b   :  { %v13509_v21 = vld [vmem:[%s21196_s7 + $0xfac] sm:$0xf0] }
 0x58c   :  { %v10337_v22 = vld [vmem:[%s21196_s7 + $0xb10] sm:$0xf]  ;;  %v10914_v56 = vor.u32 %v13509_v21, %v10913_v10  ;;  %8037 = vmatpush.bf16.msra.mxu0 %v10146_v2  ;;  %v7785_v10 = vpop.f32.mrf.mxu0 }
 0x58d   :  { %v13365_v53 = vld [vmem:[%s21196_s7 + $0xb2c] sm:$0xf0] }
 0x58e   :  { %v9505_v32 = vld [vmem:[%s21196_s7 + $0x490] sm:$0xf]  ;;  %v10338_v1 = vor.u32 %v13365_v53, %v10337_v22  ;;  %8076 = vmatpush.bf16.msra.mxu2 %v10914_v56  ;;  %v7786_v22 = vadd.f32 %v7785_v10, %v2019_v45  ;;  %v7761_v53 = vpop.f32.mrf.mxu3  ;;  %v7800_v56 = vpop.f32.mrf.mxu1 }
 0x58f   :  { %v13157_v60 = vld [vmem:[%s21196_s7 + $0x4ac] sm:$0xf0] }
 0x590   :  { %v10113_v4 = vld [vmem:[%s21196_s7 + $0x950] sm:$0xf]  ;;  %v9506_v57 = vor.u32 %v13157_v60, %v9505_v32  ;;  %8052 = vmatpush.bf16.msra.mxu1 %v10338_v1  ;;  %v18244_v11 = vadd.f32 %v7798_v31, %v7786_v22 }
 0x591   :  { %v13309_v18 = vld [vmem:[%s21196_s7 + $0x96c] sm:$0xf0] }
 0x592   :  { %v10881_v19 = vld [vmem:[%s21196_s7 + $0xf50] sm:$0xf]  ;;  %v10114_v49 = vor.u32 %v13309_v18, %v10113_v4  ;;  %8015 = vmatpush.bf16.msrb.mxu3 %v9506_v57 }
 0x593   :  { %v13501_v40 = vld [vmem:[%s21196_s7 + $0xf6c] sm:$0xf0] }
 0x594   :  { %v10305_v33 = vld [vmem:[%s21196_s7 + $0xad0] sm:$0xf]  ;;  %v10882_v34 = vor.u32 %v13501_v40, %v10881_v19  ;;  %8038 = vmatpush.bf16.msra.mxu0 %v10114_v49  ;;  %v7787_v45 = vpop.f32.mrf.mxu0 }
 0x595   :  { %v13357_v16 = vld [vmem:[%s21196_s7 + $0xaec] sm:$0xf0] }
 0x596   :  { %v9473_v58 = vld [vmem:[%s21196_s7 + $0x450] sm:$0xf]  ;;  %v10306_v8 = vor.u32 %v13357_v16, %v10305_v33  ;;  %8077 = vmatpush.bf16.msra.mxu2 %v10882_v34 }
 0x597   :  { %v13149_v26 = vld [vmem:[%s21196_s7 + $0x46c] sm:$0xf0] }
 0x598   :  { %v10081_v13 = vld [vmem:[%s21196_s7 + $0x910] sm:$0xf]  ;;  %v9474_v35 = vor.u32 %v13149_v26, %v9473_v58  ;;  %8053 = vmatpush.bf16.msra.mxu1 %v10306_v8 }
 0x599   :  { %v13301_v9 = vld [vmem:[%s21196_s7 + $0x92c] sm:$0xf0] }
 0x59a   :  { %v10849_v14 = vld [vmem:[%s21196_s7 + $0xf10] sm:$0xf]  ;;  %v10082_v42 = vor.u32 %v13301_v9, %v10081_v13  ;;  %8016 = vmatpush.bf16.msrb.mxu3 %v9474_v35 }
 0x59b   :  { %v13493_v24 = vld [vmem:[%s21196_s7 + $0xf2c] sm:$0xf0] }
 0x59c   :  { %v10273_v63 = vld [vmem:[%s21196_s7 + $0xa90] sm:$0xf]  ;;  %v10850_v38 = vor.u32 %v13493_v24, %v10849_v14  ;;  %8039 = vmatpush.bf16.msra.mxu0 %v10082_v42  ;;  %v18264_v24 = vpop.f32.mrf.mxu2 }
 0x59d   :  { %v13349_v25 = vld [vmem:[%s21196_s7 + $0xaac] sm:$0xf0] }
 0x59e   :  { %v9441_v52 = vld [vmem:[%s21196_s7 + $0x410] sm:$0xf]  ;;  %v10274_v39 = vor.u32 %v13349_v25, %v10273_v63  ;;  %8078 = vmatpush.bf16.msra.mxu2 %v10850_v38 }
 0x59f   :  { %v13141_v43 = vld [vmem:[%s21196_s7 + $0x42c] sm:$0xf0] }
 0x5a0   :  { %v10049_v41 = vld [vmem:[%s21196_s7 + $0x8d0] sm:$0xf]  ;;  %v9442_v21 = vor.u32 %v13141_v43, %v9441_v52  ;;  %8054 = vmatpush.bf16.msra.mxu1 %v10274_v39 }
 0x5a1   :  { %v13293_v46 = vld [vmem:[%s21196_s7 + $0x8ec] sm:$0xf0] }
 0x5a2   :  { %v10689_v5 = vld [vmem:[%s21196_s7 + $0xdd0] sm:$0xf]  ;;  %v10050_v37 = vor.u32 %v13293_v46, %v10049_v41  ;;  %8017 = vmatpush.bf16.msrb.mxu3 %v9442_v21 }
 0x5a3   :  { %v13453_v51 = vld [vmem:[%s21196_s7 + $0xdec] sm:$0xf0] }
 0x5a4   :  { %v10817_v20 = vld [vmem:[%s21196_s7 + $0xed0] sm:$0xf]  ;;  %v10690_v2 = vor.u32 %v13453_v51, %v10689_v5  ;;  %8040 = vmatpush.bf16.msra.mxu0 %v10050_v37 }
 0x5a5   :  { %v13485_v3 = vld [vmem:[%s21196_s7 + $0xeec] sm:$0xf0]  ;;  %8018 = vmatmul.bf16.vlgmr.msrb.gmra.mxu3 %v15133_v29 }
 0x5a6   :  { %v10241_v36 = vld [vmem:[%s21196_s7 + $0xa50] sm:$0xf]  ;;  %v10818_v1 = vor.u32 %v13485_v3, %v10817_v20  ;;  %8062 = vmatpush.bf16.msra.mxu3 %v10690_v2 }
 0x5a7   :  { %v13341_v47 = vld [vmem:[%s21196_s7 + $0xa6c] sm:$0xf0] }
 0x5a8   :  { %v10017_v32 = vld [vmem:[%s21196_s7 + $0x890] sm:$0xf]  ;;  %v10242_v4 = vor.u32 %v13341_v47, %v10241_v36  ;;  %8079 = vmatpush.bf16.msra.mxu2 %v10818_v1 }
 0x5a9   :  { %v13285_v60 = vld [vmem:[%s21196_s7 + $0x8ac] sm:$0xf0] }
 0x5aa   :  { %v10657_v18 = vld [vmem:[%s21196_s7 + $0xd90] sm:$0xf]  ;;  %v10018_v26 = vor.u32 %v13285_v60, %v10017_v32  ;;  %8055 = vmatpush.bf16.msra.mxu1 %v10242_v4  ;;  %v7826_v4 = vpop.f32.mrf.mxu2 }
 0x5ab   :  { %v13445_v19 = vld [vmem:[%s21196_s7 + $0xdac] sm:$0xf0] }
 0x5ac   :  { %v10785_v40 = vld [vmem:[%s21196_s7 + $0xe90] sm:$0xf]  ;;  %v10658_v28 = vor.u32 %v13445_v19, %v10657_v18  ;;  %8041 = vmatpush.bf16.msra.mxu0 %v10018_v26 }
 0x5ad   :  { %v13477_v33 = vld [vmem:[%s21196_s7 + $0xeac] sm:$0xf0] }
 0x5ae   :  { %v10209_v16 = vld [vmem:[%s21196_s7 + $0xa10] sm:$0xf]  ;;  %v10786_v31 = vor.u32 %v13477_v33, %v10785_v40  ;;  %8063 = vmatpush.bf16.msra.mxu3 %v10658_v28 }
 0x5af   :  { %v13333_v57 = vld [vmem:[%s21196_s7 + $0xa2c] sm:$0xf0] }
 0x5b0   :  { %v11457_v49 = vld [vmem:[%s21196_s7 + $0x13d0] sm:$0xf]  ;;  %v10210_v8 = vor.u32 %v13333_v57, %v10209_v16  ;;  %8080 = vmatpush.bf16.msra.mxu2 %v10786_v31 }
 0x5b1   :  { %v13645_v58 = vld [vmem:[%s21196_s7 + $0x13ec] sm:$0xf0] }
 0x5b2   :  { %v9985_v34 = vld [vmem:[%s21196_s7 + $0x850] sm:$0xf]  ;;  %v11458_v63 = vor.u32 %v13645_v58, %v11457_v49  ;;  %8056 = vmatpush.bf16.msra.mxu1 %v10210_v8 }
 0x5b3   :  { %v13277_v13 = vld [vmem:[%s21196_s7 + $0x86c] sm:$0xf0] }
 0x5b4   :  { %v10625_v9 = vld [vmem:[%s21196_s7 + $0xd50] sm:$0xf]  ;;  %v9986_v42 = vor.u32 %v13277_v13, %v9985_v34 }
 0x5b5   :  { %v13437_v14 = vld [vmem:[%s21196_s7 + $0xd6c] sm:$0xf0]  ;;  %8057 = vmatmul.bf16.vlgmr.msra.gmra.mxu1 %v15093_v27 }
 0x5b6   :  { %v10753_v25 = vld [vmem:[%s21196_s7 + $0xe50] sm:$0xf]  ;;  %v10626_v43 = vor.u32 %v13437_v14, %v10625_v9  ;;  %8101 = vmatpush.bf16.msrb.mxu1 %v11458_v63  ;;  %8042 = vmatpush.bf16.msra.mxu0 %v9986_v42 }
 0x5b7   :  { %v13469_v12 = vld [vmem:[%s21196_s7 + $0xe6c] sm:$0xf0] }
 0x5b8   :  { %v11425_v35 = vld [vmem:[%s21196_s7 + $0x1390] sm:$0xf]  ;;  %v10754_v39 = vor.u32 %v13469_v12, %v10753_v25  ;;  %8064 = vmatpush.bf16.msra.mxu3 %v10626_v43 }
 0x5b9   :  { %v13637_v52 = vld [vmem:[%s21196_s7 + $0x13ac] sm:$0xf0] }
 0x5ba   :  { %v9953_v41 = vld [vmem:[%s21196_s7 + $0x810] sm:$0xf]  ;;  %v11426_v3 = vor.u32 %v13637_v52, %v11425_v35  ;;  %8081 = vmatpush.bf16.msra.mxu2 %v10754_v39  ;;  %v7811_v52 = vpop.f32.mrf.mxu3 }
 0x5bb   :  { %v13269_v46 = vld [vmem:[%s21196_s7 + $0x82c] sm:$0xf0] }
 0x5bc   :  { %v10593_v38 = vld [vmem:[%s21196_s7 + $0xd10] sm:$0xf]  ;;  %v9954_v37 = vor.u32 %v13269_v46, %v9953_v41  ;;  %8102 = vmatpush.bf16.msrb.mxu1 %v11426_v3  ;;  %v7812_v46 = vadd.f32 %v7811_v52, %v18244_v11 }
 0x5bd   :  { %v13429_v5 = vld [vmem:[%s21196_s7 + $0xd2c] sm:$0xf0] }
 0x5be   :  { %v10721_v51 = vld [vmem:[%s21196_s7 + $0xe10] sm:$0xf]  ;;  %v10594_v2 = vor.u32 %v13429_v5, %v10593_v38  ;;  %8043 = vmatpush.bf16.msra.mxu0 %v9954_v37  ;;  %v7850_v38 = vpop.f32.mrf.mxu1 }
 0x5bf   :  { %v13461_v20 = vld [vmem:[%s21196_s7 + $0xe2c] sm:$0xf0] }
 0x5c0   :  { %v11201_v36 = vld [vmem:[%s21196_s7 + $0x11d0] sm:$0xf]  ;;  %v10722_v32 = vor.u32 %v13461_v20, %v10721_v51  ;;  %8065 = vmatpush.bf16.msra.mxu3 %v10594_v2 }
 0x5c1   :  { %v13581_v47 = vld [vmem:[%s21196_s7 + $0x11ec] sm:$0xf0]  ;;  %8044 = vmatmul.bf16.vlgmr.msra.gmra.mxu0 %v15131_v62 }
 0x5c2   :  { %v11969_v10 = vld [vmem:[%s21196_s7 + $0x17d0] sm:$0xf]  ;;  %v11202_v60 = vor.u32 %v13581_v47, %v11201_v36  ;;  %8082 = vmatpush.bf16.msra.mxu2 %v10722_v32 }
 0x5c3   :  { %v13773_v21 = vld [vmem:[%s21196_s7 + $0x17ec] sm:$0xf0] }
 0x5c4   :  { %v11393_v22 = vld [vmem:[%s21196_s7 + $0x1350] sm:$0xf]  ;;  %v11970_v18 = vor.u32 %v13773_v21, %v11969_v10  ;;  %8088 = vmatpush.bf16.msrb.mxu0 %v11202_v60  ;;  %v7825_v10 = vadd.f32 %v18264_v24, %v7812_v46 }
 0x5c5   :  { %v13629_v53 = vld [vmem:[%s21196_s7 + $0x136c] sm:$0xf0]  ;;  %8083 = vmatmul.bf16.vlgmr.msra.gmra.mxu2 %v15144_v7 }
 0x5c6   :  { %v10561_v56 = vld [vmem:[%s21196_s7 + $0xcd0] sm:$0xf]  ;;  %v11394_v19 = vor.u32 %v13629_v53, %v11393_v22  ;;  %8127 = vmatpush.bf16.msrb.mxu2 %v11970_v18 }
 0x5c7   :  { %v13421_v1 = vld [vmem:[%s21196_s7 + $0xcec] sm:$0xf0] }
 0x5c8   :  { %v11169_v40 = vld [vmem:[%s21196_s7 + $0x1190] sm:$0xf]  ;;  %v10562_v26 = vor.u32 %v13421_v1, %v10561_v56  ;;  %8103 = vmatpush.bf16.msrb.mxu1 %v11394_v19 }
 0x5c9   :  { %v13573_v33 = vld [vmem:[%s21196_s7 + $0x11ac] sm:$0xf0] }
 0x5ca   :  { %v11937_v16 = vld [vmem:[%s21196_s7 + $0x1790] sm:$0xf]  ;;  %v11170_v28 = vor.u32 %v13573_v33, %v11169_v40  ;;  %8066 = vmatpush.bf16.msra.mxu3 %v10562_v26  ;;  %v7837_v33 = vpop.f32.mrf.mxu0 }
 0x5cb   :  { %v13765_v57 = vld [vmem:[%s21196_s7 + $0x17ac] sm:$0xf0] }
 0x5cc   :  { %v11361_v49 = vld [vmem:[%s21196_s7 + $0x1310] sm:$0xf]  ;;  %v11938_v8 = vor.u32 %v13765_v57, %v11937_v16  ;;  %8089 = vmatpush.bf16.msrb.mxu0 %v11170_v28  ;;  %v7838_v57 = vadd.f32 %v7837_v33, %v7825_v10 }
 0x5cd   :  { %v13621_v58 = vld [vmem:[%s21196_s7 + $0x132c] sm:$0xf0] }
 0x5ce   :  { %v10529_v34 = vld [vmem:[%s21196_s7 + $0xc90] sm:$0xf]  ;;  %v11362_v13 = vor.u32 %v13621_v58, %v11361_v49  ;;  %8128 = vmatpush.bf16.msrb.mxu2 %v11938_v8  ;;  %v7813_v49 = vpop.f32.mrf.mxu3 }
 0x5cf   :  { %v13413_v31 = vld [vmem:[%s21196_s7 + $0xcac] sm:$0xf0] }
 0x5d0   :  { %v11137_v9 = vld [vmem:[%s21196_s7 + $0x1150] sm:$0xf]  ;;  %v10530_v35 = vor.u32 %v13413_v31, %v10529_v34  ;;  %8104 = vmatpush.bf16.msrb.mxu1 %v11362_v13  ;;  %v7852_v31 = vpop.f32.mrf.mxu1 }
 0x5d1   :  { %v13565_v14 = vld [vmem:[%s21196_s7 + $0x116c] sm:$0xf0] }
 0x5d2   :  { %v11905_v63 = vld [vmem:[%s21196_s7 + $0x1750] sm:$0xf]  ;;  %v11138_v42 = vor.u32 %v13565_v14, %v11137_v9  ;;  %8067 = vmatpush.bf16.msra.mxu3 %v10530_v35  ;;  %v18446_v35 = vadd.f32 %v7850_v38, %v7838_v57  ;;  %v7839_v10 = vpop.f32.mrf.mxu0 }
 0x5d3   :  { %v13757_v25 = vld [vmem:[%s21196_s7 + $0x176c] sm:$0xf0] }
 0x5d4   :  { %v11329_v12 = vld [vmem:[%s21196_s7 + $0x12d0] sm:$0xf]  ;;  %v11906_v39 = vor.u32 %v13757_v25, %v11905_v63  ;;  %8090 = vmatpush.bf16.msrb.mxu0 %v11138_v42 }
 0x5d5   :  { %v13613_v45 = vld [vmem:[%s21196_s7 + $0x12ec] sm:$0xf0] }
 0x5d6   :  { %v10497_v43 = vld [vmem:[%s21196_s7 + $0xc50] sm:$0xf]  ;;  %v11330_v5 = vor.u32 %v13613_v45, %v11329_v12  ;;  %8129 = vmatpush.bf16.msrb.mxu2 %v11906_v39 }
 0x5d7   :  { %v13405_v41 = vld [vmem:[%s21196_s7 + $0xc6c] sm:$0xf0] }
 0x5d8   :  { %v11105_v51 = vld [vmem:[%s21196_s7 + $0x1110] sm:$0xf]  ;;  %v10498_v21 = vor.u32 %v13405_v41, %v10497_v43  ;;  %8105 = vmatpush.bf16.msrb.mxu1 %v11330_v5 }
 0x5d9   :  { %v13557_v20 = vld [vmem:[%s21196_s7 + $0x112c] sm:$0xf0] }
 0x5da   :  { %v11873_v3 = vld [vmem:[%s21196_s7 + $0x1710] sm:$0xf]  ;;  %v11106_v53 = vor.u32 %v13557_v20, %v11105_v51  ;;  %8068 = vmatpush.bf16.msra.mxu3 %v10498_v21 }
 0x5db   :  { %v13749_v11 = vld [vmem:[%s21196_s7 + $0x172c] sm:$0xf0] }
 0x5dc   :  { %v11297_v36 = vld [vmem:[%s21196_s7 + $0x1290] sm:$0xf]  ;;  %v11874_v24 = vor.u32 %v13749_v11, %v11873_v3  ;;  %8091 = vmatpush.bf16.msrb.mxu0 %v11106_v53  ;;  %v18466_v3 = vpop.f32.mrf.mxu2 }
 0x5dd   :  { %v13605_v47 = vld [vmem:[%s21196_s7 + $0x12ac] sm:$0xf0] }
 0x5de   :  { %v10465_v22 = vld [vmem:[%s21196_s7 + $0xc10] sm:$0xf]  ;;  %v11298_v60 = vor.u32 %v13605_v47, %v11297_v36  ;;  %8130 = vmatpush.bf16.msrb.mxu2 %v11874_v24 }
 0x5df   :  { %v13397_v37 = vld [vmem:[%s21196_s7 + $0xc2c] sm:$0xf0] }
 0x5e0   :  { %v11073_v2 = vld [vmem:[%s21196_s7 + $0x10d0] sm:$0xf]  ;;  %v10466_v16 = vor.u32 %v13397_v37, %v10465_v22  ;;  %8106 = vmatpush.bf16.msrb.mxu1 %v11298_v60 }
 0x5e1   :  { %v13549_v32 = vld [vmem:[%s21196_s7 + $0x10ec] sm:$0xf0] }
 0x5e2   :  { %v11713_v56 = vld [vmem:[%s21196_s7 + $0x15d0] sm:$0xf]  ;;  %v11074_v58 = vor.u32 %v13549_v32, %v11073_v2  ;;  %8069 = vmatpush.bf16.msra.mxu3 %v10466_v16 }
 0x5e3   :  { %v13709_v1 = vld [vmem:[%s21196_s7 + $0x15ec] sm:$0xf0] }
 0x5e4   :  { %v11841_v4 = vld [vmem:[%s21196_s7 + $0x16d0] sm:$0xf]  ;;  %v11714_v26 = vor.u32 %v13709_v1, %v11713_v56  ;;  %8092 = vmatpush.bf16.msrb.mxu0 %v11074_v58 }
 0x5e5   :  { %v13741_v18 = vld [vmem:[%s21196_s7 + $0x16ec] sm:$0xf0]  ;;  %8070 = vmatmul.bf16.vlgmr.msra.gmra.mxu3 %v15264_v17 }
 0x5e6   :  { %v11265_v19 = vld [vmem:[%s21196_s7 + $0x1250] sm:$0xf]  ;;  %v11842_v8 = vor.u32 %v13741_v18, %v11841_v4  ;;  %8114 = vmatpush.bf16.msrb.mxu3 %v11714_v26 }
 0x5e7   :  { %v13597_v40 = vld [vmem:[%s21196_s7 + $0x126c] sm:$0xf0] }
 0x5e8   :  { %v11041_v28 = vld [vmem:[%s21196_s7 + $0x1090] sm:$0xf]  ;;  %v11266_v13 = vor.u32 %v13597_v40, %v11265_v19  ;;  %8131 = vmatpush.bf16.msrb.mxu2 %v11842_v8 }
 0x5e9   :  { %v13541_v34 = vld [vmem:[%s21196_s7 + $0x10ac] sm:$0xf0] }
 0x5ea   :  { %v11681_v9 = vld [vmem:[%s21196_s7 + $0x1590] sm:$0xf]  ;;  %v11042_v43 = vor.u32 %v13541_v34, %v11041_v28  ;;  %8107 = vmatpush.bf16.msrb.mxu1 %v11266_v13  ;;  %v7878_v13 = vpop.f32.mrf.mxu2 }
 0x5eb   :  { %v13701_v14 = vld [vmem:[%s21196_s7 + $0x15ac] sm:$0xf0] }
 0x5ec   :  { %v11809_v63 = vld [vmem:[%s21196_s7 + $0x1690] sm:$0xf]  ;;  %v11682_v41 = vor.u32 %v13701_v14, %v11681_v9  ;;  %8093 = vmatpush.bf16.msrb.mxu0 %v11042_v43 }
 0x5ed   :  { %v13733_v25 = vld [vmem:[%s21196_s7 + $0x16ac] sm:$0xf0] }
 0x5ee   :  { %v11233_v12 = vld [vmem:[%s21196_s7 + $0x1210] sm:$0xf]  ;;  %v11810_v38 = vor.u32 %v13733_v25, %v11809_v63  ;;  %8115 = vmatpush.bf16.msrb.mxu3 %v11682_v41 }
 0x5ef   :  { %v13589_v45 = vld [vmem:[%s21196_s7 + $0x122c] sm:$0xf0] }
 0x5f0   :  { %v12481_v52 = vld [vmem:[%s21196_s7 + $0x1bd0] sm:$0xf]  ;;  %v11234_v39 = vor.u32 %v13589_v45, %v11233_v12  ;;  %8132 = vmatpush.bf16.msrb.mxu2 %v11810_v38 }
 0x5f1   :  { %v13901_v42 = vld [vmem:[%s21196_s7 + $0x1bec] sm:$0xf0] }
 0x5f2   :  { %v11009_v46 = vld [vmem:[%s21196_s7 + $0x1050] sm:$0xf]  ;;  %v12482_v11 = vor.u32 %v13901_v42, %v12481_v52  ;;  %8108 = vmatpush.bf16.msrb.mxu1 %v11234_v39 }
 0x5f3   :  { %v13533_v5 = vld [vmem:[%s21196_s7 + $0x106c] sm:$0xf0] }
 0x5f4   :  { %v11649_v51 = vld [vmem:[%s21196_s7 + $0x1550] sm:$0xf]  ;;  %v11010_v53 = vor.u32 %v13533_v5, %v11009_v46 }
 0x5f5   :  { %v13693_v20 = vld [vmem:[%s21196_s7 + $0x156c] sm:$0xf0]  ;;  %8109 = vmatmul.bf16.vlgmr.msrb.gmra.mxu1 %v15222_v59 }
 0x5f6   :  { %v11777_v36 = vld [vmem:[%s21196_s7 + $0x1650] sm:$0xf]  ;;  %v11650_v37 = vor.u32 %v13693_v20, %v11649_v51  ;;  %8153 = vmatpush.bf16.msra.mxu1 %v12482_v11  ;;  %8094 = vmatpush.bf16.msrb.mxu0 %v11010_v53 }
 0x5f7   :  { %v13725_v47 = vld [vmem:[%s21196_s7 + $0x166c] sm:$0xf0] }
 0x5f8   :  { %v12449_v21 = vld [vmem:[%s21196_s7 + $0x1b90] sm:$0xf]  ;;  %v11778_v60 = vor.u32 %v13725_v47, %v11777_v36  ;;  %8116 = vmatpush.bf16.msrb.mxu3 %v11650_v37 }
 0x5f9   :  { %v13893_v22 = vld [vmem:[%s21196_s7 + $0x1bac] sm:$0xf0] }
 0x5fa   :  { %v10977_v2 = vld [vmem:[%s21196_s7 + $0x1010] sm:$0xf]  ;;  %v12450_v18 = vor.u32 %v13893_v22, %v12449_v21  ;;  %8133 = vmatpush.bf16.msrb.mxu2 %v11778_v60  ;;  %v18568_v22 = vpop.f32.mrf.mxu3 }
 0x5fb   :  { %v13525_v32 = vld [vmem:[%s21196_s7 + $0x102c] sm:$0xf0] }
 0x5fc   :  { %v11617_v24 = vld [vmem:[%s21196_s7 + $0x1510] sm:$0xf]  ;;  %v10978_v58 = vor.u32 %v13525_v32, %v10977_v2  ;;  %8154 = vmatpush.bf16.msra.mxu1 %v12450_v18  ;;  %v18576_v32 = vpop.f32.mrf.mxu1 }
 0x5fd   :  { %v13685_v56 = vld [vmem:[%s21196_s7 + $0x152c] sm:$0xf0] }
 0x5fe   :  { %v11745_v1 = vld [vmem:[%s21196_s7 + $0x1610] sm:$0xf]  ;;  %v11618_v26 = vor.u32 %v13685_v56, %v11617_v24  ;;  %8095 = vmatpush.bf16.msrb.mxu0 %v10978_v58 }
 0x5ff   :  { %v13717_v4 = vld [vmem:[%s21196_s7 + $0x162c] sm:$0xf0] }
 0x600   :  { %v12225_v19 = vld [vmem:[%s21196_s7 + $0x19d0] sm:$0xf]  ;;  %v11746_v28 = vor.u32 %v13717_v4, %v11745_v1  ;;  %8117 = vmatpush.bf16.msrb.mxu3 %v11618_v26 }
 0x601   :  { %v13837_v40 = vld [vmem:[%s21196_s7 + $0x19ec] sm:$0xf0]  ;;  %8096 = vmatmul.bf16.vlgmr.msrb.gmra.mxu0 %v15266_v55 }
 0x602   :  { %v12993_v33 = vld [vmem:[%s21196_s7 + $0x1fd0] sm:$0xf]  ;;  %v12226_v34 = vor.u32 %v13837_v40, %v12225_v19  ;;  %8134 = vmatpush.bf16.msrb.mxu2 %v11746_v28 }
 0x603   :  { %v14029_v16 = vld [vmem:[%s21196_s7 + $0x1fec] sm:$0xf0] }
 0x604   :  { %v12417_v57 = vld [vmem:[%s21196_s7 + $0x1b50] sm:$0xf]  ;;  %v12994_v9 = vor.u32 %v14029_v16, %v12993_v33  ;;  %8140 = vmatpush.bf16.msra.mxu0 %v12226_v34 }
 0x605   :  { %v13885_v49 = vld [vmem:[%s21196_s7 + $0x1b6c] sm:$0xf0]  ;;  %8135 = vmatmul.bf16.vlgmr.msrb.gmra.mxu2 %v15268_v50 }
 0x606   :  { %v11585_v31 = vld [vmem:[%s21196_s7 + $0x14d0] sm:$0xf]  ;;  %v12418_v14 = vor.u32 %v13885_v49, %v12417_v57  ;;  %8179 = vmatpush.bf16.msra.mxu2 %v12994_v9 }
 0x607   :  { %v13677_v8 = vld [vmem:[%s21196_s7 + $0x14ec] sm:$0xf0] }
 0x608   :  { %v12193_v63 = vld [vmem:[%s21196_s7 + $0x1990] sm:$0xf]  ;;  %v11586_v43 = vor.u32 %v13677_v8, %v11585_v31  ;;  %8155 = vmatpush.bf16.msra.mxu1 %v12418_v14 }
 0x609   :  { %v13829_v25 = vld [vmem:[%s21196_s7 + $0x19ac] sm:$0xf0] }
 0x60a   :  { %v12961_v12 = vld [vmem:[%s21196_s7 + $0x1f90] sm:$0xf]  ;;  %v12194_v41 = vor.u32 %v13829_v25, %v12193_v63  ;;  %8118 = vmatpush.bf16.msrb.mxu3 %v11586_v43  ;;  %v18626_v25 = vpop.f32.mrf.mxu0 }
 0x60b   :  { %v14021_v45 = vld [vmem:[%s21196_s7 + $0x1fac] sm:$0xf0] }
 0x60c   :  { %v12385_v52 = vld [vmem:[%s21196_s7 + $0x1b10] sm:$0xf]  ;;  %v12962_v39 = vor.u32 %v14021_v45, %v12961_v12  ;;  %8141 = vmatpush.bf16.msra.mxu0 %v12194_v41  ;;  %v7865_v45 = vpop.f32.mrf.mxu3 }
 0x60d   :  { %v13877_v42 = vld [vmem:[%s21196_s7 + $0x1b2c] sm:$0xf0]  ;;  %v9155_v45 = vld [vmem:[%s21196_s7 + $0x1f0] sm:$0xf0] }
 0x60e   :  { %v11553_v46 = vld [vmem:[%s21196_s7 + $0x1490] sm:$0xf]  ;;  %v12386_v5 = vor.u32 %v13877_v42, %v12385_v52  ;;  %8180 = vmatpush.bf16.msra.mxu2 %v12962_v39 }
 0x60f   :  { %v13669_v38 = vld [vmem:[%s21196_s7 + $0x14ac] sm:$0xf0] }
 0x610   :  { %v12161_v51 = vld [vmem:[%s21196_s7 + $0x1950] sm:$0xf]  ;;  %v11554_v21 = vor.u32 %v13669_v38, %v11553_v46  ;;  %8156 = vmatpush.bf16.msra.mxu1 %v12386_v5  ;;  %v7904_v46 = vpop.f32.mrf.mxu1 }
 0x611   :  { %v13821_v20 = vld [vmem:[%s21196_s7 + $0x196c] sm:$0xf0] }
 0x612   :  { %v12929_v11 = vld [vmem:[%s21196_s7 + $0x1f50] sm:$0xf]  ;;  %v12162_v53 = vor.u32 %v13821_v20, %v12161_v51  ;;  %8119 = vmatpush.bf16.msrb.mxu3 %v11554_v21  ;;  %v9411_v21 = vld [vmem:[%s21196_s7 + $0x3f0] sm:$0xf0] }
 0x613   :  { %v14013_v36 = vld [vmem:[%s21196_s7 + $0x1f6c] sm:$0xf0] }
 0x614   :  { %v12353_v47 = vld [vmem:[%s21196_s7 + $0x1ad0] sm:$0xf]  ;;  %v12930_v24 = vor.u32 %v14013_v36, %v12929_v11  ;;  %8142 = vmatpush.bf16.msra.mxu0 %v12162_v53 }
 0x615   :  { %v13869_v10 = vld [vmem:[%s21196_s7 + $0x1aec] sm:$0xf0] }
 0x616   :  { %v11521_v37 = vld [vmem:[%s21196_s7 + $0x1450] sm:$0xf]  ;;  %v12354_v60 = vor.u32 %v13869_v10, %v12353_v47  ;;  %8181 = vmatpush.bf16.msra.mxu2 %v12930_v24  ;;  %v13129_v10 = vld [vmem:[%s21196_s7 + $0x3d4] sm:$0xf] }
 0x617   :  { %v13661_v2 = vld [vmem:[%s21196_s7 + $0x146c] sm:$0xf0] }
 0x618   :  { %v12129_v56 = vld [vmem:[%s21196_s7 + $0x1910] sm:$0xf]  ;;  %v11522_v33 = vor.u32 %v13661_v2, %v11521_v37  ;;  %8157 = vmatpush.bf16.msra.mxu1 %v12354_v60 }
 0x619   :  { %v13813_v1 = vld [vmem:[%s21196_s7 + $0x192c] sm:$0xf0] }
 0x61a   :  { %v12897_v4 = vld [vmem:[%s21196_s7 + $0x1f10] sm:$0xf]  ;;  %v12130_v57 = vor.u32 %v13813_v1, %v12129_v56  ;;  %8120 = vmatpush.bf16.msrb.mxu3 %v11522_v33 }
 0x61b   :  { %v14005_v18 = vld [vmem:[%s21196_s7 + $0x1f2c] sm:$0xf0] }
 0x61c   :  { %v12321_v19 = vld [vmem:[%s21196_s7 + $0x1a90] sm:$0xf]  ;;  %v12898_v28 = vor.u32 %v14005_v18, %v12897_v4  ;;  %8143 = vmatpush.bf16.msra.mxu0 %v12130_v57  ;;  %v18670_v18 = vpop.f32.mrf.mxu2  ;;  %v13121_v57 = vld [vmem:[%s21196_s7 + $0x394] sm:$0xf] }
 0x61d   :  { %v13861_v40 = vld [vmem:[%s21196_s7 + $0x1aac] sm:$0xf0] }
 0x61e   :  { %v11489_v16 = vld [vmem:[%s21196_s7 + $0x1410] sm:$0xf]  ;;  %v12322_v34 = vor.u32 %v13861_v40, %v12321_v19  ;;  %8182 = vmatpush.bf16.msra.mxu2 %v12898_v28  ;;  %v9414_v19 = vor.u32 %v13129_v10, %v9411_v21  ;;  %v13057_v10 = vld [vmem:[%s21196_s7 + $0x194] sm:$0xf] }
 0x61f   :  { %v13653_v49 = vld [vmem:[%s21196_s7 + $0x142c] sm:$0xf0]  ;;  %v9123_v21 = vld [vmem:[%s21196_s7 + $0x1b0] sm:$0xf0] }
 0x620   :  { %v12097_v58 = vld [vmem:[%s21196_s7 + $0x18d0] sm:$0xf]  ;;  %v11490_v12 = vor.u32 %v13653_v49, %v11489_v16  ;;  %8158 = vmatpush.bf16.msra.mxu1 %v12322_v34  ;;  %v7891_v16 = vpop.f32.mrf.mxu0  ;;  %v9379_v49 = vld [vmem:[%s21196_s7 + $0x3b0] sm:$0xf0] }
 0x621   :  { %v13805_v26 = vld [vmem:[%s21196_s7 + $0x18ec] sm:$0xf0]  ;;  %v9091_v16 = vld [vmem:[%s21196_s7 + $0x170] sm:$0xf0] }
 0x622   :  { %v12737_v31 = vld [vmem:[%s21196_s7 + $0x1dd0] sm:$0xf]  ;;  %v12098_v52 = vor.u32 %v13805_v26, %v12097_v58  ;;  %8121 = vmatpush.bf16.msrb.mxu3 %v11490_v12  ;;  %v13065_v12 = vld [vmem:[%s21196_s7 + $0x1d4] sm:$0xf] }
 0x623   :  { %v13965_v8 = vld [vmem:[%s21196_s7 + $0x1dec] sm:$0xf0] }
 0x624   :  { %v12865_v13 = vld [vmem:[%s21196_s7 + $0x1ed0] sm:$0xf]  ;;  %v12738_v42 = vor.u32 %v13965_v8, %v12737_v31  ;;  %8144 = vmatpush.bf16.msra.mxu0 %v12098_v52  ;;  %v13257_v52 = vld [vmem:[%s21196_s7 + $0x7d4] sm:$0xf] }
 0x625   :  { %v13997_v9 = vld [vmem:[%s21196_s7 + $0x1eec] sm:$0xf0]  ;;  %8122 = vmatmul.bf16.vlgmr.msrb.gmra.mxu3 %v15377_v15 }
 0x626   :  { %v12289_v14 = vld [vmem:[%s21196_s7 + $0x1a50] sm:$0xf]  ;;  %v12866_v38 = vor.u32 %v13997_v9, %v12865_v13  ;;  %8166 = vmatpush.bf16.msra.mxu3 %v12738_v42  ;;  %v9923_v42 = vld [vmem:[%s21196_s7 + $0x7f0] sm:$0xf0] }
 0x627   :  { %v13853_v63 = vld [vmem:[%s21196_s7 + $0x1a6c] sm:$0xf0] }
 0x628   :  { %v12065_v43 = vld [vmem:[%s21196_s7 + $0x1890] sm:$0xf]  ;;  %v12290_v39 = vor.u32 %v13853_v63, %v12289_v14  ;;  %8183 = vmatpush.bf16.msra.mxu2 %v12866_v38  ;;  %v9382_v63 = vor.u32 %v13121_v57, %v9379_v49  ;;  %v13241_v57 = vld [vmem:[%s21196_s7 + $0x754] sm:$0xf] }
 0x629   :  { %v13797_v41 = vld [vmem:[%s21196_s7 + $0x18ac] sm:$0xf0]  ;;  %v9859_v49 = vld [vmem:[%s21196_s7 + $0x770] sm:$0xf0] }
 0x62a   :  { %v12705_v5 = vld [vmem:[%s21196_s7 + $0x1d90] sm:$0xf]  ;;  %v12066_v53 = vor.u32 %v13797_v41, %v12065_v43  ;;  %8159 = vmatpush.bf16.msra.mxu1 %v12290_v39  ;;  %v13113_v43 = vld [vmem:[%s21196_s7 + $0x354] sm:$0xf] }
 0x62b   :  { %v13957_v51 = vld [vmem:[%s21196_s7 + $0x1dac] sm:$0xf0]  ;;  %v9347_v41 = vld [vmem:[%s21196_s7 + $0x370] sm:$0xf0] }
 0x62c   :  { %v12833_v20 = vld [vmem:[%s21196_s7 + $0x1e90] sm:$0xf]  ;;  %v12706_v37 = vor.u32 %v13957_v51, %v12705_v5  ;;  %8145 = vmatpush.bf16.msra.mxu0 %v12066_v53  ;;  %v9158_v5 = vor.u32 %v13065_v12, %v9155_v45  ;;  %v13249_v53 = vld [vmem:[%s21196_s7 + $0x794] sm:$0xf] }
 0x62d   :  { %v13989_v11 = vld [vmem:[%s21196_s7 + $0x1eac] sm:$0xf0]  ;;  %v13041_v12 = vld [vmem:[%s21196_s7 + $0x114] sm:$0xf] }
 0x62e   :  { %v12257_v36 = vld [vmem:[%s21196_s7 + $0x1a10] sm:$0xf]  ;;  %v12834_v24 = vor.u32 %v13989_v11, %v12833_v20  ;;  %8167 = vmatpush.bf16.msra.mxu3 %v12706_v37  ;;  %v7930_v11 = vpop.f32.mrf.mxu2  ;;  %v9891_v37 = vld [vmem:[%s21196_s7 + $0x7b0] sm:$0xf0] }
 0x62f   :  { %v13845_v47 = vld [vmem:[%s21196_s7 + $0x1a2c] sm:$0xf0]  ;;  %v9059_v45 = vld [vmem:[%s21196_s7 + $0x130] sm:$0xf0] }
 0x630   :  { %v12033_v2 = vld [vmem:[%s21196_s7 + $0x1850] sm:$0xf]  ;;  %v12258_v60 = vor.u32 %v13845_v47, %v12257_v36  ;;  %8184 = vmatpush.bf16.msra.mxu2 %v12834_v24  ;;  %v9926_v36 = vor.u32 %v13257_v52, %v9923_v42  ;;  %v9350_v47 = vor.u32 %v13113_v43, %v9347_v41  ;;  %v9315_v24 = vld [vmem:[%s21196_s7 + $0x330] sm:$0xf0] }
 0x631   :  { %v13789_v56 = vld [vmem:[%s21196_s7 + $0x186c] sm:$0xf0]  ;;  %v13233_v52 = vld [vmem:[%s21196_s7 + $0x714] sm:$0xf] }
 0x632   :  { %v12673_v1 = vld [vmem:[%s21196_s7 + $0x1d50] sm:$0xf]  ;;  %v12034_v58 = vor.u32 %v13789_v56, %v12033_v2  ;;  %8160 = vmatpush.bf16.msra.mxu1 %v12258_v60  ;;  %v13105_v2 = vld [vmem:[%s21196_s7 + $0x314] sm:$0xf]  ;;  %v9126_v56 = vor.u32 %v13057_v10, %v9123_v21 }
 0x633   :  { %v13949_v4 = vld [vmem:[%s21196_s7 + $0x1d6c] sm:$0xf0]  ;;  %v9827_v42 = vld [vmem:[%s21196_s7 + $0x730] sm:$0xf0] }
 0x634   :  { %v12801_v40 = vld [vmem:[%s21196_s7 + $0x1e50] sm:$0xf]  ;;  %v12674_v26 = vor.u32 %v13949_v4, %v12673_v1  ;;  %8146 = vmatpush.bf16.msra.mxu0 %v12034_v58  ;;  %v13097_v58 = vld [vmem:[%s21196_s7 + $0x2d4] sm:$0xf]  ;;  %v9830_v11 = vor.u32 %v13233_v52, %v9827_v42 }
 0x635   :  { %v13981_v33 = vld [vmem:[%s21196_s7 + $0x1e6c] sm:$0xf0]  ;;  %8161 = vmatmul.bf16.vlgmr.msra.gmra.mxu1 %v15440_v48  ;;  %v13089_v43 = vld [vmem:[%s21196_s7 + $0x294] sm:$0xf] }
 0x636   :  { %v12001_v28 = vld [vmem:[%s21196_s7 + $0x1810] sm:$0xf]  ;;  %v12802_v8 = vor.u32 %v13981_v33, %v12801_v40  ;;  %8205 = vmatpush.bf16.msrb.mxu1 %v9414_v19  ;;  %8168 = vmatpush.bf16.msra.mxu3 %v12674_v26  ;;  %v9894_v19 = vor.u32 %v13249_v53, %v9891_v37  ;;  %v9318_v40 = vor.u32 %v13105_v2, %v9315_v24  ;;  %v13049_v33 = vld [vmem:[%s21196_s7 + $0x154] sm:$0xf] }
 0x637   :  { %v13781_v34 = vld [vmem:[%s21196_s7 + $0x182c] sm:$0xf0]  ;;  %v9283_v26 = vld [vmem:[%s21196_s7 + $0x2f0] sm:$0xf0]  ;;  %v7864_v53 = vadd.f32 %v18568_v22, %v18446_v35 }
 0x638   :  { %v12641_v31 = vld [vmem:[%s21196_s7 + $0x1d10] sm:$0xf]  ;;  %v12002_v46 = vor.u32 %v13781_v34, %v12001_v28  ;;  %8185 = vmatpush.bf16.msra.mxu2 %v12802_v8  ;;  %v18772_v34 = vpop.f32.mrf.mxu3  ;;  %v9251_v41 = vld [vmem:[%s21196_s7 + $0x2b0] sm:$0xf0] }
 0x639   :  { %v13941_v13 = vld [vmem:[%s21196_s7 + $0x1d2c] sm:$0xf0]  ;;  %v9667_v10 = vld [vmem:[%s21196_s7 + $0x5f0] sm:$0xf0] }
 0x63a   :  { %v12769_v9 = vld [vmem:[%s21196_s7 + $0x1e10] sm:$0xf]  ;;  %v12642_v38 = vor.u32 %v13941_v13, %v12641_v31  ;;  %8206 = vmatpush.bf16.msrb.mxu1 %v9382_v63  ;;  %8147 = vmatpush.bf16.msra.mxu0 %v12002_v46  ;;  %v9094_v31 = vor.u32 %v13049_v33, %v9091_v16  ;;  %v9286_v63 = vor.u32 %v13097_v58, %v9283_v26  ;;  %v13225_v21 = vld [vmem:[%s21196_s7 + $0x6d4] sm:$0xf] }
 0x63b   :  { %v13973_v14 = vld [vmem:[%s21196_s7 + $0x1e2c] sm:$0xf0]  ;;  %v9795_v37 = vld [vmem:[%s21196_s7 + $0x6f0] sm:$0xf0]  ;;  %v7877_v26 = vadd.f32 %v18466_v3, %v7864_v53 }
 0x63c   :  { %v12770_v39 = vor.u32 %v13973_v14, %v12769_v9  ;;  %v12609_v51 = vld [vmem:[%s21196_s7 + $0x1cd0] sm:$0xf]  ;;  %8169 = vmatpush.bf16.msra.mxu3 %v12642_v38  ;;  %v18780_v9 = vpop.f32.mrf.mxu1  ;;  %v9862_v14 = vor.u32 %v13241_v57, %v9859_v49  ;;  %v13081_v2 = vld [vmem:[%s21196_s7 + $0x254] sm:$0xf]  ;;  %v9798_v33 = vor.u32 %v13225_v21, %v9795_v37 }
 0x63d   :  { %v13933_v20 = vld [vmem:[%s21196_s7 + $0x1cec] sm:$0xf0]  ;;  %8148 = vmatmul.bf16.vlgmr.msra.gmra.mxu0 %v15476_v23  ;;  %v9219_v24 = vld [vmem:[%s21196_s7 + $0x270] sm:$0xf0] }
 0x63e   :  { %v12610_v60 = vor.u32 %v13933_v20, %v12609_v51  ;;  %8186 = vmatpush.bf16.msra.mxu2 %v12770_v39  ;;  %8192 = vmatpush.bf16.msrb.mxu0 %v9158_v5  ;;  %v12577_v1 = vld [vmem:[%s21196_s7 + $0x1c90] sm:$0xf]  ;;  %v9062_v39 = vor.u32 %v13041_v12, %v9059_v45  ;;  %v13033_v51 = vld [vmem:[%s21196_s7 + $0xd4] sm:$0xf]  ;;  %v9222_v16 = vor.u32 %v13081_v2, %v9219_v24 }
 0x63f   :  { %v13925_v4 = vld [vmem:[%s21196_s7 + $0x1cac] sm:$0xf0]  ;;  %8207 = vmatpush.bf16.msrb.mxu1 %v9350_v47  ;;  %v9027_v20 = vld [vmem:[%s21196_s7 + $0xf0] sm:$0xf0] }
 0x640   :  { %8170 = vmatpush.bf16.msra.mxu3 %v12610_v60  ;;  %v12578_v28 = vor.u32 %v13925_v4, %v12577_v1  ;;  %v12545_v8 = vld [vmem:[%s21196_s7 + $0x1c50] sm:$0xf]  ;;  %v13193_v47 = vld [vmem:[%s21196_s7 + $0x5d4] sm:$0xf]  ;;  %v18832_v60 = vpop.f32.mrf.mxu0  ;;  %v7917_v1 = vpop.f32.mrf.mxu3  ;;  %v9030_v4 = vor.u32 %v13033_v51, %v9027_v20 }
 0x641   :  { %8187 = vmatmul.bf16.vlgmr.msra.gmra.mxu2 %v15484_v54  ;;  %v13917_v13 = vld [vmem:[%s21196_s7 + $0x1c6c] sm:$0xf0]  ;;  %v9670_v35 = vor.u32 %v13193_v47, %v9667_v10  ;;  %v13025_v22 = vld [vmem:[%s21196_s7 + $0x94] sm:$0xf] }
 0x642   :  { %8231 = vmatpush.bf16.msrb.mxu2 %v9926_v36  ;;  %8193 = vmatpush.bf16.msrb.mxu0 %v9126_v56  ;;  %v12546_v46 = vor.u32 %v13917_v13, %v12545_v8  ;;  %v12513_v38 = vld [vmem:[%s21196_s7 + $0x1c10] sm:$0xf]  ;;  %v9254_v36 = vor.u32 %v13089_v43, %v9251_v41  ;;  %v13185_v57 = vld [vmem:[%s21196_s7 + $0x594] sm:$0xf] }
 0x643   :  { %8208 = vmatpush.bf16.msrb.mxu1 %v9318_v40  ;;  %v13909_v5 = vld [vmem:[%s21196_s7 + $0x1c2c] sm:$0xf0]  ;;  %v9635_v49 = vld [vmem:[%s21196_s7 + $0x5b0] sm:$0xf0] }
 0x644   :  { %8171 = vmatpush.bf16.msra.mxu3 %v12578_v28  ;;  %v12514_v56 = vor.u32 %v13909_v5, %v12513_v38  ;;  %v7956_v40 = vpop.f32.mrf.mxu1  ;;  %v13217_v58 = vld [vmem:[%s21196_s7 + $0x694] sm:$0xf]  ;;  %v9638_v12 = vor.u32 %v13185_v57, %v9635_v49 }
 0x645   :  { %v9763_v28 = vld [vmem:[%s21196_s7 + $0x6b0] sm:$0xf0] }
 0x646   :  { %8232 = vmatpush.bf16.msrb.mxu2 %v9894_v19  ;;  %8194 = vmatpush.bf16.msrb.mxu0 %v9094_v31  ;;  %v8995_v19 = vld [vmem:[%s21196_s7 + $0xb0] sm:$0xf0]  ;;  %v9766_v52 = vor.u32 %v13217_v58, %v9763_v28 }
 0x647   :  { %8209 = vmatpush.bf16.msrb.mxu1 %v9286_v63  ;;  %v13073_v31 = vld [vmem:[%s21196_s7 + $0x214] sm:$0xf]  ;;  %v8998_v63 = vor.u32 %v13025_v22, %v8995_v19 }
 0x648   :  { %8172 = vmatpush.bf16.msra.mxu3 %v12546_v46  ;;  %v9187_v8 = vld [vmem:[%s21196_s7 + $0x230] sm:$0xf0]  ;;  %v18878_v46 = vpop.f32.mrf.mxu2  ;;  %v7943_v51 = vpop.f32.mrf.mxu0 }
 0x649   :  { %v13385_v13 = vld [vmem:[%s21196_s7 + $0xbd4] sm:$0xf]  ;;  %v9190_v42 = vor.u32 %v13073_v31, %v9187_v8 }
 0x64a   :  { %8233 = vmatpush.bf16.msrb.mxu2 %v9862_v14  ;;  %8195 = vmatpush.bf16.msrb.mxu0 %v9062_v39  ;;  %v10435_v3 = vld [vmem:[%s21196_s7 + $0xbf0] sm:$0xf0]  ;;  %v7890_v14 = vadd.f32 %v18626_v25, %v7877_v26 }
 0x64b   :  { %8210 = vmatpush.bf16.msrb.mxu1 %v9254_v36  ;;  %v13017_v45 = vld [vmem:[%s21196_s7 + $0x54] sm:$0xf]  ;;  %v10438_v38 = vor.u32 %v13385_v13, %v10435_v3 }
 0x64c   :  { %8173 = vmatpush.bf16.msra.mxu3 %v12514_v56  ;;  %v8963_v43 = vld [vmem:[%s21196_s7 + $0x70] sm:$0xf0]  ;;  %v7903_v36 = vadd.f32 %v18576_v32, %v7890_v14 }
 0x64d   :  { %v13177_v25 = vld [vmem:[%s21196_s7 + $0x554] sm:$0xf]  ;;  %v8966_v47 = vor.u32 %v13017_v45, %v8963_v43 }
 0x64e   :  { %8234 = vmatpush.bf16.msrb.mxu2 %v9830_v11  ;;  %8196 = vmatpush.bf16.msrb.mxu0 %v9030_v4  ;;  %v9603_v41 = vld [vmem:[%s21196_s7 + $0x570] sm:$0xf0]  ;;  %v7916_v1 = vadd.f32 %v18772_v34, %v7903_v36 }
 0x64f   :  { %8211 = vmatpush.bf16.msrb.mxu1 %v9222_v16  ;;  %8174 = vmatmul.bf16.vlgmr.msra.gmra.mxu3 %v15591_v44  ;;  %v13209_v39 = vld [vmem:[%s21196_s7 + $0x654] sm:$0xf]  ;;  %v9606_v10 = vor.u32 %v13177_v25, %v9603_v41 }
 0x650   :  { %8218 = vmatpush.bf16.msrb.mxu3 %v9670_v35  ;;  %v9731_v5 = vld [vmem:[%s21196_s7 + $0x670] sm:$0xf0]  ;;  %v7929_v31 = vadd.f32 %v18670_v18, %v7916_v1  ;;  %v7982_v8 = vpop.f32.mrf.mxu2 }
 0x651   :  { %v13377_v20 = vld [vmem:[%s21196_s7 + $0xb94] sm:$0xf]  ;;  %v9734_v2 = vor.u32 %v13209_v39, %v9731_v5 }
 0x652   :  { %8235 = vmatpush.bf16.msrb.mxu2 %v9798_v33  ;;  %v10403_v11 = vld [vmem:[%s21196_s7 + $0xbb0] sm:$0xf0]  ;;  %8197 = vmatpush.bf16.msrb.mxu0 %v8998_v63 }
 0x653   :  { %v13009_v21 = vld [vmem:[%s21196_s7 + $0x14] sm:$0xf]  ;;  %8212 = vmatpush.bf16.msrb.mxu1 %v9190_v42  ;;  %v10406_v4 = vor.u32 %v13377_v20, %v10403_v11  ;;  %v7942_v42 = vadd.f32 %v18832_v60, %v7929_v31 }
 0x654   :  { %8219 = vmatpush.bf16.msrb.mxu3 %v9638_v12  ;;  %v8931_v53 = vld [vmem:[%s21196_s7 + $0x30] sm:$0xf0] }
 0x655   :  { %v13169_v37 = vld [vmem:[%s21196_s7 + $0x514] sm:$0xf]  ;;  %v8934_v16 = vor.u32 %v13009_v21, %v8931_v53  ;;  %v7967_v53 = vpop.f32.mrf.mxu3 }
 0x656   :  { %8236 = vmatpush.bf16.msrb.mxu2 %v9766_v52  ;;  %v9571_v32 = vld [vmem:[%s21196_s7 + $0x530] sm:$0xf0]  ;;  %8198 = vmatpush.bf16.msrb.mxu0 %v8966_v47 }
 0x657   :  { %v13201_v24 = vld [vmem:[%s21196_s7 + $0x614] sm:$0xf]  ;;  %8257 = vmatpush.bf16.msra.mxu1 %v10438_v38  ;;  %v9574_v57 = vor.u32 %v13169_v37, %v9571_v32 }
 0x658   :  { %v9699_v56 = vld [vmem:[%s21196_s7 + $0x630] sm:$0xf0]  ;;  %8220 = vmatpush.bf16.msrb.mxu3 %v9606_v10  ;;  %8213 = vmatmul.bf16.vlgmr.msrb.gmra.mxu1 %v15006_v30  ;;  %v7955_v10 = vadd.f32 %v18780_v9, %v7942_v42 }
 0x659   :  { %v13321_v35 = vld [vmem:[%s21196_s7 + $0x9d4] sm:$0xf]  ;;  %v9702_v49 = vor.u32 %v13201_v24, %v9699_v56  ;;  %v8006_v56 = vpop.f32.mrf.mxu1 }
 0x65a   :  { %v10179_v22 = vld [vmem:[%s21196_s7 + $0x9f0] sm:$0xf0]  ;;  %8237 = vmatpush.bf16.msrb.mxu2 %v9734_v2  ;;  %8199 = vmatpush.bf16.msrb.mxu0 %v8934_v16  ;;  %v7968_v24 = vadd.f32 %v7967_v53, %v7955_v10  ;;  %v14034_v16 = vld [vmem:[%s21198_s8] sm:$0xff] }
 0x65b   :  { %v13513_v19 = vld [vmem:[%s21196_s7 + $0xfd4] sm:$0xf]  ;;  %v10182_v58 = vor.u32 %v13321_v35, %v10179_v22  ;;  %8258 = vmatpush.bf16.msra.mxu1 %v10406_v4 }
 0x65c   :  { %v10947_v40 = vld [vmem:[%s21196_s7 + $0xff0] sm:$0xf0]  ;;  %8221 = vmatpush.bf16.msrb.mxu3 %v9574_v57  ;;  %v2020_v57 = vperm.slane %v14034_v16, 4 }
 0x65d   :  { %v13369_v34 = vld [vmem:[%s21196_s7 + $0xb54] sm:$0xf]  ;;  %v10950_v13 = vor.u32 %v13513_v19, %v10947_v40  ;;  %8200 = vmatmul.bf16.vlgmr.msrb.gmra.mxu0 %v15033_v61 }
 0x65e   :  { %v10371_v33 = vld [vmem:[%s21196_s7 + $0xb70] sm:$0xf0]  ;;  %8238 = vmatpush.bf16.msrb.mxu2 %v9702_v49  ;;  %8244 = vmatpush.bf16.msra.mxu0 %v10182_v58 }
 0x65f   :  { %v13161_v26 = vld [vmem:[%s21196_s7 + $0x4d4] sm:$0xf]  ;;  %v10374_v3 = vor.u32 %v13369_v34, %v10371_v33  ;;  %v7981_v33 = vadd.f32 %v18878_v46, %v7968_v24 }
 0x660   :  { %v9539_v28 = vld [vmem:[%s21196_s7 + $0x4f0] sm:$0xf0] }
 0x661   :  { %v13313_v14 = vld [vmem:[%s21196_s7 + $0x994] sm:$0xf]  ;;  %v9542_v43 = vor.u32 %v13161_v26, %v9539_v28  ;;  %8259 = vmatpush.bf16.msra.mxu1 %v10374_v3  ;;  %8239 = vmatmul.bf16.vlgmr.msrb.gmra.mxu2 %v15041_v0 }
 0x662   :  { %v10147_v63 = vld [vmem:[%s21196_s7 + $0x9b0] sm:$0xf0]  ;;  %8283 = vmatpush.bf16.msra.mxu2 %v10950_v13  ;;  %v8825_v13 = vrot.slane %v7981_v33, 4 }
 0x663   :  { %v13505_v12 = vld [vmem:[%s21196_s7 + $0xf94] sm:$0xf]  ;;  %v10150_v25 = vor.u32 %v13313_v14, %v10147_v63  ;;  %8222 = vmatpush.bf16.msrb.mxu3 %v9542_v43  ;;  %v7993_v43 = vpop.f32.mrf.mxu0 }
 0x664   :  { %v10915_v18 = vld [vmem:[%s21196_s7 + $0xfb0] sm:$0xf0]  ;;  %v8830_v42 = vsel %vm8828_vm5, %v18185_v6, %v8825_v13 }
 0x665   :  { %v13361_v45 = vld [vmem:[%s21196_s7 + $0xb14] sm:$0xf]  ;;  %v10918_v39 = vor.u32 %v13505_v12, %v10915_v18  ;;  %8245 = vmatpush.bf16.msra.mxu0 %v10150_v25  ;;  %8838 = vst [vmem:[%s21199_s9 + $0x8] sm:$0xff] %v8830_v42 }
 0x666   :  { %v10339_v52 = vld [vmem:[%s21196_s7 + $0xb30] sm:$0xf0] }
 0x667   :  { %v13153_v41 = vld [vmem:[%s21196_s7 + $0x494] sm:$0xf]  ;;  %v10342_v5 = vor.u32 %v13361_v45, %v10339_v52  ;;  %8284 = vmatpush.bf16.msra.mxu2 %v10918_v39 }
 0x668   :  { %v9507_v38 = vld [vmem:[%s21196_s7 + $0x4b0] sm:$0xf0] }
 0x669   :  { %v13305_v60 = vld [vmem:[%s21196_s7 + $0x954] sm:$0xf]  ;;  %v9510_v21 = vor.u32 %v13153_v41, %v9507_v38  ;;  %8260 = vmatpush.bf16.msra.mxu1 %v10342_v5  ;;  %v7994_v41 = vadd.f32 %v7993_v43, %v2020_v57  ;;  %v7969_v38 = vpop.f32.mrf.mxu3 }
 0x66a   :  { %v10115_v51 = vld [vmem:[%s21196_s7 + $0x970] sm:$0xf0] }
 0x66b   :  { %v13497_v20 = vld [vmem:[%s21196_s7 + $0xf54] sm:$0xf]  ;;  %v10118_v37 = vor.u32 %v13305_v60, %v10115_v51  ;;  %8223 = vmatpush.bf16.msrb.mxu3 %v9510_v21  ;;  %v8008_v51 = vpop.f32.mrf.mxu1 }
 0x66c   :  { %v10883_v11 = vld [vmem:[%s21196_s7 + $0xf70] sm:$0xf0] }
 0x66d   :  { %v13353_v36 = vld [vmem:[%s21196_s7 + $0xad4] sm:$0xf]  ;;  %v10886_v1 = vor.u32 %v13497_v20, %v10883_v11  ;;  %8246 = vmatpush.bf16.msra.mxu0 %v10118_v37 }
 0x66e   :  { %v10307_v47 = vld [vmem:[%s21196_s7 + $0xaf0] sm:$0xf0] }
 0x66f   :  { %v13145_v2 = vld [vmem:[%s21196_s7 + $0x454] sm:$0xf]  ;;  %v10310_v4 = vor.u32 %v13353_v36, %v10307_v47  ;;  %8285 = vmatpush.bf16.msra.mxu2 %v10886_v1 }
 0x670   :  { %v9475_v32 = vld [vmem:[%s21196_s7 + $0x470] sm:$0xf0] }
 0x671   :  { %v13297_v9 = vld [vmem:[%s21196_s7 + $0x914] sm:$0xf]  ;;  %v9478_v49 = vor.u32 %v13145_v2, %v9475_v32  ;;  %8261 = vmatpush.bf16.msra.mxu1 %v10310_v4  ;;  %v19072_v2 = vadd.f32 %v8006_v56, %v7994_v41 }
 0x672   :  { %v10083_v35 = vld [vmem:[%s21196_s7 + $0x930] sm:$0xf0] }
 0x673   :  { %v13489_v22 = vld [vmem:[%s21196_s7 + $0xf14] sm:$0xf]  ;;  %v10086_v28 = vor.u32 %v13297_v9, %v10083_v35  ;;  %8224 = vmatpush.bf16.msrb.mxu3 %v9478_v49  ;;  %v7995_v49 = vpop.f32.mrf.mxu0 }
 0x674   :  { %v10851_v19 = vld [vmem:[%s21196_s7 + $0xf30] sm:$0xf0] }
 0x675   :  { %v13345_v40 = vld [vmem:[%s21196_s7 + $0xa94] sm:$0xf]  ;;  %v10854_v3 = vor.u32 %v13489_v22, %v10851_v19  ;;  %8247 = vmatpush.bf16.msra.mxu0 %v10086_v28 }
 0x676   :  { %v10275_v34 = vld [vmem:[%s21196_s7 + $0xab0] sm:$0xf0] }
 0x677   :  { %v13137_v58 = vld [vmem:[%s21196_s7 + $0x414] sm:$0xf]  ;;  %v10278_v14 = vor.u32 %v13345_v40, %v10275_v34  ;;  %8286 = vmatpush.bf16.msra.mxu2 %v10854_v3  ;;  %v19092_v34 = vpop.f32.mrf.mxu2 }
 0x678   :  { %v9443_v26 = vld [vmem:[%s21196_s7 + $0x430] sm:$0xf0] }
 0x679   :  { %v13289_v46 = vld [vmem:[%s21196_s7 + $0x8d4] sm:$0xf]  ;;  %v9446_v25 = vor.u32 %v13137_v58, %v9443_v26  ;;  %8262 = vmatpush.bf16.msra.mxu1 %v10278_v14 }
 0x67a   :  { %v10051_v31 = vld [vmem:[%s21196_s7 + $0x8f0] sm:$0xf0] }
 0x67b   :  { %v13449_v8 = vld [vmem:[%s21196_s7 + $0xdd4] sm:$0xf]  ;;  %v10054_v39 = vor.u32 %v13289_v46, %v10051_v31  ;;  %8225 = vmatpush.bf16.msrb.mxu3 %v9446_v25 }
 0x67c   :  { %v10691_v63 = vld [vmem:[%s21196_s7 + $0xdf0] sm:$0xf0] }
 0x67d   :  { %v13481_v12 = vld [vmem:[%s21196_s7 + $0xed4] sm:$0xf]  ;;  %v10694_v5 = vor.u32 %v13449_v8, %v10691_v63  ;;  %8248 = vmatpush.bf16.msra.mxu0 %v10054_v39 }
 0x67e   :  { %v10819_v18 = vld [vmem:[%s21196_s7 + $0xef0] sm:$0xf0]  ;;  %8226 = vmatmul.bf16.vlgmr.msrb.gmra.mxu3 %v15133_v29 }
 0x67f   :  { %v13337_v45 = vld [vmem:[%s21196_s7 + $0xa54] sm:$0xf]  ;;  %v10822_v20 = vor.u32 %v13481_v12, %v10819_v18  ;;  %8270 = vmatpush.bf16.msra.mxu3 %v10694_v5 }
 0x680   :  { %v10243_v52 = vld [vmem:[%s21196_s7 + $0xa70] sm:$0xf0] }
 0x681   :  { %v13281_v60 = vld [vmem:[%s21196_s7 + $0x894] sm:$0xf]  ;;  %v10246_v11 = vor.u32 %v13337_v45, %v10243_v52  ;;  %8287 = vmatpush.bf16.msra.mxu2 %v10822_v20  ;;  %v8034_v20 = vpop.f32.mrf.mxu2 }
 0x682   :  { %v10019_v6 = vld [vmem:[%s21196_s7 + $0x8b0] sm:$0xf0] }
 0x683   :  { %v13441_v36 = vld [vmem:[%s21196_s7 + $0xd94] sm:$0xf]  ;;  %v10022_v1 = vor.u32 %v13281_v60, %v10019_v6  ;;  %8263 = vmatpush.bf16.msra.mxu1 %v10246_v11 }
 0x684   :  { %v10659_v47 = vld [vmem:[%s21196_s7 + $0xdb0] sm:$0xf0] }
 0x685   :  { %v13473_v10 = vld [vmem:[%s21196_s7 + $0xe94] sm:$0xf]  ;;  %v10662_v4 = vor.u32 %v13441_v36, %v10659_v47  ;;  %8249 = vmatpush.bf16.msra.mxu0 %v10022_v1 }
 0x686   :  { %v10787_v21 = vld [vmem:[%s21196_s7 + $0xeb0] sm:$0xf0] }
 0x687   :  { %v13329_v53 = vld [vmem:[%s21196_s7 + $0xa14] sm:$0xf]  ;;  %v10790_v56 = vor.u32 %v13473_v10, %v10787_v21  ;;  %8271 = vmatpush.bf16.msra.mxu3 %v10662_v4 }
 0x688   :  { %v10211_v37 = vld [vmem:[%s21196_s7 + $0xa30] sm:$0xf0] }
 0x689   :  { %v13641_v32 = vld [vmem:[%s21196_s7 + $0x13d4] sm:$0xf]  ;;  %v10214_v35 = vor.u32 %v13329_v53, %v10211_v37  ;;  %8288 = vmatpush.bf16.msra.mxu2 %v10790_v56 }
 0x68a   :  { %v11459_v24 = vld [vmem:[%s21196_s7 + $0x13f0] sm:$0xf0] }
 0x68b   :  { %v13273_v9 = vld [vmem:[%s21196_s7 + $0x854] sm:$0xf]  ;;  %v11462_v33 = vor.u32 %v13641_v32, %v11459_v24  ;;  %8264 = vmatpush.bf16.msra.mxu1 %v10214_v35 }
 0x68c   :  { %v9987_v22 = vld [vmem:[%s21196_s7 + $0x870] sm:$0xf0] }
 0x68d   :  { %v13433_v19 = vld [vmem:[%s21196_s7 + $0xd54] sm:$0xf]  ;;  %v9990_v28 = vor.u32 %v13273_v9, %v9987_v22 }
 0x68e   :  { %v10627_v40 = vld [vmem:[%s21196_s7 + $0xd70] sm:$0xf0]  ;;  %8265 = vmatmul.bf16.vlgmr.msra.gmra.mxu1 %v15093_v27 }
 0x68f   :  { %v13465_v16 = vld [vmem:[%s21196_s7 + $0xe54] sm:$0xf]  ;;  %v10630_v46 = vor.u32 %v13433_v19, %v10627_v40  ;;  %8309 = vmatpush.bf16.msrb.mxu1 %v11462_v33  ;;  %8250 = vmatpush.bf16.msra.mxu0 %v9990_v28 }
 0x690   :  { %v10755_v57 = vld [vmem:[%s21196_s7 + $0xe70] sm:$0xf0] }
 0x691   :  { %v13633_v58 = vld [vmem:[%s21196_s7 + $0x1394] sm:$0xf]  ;;  %v10758_v3 = vor.u32 %v13465_v16, %v10755_v57  ;;  %8272 = vmatpush.bf16.msra.mxu3 %v10630_v46 }
 0x692   :  { %v11427_v26 = vld [vmem:[%s21196_s7 + $0x13b0] sm:$0xf0] }
 0x693   :  { %v13265_v31 = vld [vmem:[%s21196_s7 + $0x814] sm:$0xf]  ;;  %v11430_v18 = vor.u32 %v13633_v58, %v11427_v26  ;;  %8289 = vmatpush.bf16.msra.mxu2 %v10758_v3  ;;  %v8019_v58 = vpop.f32.mrf.mxu3 }
 0x694   :  { %v9955_v8 = vld [vmem:[%s21196_s7 + $0x830] sm:$0xf0] }
 0x695   :  { %v13425_v13 = vld [vmem:[%s21196_s7 + $0xd14] sm:$0xf]  ;;  %v9958_v38 = vor.u32 %v13265_v31, %v9955_v8  ;;  %8310 = vmatpush.bf16.msrb.mxu1 %v11430_v18  ;;  %v8020_v31 = vadd.f32 %v8019_v58, %v19072_v2  ;;  %v8058_v8 = vpop.f32.mrf.mxu1 }
 0x696   :  { %v10595_v14 = vld [vmem:[%s21196_s7 + $0xd30] sm:$0xf0] }
 0x697   :  { %v13457_v63 = vld [vmem:[%s21196_s7 + $0xe14] sm:$0xf]  ;;  %v10598_v39 = vor.u32 %v13425_v13, %v10595_v14  ;;  %8251 = vmatpush.bf16.msra.mxu0 %v9958_v38 }
 0x698   :  { %v10723_v12 = vld [vmem:[%s21196_s7 + $0xe30] sm:$0xf0] }
 0x699   :  { %v13577_v45 = vld [vmem:[%s21196_s7 + $0x11d4] sm:$0xf]  ;;  %v10726_v5 = vor.u32 %v13457_v63, %v10723_v12  ;;  %8273 = vmatpush.bf16.msra.mxu3 %v10598_v39 }
 0x69a   :  { %v11203_v52 = vld [vmem:[%s21196_s7 + $0x11f0] sm:$0xf0]  ;;  %8252 = vmatmul.bf16.vlgmr.msra.gmra.mxu0 %v15131_v62 }
 0x69b   :  { %v13769_v42 = vld [vmem:[%s21196_s7 + $0x17d4] sm:$0xf]  ;;  %v11206_v60 = vor.u32 %v13577_v45, %v11203_v52  ;;  %8290 = vmatpush.bf16.msra.mxu2 %v10726_v5  ;;  %v8033_v52 = vadd.f32 %v19092_v34, %v8020_v31 }
 0x69c   :  { %v11971_v43 = vld [vmem:[%s21196_s7 + $0x17f0] sm:$0xf0] }
 0x69d   :  { %v13625_v25 = vld [vmem:[%s21196_s7 + $0x1354] sm:$0xf]  ;;  %v11974_v11 = vor.u32 %v13769_v42, %v11971_v43  ;;  %8296 = vmatpush.bf16.msrb.mxu0 %v11206_v60 }
 0x69e   :  { %v11395_v41 = vld [vmem:[%s21196_s7 + $0x1370] sm:$0xf0]  ;;  %8291 = vmatmul.bf16.vlgmr.msra.gmra.mxu2 %v15144_v7 }
 0x69f   :  { %v13417_v6 = vld [vmem:[%s21196_s7 + $0xcd4] sm:$0xf]  ;;  %v11398_v36 = vor.u32 %v13625_v25, %v11395_v41  ;;  %8335 = vmatpush.bf16.msrb.mxu2 %v11974_v11 }
 0x6a0   :  { %v10563_v51 = vld [vmem:[%s21196_s7 + $0xcf0] sm:$0xf0] }
 0x6a1   :  { %v13569_v47 = vld [vmem:[%s21196_s7 + $0x1194] sm:$0xf]  ;;  %v10566_v24 = vor.u32 %v13417_v6, %v10563_v51  ;;  %8311 = vmatpush.bf16.msrb.mxu1 %v11398_v36 }
 0x6a2   :  { %v11171_v10 = vld [vmem:[%s21196_s7 + $0x11b0] sm:$0xf0] }
 0x6a3   :  { %v13761_v21 = vld [vmem:[%s21196_s7 + $0x1794] sm:$0xf]  ;;  %v11174_v1 = vor.u32 %v13569_v47, %v11171_v10  ;;  %8274 = vmatpush.bf16.msra.mxu3 %v10566_v24  ;;  %v8045_v47 = vpop.f32.mrf.mxu0 }
 0x6a4   :  { %v11939_v53 = vld [vmem:[%s21196_s7 + $0x17b0] sm:$0xf0] }
 0x6a5   :  { %v13617_v37 = vld [vmem:[%s21196_s7 + $0x1314] sm:$0xf]  ;;  %v11942_v56 = vor.u32 %v13761_v21, %v11939_v53  ;;  %8297 = vmatpush.bf16.msrb.mxu0 %v11174_v1  ;;  %v8046_v21 = vadd.f32 %v8045_v47, %v8033_v52  ;;  %v8021_v53 = vpop.f32.mrf.mxu3 }
 0x6a6   :  { %v11363_v32 = vld [vmem:[%s21196_s7 + $0x1330] sm:$0xf0] }
 0x6a7   :  { %v13409_v4 = vld [vmem:[%s21196_s7 + $0xc94] sm:$0xf]  ;;  %v11366_v35 = vor.u32 %v13617_v37, %v11363_v32  ;;  %8336 = vmatpush.bf16.msrb.mxu2 %v11942_v56 }
 0x6a8   :  { %v10531_v9 = vld [vmem:[%s21196_s7 + $0xcb0] sm:$0xf0] }
 0x6a9   :  { %v13561_v22 = vld [vmem:[%s21196_s7 + $0x1154] sm:$0xf]  ;;  %v10534_v49 = vor.u32 %v13409_v4, %v10531_v9  ;;  %8312 = vmatpush.bf16.msrb.mxu1 %v11366_v35  ;;  %v8060_v4 = vpop.f32.mrf.mxu1 }
 0x6aa   :  { %v11139_v19 = vld [vmem:[%s21196_s7 + $0x1170] sm:$0xf0] }
 0x6ab   :  { %v13753_v40 = vld [vmem:[%s21196_s7 + $0x1754] sm:$0xf]  ;;  %v11142_v26 = vor.u32 %v13561_v22, %v11139_v19  ;;  %8275 = vmatpush.bf16.msra.mxu3 %v10534_v49 }
 0x6ac   :  { %v11907_v33 = vld [vmem:[%s21196_s7 + $0x1770] sm:$0xf0] }
 0x6ad   :  { %v13609_v16 = vld [vmem:[%s21196_s7 + $0x12d4] sm:$0xf]  ;;  %v11910_v13 = vor.u32 %v13753_v40, %v11907_v33  ;;  %8298 = vmatpush.bf16.msrb.mxu0 %v11142_v26 }
 0x6ae   :  { %v11331_v57 = vld [vmem:[%s21196_s7 + $0x12f0] sm:$0xf0] }
 0x6af   :  { %v13401_v28 = vld [vmem:[%s21196_s7 + $0xc54] sm:$0xf]  ;;  %v11334_v3 = vor.u32 %v13609_v16, %v11331_v57  ;;  %8337 = vmatpush.bf16.msrb.mxu2 %v11910_v13  ;;  %v19274_v57 = vadd.f32 %v8058_v8, %v8046_v21 }
 0x6b0   :  { %v10499_v46 = vld [vmem:[%s21196_s7 + $0xc70] sm:$0xf0] }
 0x6b1   :  { %v13553_v14 = vld [vmem:[%s21196_s7 + $0x1114] sm:$0xf]  ;;  %v10502_v42 = vor.u32 %v13401_v28, %v10499_v46  ;;  %8313 = vmatpush.bf16.msrb.mxu1 %v11334_v3 }
 0x6b2   :  { %v11107_v63 = vld [vmem:[%s21196_s7 + $0x1130] sm:$0xf0] }
 0x6b3   :  { %v13745_v12 = vld [vmem:[%s21196_s7 + $0x1714] sm:$0xf]  ;;  %v11110_v25 = vor.u32 %v13553_v14, %v11107_v63  ;;  %8276 = vmatpush.bf16.msra.mxu3 %v10502_v42  ;;  %v19294_v63 = vpop.f32.mrf.mxu2 }
 0x6b4   :  { %v11875_v2 = vld [vmem:[%s21196_s7 + $0x1730] sm:$0xf0] }
 0x6b5   :  { %v13601_v18 = vld [vmem:[%s21196_s7 + $0x1294] sm:$0xf]  ;;  %v11878_v34 = vor.u32 %v13745_v12, %v11875_v2  ;;  %8299 = vmatpush.bf16.msrb.mxu0 %v11110_v25 }
 0x6b6   :  { %v11299_v45 = vld [vmem:[%s21196_s7 + $0x12b0] sm:$0xf0] }
 0x6b7   :  { %v13393_v43 = vld [vmem:[%s21196_s7 + $0xc14] sm:$0xf]  ;;  %v11302_v5 = vor.u32 %v13601_v18, %v11299_v45  ;;  %8338 = vmatpush.bf16.msrb.mxu2 %v11878_v34  ;;  %v8047_v45 = vpop.f32.mrf.mxu0 }
 0x6b8   :  { %v10467_v41 = vld [vmem:[%s21196_s7 + $0xc30] sm:$0xf0] }
 0x6b9   :  { %v13545_v38 = vld [vmem:[%s21196_s7 + $0x10d4] sm:$0xf]  ;;  %v10470_v10 = vor.u32 %v13393_v43, %v10467_v41  ;;  %8314 = vmatpush.bf16.msrb.mxu1 %v11302_v5 }
 0x6ba   :  { %v11075_v39 = vld [vmem:[%s21196_s7 + $0x10f0] sm:$0xf0] }
 0x6bb   :  { %v13705_v60 = vld [vmem:[%s21196_s7 + $0x15d4] sm:$0xf]  ;;  %v11078_v37 = vor.u32 %v13545_v38, %v11075_v39  ;;  %8277 = vmatpush.bf16.msra.mxu3 %v10470_v10 }
 0x6bc   :  { %v11715_v6 = vld [vmem:[%s21196_s7 + $0x15f0] sm:$0xf0] }
 0x6bd   :  { %v13737_v51 = vld [vmem:[%s21196_s7 + $0x16d4] sm:$0xf]  ;;  %v11718_v32 = vor.u32 %v13705_v60, %v11715_v6  ;;  %8300 = vmatpush.bf16.msrb.mxu0 %v11078_v37 }
 0x6be   :  { %v11843_v20 = vld [vmem:[%s21196_s7 + $0x16f0] sm:$0xf0]  ;;  %8278 = vmatmul.bf16.vlgmr.msra.gmra.mxu3 %v15264_v17 }
 0x6bf   :  { %v13593_v11 = vld [vmem:[%s21196_s7 + $0x1254] sm:$0xf]  ;;  %v11846_v9 = vor.u32 %v13737_v51, %v11843_v20  ;;  %8322 = vmatpush.bf16.msrb.mxu3 %v11718_v32 }
 0x6c0   :  { %v11267_v36 = vld [vmem:[%s21196_s7 + $0x1270] sm:$0xf0] }
 0x6c1   :  { %v13537_v24 = vld [vmem:[%s21196_s7 + $0x1094] sm:$0xf]  ;;  %v11270_v56 = vor.u32 %v13593_v11, %v11267_v36  ;;  %8339 = vmatpush.bf16.msrb.mxu2 %v11846_v9  ;;  %v8086_v9 = vpop.f32.mrf.mxu2 }
 0x6c2   :  { %v11043_v1 = vld [vmem:[%s21196_s7 + $0x10b0] sm:$0xf0] }
 0x6c3   :  { %v13697_v35 = vld [vmem:[%s21196_s7 + $0x1594] sm:$0xf]  ;;  %v11046_v26 = vor.u32 %v13537_v24, %v11043_v1  ;;  %8315 = vmatpush.bf16.msrb.mxu1 %v11270_v56 }
 0x6c4   :  { %v11683_v22 = vld [vmem:[%s21196_s7 + $0x15b0] sm:$0xf0] }
 0x6c5   :  { %v13729_v19 = vld [vmem:[%s21196_s7 + $0x1694] sm:$0xf]  ;;  %v11686_v28 = vor.u32 %v13697_v35, %v11683_v22  ;;  %8301 = vmatpush.bf16.msrb.mxu0 %v11046_v26 }
 0x6c6   :  { %v11811_v40 = vld [vmem:[%s21196_s7 + $0x16b0] sm:$0xf0] }
 0x6c7   :  { %v13585_v33 = vld [vmem:[%s21196_s7 + $0x1214] sm:$0xf]  ;;  %v11814_v31 = vor.u32 %v13729_v19, %v11811_v40  ;;  %8323 = vmatpush.bf16.msrb.mxu3 %v11686_v28 }
 0x6c8   :  { %v11235_v16 = vld [vmem:[%s21196_s7 + $0x1230] sm:$0xf0] }
 0x6c9   :  { %v13897_v49 = vld [vmem:[%s21196_s7 + $0x1bd4] sm:$0xf]  ;;  %v11238_v8 = vor.u32 %v13585_v33, %v11235_v16  ;;  %8340 = vmatpush.bf16.msrb.mxu2 %v11814_v31 }
 0x6ca   :  { %v12483_v58 = vld [vmem:[%s21196_s7 + $0x1bf0] sm:$0xf0] }
 0x6cb   :  { %v13529_v46 = vld [vmem:[%s21196_s7 + $0x1054] sm:$0xf]  ;;  %v12486_v12 = vor.u32 %v13897_v49, %v12483_v58  ;;  %8316 = vmatpush.bf16.msrb.mxu1 %v11238_v8 }
 0x6cc   :  { %v11011_v13 = vld [vmem:[%s21196_s7 + $0x1070] sm:$0xf0] }
 0x6cd   :  { %v13689_v3 = vld [vmem:[%s21196_s7 + $0x1554] sm:$0xf]  ;;  %v11014_v43 = vor.u32 %v13529_v46, %v11011_v13 }
 0x6ce   :  { %v11651_v14 = vld [vmem:[%s21196_s7 + $0x1570] sm:$0xf0]  ;;  %8317 = vmatmul.bf16.vlgmr.msrb.gmra.mxu1 %v15222_v59 }
 0x6cf   :  { %v13721_v2 = vld [vmem:[%s21196_s7 + $0x1654] sm:$0xf]  ;;  %v11654_v25 = vor.u32 %v13689_v3, %v11651_v14  ;;  %8361 = vmatpush.bf16.msra.mxu1 %v12486_v12  ;;  %8302 = vmatpush.bf16.msrb.mxu0 %v11014_v43 }
 0x6d0   :  { %v11779_v18 = vld [vmem:[%s21196_s7 + $0x1670] sm:$0xf0] }
 0x6d1   :  { %v13889_v52 = vld [vmem:[%s21196_s7 + $0x1b94] sm:$0xf]  ;;  %v11782_v34 = vor.u32 %v13721_v2, %v11779_v18  ;;  %8324 = vmatpush.bf16.msrb.mxu3 %v11654_v25 }
 0x6d2   :  { %v12451_v42 = vld [vmem:[%s21196_s7 + $0x1bb0] sm:$0xf0] }
 0x6d3   :  { %v13521_v41 = vld [vmem:[%s21196_s7 + $0x1014] sm:$0xf]  ;;  %v12454_v51 = vor.u32 %v13889_v52, %v12451_v42  ;;  %8341 = vmatpush.bf16.msrb.mxu2 %v11782_v34  ;;  %v8071_v52 = vpop.f32.mrf.mxu3 }
 0x6d4   :  { %v10979_v38 = vld [vmem:[%s21196_s7 + $0x1030] sm:$0xf0] }
 0x6d5   :  { %v13681_v39 = vld [vmem:[%s21196_s7 + $0x1514] sm:$0xf]  ;;  %v10982_v53 = vor.u32 %v13521_v41, %v10979_v38  ;;  %8362 = vmatpush.bf16.msra.mxu1 %v12454_v51  ;;  %v8072_v41 = vadd.f32 %v8071_v52, %v19274_v57  ;;  %v8110_v38 = vpop.f32.mrf.mxu1  ;;  %v13134_v52 = vld [vmem:[%s21196_s7 + $0x3f4] sm:$0xf0] }
 0x6d6   :  { %v11619_v5 = vld [vmem:[%s21196_s7 + $0x1530] sm:$0xf0] }
 0x6d7   :  { %v13713_v60 = vld [vmem:[%s21196_s7 + $0x1614] sm:$0xf]  ;;  %v11622_v37 = vor.u32 %v13681_v39, %v11619_v5  ;;  %8303 = vmatpush.bf16.msrb.mxu0 %v10982_v53 }
 0x6d8   :  { %v11747_v6 = vld [vmem:[%s21196_s7 + $0x1630] sm:$0xf0] }
 0x6d9   :  { %v13833_v20 = vld [vmem:[%s21196_s7 + $0x19d4] sm:$0xf]  ;;  %v11750_v32 = vor.u32 %v13713_v60, %v11747_v6  ;;  %8325 = vmatpush.bf16.msrb.mxu3 %v11622_v37 }
 0x6da   :  { %v12227_v11 = vld [vmem:[%s21196_s7 + $0x19f0] sm:$0xf0]  ;;  %8304 = vmatmul.bf16.vlgmr.msrb.gmra.mxu0 %v15266_v55 }
 0x6db   :  { %v14025_v36 = vld [vmem:[%s21196_s7 + $0x1fd4] sm:$0xf]  ;;  %v12230_v24 = vor.u32 %v13833_v20, %v12227_v11  ;;  %8342 = vmatpush.bf16.msrb.mxu2 %v11750_v32  ;;  %v8085_v11 = vadd.f32 %v19294_v63, %v8072_v41 }
 0x6dc   :  { %v12995_v47 = vld [vmem:[%s21196_s7 + $0x1ff0] sm:$0xf0] }
 0x6dd   :  { %v13881_v10 = vld [vmem:[%s21196_s7 + $0x1b54] sm:$0xf]  ;;  %v12998_v56 = vor.u32 %v14025_v36, %v12995_v47  ;;  %8348 = vmatpush.bf16.msra.mxu0 %v12230_v24 }
 0x6de   :  { %v12419_v21 = vld [vmem:[%s21196_s7 + $0x1b70] sm:$0xf0]  ;;  %8343 = vmatmul.bf16.vlgmr.msrb.gmra.mxu2 %v15268_v50 }
 0x6df   :  { %v13673_v1 = vld [vmem:[%s21196_s7 + $0x14d4] sm:$0xf]  ;;  %v12422_v35 = vor.u32 %v13881_v10, %v12419_v21  ;;  %8387 = vmatpush.bf16.msra.mxu2 %v12998_v56 }
 0x6e0   :  { %v11587_v4 = vld [vmem:[%s21196_s7 + $0x14f0] sm:$0xf0] }
 0x6e1   :  { %v13825_v22 = vld [vmem:[%s21196_s7 + $0x1994] sm:$0xf]  ;;  %v11590_v58 = vor.u32 %v13673_v1, %v11587_v4  ;;  %8363 = vmatpush.bf16.msra.mxu1 %v12422_v35 }
 0x6e2   :  { %v12195_v19 = vld [vmem:[%s21196_s7 + $0x19b0] sm:$0xf0] }
 0x6e3   :  { %v14017_v40 = vld [vmem:[%s21196_s7 + $0x1f94] sm:$0xf]  ;;  %v12198_v26 = vor.u32 %v13825_v22, %v12195_v19  ;;  %8326 = vmatpush.bf16.msrb.mxu3 %v11590_v58  ;;  %v8097_v22 = vpop.f32.mrf.mxu0 }
 0x6e4   :  { %v12963_v33 = vld [vmem:[%s21196_s7 + $0x1fb0] sm:$0xf0] }
 0x6e5   :  { %v13873_v16 = vld [vmem:[%s21196_s7 + $0x1b14] sm:$0xf]  ;;  %v12966_v31 = vor.u32 %v14017_v40, %v12963_v33  ;;  %8349 = vmatpush.bf16.msra.mxu0 %v12198_v26  ;;  %v8098_v40 = vadd.f32 %v8097_v22, %v8085_v11  ;;  %v8073_v33 = vpop.f32.mrf.mxu3  ;;  %v9385_v11 = vld [vmem:[%s21196_s7 + $0x398] sm:$0xf] }
 0x6e6   :  { %v12387_v49 = vld [vmem:[%s21196_s7 + $0x1b30] sm:$0xf0]  ;;  %v13262_v22 = vld [vmem:[%s21196_s7 + $0x7f4] sm:$0xf0] }
 0x6e7   :  { %v13665_v28 = vld [vmem:[%s21196_s7 + $0x1494] sm:$0xf]  ;;  %v12390_v8 = vor.u32 %v13873_v16, %v12387_v49  ;;  %8388 = vmatpush.bf16.msra.mxu2 %v12966_v31 }
 0x6e8   :  { %v11555_v46 = vld [vmem:[%s21196_s7 + $0x14b0] sm:$0xf0] }
 0x6e9   :  { %v13817_v13 = vld [vmem:[%s21196_s7 + $0x1954] sm:$0xf]  ;;  %v11558_v45 = vor.u32 %v13665_v28, %v11555_v46  ;;  %8364 = vmatpush.bf16.msra.mxu1 %v12390_v8  ;;  %v8112_v28 = vpop.f32.mrf.mxu1 }
 0x6ea   :  { %v12163_v3 = vld [vmem:[%s21196_s7 + $0x1970] sm:$0xf0] }
 0x6eb   :  { %v14009_v14 = vld [vmem:[%s21196_s7 + $0x1f54] sm:$0xf]  ;;  %v12166_v42 = vor.u32 %v13817_v13, %v12163_v3  ;;  %8327 = vmatpush.bf16.msrb.mxu3 %v11558_v45  ;;  %v9417_v45 = vld [vmem:[%s21196_s7 + $0x3d8] sm:$0xf] }
 0x6ec   :  { %v12931_v12 = vld [vmem:[%s21196_s7 + $0x1f70] sm:$0xf0] }
 0x6ed   :  { %v13865_v2 = vld [vmem:[%s21196_s7 + $0x1ad4] sm:$0xf]  ;;  %v12934_v39 = vor.u32 %v14009_v14, %v12931_v12  ;;  %8350 = vmatpush.bf16.msra.mxu0 %v12166_v42 }
 0x6ee   :  { %v12355_v18 = vld [vmem:[%s21196_s7 + $0x1af0] sm:$0xf0] }
 0x6ef   :  { %v13657_v43 = vld [vmem:[%s21196_s7 + $0x1454] sm:$0xf]  ;;  %v12358_v34 = vor.u32 %v13865_v2, %v12355_v18  ;;  %8389 = vmatpush.bf16.msra.mxu2 %v12934_v39  ;;  %v19476_v18 = vadd.f32 %v8110_v38, %v8098_v40  ;;  %v13118_v40 = vld [vmem:[%s21196_s7 + $0x374] sm:$0xf0] }
 0x6f0   :  { %v11523_v25 = vld [vmem:[%s21196_s7 + $0x1470] sm:$0xf0] }
 0x6f1   :  { %v13809_v5 = vld [vmem:[%s21196_s7 + $0x1914] sm:$0xf]  ;;  %v11526_v36 = vor.u32 %v13657_v43, %v11523_v25  ;;  %8365 = vmatpush.bf16.msra.mxu1 %v12358_v34 }
 0x6f2   :  { %v12131_v60 = vld [vmem:[%s21196_s7 + $0x1930] sm:$0xf0] }
 0x6f3   :  { %v14001_v6 = vld [vmem:[%s21196_s7 + $0x1f14] sm:$0xf]  ;;  %v12134_v10 = vor.u32 %v13809_v5, %v12131_v60  ;;  %8328 = vmatpush.bf16.msrb.mxu3 %v11526_v36  ;;  %v19496_v60 = vpop.f32.mrf.mxu2  ;;  %v13126_v36 = vld [vmem:[%s21196_s7 + $0x3b4] sm:$0xf0] }
 0x6f4   :  { %v12899_v57 = vld [vmem:[%s21196_s7 + $0x1f30] sm:$0xf0] }
 0x6f5   :  { %v13857_v51 = vld [vmem:[%s21196_s7 + $0x1a94] sm:$0xf]  ;;  %v12902_v63 = vor.u32 %v14001_v6, %v12899_v57  ;;  %8351 = vmatpush.bf16.msra.mxu0 %v12134_v10  ;;  %v9418_v6 = vor.u32 %v13134_v52, %v9417_v45  ;;  %v13110_v45 = vld [vmem:[%s21196_s7 + $0x334] sm:$0xf0] }
 0x6f6   :  { %v12323_v20 = vld [vmem:[%s21196_s7 + $0x1ab0] sm:$0xf0] }
 0x6f7   :  { %v13649_v47 = vld [vmem:[%s21196_s7 + $0x1414] sm:$0xf]  ;;  %v12326_v32 = vor.u32 %v13857_v51, %v12323_v20  ;;  %8390 = vmatpush.bf16.msra.mxu2 %v12902_v63  ;;  %v8099_v20 = vpop.f32.mrf.mxu0 }
 0x6f8   :  { %v11491_v21 = vld [vmem:[%s21196_s7 + $0x1430] sm:$0xf0] }
 0x6f9   :  { %v13801_v53 = vld [vmem:[%s21196_s7 + $0x18d4] sm:$0xf]  ;;  %v11494_v19 = vor.u32 %v13649_v47, %v11491_v21  ;;  %8366 = vmatpush.bf16.msra.mxu1 %v12326_v32 }
 0x6fa   :  { %v12099_v37 = vld [vmem:[%s21196_s7 + $0x18f0] sm:$0xf0] }
 0x6fb   :  { %v13961_v24 = vld [vmem:[%s21196_s7 + $0x1dd4] sm:$0xf]  ;;  %v12102_v16 = vor.u32 %v13801_v53, %v12099_v37  ;;  %8329 = vmatpush.bf16.msrb.mxu3 %v11494_v19  ;;  %v9353_v19 = vld [vmem:[%s21196_s7 + $0x358] sm:$0xf] }
 0x6fc   :  { %v12739_v1 = vld [vmem:[%s21196_s7 + $0x1df0] sm:$0xf0] }
 0x6fd   :  { %v13993_v4 = vld [vmem:[%s21196_s7 + $0x1ed4] sm:$0xf]  ;;  %v12742_v49 = vor.u32 %v13961_v24, %v12739_v1  ;;  %8352 = vmatpush.bf16.msra.mxu0 %v12102_v16 }
 0x6fe   :  { %v12867_v9 = vld [vmem:[%s21196_s7 + $0x1ef0] sm:$0xf0]  ;;  %8330 = vmatmul.bf16.vlgmr.msrb.gmra.mxu3 %v15377_v15 }
 0x6ff   :  { %v13849_v56 = vld [vmem:[%s21196_s7 + $0x1a54] sm:$0xf]  ;;  %v12870_v46 = vor.u32 %v13993_v4, %v12867_v9  ;;  %8374 = vmatpush.bf16.msra.mxu3 %v12742_v49  ;;  %v9386_v4 = vor.u32 %v13126_v36, %v9385_v11  ;;  %v9161_v9 = vld [vmem:[%s21196_s7 + $0x1d8] sm:$0xf]  ;;  %v8123_v11 = vpop.f32.mrf.mxu3 }
 0x700   :  { %v12291_v35 = vld [vmem:[%s21196_s7 + $0x1a70] sm:$0xf0] }
 0x701   :  { %v13793_v58 = vld [vmem:[%s21196_s7 + $0x1894] sm:$0xf]  ;;  %v12294_v31 = vor.u32 %v13849_v56, %v12291_v35  ;;  %8391 = vmatpush.bf16.msra.mxu2 %v12870_v46  ;;  %v13070_v56 = vld [vmem:[%s21196_s7 + $0x1f4] sm:$0xf0]  ;;  %v8138_v46 = vpop.f32.mrf.mxu2 }
 0x702   :  { %v12067_v26 = vld [vmem:[%s21196_s7 + $0x18b0] sm:$0xf0]  ;;  %v9929_v35 = vld [vmem:[%s21196_s7 + $0x7d8] sm:$0xf] }
 0x703   :  { %v13953_v8 = vld [vmem:[%s21196_s7 + $0x1d94] sm:$0xf]  ;;  %v12070_v42 = vor.u32 %v13793_v58, %v12067_v26  ;;  %8367 = vmatpush.bf16.msra.mxu1 %v12294_v31  ;;  %v9162_v58 = vor.u32 %v13070_v56, %v9161_v9  ;;  %v9930_v31 = vor.u32 %v13262_v22, %v9929_v35  ;;  %v13094_v9 = vld [vmem:[%s21196_s7 + $0x2b4] sm:$0xf0] }
 0x704   :  { %v12707_v13 = vld [vmem:[%s21196_s7 + $0x1db0] sm:$0xf0]  ;;  %v13230_v46 = vld [vmem:[%s21196_s7 + $0x6f4] sm:$0xf0] }
 0x705   :  { %v13985_v3 = vld [vmem:[%s21196_s7 + $0x1e94] sm:$0xf]  ;;  %v12710_v43 = vor.u32 %v13953_v8, %v12707_v13  ;;  %8353 = vmatpush.bf16.msra.mxu0 %v12070_v42  ;;  %v9354_v8 = vor.u32 %v13118_v40, %v9353_v19  ;;  %v9129_v13 = vld [vmem:[%s21196_s7 + $0x198] sm:$0xf] }
 0x706   :  { %v12835_v14 = vld [vmem:[%s21196_s7 + $0x1eb0] sm:$0xf0] }
 0x707   :  { %v13841_v12 = vld [vmem:[%s21196_s7 + $0x1a14] sm:$0xf]  ;;  %v12838_v41 = vor.u32 %v13985_v3, %v12835_v14  ;;  %8375 = vmatpush.bf16.msra.mxu3 %v12710_v43  ;;  %v13062_v3 = vld [vmem:[%s21196_s7 + $0x1b4] sm:$0xf0] }
 0x708   :  { %v12259_v2 = vld [vmem:[%s21196_s7 + $0x1a30] sm:$0xf0]  ;;  %v9897_v14 = vld [vmem:[%s21196_s7 + $0x798] sm:$0xf]  ;;  %v9130_v42 = vor.u32 %v13062_v3, %v9129_v13  ;;  %v8149_v13 = vpop.f32.mrf.mxu0 }
 0x709   :  { %v13785_v25 = vld [vmem:[%s21196_s7 + $0x1854] sm:$0xf]  ;;  %v12262_v38 = vor.u32 %v13841_v12, %v12259_v2  ;;  %8392 = vmatpush.bf16.msra.mxu2 %v12838_v41  ;;  %v13254_v12 = vld [vmem:[%s21196_s7 + $0x7b4] sm:$0xf0] }
 0x70a   :  { %v12035_v39 = vld [vmem:[%s21196_s7 + $0x1870] sm:$0xf0]  ;;  %v9321_v2 = vld [vmem:[%s21196_s7 + $0x318] sm:$0xf]  ;;  %v9898_v41 = vor.u32 %v13254_v12, %v9897_v14  ;;  %v8125_v12 = vpop.f32.mrf.mxu3 }
 0x70b   :  { %v13945_v34 = vld [vmem:[%s21196_s7 + $0x1d54] sm:$0xf]  ;;  %v12038_v47 = vor.u32 %v13785_v25, %v12035_v39  ;;  %8368 = vmatpush.bf16.msra.mxu1 %v12262_v38  ;;  %v9322_v38 = vor.u32 %v13110_v45, %v9321_v2  ;;  %v9097_v39 = vld [vmem:[%s21196_s7 + $0x158] sm:$0xf] }
 0x70c   :  { %v12675_v5 = vld [vmem:[%s21196_s7 + $0x1d70] sm:$0xf0] }
 0x70d   :  { %v13977_v57 = vld [vmem:[%s21196_s7 + $0x1e54] sm:$0xf]  ;;  %v12678_v10 = vor.u32 %v13945_v34, %v12675_v5  ;;  %8354 = vmatpush.bf16.msra.mxu0 %v12038_v47  ;;  %v13054_v34 = vld [vmem:[%s21196_s7 + $0x174] sm:$0xf0] }
 0x70e   :  { %v12803_v51 = vld [vmem:[%s21196_s7 + $0x1e70] sm:$0xf0]  ;;  %8369 = vmatmul.bf16.vlgmr.msra.gmra.mxu1 %v15440_v48  ;;  %v9865_v5 = vld [vmem:[%s21196_s7 + $0x758] sm:$0xf]  ;;  %v9098_v36 = vor.u32 %v13054_v34, %v9097_v39 }
 0x70f   :  { %v13777_v21 = vld [vmem:[%s21196_s7 + $0x1814] sm:$0xf]  ;;  %v12806_v63 = vor.u32 %v13977_v57, %v12803_v51  ;;  %8413 = vmatpush.bf16.msrb.mxu1 %v9418_v6  ;;  %8376 = vmatpush.bf16.msra.mxu3 %v12678_v10  ;;  %v13246_v6 = vld [vmem:[%s21196_s7 + $0x774] sm:$0xf0] }
 0x710   :  { %v12003_v53 = vld [vmem:[%s21196_s7 + $0x1830] sm:$0xf0]  ;;  %v9289_v57 = vld [vmem:[%s21196_s7 + $0x2d8] sm:$0xf] }
 0x711   :  { %v13937_v37 = vld [vmem:[%s21196_s7 + $0x1d14] sm:$0xf]  ;;  %v12006_v33 = vor.u32 %v13777_v21, %v12003_v53  ;;  %8393 = vmatpush.bf16.msra.mxu2 %v12806_v63  ;;  %v13102_v51 = vld [vmem:[%s21196_s7 + $0x2f4] sm:$0xf0]  ;;  %v8124_v21 = vadd.f32 %v8123_v11, %v19476_v18  ;;  %v8162_v53 = vpop.f32.mrf.mxu1 }
 0x712   :  { %v12643_v32 = vld [vmem:[%s21196_s7 + $0x1d30] sm:$0xf0]  ;;  %v9290_v63 = vor.u32 %v13102_v51, %v9289_v57  ;;  %v13238_v18 = vld [vmem:[%s21196_s7 + $0x734] sm:$0xf0] }
 0x713   :  { %v13969_v24 = vld [vmem:[%s21196_s7 + $0x1e14] sm:$0xf]  ;;  %v12646_v16 = vor.u32 %v13937_v37, %v12643_v32  ;;  %8414 = vmatpush.bf16.msrb.mxu1 %v9386_v4  ;;  %8355 = vmatpush.bf16.msra.mxu0 %v12006_v33  ;;  %v9866_v37 = vor.u32 %v13246_v6, %v9865_v5  ;;  %v9065_v32 = vld [vmem:[%s21196_s7 + $0x118] sm:$0xf]  ;;  %v8137_v56 = vadd.f32 %v19496_v60, %v8124_v21 }
 0x714   :  { %v12771_v1 = vld [vmem:[%s21196_s7 + $0x1e30] sm:$0xf0]  ;;  %v9257_v4 = vld [vmem:[%s21196_s7 + $0x298] sm:$0xf] }
 0x715   :  { %v12774_v49 = vor.u32 %v13969_v24, %v12771_v1  ;;  %v13929_v26 = vld [vmem:[%s21196_s7 + $0x1cd4] sm:$0xf]  ;;  %8377 = vmatpush.bf16.msra.mxu3 %v12646_v16  ;;  %v13046_v24 = vld [vmem:[%s21196_s7 + $0x134] sm:$0xf0]  ;;  %v8150_v14 = vadd.f32 %v8149_v13, %v8137_v56 }
 0x716   :  { %v12611_v28 = vld [vmem:[%s21196_s7 + $0x1cf0] sm:$0xf0]  ;;  %8356 = vmatmul.bf16.vlgmr.msra.gmra.mxu0 %v15476_v23  ;;  %v9833_v1 = vld [vmem:[%s21196_s7 + $0x718] sm:$0xf]  ;;  %v9066_v19 = vor.u32 %v13046_v24, %v9065_v32  ;;  %v19698_v24 = vpop.f32.mrf.mxu2 }
 0x717   :  { %v12614_v52 = vor.u32 %v13929_v26, %v12611_v28  ;;  %8394 = vmatpush.bf16.msra.mxu2 %v12774_v49  ;;  %8400 = vmatpush.bf16.msrb.mxu0 %v9162_v58  ;;  %v13921_v43 = vld [vmem:[%s21196_s7 + $0x1c94] sm:$0xf]  ;;  %v9033_v33 = vld [vmem:[%s21196_s7 + $0xd8] sm:$0xf]  ;;  %v9834_v60 = vor.u32 %v13238_v18, %v9833_v1  ;;  %v9258_v49 = vor.u32 %v13094_v9, %v9257_v4  ;;  %v8151_v9 = vpop.f32.mrf.mxu0 }
 0x718   :  { %v12579_v25 = vld [vmem:[%s21196_s7 + $0x1cb0] sm:$0xf0]  ;;  %8415 = vmatpush.bf16.msrb.mxu1 %v9354_v8  ;;  %v13038_v16 = vld [vmem:[%s21196_s7 + $0xf4] sm:$0xf0]  ;;  %v19678_v51 = vadd.f32 %v8162_v53, %v8150_v14 }
 0x719   :  { %8378 = vmatpush.bf16.msra.mxu3 %v12614_v52  ;;  %v12582_v20 = vor.u32 %v13921_v43, %v12579_v25  ;;  %v13913_v47 = vld [vmem:[%s21196_s7 + $0x1c54] sm:$0xf]  ;;  %v9673_v58 = vld [vmem:[%s21196_s7 + $0x5d8] sm:$0xf]  ;;  %v9034_v2 = vor.u32 %v13038_v16, %v9033_v33  ;;  %v8164_v43 = vpop.f32.mrf.mxu1 }
 0x71a   :  { %8395 = vmatmul.bf16.vlgmr.msra.gmra.mxu2 %v15484_v54  ;;  %v12547_v10 = vld [vmem:[%s21196_s7 + $0x1c70] sm:$0xf0]  ;;  %v13198_v26 = vld [vmem:[%s21196_s7 + $0x5f4] sm:$0xf0] }
 0x71b   :  { %8439 = vmatpush.bf16.msrb.mxu2 %v9930_v31  ;;  %8401 = vmatpush.bf16.msrb.mxu0 %v9130_v42  ;;  %v12550_v35 = vor.u32 %v13913_v47, %v12547_v10  ;;  %v13905_v22 = vld [vmem:[%s21196_s7 + $0x1c14] sm:$0xf]  ;;  %v9801_v28 = vld [vmem:[%s21196_s7 + $0x6d8] sm:$0xf]  ;;  %v9674_v45 = vor.u32 %v13198_v26, %v9673_v58 }
 0x71c   :  { %8416 = vmatpush.bf16.msrb.mxu1 %v9322_v38  ;;  %v12515_v40 = vld [vmem:[%s21196_s7 + $0x1c30] sm:$0xf0]  ;;  %v9225_v31 = vld [vmem:[%s21196_s7 + $0x258] sm:$0xf]  ;;  %v9802_v25 = vor.u32 %v13230_v46, %v9801_v28 }
 0x71d   :  { %8379 = vmatpush.bf16.msra.mxu3 %v12582_v20  ;;  %v13086_v8 = vld [vmem:[%s21196_s7 + $0x274] sm:$0xf0]  ;;  %v12518_v3 = vor.u32 %v13905_v22, %v12515_v40 }
 0x71e   :  { %v9001_v52 = vld [vmem:[%s21196_s7 + $0x98] sm:$0xf] }
 0x71f   :  { %8440 = vmatpush.bf16.msrb.mxu2 %v9898_v41  ;;  %8402 = vmatpush.bf16.msrb.mxu0 %v9098_v36  ;;  %v13030_v42 = vld [vmem:[%s21196_s7 + $0xb4] sm:$0xf0]  ;;  %v9226_v41 = vor.u32 %v13086_v8, %v9225_v31 }
 0x720   :  { %8417 = vmatpush.bf16.msrb.mxu1 %v9290_v63  ;;  %v9641_v38 = vld [vmem:[%s21196_s7 + $0x598] sm:$0xf]  ;;  %v9002_v36 = vor.u32 %v13030_v42, %v9001_v52 }
 0x721   :  { %8380 = vmatpush.bf16.msra.mxu3 %v12550_v35  ;;  %v13190_v39 = vld [vmem:[%s21196_s7 + $0x5b4] sm:$0xf0] }
 0x722   :  { %v9769_v34 = vld [vmem:[%s21196_s7 + $0x698] sm:$0xf]  ;;  %v9642_v47 = vor.u32 %v13190_v39, %v9641_v38 }
 0x723   :  { %8441 = vmatpush.bf16.msrb.mxu2 %v9866_v37  ;;  %8403 = vmatpush.bf16.msrb.mxu0 %v9066_v19  ;;  %v13222_v5 = vld [vmem:[%s21196_s7 + $0x6b4] sm:$0xf0] }
 0x724   :  { %8418 = vmatpush.bf16.msrb.mxu1 %v9258_v49  ;;  %v9193_v6 = vld [vmem:[%s21196_s7 + $0x218] sm:$0xf]  ;;  %v9770_v21 = vor.u32 %v13222_v5, %v9769_v34 }
 0x725   :  { %v13078_v57 = vld [vmem:[%s21196_s7 + $0x234] sm:$0xf0]  ;;  %8381 = vmatpush.bf16.msra.mxu3 %v12518_v3 }
 0x726   :  { %v10441_v20 = vld [vmem:[%s21196_s7 + $0xbd8] sm:$0xf]  ;;  %v9194_v53 = vor.u32 %v13078_v57, %v9193_v6 }
 0x727   :  { %8442 = vmatpush.bf16.msrb.mxu2 %v9834_v60  ;;  %v13390_v11 = vld [vmem:[%s21196_s7 + $0xbf4] sm:$0xf0]  ;;  %8404 = vmatpush.bf16.msrb.mxu0 %v9034_v2 }
 0x728   :  { %v8969_v10 = vld [vmem:[%s21196_s7 + $0x58] sm:$0xf]  ;;  %8419 = vmatpush.bf16.msrb.mxu1 %v9226_v41  ;;  %8382 = vmatmul.bf16.vlgmr.msra.gmra.mxu3 %v15591_v44  ;;  %v10442_v1 = vor.u32 %v13390_v11, %v10441_v20 }
 0x729   :  { %8426 = vmatpush.bf16.msrb.mxu3 %v9674_v45  ;;  %v13022_v37 = vld [vmem:[%s21196_s7 + $0x74] sm:$0xf0] }
 0x72a   :  { %v9609_v63 = vld [vmem:[%s21196_s7 + $0x558] sm:$0xf]  ;;  %v8970_v22 = vor.u32 %v13022_v37, %v8969_v10 }
 0x72b   :  { %8443 = vmatpush.bf16.msrb.mxu2 %v9802_v25  ;;  %v13182_v32 = vld [vmem:[%s21196_s7 + $0x574] sm:$0xf0]  ;;  %8405 = vmatpush.bf16.msrb.mxu0 %v9002_v36  ;;  %v8190_v25 = vpop.f32.mrf.mxu2 }
 0x72c   :  { %v9737_v18 = vld [vmem:[%s21196_s7 + $0x658] sm:$0xf]  ;;  %v9610_v19 = vor.u32 %v13182_v32, %v9609_v63  ;;  %8420 = vmatpush.bf16.msrb.mxu1 %v9194_v53 }
 0x72d   :  { %v13214_v4 = vld [vmem:[%s21196_s7 + $0x674] sm:$0xf0]  ;;  %8427 = vmatpush.bf16.msrb.mxu3 %v9642_v47 }
 0x72e   :  { %v10409_v56 = vld [vmem:[%s21196_s7 + $0xb98] sm:$0xf]  ;;  %v9738_v60 = vor.u32 %v13214_v4, %v9737_v18 }
 0x72f   :  { %v13382_v35 = vld [vmem:[%s21196_s7 + $0xbb4] sm:$0xf0]  ;;  %8444 = vmatpush.bf16.msrb.mxu2 %v9770_v21  ;;  %8406 = vmatpush.bf16.msrb.mxu0 %v8970_v22 }
 0x730   :  { %v8937_v40 = vld [vmem:[%s21196_s7 + $0x18] sm:$0xf]  ;;  %8465 = vmatpush.bf16.msra.mxu1 %v10442_v1  ;;  %v10410_v28 = vor.u32 %v13382_v35, %v10409_v56  ;;  %v8175_v56 = vpop.f32.mrf.mxu3 }
 0x731   :  { %v13014_v33 = vld [vmem:[%s21196_s7 + $0x34] sm:$0xf0]  ;;  %8428 = vmatpush.bf16.msrb.mxu3 %v9610_v19  ;;  %8421 = vmatmul.bf16.vlgmr.msrb.gmra.mxu1 %v15006_v30 }
 0x732   :  { %v9577_v16 = vld [vmem:[%s21196_s7 + $0x518] sm:$0xf]  ;;  %v8938_v12 = vor.u32 %v13014_v33, %v8937_v40  ;;  %v8176_v40 = vadd.f32 %v8175_v56, %v19678_v51  ;;  %v8214_v33 = vpop.f32.mrf.mxu1 }
 0x733   :  { %v13174_v49 = vld [vmem:[%s21196_s7 + $0x534] sm:$0xf0]  ;;  %8445 = vmatpush.bf16.msrb.mxu2 %v9738_v60 }
 0x734   :  { %v9705_v58 = vld [vmem:[%s21196_s7 + $0x618] sm:$0xf]  ;;  %v9578_v2 = vor.u32 %v13174_v49, %v9577_v16  ;;  %8466 = vmatpush.bf16.msra.mxu1 %v10410_v28  ;;  %8407 = vmatpush.bf16.msrb.mxu0 %v8938_v12 }
 0x735   :  { %v13206_v26 = vld [vmem:[%s21196_s7 + $0x634] sm:$0xf0] }
 0x736   :  { %v10185_v46 = vld [vmem:[%s21196_s7 + $0x9d8] sm:$0xf]  ;;  %v9706_v45 = vor.u32 %v13206_v26, %v9705_v58  ;;  %8429 = vmatpush.bf16.msrb.mxu3 %v9578_v2 }
 0x737   :  { %v13326_v31 = vld [vmem:[%s21196_s7 + $0x9f4] sm:$0xf0]  ;;  %8408 = vmatmul.bf16.vlgmr.msrb.gmra.mxu0 %v15033_v61 }
 0x738   :  { %v10953_v8 = vld [vmem:[%s21196_s7 + $0xfd8] sm:$0xf]  ;;  %v10186_v52 = vor.u32 %v13326_v31, %v10185_v46  ;;  %8446 = vmatpush.bf16.msrb.mxu2 %v9706_v45  ;;  %v19826_v31 = vadd.f32 %v19698_v24, %v8176_v40 }
 0x739   :  { %v13518_v13 = vld [vmem:[%s21196_s7 + $0xff4] sm:$0xf0] }
 0x73a   :  { %v10377_v3 = vld [vmem:[%s21196_s7 + $0xb58] sm:$0xf]  ;;  %v10954_v41 = vor.u32 %v13518_v13, %v10953_v8  ;;  %8452 = vmatpush.bf16.msra.mxu0 %v10186_v52  ;;  %v14035_v8 = vld [vmem:[%s21198_s8] sm:$0xff] }
 0x73b   :  { %v13374_v14 = vld [vmem:[%s21196_s7 + $0xb74] sm:$0xf0]  ;;  %8447 = vmatmul.bf16.vlgmr.msrb.gmra.mxu2 %v15041_v0  ;;  %v2021_v13 = vperm.slane %v14035_v8, 5 }
 0x73c   :  { %v9545_v42 = vld [vmem:[%s21196_s7 + $0x4d8] sm:$0xf]  ;;  %v10378_v38 = vor.u32 %v13374_v14, %v10377_v3  ;;  %8491 = vmatpush.bf16.msra.mxu2 %v10954_v41 }
 0x73d   :  { %v13166_v43 = vld [vmem:[%s21196_s7 + $0x4f4] sm:$0xf0] }
 0x73e   :  { %v10153_v39 = vld [vmem:[%s21196_s7 + $0x998] sm:$0xf]  ;;  %v9546_v11 = vor.u32 %v13166_v43, %v9545_v42  ;;  %8467 = vmatpush.bf16.msra.mxu1 %v10378_v38 }
 0x73f   :  { %v13318_v34 = vld [vmem:[%s21196_s7 + $0x9b4] sm:$0xf0] }
 0x740   :  { %v10921_v5 = vld [vmem:[%s21196_s7 + $0xf98] sm:$0xf]  ;;  %v10154_v36 = vor.u32 %v13318_v34, %v10153_v39  ;;  %8430 = vmatpush.bf16.msrb.mxu3 %v9546_v11 }
 0x741   :  { %v13510_v6 = vld [vmem:[%s21196_s7 + $0xfb4] sm:$0xf0] }
 0x742   :  { %v10345_v57 = vld [vmem:[%s21196_s7 + $0xb18] sm:$0xf]  ;;  %v10922_v21 = vor.u32 %v13510_v6, %v10921_v5  ;;  %8453 = vmatpush.bf16.msra.mxu0 %v10154_v36  ;;  %v8201_v5 = vpop.f32.mrf.mxu0 }
 0x743   :  { %v13366_v20 = vld [vmem:[%s21196_s7 + $0xb34] sm:$0xf0] }
 0x744   :  { %v9513_v47 = vld [vmem:[%s21196_s7 + $0x498] sm:$0xf]  ;;  %v10346_v53 = vor.u32 %v13366_v20, %v10345_v57  ;;  %8492 = vmatpush.bf16.msra.mxu2 %v10922_v21  ;;  %v8202_v57 = vadd.f32 %v8201_v5, %v2021_v13  ;;  %v8177_v20 = vpop.f32.mrf.mxu3  ;;  %v8216_v21 = vpop.f32.mrf.mxu1 }
 0x745   :  { %v13158_v10 = vld [vmem:[%s21196_s7 + $0x4b4] sm:$0xf0] }
 0x746   :  { %v10121_v37 = vld [vmem:[%s21196_s7 + $0x958] sm:$0xf]  ;;  %v9514_v9 = vor.u32 %v13158_v10, %v9513_v47  ;;  %8468 = vmatpush.bf16.msra.mxu1 %v10346_v53  ;;  %v19885_v56 = vadd.f32 %v8214_v33, %v8202_v57 }
 0x747   :  { %v13310_v63 = vld [vmem:[%s21196_s7 + $0x974] sm:$0xf0] }
 0x748   :  { %v10889_v32 = vld [vmem:[%s21196_s7 + $0xf58] sm:$0xf]  ;;  %v10122_v35 = vor.u32 %v13310_v63, %v10121_v37  ;;  %8431 = vmatpush.bf16.msrb.mxu3 %v9514_v9 }
 0x749   :  { %v13502_v1 = vld [vmem:[%s21196_s7 + $0xf74] sm:$0xf0] }
 0x74a   :  { %v10313_v18 = vld [vmem:[%s21196_s7 + $0xad8] sm:$0xf]  ;;  %v10890_v16 = vor.u32 %v13502_v1, %v10889_v32  ;;  %8454 = vmatpush.bf16.msra.mxu0 %v10122_v35  ;;  %v8203_v13 = vpop.f32.mrf.mxu0 }
 0x74b   :  { %v13358_v4 = vld [vmem:[%s21196_s7 + $0xaf4] sm:$0xf0] }
 0x74c   :  { %v9481_v22 = vld [vmem:[%s21196_s7 + $0x458] sm:$0xf]  ;;  %v10314_v60 = vor.u32 %v13358_v4, %v10313_v18  ;;  %8493 = vmatpush.bf16.msra.mxu2 %v10890_v16 }
 0x74d   :  { %v13150_v19 = vld [vmem:[%s21196_s7 + $0x474] sm:$0xf0] }
 0x74e   :  { %v10089_v49 = vld [vmem:[%s21196_s7 + $0x918] sm:$0xf]  ;;  %v9482_v3 = vor.u32 %v13150_v19, %v9481_v22  ;;  %8469 = vmatpush.bf16.msra.mxu1 %v10314_v60 }
 0x74f   :  { %v13302_v58 = vld [vmem:[%s21196_s7 + $0x934] sm:$0xf0] }
 0x750   :  { %v10857_v26 = vld [vmem:[%s21196_s7 + $0xf18] sm:$0xf]  ;;  %v10090_v12 = vor.u32 %v13302_v58, %v10089_v49  ;;  %8432 = vmatpush.bf16.msrb.mxu3 %v9482_v3 }
 0x751   :  { %v13494_v51 = vld [vmem:[%s21196_s7 + $0xf34] sm:$0xf0] }
 0x752   :  { %v10281_v28 = vld [vmem:[%s21196_s7 + $0xa98] sm:$0xf]  ;;  %v10858_v52 = vor.u32 %v13494_v51, %v10857_v26  ;;  %8455 = vmatpush.bf16.msra.mxu0 %v10090_v12  ;;  %v19905_v51 = vpop.f32.mrf.mxu2 }
 0x753   :  { %v13350_v46 = vld [vmem:[%s21196_s7 + $0xab4] sm:$0xf0] }
 0x754   :  { %v9449_v14 = vld [vmem:[%s21196_s7 + $0x418] sm:$0xf]  ;;  %v10282_v42 = vor.u32 %v13350_v46, %v10281_v28  ;;  %8494 = vmatpush.bf16.msra.mxu2 %v10858_v52 }
 0x755   :  { %v13142_v2 = vld [vmem:[%s21196_s7 + $0x434] sm:$0xf0] }
 0x756   :  { %v10057_v24 = vld [vmem:[%s21196_s7 + $0x8d8] sm:$0xf]  ;;  %v9450_v6 = vor.u32 %v13142_v2, %v9449_v14  ;;  %8470 = vmatpush.bf16.msra.mxu1 %v10282_v42 }
 0x757   :  { %v13294_v45 = vld [vmem:[%s21196_s7 + $0x8f4] sm:$0xf0] }
 0x758   :  { %v10697_v43 = vld [vmem:[%s21196_s7 + $0xdd8] sm:$0xf]  ;;  %v10058_v11 = vor.u32 %v13294_v45, %v10057_v24  ;;  %8433 = vmatpush.bf16.msrb.mxu3 %v9450_v6 }
 0x759   :  { %v13454_v25 = vld [vmem:[%s21196_s7 + $0xdf4] sm:$0xf0] }
 0x75a   :  { %v10825_v41 = vld [vmem:[%s21196_s7 + $0xed8] sm:$0xf]  ;;  %v10698_v36 = vor.u32 %v13454_v25, %v10697_v43  ;;  %8456 = vmatpush.bf16.msra.mxu0 %v10058_v11 }
 0x75b   :  { %v13486_v38 = vld [vmem:[%s21196_s7 + $0xef4] sm:$0xf0]  ;;  %8434 = vmatmul.bf16.vlgmr.msrb.gmra.mxu3 %v15133_v29 }
 0x75c   :  { %v10249_v39 = vld [vmem:[%s21196_s7 + $0xa58] sm:$0xf]  ;;  %v10826_v53 = vor.u32 %v13486_v38, %v10825_v41  ;;  %8478 = vmatpush.bf16.msra.mxu3 %v10698_v36 }
 0x75d   :  { %v13342_v34 = vld [vmem:[%s21196_s7 + $0xa74] sm:$0xf0] }
 0x75e   :  { %v10025_v47 = vld [vmem:[%s21196_s7 + $0x898] sm:$0xf]  ;;  %v10250_v37 = vor.u32 %v13342_v34, %v10249_v39  ;;  %8495 = vmatpush.bf16.msra.mxu2 %v10826_v53 }
 0x75f   :  { %v13286_v10 = vld [vmem:[%s21196_s7 + $0x8b4] sm:$0xf0] }
 0x760   :  { %v10665_v63 = vld [vmem:[%s21196_s7 + $0xd98] sm:$0xf]  ;;  %v10026_v19 = vor.u32 %v13286_v10, %v10025_v47  ;;  %8471 = vmatpush.bf16.msra.mxu1 %v10250_v37  ;;  %v8242_v37 = vpop.f32.mrf.mxu2 }
 0x761   :  { %v13446_v32 = vld [vmem:[%s21196_s7 + $0xdb4] sm:$0xf0] }
 0x762   :  { %v10793_v1 = vld [vmem:[%s21196_s7 + $0xe98] sm:$0xf]  ;;  %v10666_v40 = vor.u32 %v13446_v32, %v10665_v63  ;;  %8457 = vmatpush.bf16.msra.mxu0 %v10026_v19 }
 0x763   :  { %v13478_v18 = vld [vmem:[%s21196_s7 + $0xeb4] sm:$0xf0] }
 0x764   :  { %v10217_v4 = vld [vmem:[%s21196_s7 + $0xa18] sm:$0xf]  ;;  %v10794_v33 = vor.u32 %v13478_v18, %v10793_v1  ;;  %8479 = vmatpush.bf16.msra.mxu3 %v10666_v40 }
 0x765   :  { %v13334_v9 = vld [vmem:[%s21196_s7 + $0xa34] sm:$0xf0] }
 0x766   :  { %v11465_v35 = vld [vmem:[%s21196_s7 + $0x13d8] sm:$0xf]  ;;  %v10218_v60 = vor.u32 %v13334_v9, %v10217_v4  ;;  %8496 = vmatpush.bf16.msra.mxu2 %v10794_v33 }
 0x767   :  { %v13646_v22 = vld [vmem:[%s21196_s7 + $0x13f4] sm:$0xf0] }
 0x768   :  { %v9993_v16 = vld [vmem:[%s21196_s7 + $0x858] sm:$0xf]  ;;  %v11466_v28 = vor.u32 %v13646_v22, %v11465_v35  ;;  %8472 = vmatpush.bf16.msra.mxu1 %v10218_v60 }
 0x769   :  { %v13278_v49 = vld [vmem:[%s21196_s7 + $0x874] sm:$0xf0] }
 0x76a   :  { %v10633_v58 = vld [vmem:[%s21196_s7 + $0xd58] sm:$0xf]  ;;  %v9994_v12 = vor.u32 %v13278_v49, %v9993_v16 }
 0x76b   :  { %v13438_v26 = vld [vmem:[%s21196_s7 + $0xd74] sm:$0xf0]  ;;  %8473 = vmatmul.bf16.vlgmr.msra.gmra.mxu1 %v15093_v27 }
 0x76c   :  { %v10761_v46 = vld [vmem:[%s21196_s7 + $0xe58] sm:$0xf]  ;;  %v10634_v2 = vor.u32 %v13438_v26, %v10633_v58  ;;  %8517 = vmatpush.bf16.msrb.mxu1 %v11466_v28  ;;  %8458 = vmatpush.bf16.msra.mxu0 %v9994_v12 }
 0x76d   :  { %v13470_v8 = vld [vmem:[%s21196_s7 + $0xe74] sm:$0xf0] }
 0x76e   :  { %v11433_v3 = vld [vmem:[%s21196_s7 + $0x1398] sm:$0xf]  ;;  %v10762_v42 = vor.u32 %v13470_v8, %v10761_v46  ;;  %8480 = vmatpush.bf16.msra.mxu3 %v10634_v2 }
 0x76f   :  { %v13638_v14 = vld [vmem:[%s21196_s7 + $0x13b4] sm:$0xf0] }
 0x770   :  { %v9961_v24 = vld [vmem:[%s21196_s7 + $0x818] sm:$0xf]  ;;  %v11434_v38 = vor.u32 %v13638_v14, %v11433_v3  ;;  %8497 = vmatpush.bf16.msra.mxu2 %v10762_v42  ;;  %v8227_v14 = vpop.f32.mrf.mxu3 }
 0x771   :  { %v13270_v45 = vld [vmem:[%s21196_s7 + $0x834] sm:$0xf0] }
 0x772   :  { %v10601_v52 = vld [vmem:[%s21196_s7 + $0xd18] sm:$0xf]  ;;  %v9962_v11 = vor.u32 %v13270_v45, %v9961_v24  ;;  %8518 = vmatpush.bf16.msrb.mxu1 %v11434_v38  ;;  %v8228_v45 = vadd.f32 %v8227_v14, %v19885_v56 }
 0x773   :  { %v13430_v43 = vld [vmem:[%s21196_s7 + $0xd34] sm:$0xf0] }
 0x774   :  { %v10729_v25 = vld [vmem:[%s21196_s7 + $0xe18] sm:$0xf]  ;;  %v10602_v36 = vor.u32 %v13430_v43, %v10601_v52  ;;  %8459 = vmatpush.bf16.msra.mxu0 %v9962_v11  ;;  %v8266_v52 = vpop.f32.mrf.mxu1 }
 0x775   :  { %v13462_v41 = vld [vmem:[%s21196_s7 + $0xe34] sm:$0xf0] }
 0x776   :  { %v11209_v39 = vld [vmem:[%s21196_s7 + $0x11d8] sm:$0xf]  ;;  %v10730_v47 = vor.u32 %v13462_v41, %v10729_v25  ;;  %8481 = vmatpush.bf16.msra.mxu3 %v10602_v36 }
 0x777   :  { %v13582_v34 = vld [vmem:[%s21196_s7 + $0x11f4] sm:$0xf0]  ;;  %8460 = vmatmul.bf16.vlgmr.msra.gmra.mxu0 %v15131_v62 }
 0x778   :  { %v11977_v5 = vld [vmem:[%s21196_s7 + $0x17d8] sm:$0xf]  ;;  %v11210_v10 = vor.u32 %v13582_v34, %v11209_v39  ;;  %8498 = vmatpush.bf16.msra.mxu2 %v10730_v47 }
 0x779   :  { %v13774_v6 = vld [vmem:[%s21196_s7 + $0x17f4] sm:$0xf0] }
 0x77a   :  { %v11401_v57 = vld [vmem:[%s21196_s7 + $0x1358] sm:$0xf]  ;;  %v11978_v63 = vor.u32 %v13774_v6, %v11977_v5  ;;  %8504 = vmatpush.bf16.msrb.mxu0 %v11210_v10  ;;  %v8241_v5 = vadd.f32 %v19905_v51, %v8228_v45 }
 0x77b   :  { %v13630_v20 = vld [vmem:[%s21196_s7 + $0x1374] sm:$0xf0]  ;;  %8499 = vmatmul.bf16.vlgmr.msra.gmra.mxu2 %v15144_v7 }
 0x77c   :  { %v10569_v21 = vld [vmem:[%s21196_s7 + $0xcd8] sm:$0xf]  ;;  %v11402_v32 = vor.u32 %v13630_v20, %v11401_v57  ;;  %8543 = vmatpush.bf16.msrb.mxu2 %v11978_v63 }
 0x77d   :  { %v13422_v53 = vld [vmem:[%s21196_s7 + $0xcf4] sm:$0xf0] }
 0x77e   :  { %v11177_v1 = vld [vmem:[%s21196_s7 + $0x1198] sm:$0xf]  ;;  %v10570_v19 = vor.u32 %v13422_v53, %v10569_v21  ;;  %8519 = vmatpush.bf16.msrb.mxu1 %v11402_v32 }
 0x77f   :  { %v13574_v18 = vld [vmem:[%s21196_s7 + $0x11b4] sm:$0xf0] }
 0x780   :  { %v11945_v4 = vld [vmem:[%s21196_s7 + $0x1798] sm:$0xf]  ;;  %v11178_v40 = vor.u32 %v13574_v18, %v11177_v1  ;;  %8482 = vmatpush.bf16.msra.mxu3 %v10570_v19  ;;  %v8253_v18 = vpop.f32.mrf.mxu0 }
 0x781   :  { %v13766_v9 = vld [vmem:[%s21196_s7 + $0x17b4] sm:$0xf0] }
 0x782   :  { %v11369_v35 = vld [vmem:[%s21196_s7 + $0x1318] sm:$0xf]  ;;  %v11946_v60 = vor.u32 %v13766_v9, %v11945_v4  ;;  %8505 = vmatpush.bf16.msrb.mxu0 %v11178_v40  ;;  %v8254_v9 = vadd.f32 %v8253_v18, %v8241_v5 }
 0x783   :  { %v13622_v22 = vld [vmem:[%s21196_s7 + $0x1334] sm:$0xf0] }
 0x784   :  { %v10537_v16 = vld [vmem:[%s21196_s7 + $0xc98] sm:$0xf]  ;;  %v11370_v49 = vor.u32 %v13622_v22, %v11369_v35  ;;  %8544 = vmatpush.bf16.msrb.mxu2 %v11946_v60  ;;  %v8229_v35 = vpop.f32.mrf.mxu3 }
 0x785   :  { %v13414_v33 = vld [vmem:[%s21196_s7 + $0xcb4] sm:$0xf0] }
 0x786   :  { %v11145_v58 = vld [vmem:[%s21196_s7 + $0x1158] sm:$0xf]  ;;  %v10538_v3 = vor.u32 %v13414_v33, %v10537_v16  ;;  %8520 = vmatpush.bf16.msrb.mxu1 %v11370_v49  ;;  %v8268_v33 = vpop.f32.mrf.mxu1 }
 0x787   :  { %v13566_v26 = vld [vmem:[%s21196_s7 + $0x1174] sm:$0xf0] }
 0x788   :  { %v11913_v28 = vld [vmem:[%s21196_s7 + $0x1758] sm:$0xf]  ;;  %v11146_v12 = vor.u32 %v13566_v26, %v11145_v58  ;;  %8483 = vmatpush.bf16.msra.mxu3 %v10538_v3  ;;  %v20087_v3 = vadd.f32 %v8266_v52, %v8254_v9  ;;  %v8255_v5 = vpop.f32.mrf.mxu0 }
 0x789   :  { %v13758_v46 = vld [vmem:[%s21196_s7 + $0x1774] sm:$0xf0] }
 0x78a   :  { %v11337_v8 = vld [vmem:[%s21196_s7 + $0x12d8] sm:$0xf]  ;;  %v11914_v42 = vor.u32 %v13758_v46, %v11913_v28  ;;  %8506 = vmatpush.bf16.msrb.mxu0 %v11146_v12 }
 0x78b   :  { %v13614_v13 = vld [vmem:[%s21196_s7 + $0x12f4] sm:$0xf0] }
 0x78c   :  { %v10505_v2 = vld [vmem:[%s21196_s7 + $0xc58] sm:$0xf]  ;;  %v11338_v43 = vor.u32 %v13614_v13, %v11337_v8  ;;  %8545 = vmatpush.bf16.msrb.mxu2 %v11914_v42 }
 0x78d   :  { %v13406_v24 = vld [vmem:[%s21196_s7 + $0xc74] sm:$0xf0] }
 0x78e   :  { %v11113_v25 = vld [vmem:[%s21196_s7 + $0x1118] sm:$0xf]  ;;  %v10506_v6 = vor.u32 %v13406_v24, %v10505_v2  ;;  %8521 = vmatpush.bf16.msrb.mxu1 %v11338_v43 }
 0x78f   :  { %v13558_v41 = vld [vmem:[%s21196_s7 + $0x1134] sm:$0xf0] }
 0x790   :  { %v11881_v38 = vld [vmem:[%s21196_s7 + $0x1718] sm:$0xf]  ;;  %v11114_v20 = vor.u32 %v13558_v41, %v11113_v25  ;;  %8484 = vmatpush.bf16.msra.mxu3 %v10506_v6 }
 0x791   :  { %v13750_v56 = vld [vmem:[%s21196_s7 + $0x1734] sm:$0xf0] }
 0x792   :  { %v11305_v39 = vld [vmem:[%s21196_s7 + $0x1298] sm:$0xf]  ;;  %v11882_v51 = vor.u32 %v13750_v56, %v11881_v38  ;;  %8507 = vmatpush.bf16.msrb.mxu0 %v11114_v20  ;;  %v20107_v38 = vpop.f32.mrf.mxu2 }
 0x793   :  { %v13606_v34 = vld [vmem:[%s21196_s7 + $0x12b4] sm:$0xf0] }
 0x794   :  { %v10473_v57 = vld [vmem:[%s21196_s7 + $0xc18] sm:$0xf]  ;;  %v11306_v10 = vor.u32 %v13606_v34, %v11305_v39  ;;  %8546 = vmatpush.bf16.msrb.mxu2 %v11882_v51 }
 0x795   :  { %v13398_v11 = vld [vmem:[%s21196_s7 + $0xc34] sm:$0xf0] }
 0x796   :  { %v11081_v36 = vld [vmem:[%s21196_s7 + $0x10d8] sm:$0xf]  ;;  %v10474_v4 = vor.u32 %v13398_v11, %v10473_v57  ;;  %8522 = vmatpush.bf16.msrb.mxu1 %v11306_v10 }
 0x797   :  { %v13550_v47 = vld [vmem:[%s21196_s7 + $0x10f4] sm:$0xf0] }
 0x798   :  { %v11721_v21 = vld [vmem:[%s21196_s7 + $0x15d8] sm:$0xf]  ;;  %v11082_v22 = vor.u32 %v13550_v47, %v11081_v36  ;;  %8485 = vmatpush.bf16.msra.mxu3 %v10474_v4 }
 0x799   :  { %v13710_v53 = vld [vmem:[%s21196_s7 + $0x15f4] sm:$0xf0] }
 0x79a   :  { %v11849_v37 = vld [vmem:[%s21196_s7 + $0x16d8] sm:$0xf]  ;;  %v11722_v19 = vor.u32 %v13710_v53, %v11721_v21  ;;  %8508 = vmatpush.bf16.msrb.mxu0 %v11082_v22 }
 0x79b   :  { %v13742_v63 = vld [vmem:[%s21196_s7 + $0x16f4] sm:$0xf0]  ;;  %8486 = vmatmul.bf16.vlgmr.msra.gmra.mxu3 %v15264_v17 }
 0x79c   :  { %v11273_v32 = vld [vmem:[%s21196_s7 + $0x1258] sm:$0xf]  ;;  %v11850_v60 = vor.u32 %v13742_v63, %v11849_v37  ;;  %8530 = vmatpush.bf16.msrb.mxu3 %v11722_v19 }
 0x79d   :  { %v13598_v1 = vld [vmem:[%s21196_s7 + $0x1274] sm:$0xf0] }
 0x79e   :  { %v11049_v40 = vld [vmem:[%s21196_s7 + $0x1098] sm:$0xf]  ;;  %v11274_v49 = vor.u32 %v13598_v1, %v11273_v32  ;;  %8547 = vmatpush.bf16.msrb.mxu2 %v11850_v60 }
 0x79f   :  { %v13542_v16 = vld [vmem:[%s21196_s7 + $0x10b4] sm:$0xf0] }
 0x7a0   :  { %v11689_v58 = vld [vmem:[%s21196_s7 + $0x1598] sm:$0xf]  ;;  %v11050_v2 = vor.u32 %v13542_v16, %v11049_v40  ;;  %8523 = vmatpush.bf16.msrb.mxu1 %v11274_v49  ;;  %v8294_v49 = vpop.f32.mrf.mxu2 }
 0x7a1   :  { %v13702_v26 = vld [vmem:[%s21196_s7 + $0x15b4] sm:$0xf0] }
 0x7a2   :  { %v11817_v28 = vld [vmem:[%s21196_s7 + $0x1698] sm:$0xf]  ;;  %v11690_v24 = vor.u32 %v13702_v26, %v11689_v58  ;;  %8509 = vmatpush.bf16.msrb.mxu0 %v11050_v2 }
 0x7a3   :  { %v13734_v46 = vld [vmem:[%s21196_s7 + $0x16b4] sm:$0xf0] }
 0x7a4   :  { %v11241_v8 = vld [vmem:[%s21196_s7 + $0x1218] sm:$0xf]  ;;  %v11818_v52 = vor.u32 %v13734_v46, %v11817_v28  ;;  %8531 = vmatpush.bf16.msrb.mxu3 %v11690_v24 }
 0x7a5   :  { %v13590_v13 = vld [vmem:[%s21196_s7 + $0x1234] sm:$0xf0] }
 0x7a6   :  { %v12489_v14 = vld [vmem:[%s21196_s7 + $0x1bd8] sm:$0xf]  ;;  %v11242_v42 = vor.u32 %v13590_v13, %v11241_v8  ;;  %8548 = vmatpush.bf16.msrb.mxu2 %v11818_v52 }
 0x7a7   :  { %v13902_v12 = vld [vmem:[%s21196_s7 + $0x1bf4] sm:$0xf0] }
 0x7a8   :  { %v11017_v45 = vld [vmem:[%s21196_s7 + $0x1058] sm:$0xf]  ;;  %v12490_v56 = vor.u32 %v13902_v12, %v12489_v14  ;;  %8524 = vmatpush.bf16.msrb.mxu1 %v11242_v42 }
 0x7a9   :  { %v13534_v43 = vld [vmem:[%s21196_s7 + $0x1074] sm:$0xf0] }
 0x7aa   :  { %v11657_v25 = vld [vmem:[%s21196_s7 + $0x1558] sm:$0xf]  ;;  %v11018_v20 = vor.u32 %v13534_v43, %v11017_v45 }
 0x7ab   :  { %v13694_v41 = vld [vmem:[%s21196_s7 + $0x1574] sm:$0xf0]  ;;  %8525 = vmatmul.bf16.vlgmr.msrb.gmra.mxu1 %v15222_v59 }
 0x7ac   :  { %v11785_v39 = vld [vmem:[%s21196_s7 + $0x1658] sm:$0xf]  ;;  %v11658_v11 = vor.u32 %v13694_v41, %v11657_v25  ;;  %8569 = vmatpush.bf16.msra.mxu1 %v12490_v56  ;;  %8510 = vmatpush.bf16.msrb.mxu0 %v11018_v20 }
 0x7ad   :  { %v13726_v34 = vld [vmem:[%s21196_s7 + $0x1674] sm:$0xf0] }
 0x7ae   :  { %v12457_v6 = vld [vmem:[%s21196_s7 + $0x1b98] sm:$0xf]  ;;  %v11786_v10 = vor.u32 %v13726_v34, %v11785_v39  ;;  %8532 = vmatpush.bf16.msrb.mxu3 %v11658_v11 }
 0x7af   :  { %v13894_v57 = vld [vmem:[%s21196_s7 + $0x1bb4] sm:$0xf0] }
 0x7b0   :  { %v10985_v36 = vld [vmem:[%s21196_s7 + $0x1018] sm:$0xf]  ;;  %v12458_v63 = vor.u32 %v13894_v57, %v12457_v6  ;;  %8549 = vmatpush.bf16.msrb.mxu2 %v11786_v10  ;;  %v20209_v57 = vpop.f32.mrf.mxu3 }
 0x7b1   :  { %v13526_v47 = vld [vmem:[%s21196_s7 + $0x1034] sm:$0xf0] }
 0x7b2   :  { %v11625_v51 = vld [vmem:[%s21196_s7 + $0x1518] sm:$0xf]  ;;  %v10986_v22 = vor.u32 %v13526_v47, %v10985_v36  ;;  %8570 = vmatpush.bf16.msra.mxu1 %v12458_v63  ;;  %v20217_v47 = vpop.f32.mrf.mxu1 }
 0x7b3   :  { %v13686_v21 = vld [vmem:[%s21196_s7 + $0x1534] sm:$0xf0] }
 0x7b4   :  { %v11753_v53 = vld [vmem:[%s21196_s7 + $0x1618] sm:$0xf]  ;;  %v11626_v19 = vor.u32 %v13686_v21, %v11625_v51  ;;  %8511 = vmatpush.bf16.msrb.mxu0 %v10986_v22 }
 0x7b5   :  { %v13718_v37 = vld [vmem:[%s21196_s7 + $0x1634] sm:$0xf0] }
 0x7b6   :  { %v12233_v32 = vld [vmem:[%s21196_s7 + $0x19d8] sm:$0xf]  ;;  %v11754_v40 = vor.u32 %v13718_v37, %v11753_v53  ;;  %8533 = vmatpush.bf16.msrb.mxu3 %v11626_v19 }
 0x7b7   :  { %v13838_v1 = vld [vmem:[%s21196_s7 + $0x19f4] sm:$0xf0]  ;;  %8512 = vmatmul.bf16.vlgmr.msrb.gmra.mxu0 %v15266_v55 }
 0x7b8   :  { %v13001_v18 = vld [vmem:[%s21196_s7 + $0x1fd8] sm:$0xf]  ;;  %v12234_v16 = vor.u32 %v13838_v1, %v12233_v32  ;;  %8550 = vmatpush.bf16.msrb.mxu2 %v11754_v40 }
 0x7b9   :  { %v14030_v4 = vld [vmem:[%s21196_s7 + $0x1ff4] sm:$0xf0] }
 0x7ba   :  { %v12425_v9 = vld [vmem:[%s21196_s7 + $0x1b58] sm:$0xf]  ;;  %v13002_v58 = vor.u32 %v14030_v4, %v13001_v18  ;;  %8556 = vmatpush.bf16.msra.mxu0 %v12234_v16 }
 0x7bb   :  { %v13886_v35 = vld [vmem:[%s21196_s7 + $0x1b74] sm:$0xf0]  ;;  %8551 = vmatmul.bf16.vlgmr.msrb.gmra.mxu2 %v15268_v50 }
 0x7bc   :  { %v11593_v33 = vld [vmem:[%s21196_s7 + $0x14d8] sm:$0xf]  ;;  %v12426_v26 = vor.u32 %v13886_v35, %v12425_v9  ;;  %8595 = vmatpush.bf16.msra.mxu2 %v13002_v58 }
 0x7bd   :  { %v13678_v60 = vld [vmem:[%s21196_s7 + $0x14f4] sm:$0xf0] }
 0x7be   :  { %v12201_v28 = vld [vmem:[%s21196_s7 + $0x1998] sm:$0xf]  ;;  %v11594_v2 = vor.u32 %v13678_v60, %v11593_v33  ;;  %8571 = vmatpush.bf16.msra.mxu1 %v12426_v26 }
 0x7bf   :  { %v13830_v46 = vld [vmem:[%s21196_s7 + $0x19b4] sm:$0xf0] }
 0x7c0   :  { %v12969_v8 = vld [vmem:[%s21196_s7 + $0x1f98] sm:$0xf]  ;;  %v12202_v24 = vor.u32 %v13830_v46, %v12201_v28  ;;  %8534 = vmatpush.bf16.msrb.mxu3 %v11594_v2  ;;  %v20267_v46 = vpop.f32.mrf.mxu0 }
 0x7c1   :  { %v14022_v13 = vld [vmem:[%s21196_s7 + $0x1fb4] sm:$0xf0] }
 0x7c2   :  { %v12393_v14 = vld [vmem:[%s21196_s7 + $0x1b18] sm:$0xf]  ;;  %v12970_v42 = vor.u32 %v14022_v13, %v12969_v8  ;;  %8557 = vmatpush.bf16.msra.mxu0 %v12202_v24  ;;  %v8281_v13 = vpop.f32.mrf.mxu3 }
 0x7c3   :  { %v13878_v12 = vld [vmem:[%s21196_s7 + $0x1b34] sm:$0xf0]  ;;  %v9163_v13 = vld [vmem:[%s21196_s7 + $0x1f8] sm:$0xf0] }
 0x7c4   :  { %v11561_v45 = vld [vmem:[%s21196_s7 + $0x1498] sm:$0xf]  ;;  %v12394_v43 = vor.u32 %v13878_v12, %v12393_v14  ;;  %8596 = vmatpush.bf16.msra.mxu2 %v12970_v42 }
 0x7c5   :  { %v13670_v52 = vld [vmem:[%s21196_s7 + $0x14b4] sm:$0xf0] }
 0x7c6   :  { %v12169_v25 = vld [vmem:[%s21196_s7 + $0x1958] sm:$0xf]  ;;  %v11562_v6 = vor.u32 %v13670_v52, %v11561_v45  ;;  %8572 = vmatpush.bf16.msra.mxu1 %v12394_v43  ;;  %v8320_v45 = vpop.f32.mrf.mxu1 }
 0x7c7   :  { %v13822_v41 = vld [vmem:[%s21196_s7 + $0x1974] sm:$0xf0] }
 0x7c8   :  { %v12937_v56 = vld [vmem:[%s21196_s7 + $0x1f58] sm:$0xf]  ;;  %v12170_v20 = vor.u32 %v13822_v41, %v12169_v25  ;;  %8535 = vmatpush.bf16.msrb.mxu3 %v11562_v6  ;;  %v9419_v6 = vld [vmem:[%s21196_s7 + $0x3f8] sm:$0xf0] }
 0x7c9   :  { %v14014_v39 = vld [vmem:[%s21196_s7 + $0x1f74] sm:$0xf0] }
 0x7ca   :  { %v12361_v34 = vld [vmem:[%s21196_s7 + $0x1ad8] sm:$0xf]  ;;  %v12938_v51 = vor.u32 %v14014_v39, %v12937_v56  ;;  %8558 = vmatpush.bf16.msra.mxu0 %v12170_v20 }
 0x7cb   :  { %v13870_v5 = vld [vmem:[%s21196_s7 + $0x1af4] sm:$0xf0] }
 0x7cc   :  { %v11529_v11 = vld [vmem:[%s21196_s7 + $0x1458] sm:$0xf]  ;;  %v12362_v10 = vor.u32 %v13870_v5, %v12361_v34  ;;  %8597 = vmatpush.bf16.msra.mxu2 %v12938_v51  ;;  %v13130_v5 = vld [vmem:[%s21196_s7 + $0x3dc] sm:$0xf] }
 0x7cd   :  { %v13662_v36 = vld [vmem:[%s21196_s7 + $0x1474] sm:$0xf0] }
 0x7ce   :  { %v12137_v21 = vld [vmem:[%s21196_s7 + $0x1918] sm:$0xf]  ;;  %v11530_v18 = vor.u32 %v13662_v36, %v11529_v11  ;;  %8573 = vmatpush.bf16.msra.mxu1 %v12362_v10 }
 0x7cf   :  { %v13814_v53 = vld [vmem:[%s21196_s7 + $0x1934] sm:$0xf0] }
 0x7d0   :  { %v12905_v37 = vld [vmem:[%s21196_s7 + $0x1f18] sm:$0xf]  ;;  %v12138_v9 = vor.u32 %v13814_v53, %v12137_v21  ;;  %8536 = vmatpush.bf16.msrb.mxu3 %v11530_v18 }
 0x7d1   :  { %v14006_v63 = vld [vmem:[%s21196_s7 + $0x1f34] sm:$0xf0] }
 0x7d2   :  { %v12329_v32 = vld [vmem:[%s21196_s7 + $0x1a98] sm:$0xf]  ;;  %v12906_v40 = vor.u32 %v14006_v63, %v12905_v37  ;;  %8559 = vmatpush.bf16.msra.mxu0 %v12138_v9  ;;  %v20311_v63 = vpop.f32.mrf.mxu2  ;;  %v13122_v9 = vld [vmem:[%s21196_s7 + $0x39c] sm:$0xf] }
 0x7d3   :  { %v13862_v1 = vld [vmem:[%s21196_s7 + $0x1ab4] sm:$0xf0] }
 0x7d4   :  { %v11497_v4 = vld [vmem:[%s21196_s7 + $0x1418] sm:$0xf]  ;;  %v12330_v16 = vor.u32 %v13862_v1, %v12329_v32  ;;  %8598 = vmatpush.bf16.msra.mxu2 %v12906_v40  ;;  %v9422_v32 = vor.u32 %v13130_v5, %v9419_v6  ;;  %v13058_v5 = vld [vmem:[%s21196_s7 + $0x19c] sm:$0xf] }
 0x7d5   :  { %v13654_v35 = vld [vmem:[%s21196_s7 + $0x1434] sm:$0xf0]  ;;  %v9131_v6 = vld [vmem:[%s21196_s7 + $0x1b8] sm:$0xf0] }
 0x7d6   :  { %v12105_v22 = vld [vmem:[%s21196_s7 + $0x18d8] sm:$0xf]  ;;  %v11498_v8 = vor.u32 %v13654_v35, %v11497_v4  ;;  %8574 = vmatpush.bf16.msra.mxu1 %v12330_v16  ;;  %v8307_v4 = vpop.f32.mrf.mxu0  ;;  %v9387_v35 = vld [vmem:[%s21196_s7 + $0x3b8] sm:$0xf0] }
 0x7d7   :  { %v13806_v19 = vld [vmem:[%s21196_s7 + $0x18f4] sm:$0xf0]  ;;  %v9099_v4 = vld [vmem:[%s21196_s7 + $0x178] sm:$0xf0] }
 0x7d8   :  { %v12745_v33 = vld [vmem:[%s21196_s7 + $0x1dd8] sm:$0xf]  ;;  %v12106_v14 = vor.u32 %v13806_v19, %v12105_v22  ;;  %8537 = vmatpush.bf16.msrb.mxu3 %v11498_v8  ;;  %v13066_v8 = vld [vmem:[%s21196_s7 + $0x1dc] sm:$0xf] }
 0x7d9   :  { %v13966_v60 = vld [vmem:[%s21196_s7 + $0x1df4] sm:$0xf0] }
 0x7da   :  { %v12873_v49 = vld [vmem:[%s21196_s7 + $0x1ed8] sm:$0xf]  ;;  %v12746_v12 = vor.u32 %v13966_v60, %v12745_v33  ;;  %8560 = vmatpush.bf16.msra.mxu0 %v12106_v14  ;;  %v13258_v14 = vld [vmem:[%s21196_s7 + $0x7dc] sm:$0xf] }
 0x7db   :  { %v13998_v58 = vld [vmem:[%s21196_s7 + $0x1ef4] sm:$0xf0]  ;;  %8538 = vmatmul.bf16.vlgmr.msrb.gmra.mxu3 %v15377_v15 }
 0x7dc   :  { %v12297_v26 = vld [vmem:[%s21196_s7 + $0x1a58] sm:$0xf]  ;;  %v12874_v52 = vor.u32 %v13998_v58, %v12873_v49  ;;  %8582 = vmatpush.bf16.msra.mxu3 %v12746_v12  ;;  %v9931_v12 = vld [vmem:[%s21196_s7 + $0x7f8] sm:$0xf0] }
 0x7dd   :  { %v13854_v28 = vld [vmem:[%s21196_s7 + $0x1a74] sm:$0xf0] }
 0x7de   :  { %v12073_v2 = vld [vmem:[%s21196_s7 + $0x1898] sm:$0xf]  ;;  %v12298_v42 = vor.u32 %v13854_v28, %v12297_v26  ;;  %8599 = vmatpush.bf16.msra.mxu2 %v12874_v52  ;;  %v9390_v28 = vor.u32 %v13122_v9, %v9387_v35  ;;  %v13242_v9 = vld [vmem:[%s21196_s7 + $0x75c] sm:$0xf] }
 0x7df   :  { %v13798_v24 = vld [vmem:[%s21196_s7 + $0x18b4] sm:$0xf0]  ;;  %v9867_v35 = vld [vmem:[%s21196_s7 + $0x778] sm:$0xf0] }
 0x7e0   :  { %v12713_v43 = vld [vmem:[%s21196_s7 + $0x1d98] sm:$0xf]  ;;  %v12074_v20 = vor.u32 %v13798_v24, %v12073_v2  ;;  %8575 = vmatpush.bf16.msra.mxu1 %v12298_v42  ;;  %v13114_v2 = vld [vmem:[%s21196_s7 + $0x35c] sm:$0xf] }
 0x7e1   :  { %v13958_v25 = vld [vmem:[%s21196_s7 + $0x1db4] sm:$0xf0]  ;;  %v9355_v24 = vld [vmem:[%s21196_s7 + $0x378] sm:$0xf0] }
 0x7e2   :  { %v12841_v41 = vld [vmem:[%s21196_s7 + $0x1e98] sm:$0xf]  ;;  %v12714_v11 = vor.u32 %v13958_v25, %v12713_v43  ;;  %8561 = vmatpush.bf16.msra.mxu0 %v12074_v20  ;;  %v9166_v43 = vor.u32 %v13066_v8, %v9163_v13  ;;  %v13250_v20 = vld [vmem:[%s21196_s7 + $0x79c] sm:$0xf] }
 0x7e3   :  { %v13990_v56 = vld [vmem:[%s21196_s7 + $0x1eb4] sm:$0xf0]  ;;  %v13042_v8 = vld [vmem:[%s21196_s7 + $0x11c] sm:$0xf] }
 0x7e4   :  { %v12265_v39 = vld [vmem:[%s21196_s7 + $0x1a18] sm:$0xf]  ;;  %v12842_v51 = vor.u32 %v13990_v56, %v12841_v41  ;;  %8583 = vmatpush.bf16.msra.mxu3 %v12714_v11  ;;  %v8346_v56 = vpop.f32.mrf.mxu2  ;;  %v9899_v11 = vld [vmem:[%s21196_s7 + $0x7b8] sm:$0xf0] }
 0x7e5   :  { %v13846_v34 = vld [vmem:[%s21196_s7 + $0x1a34] sm:$0xf0]  ;;  %v9067_v13 = vld [vmem:[%s21196_s7 + $0x138] sm:$0xf0] }
 0x7e6   :  { %v12041_v36 = vld [vmem:[%s21196_s7 + $0x1858] sm:$0xf]  ;;  %v12266_v10 = vor.u32 %v13846_v34, %v12265_v39  ;;  %8600 = vmatpush.bf16.msra.mxu2 %v12842_v51  ;;  %v9934_v39 = vor.u32 %v13258_v14, %v9931_v12  ;;  %v9358_v34 = vor.u32 %v13114_v2, %v9355_v24  ;;  %v9323_v51 = vld [vmem:[%s21196_s7 + $0x338] sm:$0xf0] }
 0x7e7   :  { %v13790_v21 = vld [vmem:[%s21196_s7 + $0x1874] sm:$0xf0]  ;;  %v13234_v14 = vld [vmem:[%s21196_s7 + $0x71c] sm:$0xf] }
 0x7e8   :  { %v12681_v53 = vld [vmem:[%s21196_s7 + $0x1d58] sm:$0xf]  ;;  %v12042_v22 = vor.u32 %v13790_v21, %v12041_v36  ;;  %8576 = vmatpush.bf16.msra.mxu1 %v12266_v10  ;;  %v13106_v36 = vld [vmem:[%s21196_s7 + $0x31c] sm:$0xf]  ;;  %v9134_v21 = vor.u32 %v13058_v5, %v9131_v6 }
 0x7e9   :  { %v13950_v37 = vld [vmem:[%s21196_s7 + $0x1d74] sm:$0xf0]  ;;  %v9835_v12 = vld [vmem:[%s21196_s7 + $0x738] sm:$0xf0] }
 0x7ea   :  { %v12809_v1 = vld [vmem:[%s21196_s7 + $0x1e58] sm:$0xf]  ;;  %v12682_v19 = vor.u32 %v13950_v37, %v12681_v53  ;;  %8562 = vmatpush.bf16.msra.mxu0 %v12042_v22  ;;  %v13098_v22 = vld [vmem:[%s21196_s7 + $0x2dc] sm:$0xf]  ;;  %v9838_v56 = vor.u32 %v13234_v14, %v9835_v12 }
 0x7eb   :  { %v13982_v18 = vld [vmem:[%s21196_s7 + $0x1e74] sm:$0xf0]  ;;  %8577 = vmatmul.bf16.vlgmr.msra.gmra.mxu1 %v15440_v48  ;;  %v13090_v2 = vld [vmem:[%s21196_s7 + $0x29c] sm:$0xf] }
 0x7ec   :  { %v12009_v40 = vld [vmem:[%s21196_s7 + $0x1818] sm:$0xf]  ;;  %v12810_v60 = vor.u32 %v13982_v18, %v12809_v1  ;;  %8621 = vmatpush.bf16.msrb.mxu1 %v9422_v32  ;;  %8584 = vmatpush.bf16.msra.mxu3 %v12682_v19  ;;  %v9902_v32 = vor.u32 %v13250_v20, %v9899_v11  ;;  %v9326_v1 = vor.u32 %v13106_v36, %v9323_v51  ;;  %v13050_v18 = vld [vmem:[%s21196_s7 + $0x15c] sm:$0xf] }
 0x7ed   :  { %v13782_v16 = vld [vmem:[%s21196_s7 + $0x1834] sm:$0xf0]  ;;  %v9291_v19 = vld [vmem:[%s21196_s7 + $0x2f8] sm:$0xf0]  ;;  %v8280_v20 = vadd.f32 %v20209_v57, %v20087_v3 }
 0x7ee   :  { %v12649_v33 = vld [vmem:[%s21196_s7 + $0x1d18] sm:$0xf]  ;;  %v12010_v45 = vor.u32 %v13782_v16, %v12009_v40  ;;  %8601 = vmatpush.bf16.msra.mxu2 %v12810_v60  ;;  %v20413_v16 = vpop.f32.mrf.mxu3  ;;  %v9259_v24 = vld [vmem:[%s21196_s7 + $0x2b8] sm:$0xf0] }
 0x7ef   :  { %v13942_v49 = vld [vmem:[%s21196_s7 + $0x1d34] sm:$0xf0]  ;;  %v9675_v5 = vld [vmem:[%s21196_s7 + $0x5f8] sm:$0xf0] }
 0x7f0   :  { %v12777_v58 = vld [vmem:[%s21196_s7 + $0x1e18] sm:$0xf]  ;;  %v12650_v52 = vor.u32 %v13942_v49, %v12649_v33  ;;  %8622 = vmatpush.bf16.msrb.mxu1 %v9390_v28  ;;  %8563 = vmatpush.bf16.msra.mxu0 %v12010_v45  ;;  %v9102_v33 = vor.u32 %v13050_v18, %v9099_v4  ;;  %v9294_v28 = vor.u32 %v13098_v22, %v9291_v19  ;;  %v13226_v6 = vld [vmem:[%s21196_s7 + $0x6dc] sm:$0xf] }
 0x7f1   :  { %v13974_v26 = vld [vmem:[%s21196_s7 + $0x1e34] sm:$0xf0]  ;;  %v9803_v11 = vld [vmem:[%s21196_s7 + $0x6f8] sm:$0xf0]  ;;  %v8293_v19 = vadd.f32 %v20107_v38, %v8280_v20 }
 0x7f2   :  { %v12778_v42 = vor.u32 %v13974_v26, %v12777_v58  ;;  %v12617_v25 = vld [vmem:[%s21196_s7 + $0x1cd8] sm:$0xf]  ;;  %8585 = vmatpush.bf16.msra.mxu3 %v12650_v52  ;;  %v20421_v58 = vpop.f32.mrf.mxu1  ;;  %v9870_v26 = vor.u32 %v13242_v9, %v9867_v35  ;;  %v13082_v36 = vld [vmem:[%s21196_s7 + $0x25c] sm:$0xf]  ;;  %v9806_v18 = vor.u32 %v13226_v6, %v9803_v11 }
 0x7f3   :  { %v13934_v41 = vld [vmem:[%s21196_s7 + $0x1cf4] sm:$0xf0]  ;;  %8564 = vmatmul.bf16.vlgmr.msra.gmra.mxu0 %v15476_v23  ;;  %v9227_v51 = vld [vmem:[%s21196_s7 + $0x278] sm:$0xf0] }
 0x7f4   :  { %v12618_v10 = vor.u32 %v13934_v41, %v12617_v25  ;;  %8602 = vmatpush.bf16.msra.mxu2 %v12778_v42  ;;  %8608 = vmatpush.bf16.msrb.mxu0 %v9166_v43  ;;  %v12585_v53 = vld [vmem:[%s21196_s7 + $0x1c98] sm:$0xf]  ;;  %v9070_v42 = vor.u32 %v13042_v8, %v9067_v13  ;;  %v13034_v25 = vld [vmem:[%s21196_s7 + $0xdc] sm:$0xf]  ;;  %v9230_v4 = vor.u32 %v13082_v36, %v9227_v51 }
 0x7f5   :  { %v13926_v37 = vld [vmem:[%s21196_s7 + $0x1cb4] sm:$0xf0]  ;;  %8623 = vmatpush.bf16.msrb.mxu1 %v9358_v34  ;;  %v9035_v41 = vld [vmem:[%s21196_s7 + $0xf8] sm:$0xf0] }
 0x7f6   :  { %8586 = vmatpush.bf16.msra.mxu3 %v12618_v10  ;;  %v12586_v40 = vor.u32 %v13926_v37, %v12585_v53  ;;  %v12553_v60 = vld [vmem:[%s21196_s7 + $0x1c58] sm:$0xf]  ;;  %v13194_v34 = vld [vmem:[%s21196_s7 + $0x5dc] sm:$0xf]  ;;  %v20473_v10 = vpop.f32.mrf.mxu0  ;;  %v8333_v53 = vpop.f32.mrf.mxu3  ;;  %v9038_v37 = vor.u32 %v13034_v25, %v9035_v41 }
 0x7f7   :  { %8603 = vmatmul.bf16.vlgmr.msra.gmra.mxu2 %v15484_v54  ;;  %v13918_v49 = vld [vmem:[%s21196_s7 + $0x1c74] sm:$0xf0]  ;;  %v9678_v3 = vor.u32 %v13194_v34, %v9675_v5  ;;  %v13026_v57 = vld [vmem:[%s21196_s7 + $0x9c] sm:$0xf] }
 0x7f8   :  { %8647 = vmatpush.bf16.msrb.mxu2 %v9934_v39  ;;  %8609 = vmatpush.bf16.msrb.mxu0 %v9134_v21  ;;  %v12554_v45 = vor.u32 %v13918_v49, %v12553_v60  ;;  %v12521_v52 = vld [vmem:[%s21196_s7 + $0x1c18] sm:$0xf]  ;;  %v9262_v39 = vor.u32 %v13090_v2, %v9259_v24  ;;  %v13186_v9 = vld [vmem:[%s21196_s7 + $0x59c] sm:$0xf] }
 0x7f9   :  { %8624 = vmatpush.bf16.msrb.mxu1 %v9326_v1  ;;  %v13910_v43 = vld [vmem:[%s21196_s7 + $0x1c34] sm:$0xf0]  ;;  %v9643_v35 = vld [vmem:[%s21196_s7 + $0x5b8] sm:$0xf0] }
 0x7fa   :  { %8587 = vmatpush.bf16.msra.mxu3 %v12586_v40  ;;  %v12522_v21 = vor.u32 %v13910_v43, %v12521_v52  ;;  %v8372_v1 = vpop.f32.mrf.mxu1  ;;  %v13218_v22 = vld [vmem:[%s21196_s7 + $0x69c] sm:$0xf]  ;;  %v9646_v8 = vor.u32 %v13186_v9, %v9643_v35 }
 0x7fb   :  { %v9771_v40 = vld [vmem:[%s21196_s7 + $0x6b8] sm:$0xf0] }
 0x7fc   :  { %8648 = vmatpush.bf16.msrb.mxu2 %v9902_v32  ;;  %8610 = vmatpush.bf16.msrb.mxu0 %v9102_v33  ;;  %v9003_v32 = vld [vmem:[%s21196_s7 + $0xb8] sm:$0xf0]  ;;  %v9774_v14 = vor.u32 %v13218_v22, %v9771_v40 }
 0x7fd   :  { %8625 = vmatpush.bf16.msrb.mxu1 %v9294_v28  ;;  %v13074_v33 = vld [vmem:[%s21196_s7 + $0x21c] sm:$0xf]  ;;  %v9006_v28 = vor.u32 %v13026_v57, %v9003_v32 }
 0x7fe   :  { %8588 = vmatpush.bf16.msra.mxu3 %v12554_v45  ;;  %v9195_v60 = vld [vmem:[%s21196_s7 + $0x238] sm:$0xf0]  ;;  %v20519_v45 = vpop.f32.mrf.mxu2  ;;  %v8359_v25 = vpop.f32.mrf.mxu0 }
 0x7ff   :  { %v13386_v49 = vld [vmem:[%s21196_s7 + $0xbdc] sm:$0xf]  ;;  %v9198_v12 = vor.u32 %v13074_v33, %v9195_v60 }
 0x800   :  { %8649 = vmatpush.bf16.msrb.mxu2 %v9870_v26  ;;  %8611 = vmatpush.bf16.msrb.mxu0 %v9070_v42  ;;  %v10443_v38 = vld [vmem:[%s21196_s7 + $0xbf8] sm:$0xf0]  ;;  %v8306_v26 = vadd.f32 %v20267_v46, %v8293_v19 }
 0x801   :  { %8626 = vmatpush.bf16.msrb.mxu1 %v9262_v39  ;;  %v13018_v13 = vld [vmem:[%s21196_s7 + $0x5c] sm:$0xf]  ;;  %v10446_v52 = vor.u32 %v13386_v49, %v10443_v38 }
 0x802   :  { %8589 = vmatpush.bf16.msra.mxu3 %v12522_v21  ;;  %v8971_v2 = vld [vmem:[%s21196_s7 + $0x78] sm:$0xf0]  ;;  %v8319_v39 = vadd.f32 %v20217_v47, %v8306_v26 }
 0x803   :  { %v13178_v46 = vld [vmem:[%s21196_s7 + $0x55c] sm:$0xf]  ;;  %v8974_v34 = vor.u32 %v13018_v13, %v8971_v2 }
 0x804   :  { %8650 = vmatpush.bf16.msrb.mxu2 %v9838_v56  ;;  %8612 = vmatpush.bf16.msrb.mxu0 %v9038_v37  ;;  %v9611_v24 = vld [vmem:[%s21196_s7 + $0x578] sm:$0xf0]  ;;  %v8332_v53 = vadd.f32 %v20413_v16, %v8319_v39 }
 0x805   :  { %8627 = vmatpush.bf16.msrb.mxu1 %v9230_v4  ;;  %8590 = vmatmul.bf16.vlgmr.msra.gmra.mxu3 %v15591_v44  ;;  %v13210_v42 = vld [vmem:[%s21196_s7 + $0x65c] sm:$0xf]  ;;  %v9614_v5 = vor.u32 %v13178_v46, %v9611_v24 }
 0x806   :  { %8634 = vmatpush.bf16.msrb.mxu3 %v9678_v3  ;;  %v9739_v43 = vld [vmem:[%s21196_s7 + $0x678] sm:$0xf0]  ;;  %v8345_v33 = vadd.f32 %v20311_v63, %v8332_v53  ;;  %v8398_v60 = vpop.f32.mrf.mxu2 }
 0x807   :  { %v13378_v41 = vld [vmem:[%s21196_s7 + $0xb9c] sm:$0xf]  ;;  %v9742_v36 = vor.u32 %v13210_v42, %v9739_v43 }
 0x808   :  { %8651 = vmatpush.bf16.msrb.mxu2 %v9806_v18  ;;  %v10411_v56 = vld [vmem:[%s21196_s7 + $0xbb8] sm:$0xf0]  ;;  %8613 = vmatpush.bf16.msrb.mxu0 %v9006_v28 }
 0x809   :  { %v13010_v6 = vld [vmem:[%s21196_s7 + $0x1c] sm:$0xf]  ;;  %8628 = vmatpush.bf16.msrb.mxu1 %v9198_v12  ;;  %v10414_v37 = vor.u32 %v13378_v41, %v10411_v56 }
 0x80a   :  { %8635 = vmatpush.bf16.msrb.mxu3 %v9646_v8  ;;  %v8939_v20 = vld [vmem:[%s21196_s7 + $0x38] sm:$0xf0] }
 0x80b   :  { %v13170_v11 = vld [vmem:[%s21196_s7 + $0x51c] sm:$0xf]  ;;  %v8942_v4 = vor.u32 %v13010_v6, %v8939_v20  ;;  %v8383_v6 = vpop.f32.mrf.mxu3 }
 0x80c   :  { %8652 = vmatpush.bf16.msrb.mxu2 %v9774_v14  ;;  %v9579_v47 = vld [vmem:[%s21196_s7 + $0x538] sm:$0xf0]  ;;  %8614 = vmatpush.bf16.msrb.mxu0 %v8974_v34  ;;  %v8358_v14 = vadd.f32 %v20473_v10, %v8345_v33 }
 0x80d   :  { %v13202_v51 = vld [vmem:[%s21196_s7 + $0x61c] sm:$0xf]  ;;  %8673 = vmatpush.bf16.msra.mxu1 %v10446_v52  ;;  %v9582_v9 = vor.u32 %v13170_v11, %v9579_v47  ;;  %v8422_v47 = vpop.f32.mrf.mxu1 }
 0x80e   :  { %v9707_v21 = vld [vmem:[%s21196_s7 + $0x638] sm:$0xf0]  ;;  %8636 = vmatpush.bf16.msrb.mxu3 %v9614_v5  ;;  %8629 = vmatmul.bf16.vlgmr.msrb.gmra.mxu1 %v15006_v30  ;;  %v8371_v34 = vadd.f32 %v20421_v58, %v8358_v14 }
 0x80f   :  { %v13322_v3 = vld [vmem:[%s21196_s7 + $0x9dc] sm:$0xf]  ;;  %v9710_v35 = vor.u32 %v13202_v51, %v9707_v21 }
 0x810   :  { %v10187_v57 = vld [vmem:[%s21196_s7 + $0x9f8] sm:$0xf0]  ;;  %8653 = vmatpush.bf16.msrb.mxu2 %v9742_v36  ;;  %8615 = vmatpush.bf16.msrb.mxu0 %v8942_v4  ;;  %v8384_v36 = vadd.f32 %v8383_v6, %v8371_v34 }
 0x811   :  { %v13514_v32 = vld [vmem:[%s21196_s7 + $0xfdc] sm:$0xf]  ;;  %v10190_v22 = vor.u32 %v13322_v3, %v10187_v57  ;;  %8674 = vmatpush.bf16.msra.mxu1 %v10414_v37 }
 0x812   :  { %v10955_v1 = vld [vmem:[%s21196_s7 + $0xff8] sm:$0xf0]  ;;  %8637 = vmatpush.bf16.msrb.mxu3 %v9582_v9 }
 0x813   :  { %v13370_v16 = vld [vmem:[%s21196_s7 + $0xb5c] sm:$0xf]  ;;  %v10958_v49 = vor.u32 %v13514_v32, %v10955_v1  ;;  %8616 = vmatmul.bf16.vlgmr.msrb.gmra.mxu0 %v15033_v61  ;;  %v8397_v32 = vadd.f32 %v20519_v45, %v8384_v36  ;;  %v20654_v1 = vld [vmem:[%s21198_s8] sm:$0xff] }
 0x814   :  { %v10379_v18 = vld [vmem:[%s21196_s7 + $0xb78] sm:$0xf0]  ;;  %8654 = vmatpush.bf16.msrb.mxu2 %v9710_v35  ;;  %8660 = vmatpush.bf16.msra.mxu0 %v10190_v22 }
 0x815   :  { %v13162_v19 = vld [vmem:[%s21196_s7 + $0x4dc] sm:$0xf]  ;;  %v10382_v38 = vor.u32 %v13370_v16, %v10379_v18  ;;  %v2022_v16 = vperm.slane %v20654_v1, 6 }
 0x816   :  { %v9547_v40 = vld [vmem:[%s21196_s7 + $0x4f8] sm:$0xf0] }
 0x817   :  { %v13314_v30 = vld [vmem:[%s21196_s7 + $0x99c] sm:$0xf]  ;;  %v9550_v12 = vor.u32 %v13162_v19, %v9547_v40  ;;  %8675 = vmatpush.bf16.msra.mxu1 %v10382_v38  ;;  %8655 = vmatmul.bf16.vlgmr.msrb.gmra.mxu2 %v15041_v0  ;;  %v8826_v40 = vrot.slane %v8397_v32, 4 }
 0x818   :  { %v10155_v26 = vld [vmem:[%s21196_s7 + $0x9b8] sm:$0xf0]  ;;  %8699 = vmatpush.bf16.msra.mxu2 %v10958_v49 }
 0x819   :  { %v13506_v28 = vld [vmem:[%s21196_s7 + $0xf9c] sm:$0xf]  ;;  %v10158_v2 = vor.u32 %v13314_v30, %v10155_v26  ;;  %8638 = vmatpush.bf16.msrb.mxu3 %v9550_v12  ;;  %v8385_v12 = vpop.f32.mrf.mxu3 }
 0x81a   :  { %v10923_v63 = vld [vmem:[%s21196_s7 + $0xfb8] sm:$0xf0] }
 0x81b   :  { %v13362_v8 = vld [vmem:[%s21196_s7 + $0xb1c] sm:$0xf]  ;;  %v10926_v52 = vor.u32 %v13506_v28, %v10923_v63  ;;  %8661 = vmatpush.bf16.msra.mxu0 %v10158_v2  ;;  %v8831_v63 = vsel %vm8828_vm5, %v19826_v31, %v8826_v40 }
 0x81c   :  { %v10347_v13 = vld [vmem:[%s21196_s7 + $0xb38] sm:$0xf0]  ;;  %8839 = vst [vmem:[%s21199_s9 + $0x10] sm:$0xff] %v8831_v63 }
 0x81d   :  { %v13154_v46 = vld [vmem:[%s21196_s7 + $0x49c] sm:$0xf]  ;;  %v10350_v42 = vor.u32 %v13362_v8, %v10347_v13  ;;  %8700 = vmatpush.bf16.msra.mxu2 %v10926_v52  ;;  %v8409_v8 = vpop.f32.mrf.mxu0  ;;  %v8424_v52 = vpop.f32.mrf.mxu1 }
 0x81e   :  { %v9515_v24 = vld [vmem:[%s21196_s7 + $0x4b8] sm:$0xf0]  ;;  %v8410_v14 = vadd.f32 %v8409_v8, %v2022_v16 }
 0x81f   :  { %v13306_v10 = vld [vmem:[%s21196_s7 + $0x95c] sm:$0xf]  ;;  %v9518_v5 = vor.u32 %v13154_v46, %v9515_v24  ;;  %8676 = vmatpush.bf16.msra.mxu1 %v10350_v42 }
 0x820   :  { %v10123_v43 = vld [vmem:[%s21196_s7 + $0x978] sm:$0xf0] }
 0x821   :  { %v13498_v25 = vld [vmem:[%s21196_s7 + $0xf5c] sm:$0xf]  ;;  %v10126_v61 = vor.u32 %v13306_v10, %v10123_v43  ;;  %8639 = vmatpush.bf16.msrb.mxu3 %v9518_v5  ;;  %v20716_v5 = vadd.f32 %v8422_v47, %v8410_v14 }
 0x822   :  { %v10891_v41 = vld [vmem:[%s21196_s7 + $0xf78] sm:$0xf0] }
 0x823   :  { %v13354_v56 = vld [vmem:[%s21196_s7 + $0xadc] sm:$0xf]  ;;  %v10894_v0 = vor.u32 %v13498_v25, %v10891_v41  ;;  %8662 = vmatpush.bf16.msra.mxu0 %v10126_v61 }
 0x824   :  { %v10315_v39 = vld [vmem:[%s21196_s7 + $0xaf8] sm:$0xf0] }
 0x825   :  { %v13146_v20 = vld [vmem:[%s21196_s7 + $0x45c] sm:$0xf]  ;;  %v10318_v51 = vor.u32 %v13354_v56, %v10315_v39  ;;  %8701 = vmatpush.bf16.msra.mxu2 %v10894_v0  ;;  %v8411_v32 = vpop.f32.mrf.mxu0 }
 0x826   :  { %v9483_v11 = vld [vmem:[%s21196_s7 + $0x478] sm:$0xf0] }
 0x827   :  { %v13298_v58 = vld [vmem:[%s21196_s7 + $0x91c] sm:$0xf]  ;;  %v9486_v18 = vor.u32 %v13146_v20, %v9483_v11  ;;  %8677 = vmatpush.bf16.msra.mxu1 %v10318_v51 }
 0x828   :  { %v10091_v21 = vld [vmem:[%s21196_s7 + $0x938] sm:$0xf0] }
 0x829   :  { %v13490_v53 = vld [vmem:[%s21196_s7 + $0xf1c] sm:$0xf]  ;;  %v10094_v35 = vor.u32 %v13298_v58, %v10091_v21  ;;  %8640 = vmatpush.bf16.msrb.mxu3 %v9486_v18 }
 0x82a   :  { %v10859_v37 = vld [vmem:[%s21196_s7 + $0xf38] sm:$0xf0] }
 0x82b   :  { %v13346_v3 = vld [vmem:[%s21196_s7 + $0xa9c] sm:$0xf]  ;;  %v10862_v33 = vor.u32 %v13490_v53, %v10859_v37  ;;  %8663 = vmatpush.bf16.msra.mxu0 %v10094_v35  ;;  %v20736_v53 = vpop.f32.mrf.mxu2 }
 0x82c   :  { %v10283_v57 = vld [vmem:[%s21196_s7 + $0xab8] sm:$0xf0] }
 0x82d   :  { %v13138_v4 = vld [vmem:[%s21196_s7 + $0x41c] sm:$0xf]  ;;  %v10286_v60 = vor.u32 %v13346_v3, %v10283_v57  ;;  %8702 = vmatpush.bf16.msra.mxu2 %v10862_v33 }
 0x82e   :  { %v9451_v9 = vld [vmem:[%s21196_s7 + $0x438] sm:$0xf0] }
 0x82f   :  { %v13290_v45 = vld [vmem:[%s21196_s7 + $0x8dc] sm:$0xf]  ;;  %v9454_v13 = vor.u32 %v13138_v4, %v9451_v9  ;;  %8678 = vmatpush.bf16.msra.mxu1 %v10286_v60 }
 0x830   :  { %v10059_v22 = vld [vmem:[%s21196_s7 + $0x8f8] sm:$0xf0] }
 0x831   :  { %v13450_v19 = vld [vmem:[%s21196_s7 + $0xddc] sm:$0xf]  ;;  %v10062_v2 = vor.u32 %v13290_v45, %v10059_v22  ;;  %8641 = vmatpush.bf16.msrb.mxu3 %v9454_v13 }
 0x832   :  { %v10699_v49 = vld [vmem:[%s21196_s7 + $0xdf8] sm:$0xf0] }
 0x833   :  { %v13482_v38 = vld [vmem:[%s21196_s7 + $0xedc] sm:$0xf]  ;;  %v10702_v46 = vor.u32 %v13450_v19, %v10699_v49  ;;  %8664 = vmatpush.bf16.msra.mxu0 %v10062_v2 }
 0x834   :  { %v10827_v30 = vld [vmem:[%s21196_s7 + $0xef8] sm:$0xf0]  ;;  %8642 = vmatmul.bf16.vlgmr.msrb.gmra.mxu3 %v15133_v29 }
 0x835   :  { %v13338_v26 = vld [vmem:[%s21196_s7 + $0xa5c] sm:$0xf]  ;;  %v10830_v42 = vor.u32 %v13482_v38, %v10827_v30  ;;  %8686 = vmatpush.bf16.msra.mxu3 %v10702_v46 }
 0x836   :  { %v10251_v28 = vld [vmem:[%s21196_s7 + $0xa78] sm:$0xf0] }
 0x837   :  { %v13282_v24 = vld [vmem:[%s21196_s7 + $0x89c] sm:$0xf]  ;;  %v10254_v10 = vor.u32 %v13338_v26, %v10251_v28  ;;  %8703 = vmatpush.bf16.msra.mxu2 %v10830_v42 }
 0x838   :  { %v10027_v31 = vld [vmem:[%s21196_s7 + $0x8b8] sm:$0xf0] }
 0x839   :  { %v13442_v43 = vld [vmem:[%s21196_s7 + $0xd9c] sm:$0xf]  ;;  %v10030_v20 = vor.u32 %v13282_v24, %v10027_v31  ;;  %8679 = vmatpush.bf16.msra.mxu1 %v10254_v10  ;;  %v8450_v24 = vpop.f32.mrf.mxu2 }
 0x83a   :  { %v10667_v25 = vld [vmem:[%s21196_s7 + $0xdb8] sm:$0xf0] }
 0x83b   :  { %v13474_v41 = vld [vmem:[%s21196_s7 + $0xe9c] sm:$0xf]  ;;  %v10670_v11 = vor.u32 %v13442_v43, %v10667_v25  ;;  %8665 = vmatpush.bf16.msra.mxu0 %v10030_v20 }
 0x83c   :  { %v10795_v56 = vld [vmem:[%s21196_s7 + $0xeb8] sm:$0xf0] }
 0x83d   :  { %v13330_v39 = vld [vmem:[%s21196_s7 + $0xa1c] sm:$0xf]  ;;  %v10798_v47 = vor.u32 %v13474_v41, %v10795_v56  ;;  %8687 = vmatpush.bf16.msra.mxu3 %v10670_v11 }
 0x83e   :  { %v10219_v34 = vld [vmem:[%s21196_s7 + $0xa38] sm:$0xf0] }
 0x83f   :  { %v13642_v6 = vld [vmem:[%s21196_s7 + $0x13dc] sm:$0xf]  ;;  %v10222_v0 = vor.u32 %v13330_v39, %v10219_v34  ;;  %8704 = vmatpush.bf16.msra.mxu2 %v10798_v47 }
 0x840   :  { %v11467_v61 = vld [vmem:[%s21196_s7 + $0x13f8] sm:$0xf0] }
 0x841   :  { %v13274_v36 = vld [vmem:[%s21196_s7 + $0x85c] sm:$0xf]  ;;  %v11470_v37 = vor.u32 %v13642_v6, %v11467_v61  ;;  %8680 = vmatpush.bf16.msra.mxu1 %v10222_v0 }
 0x842   :  { %v9995_v51 = vld [vmem:[%s21196_s7 + $0x878] sm:$0xf0] }
 0x843   :  { %v13434_v58 = vld [vmem:[%s21196_s7 + $0xd5c] sm:$0xf]  ;;  %v9998_v29 = vor.u32 %v13274_v36, %v9995_v51 }
 0x844   :  { %v10635_v21 = vld [vmem:[%s21196_s7 + $0xd78] sm:$0xf0]  ;;  %8681 = vmatmul.bf16.vlgmr.msra.gmra.mxu1 %v15093_v27 }
 0x845   :  { %v13466_v3 = vld [vmem:[%s21196_s7 + $0xe5c] sm:$0xf]  ;;  %v10638_v4 = vor.u32 %v13434_v58, %v10635_v21  ;;  %8725 = vmatpush.bf16.msrb.mxu1 %v11470_v37  ;;  %8666 = vmatpush.bf16.msra.mxu0 %v9998_v29  ;;  %v8435_v37 = vpop.f32.mrf.mxu3 }
 0x846   :  { %v10763_v57 = vld [vmem:[%s21196_s7 + $0xe78] sm:$0xf0]  ;;  %v8436_v32 = vadd.f32 %v8435_v37, %v20716_v5 }
 0x847   :  { %v13634_v16 = vld [vmem:[%s21196_s7 + $0x139c] sm:$0xf]  ;;  %v10766_v22 = vor.u32 %v13466_v3, %v10763_v57  ;;  %8688 = vmatpush.bf16.msra.mxu3 %v10638_v4 }
 0x848   :  { %v11435_v18 = vld [vmem:[%s21196_s7 + $0x13b8] sm:$0xf0] }
 0x849   :  { %v13266_v9 = vld [vmem:[%s21196_s7 + $0x81c] sm:$0xf]  ;;  %v11438_v60 = vor.u32 %v13634_v16, %v11435_v18  ;;  %8705 = vmatpush.bf16.msra.mxu2 %v10766_v22  ;;  %v8474_v16 = vpop.f32.mrf.mxu1  ;;  %v8449_v22 = vadd.f32 %v20736_v53, %v8436_v32 }
 0x84a   :  { %v9963_v35 = vld [vmem:[%s21196_s7 + $0x838] sm:$0xf0] }
 0x84b   :  { %v13426_v45 = vld [vmem:[%s21196_s7 + $0xd1c] sm:$0xf]  ;;  %v9966_v8 = vor.u32 %v13266_v9, %v9963_v35  ;;  %8726 = vmatpush.bf16.msrb.mxu1 %v11438_v60 }
 0x84c   :  { %v10603_v19 = vld [vmem:[%s21196_s7 + $0xd38] sm:$0xf0] }
 0x84d   :  { %v13458_v40 = vld [vmem:[%s21196_s7 + $0xe1c] sm:$0xf]  ;;  %v10606_v13 = vor.u32 %v13426_v45, %v10603_v19  ;;  %8667 = vmatpush.bf16.msra.mxu0 %v9966_v8  ;;  %v8437_v24 = vpop.f32.mrf.mxu3 }
 0x84e   :  { %v10731_v33 = vld [vmem:[%s21196_s7 + $0xe38] sm:$0xf0] }
 0x84f   :  { %v13578_v49 = vld [vmem:[%s21196_s7 + $0x11dc] sm:$0xf]  ;;  %v10734_v14 = vor.u32 %v13458_v40, %v10731_v33  ;;  %8689 = vmatpush.bf16.msra.mxu3 %v10606_v13 }
 0x850   :  { %v11211_v38 = vld [vmem:[%s21196_s7 + $0x11f8] sm:$0xf0]  ;;  %8668 = vmatmul.bf16.vlgmr.msra.gmra.mxu0 %v15131_v62 }
 0x851   :  { %v13770_v30 = vld [vmem:[%s21196_s7 + $0x17dc] sm:$0xf]  ;;  %v11214_v12 = vor.u32 %v13578_v49, %v11211_v38  ;;  %8706 = vmatpush.bf16.msra.mxu2 %v10734_v14 }
 0x852   :  { %v11979_v26 = vld [vmem:[%s21196_s7 + $0x17f8] sm:$0xf0] }
 0x853   :  { %v13626_v28 = vld [vmem:[%s21196_s7 + $0x135c] sm:$0xf]  ;;  %v11982_v31 = vor.u32 %v13770_v30, %v11979_v26  ;;  %8712 = vmatpush.bf16.msrb.mxu0 %v11214_v12  ;;  %v8461_v12 = vpop.f32.mrf.mxu0 }
 0x854   :  { %v11403_v63 = vld [vmem:[%s21196_s7 + $0x1378] sm:$0xf0]  ;;  %8707 = vmatmul.bf16.vlgmr.msra.gmra.mxu2 %v15144_v7 }
 0x855   :  { %v13418_v2 = vld [vmem:[%s21196_s7 + $0xcdc] sm:$0xf]  ;;  %v11406_v52 = vor.u32 %v13626_v28, %v11403_v63  ;;  %8751 = vmatpush.bf16.msrb.mxu2 %v11982_v31 }
 0x856   :  { %v10571_v46 = vld [vmem:[%s21196_s7 + $0xcf8] sm:$0xf0] }
 0x857   :  { %v13570_v42 = vld [vmem:[%s21196_s7 + $0x119c] sm:$0xf]  ;;  %v10574_v56 = vor.u32 %v13418_v2, %v10571_v46  ;;  %8727 = vmatpush.bf16.msrb.mxu1 %v11406_v52  ;;  %v8462_v46 = vadd.f32 %v8461_v12, %v8449_v22 }
 0x858   :  { %v11179_v27 = vld [vmem:[%s21196_s7 + $0x11b8] sm:$0xf0] }
 0x859   :  { %v13762_v10 = vld [vmem:[%s21196_s7 + $0x179c] sm:$0xf]  ;;  %v11182_v39 = vor.u32 %v13570_v42, %v11179_v27  ;;  %8690 = vmatpush.bf16.msra.mxu3 %v10574_v56 }
 0x85a   :  { %v11947_v43 = vld [vmem:[%s21196_s7 + $0x17b8] sm:$0xf0] }
 0x85b   :  { %v13618_v25 = vld [vmem:[%s21196_s7 + $0x131c] sm:$0xf]  ;;  %v11950_v61 = vor.u32 %v13762_v10, %v11947_v43  ;;  %8713 = vmatpush.bf16.msrb.mxu0 %v11182_v39  ;;  %v8476_v10 = vpop.f32.mrf.mxu1 }
 0x85c   :  { %v11371_v41 = vld [vmem:[%s21196_s7 + $0x1338] sm:$0xf0] }
 0x85d   :  { %v13410_v34 = vld [vmem:[%s21196_s7 + $0xc9c] sm:$0xf]  ;;  %v11374_v20 = vor.u32 %v13618_v25, %v11371_v41  ;;  %8752 = vmatpush.bf16.msrb.mxu2 %v11950_v61 }
 0x85e   :  { %v10539_v6 = vld [vmem:[%s21196_s7 + $0xcb8] sm:$0xf0] }
 0x85f   :  { %v13562_v11 = vld [vmem:[%s21196_s7 + $0x115c] sm:$0xf]  ;;  %v10542_v21 = vor.u32 %v13410_v34, %v10539_v6  ;;  %8728 = vmatpush.bf16.msrb.mxu1 %v11374_v20  ;;  %v20918_v20 = vadd.f32 %v8474_v16, %v8462_v46 }
 0x860   :  { %v11147_v36 = vld [vmem:[%s21196_s7 + $0x1178] sm:$0xf0] }
 0x861   :  { %v13754_v47 = vld [vmem:[%s21196_s7 + $0x175c] sm:$0xf]  ;;  %v11150_v3 = vor.u32 %v13562_v11, %v11147_v36  ;;  %8691 = vmatpush.bf16.msra.mxu3 %v10542_v21 }
 0x862   :  { %v11915_v0 = vld [vmem:[%s21196_s7 + $0x1778] sm:$0xf0] }
 0x863   :  { %v13610_v51 = vld [vmem:[%s21196_s7 + $0x12dc] sm:$0xf]  ;;  %v11918_v18 = vor.u32 %v13754_v47, %v11915_v0  ;;  %8714 = vmatpush.bf16.msrb.mxu0 %v11150_v3 }
 0x864   :  { %v11339_v58 = vld [vmem:[%s21196_s7 + $0x12f8] sm:$0xf0] }
 0x865   :  { %v13402_v62 = vld [vmem:[%s21196_s7 + $0xc5c] sm:$0xf]  ;;  %v11342_v7 = vor.u32 %v13610_v51, %v11339_v58  ;;  %8753 = vmatpush.bf16.msrb.mxu2 %v11918_v18 }
 0x866   :  { %v10507_v57 = vld [vmem:[%s21196_s7 + $0xc78] sm:$0xf0] }
 0x867   :  { %v13554_v29 = vld [vmem:[%s21196_s7 + $0x111c] sm:$0xf]  ;;  %v10510_v19 = vor.u32 %v13402_v62, %v10507_v57  ;;  %8729 = vmatpush.bf16.msrb.mxu1 %v11342_v7  ;;  %v20938_v57 = vpop.f32.mrf.mxu2  ;;  %v8463_v7 = vpop.f32.mrf.mxu0 }
 0x868   :  { %v11115_v4 = vld [vmem:[%s21196_s7 + $0x1138] sm:$0xf0] }
 0x869   :  { %v13746_v9 = vld [vmem:[%s21196_s7 + $0x171c] sm:$0xf]  ;;  %v11118_v33 = vor.u32 %v13554_v29, %v11115_v4  ;;  %8692 = vmatpush.bf16.msra.mxu3 %v10510_v19 }
 0x86a   :  { %v11883_v5 = vld [vmem:[%s21196_s7 + $0x1738] sm:$0xf0] }
 0x86b   :  { %v13602_v35 = vld [vmem:[%s21196_s7 + $0x129c] sm:$0xf]  ;;  %v11886_v53 = vor.u32 %v13746_v9, %v11883_v5  ;;  %8715 = vmatpush.bf16.msrb.mxu0 %v11118_v33 }
 0x86c   :  { %v11307_v45 = vld [vmem:[%s21196_s7 + $0x12b8] sm:$0xf0] }
 0x86d   :  { %v13394_v40 = vld [vmem:[%s21196_s7 + $0xc1c] sm:$0xf]  ;;  %v11310_v30 = vor.u32 %v13602_v35, %v11307_v45  ;;  %8754 = vmatpush.bf16.msrb.mxu2 %v11886_v53 }
 0x86e   :  { %v10475_v60 = vld [vmem:[%s21196_s7 + $0xc38] sm:$0xf0] }
 0x86f   :  { %v13546_v49 = vld [vmem:[%s21196_s7 + $0x10dc] sm:$0xf]  ;;  %v10478_v2 = vor.u32 %v13394_v40, %v10475_v60  ;;  %8730 = vmatpush.bf16.msrb.mxu1 %v11310_v30  ;;  %v8502_v46 = vpop.f32.mrf.mxu2 }
 0x870   :  { %v11083_v38 = vld [vmem:[%s21196_s7 + $0x10f8] sm:$0xf0] }
 0x871   :  { %v13706_v26 = vld [vmem:[%s21196_s7 + $0x15dc] sm:$0xf]  ;;  %v11086_v31 = vor.u32 %v13546_v49, %v11083_v38  ;;  %8693 = vmatpush.bf16.msra.mxu3 %v10478_v2 }
 0x872   :  { %v11723_v28 = vld [vmem:[%s21196_s7 + $0x15f8] sm:$0xf0] }
 0x873   :  { %v13738_v63 = vld [vmem:[%s21196_s7 + $0x16dc] sm:$0xf]  ;;  %v11726_v52 = vor.u32 %v13706_v26, %v11723_v28  ;;  %8716 = vmatpush.bf16.msrb.mxu0 %v11086_v31 }
 0x874   :  { %v11851_v8 = vld [vmem:[%s21196_s7 + $0x16f8] sm:$0xf0]  ;;  %8694 = vmatmul.bf16.vlgmr.msra.gmra.mxu3 %v15264_v17 }
 0x875   :  { %v13594_v13 = vld [vmem:[%s21196_s7 + $0x125c] sm:$0xf]  ;;  %v11854_v43 = vor.u32 %v13738_v63, %v11851_v8  ;;  %8738 = vmatpush.bf16.msrb.mxu3 %v11726_v52 }
 0x876   :  { %v11275_v14 = vld [vmem:[%s21196_s7 + $0x1278] sm:$0xf0] }
 0x877   :  { %v13538_v42 = vld [vmem:[%s21196_s7 + $0x109c] sm:$0xf]  ;;  %v11278_v25 = vor.u32 %v13594_v13, %v11275_v14  ;;  %8755 = vmatpush.bf16.msrb.mxu2 %v11854_v43 }
 0x878   :  { %v11051_v27 = vld [vmem:[%s21196_s7 + $0x10b8] sm:$0xf0] }
 0x879   :  { %v13698_v41 = vld [vmem:[%s21196_s7 + $0x159c] sm:$0xf]  ;;  %v11054_v47 = vor.u32 %v13538_v42, %v11051_v27  ;;  %8731 = vmatpush.bf16.msrb.mxu1 %v11278_v25 }
 0x87a   :  { %v11691_v56 = vld [vmem:[%s21196_s7 + $0x15b8] sm:$0xf0] }
 0x87b   :  { %v13730_v39 = vld [vmem:[%s21196_s7 + $0x169c] sm:$0xf]  ;;  %v11694_v0 = vor.u32 %v13698_v41, %v11691_v56  ;;  %8717 = vmatpush.bf16.msrb.mxu0 %v11054_v47 }
 0x87c   :  { %v11819_v34 = vld [vmem:[%s21196_s7 + $0x16b8] sm:$0xf0] }
 0x87d   :  { %v13586_v6 = vld [vmem:[%s21196_s7 + $0x121c] sm:$0xf]  ;;  %v11822_v58 = vor.u32 %v13730_v39, %v11819_v34  ;;  %8739 = vmatpush.bf16.msrb.mxu3 %v11694_v0 }
 0x87e   :  { %v11243_v61 = vld [vmem:[%s21196_s7 + $0x1238] sm:$0xf0] }
 0x87f   :  { %v13898_v11 = vld [vmem:[%s21196_s7 + $0x1bdc] sm:$0xf]  ;;  %v11246_v21 = vor.u32 %v13586_v6, %v11243_v61  ;;  %8756 = vmatpush.bf16.msrb.mxu2 %v11822_v58 }
 0x880   :  { %v12491_v36 = vld [vmem:[%s21196_s7 + $0x1bf8] sm:$0xf0] }
 0x881   :  { %v13530_v51 = vld [vmem:[%s21196_s7 + $0x105c] sm:$0xf]  ;;  %v12494_v32 = vor.u32 %v13898_v11, %v12491_v36  ;;  %8732 = vmatpush.bf16.msrb.mxu1 %v11246_v21  ;;  %v8487_v21 = vpop.f32.mrf.mxu3 }
 0x882   :  { %v11019_v37 = vld [vmem:[%s21196_s7 + $0x1078] sm:$0xf0] }
 0x883   :  { %v13690_v3 = vld [vmem:[%s21196_s7 + $0x155c] sm:$0xf]  ;;  %v11022_v17 = vor.u32 %v13530_v51, %v11019_v37 }
 0x884   :  { %v11659_v62 = vld [vmem:[%s21196_s7 + $0x1578] sm:$0xf0]  ;;  %8733 = vmatmul.bf16.vlgmr.msrb.gmra.mxu1 %v15222_v59 }
 0x885   :  { %v13722_v16 = vld [vmem:[%s21196_s7 + $0x165c] sm:$0xf]  ;;  %v11662_v9 = vor.u32 %v13690_v3, %v11659_v62  ;;  %8777 = vmatpush.bf16.msra.mxu1 %v12494_v32  ;;  %8718 = vmatpush.bf16.msrb.mxu0 %v11022_v17  ;;  %v8488_v62 = vadd.f32 %v8487_v21, %v20918_v20  ;;  %v8526_v32 = vpop.f32.mrf.mxu1 }
 0x886   :  { %v11787_v18 = vld [vmem:[%s21196_s7 + $0x1678] sm:$0xf0] }
 0x887   :  { %v13890_v29 = vld [vmem:[%s21196_s7 + $0x1b9c] sm:$0xf]  ;;  %v11790_v22 = vor.u32 %v13722_v16, %v11787_v18  ;;  %8740 = vmatpush.bf16.msrb.mxu3 %v11662_v9  ;;  %v8501_v9 = vadd.f32 %v20938_v57, %v8488_v62 }
 0x888   :  { %v12459_v4 = vld [vmem:[%s21196_s7 + $0x1bb8] sm:$0xf0] }
 0x889   :  { %v13522_v5 = vld [vmem:[%s21196_s7 + $0x101c] sm:$0xf]  ;;  %v12462_v60 = vor.u32 %v13890_v29, %v12459_v4  ;;  %8757 = vmatpush.bf16.msrb.mxu2 %v11790_v22 }
 0x88a   :  { %v10987_v35 = vld [vmem:[%s21196_s7 + $0x1038] sm:$0xf0] }
 0x88b   :  { %v13682_v45 = vld [vmem:[%s21196_s7 + $0x151c] sm:$0xf]  ;;  %v10990_v63 = vor.u32 %v13522_v5, %v10987_v35  ;;  %8778 = vmatpush.bf16.msra.mxu1 %v12462_v60 }
 0x88c   :  { %v11627_v19 = vld [vmem:[%s21196_s7 + $0x1538] sm:$0xf0] }
 0x88d   :  { %v13714_v40 = vld [vmem:[%s21196_s7 + $0x161c] sm:$0xf]  ;;  %v11630_v8 = vor.u32 %v13682_v45, %v11627_v19  ;;  %8719 = vmatpush.bf16.msrb.mxu0 %v10990_v63 }
 0x88e   :  { %v11755_v33 = vld [vmem:[%s21196_s7 + $0x1638] sm:$0xf0] }
 0x88f   :  { %v13834_v49 = vld [vmem:[%s21196_s7 + $0x19dc] sm:$0xf]  ;;  %v11758_v13 = vor.u32 %v13714_v40, %v11755_v33  ;;  %8741 = vmatpush.bf16.msrb.mxu3 %v11630_v8 }
 0x890   :  { %v12235_v38 = vld [vmem:[%s21196_s7 + $0x19f8] sm:$0xf0]  ;;  %8720 = vmatmul.bf16.vlgmr.msrb.gmra.mxu0 %v15266_v55 }
 0x891   :  { %v14026_v53 = vld [vmem:[%s21196_s7 + $0x1fdc] sm:$0xf]  ;;  %v12238_v14 = vor.u32 %v13834_v49, %v12235_v38  ;;  %8758 = vmatpush.bf16.msrb.mxu2 %v11758_v13  ;;  %v8489_v13 = vpop.f32.mrf.mxu3 }
 0x892   :  { %v13003_v30 = vld [vmem:[%s21196_s7 + $0x1ff8] sm:$0xf0] }
 0x893   :  { %v13882_v26 = vld [vmem:[%s21196_s7 + $0x1b5c] sm:$0xf]  ;;  %v13006_v24 = vor.u32 %v14026_v53, %v13003_v30  ;;  %8764 = vmatpush.bf16.msra.mxu0 %v12238_v14 }
 0x894   :  { %v12427_v28 = vld [vmem:[%s21196_s7 + $0x1b78] sm:$0xf0]  ;;  %8759 = vmatmul.bf16.vlgmr.msrb.gmra.mxu2 %v15268_v50 }
 0x895   :  { %v13674_v12 = vld [vmem:[%s21196_s7 + $0x14dc] sm:$0xf]  ;;  %v12430_v31 = vor.u32 %v13882_v26, %v12427_v28  ;;  %8803 = vmatpush.bf16.msra.mxu2 %v13006_v24  ;;  %v8513_v28 = vpop.f32.mrf.mxu0  ;;  %v8528_v24 = vpop.f32.mrf.mxu1 }
 0x896   :  { %v11595_v2 = vld [vmem:[%s21196_s7 + $0x14f8] sm:$0xf0]  ;;  %v8514_v8 = vadd.f32 %v8513_v28, %v8501_v9 }
 0x897   :  { %v13826_v52 = vld [vmem:[%s21196_s7 + $0x199c] sm:$0xf]  ;;  %v11598_v25 = vor.u32 %v13674_v12, %v11595_v2  ;;  %8779 = vmatpush.bf16.msra.mxu1 %v12430_v31 }
 0x898   :  { %v12203_v59 = vld [vmem:[%s21196_s7 + $0x19b8] sm:$0xf0] }
 0x899   :  { %v14018_v42 = vld [vmem:[%s21196_s7 + $0x1f9c] sm:$0xf]  ;;  %v12206_v41 = vor.u32 %v13826_v52, %v12203_v59  ;;  %8742 = vmatpush.bf16.msrb.mxu3 %v11598_v25 }
 0x89a   :  { %v12971_v27 = vld [vmem:[%s21196_s7 + $0x1fb8] sm:$0xf0] }
 0x89b   :  { %v13874_v10 = vld [vmem:[%s21196_s7 + $0x1b1c] sm:$0xf]  ;;  %v12974_v34 = vor.u32 %v14018_v42, %v12971_v27  ;;  %8765 = vmatpush.bf16.msra.mxu0 %v12206_v41  ;;  %v8527_v41 = vadd.f32 %v8526_v32, %v8514_v8 }
 0x89c   :  { %v12395_v43 = vld [vmem:[%s21196_s7 + $0x1b38] sm:$0xf0] }
 0x89d   :  { %v13666_v56 = vld [vmem:[%s21196_s7 + $0x149c] sm:$0xf]  ;;  %v12398_v6 = vor.u32 %v13874_v10, %v12395_v43  ;;  %8804 = vmatpush.bf16.msra.mxu2 %v12974_v34  ;;  %v8515_v21 = vpop.f32.mrf.mxu0 }
 0x89e   :  { %v11563_v39 = vld [vmem:[%s21196_s7 + $0x14b8] sm:$0xf0] }
 0x89f   :  { %v13818_v61 = vld [vmem:[%s21196_s7 + $0x195c] sm:$0xf]  ;;  %v11566_v58 = vor.u32 %v13666_v56, %v11563_v39  ;;  %8780 = vmatpush.bf16.msra.mxu1 %v12398_v6 }
 0x8a0   :  { %v12171_v11 = vld [vmem:[%s21196_s7 + $0x1978] sm:$0xf0] }
 0x8a1   :  { %v14010_v36 = vld [vmem:[%s21196_s7 + $0x1f5c] sm:$0xf]  ;;  %v12174_v37 = vor.u32 %v13818_v61, %v12171_v11  ;;  %8743 = vmatpush.bf16.msrb.mxu3 %v11566_v58 }
 0x8a2   :  { %v12939_v47 = vld [vmem:[%s21196_s7 + $0x1f78] sm:$0xf0] }
 0x8a3   :  { %v13866_v0 = vld [vmem:[%s21196_s7 + $0x1adc] sm:$0xf]  ;;  %v12942_v16 = vor.u32 %v14010_v36, %v12939_v47  ;;  %8766 = vmatpush.bf16.msra.mxu0 %v12174_v37 }
 0x8a4   :  { %v12363_v51 = vld [vmem:[%s21196_s7 + $0x1af8] sm:$0xf0] }
 0x8a5   :  { %v13658_v55 = vld [vmem:[%s21196_s7 + $0x145c] sm:$0xf]  ;;  %v12366_v50 = vor.u32 %v13866_v0, %v12363_v51  ;;  %8805 = vmatpush.bf16.msra.mxu2 %v12942_v16  ;;  %v8552_v0 = vpop.f32.mrf.mxu2 }
 0x8a6   :  { %v11531_v3 = vld [vmem:[%s21196_s7 + $0x1478] sm:$0xf0] }
 0x8a7   :  { %v13810_v18 = vld [vmem:[%s21196_s7 + $0x191c] sm:$0xf]  ;;  %v11534_v5 = vor.u32 %v13658_v55, %v11531_v3  ;;  %8781 = vmatpush.bf16.msra.mxu1 %v12366_v50 }
 0x8a8   :  { %v12139_v7 = vld [vmem:[%s21196_s7 + $0x1938] sm:$0xf0] }
 0x8a9   :  { %v14002_v29 = vld [vmem:[%s21196_s7 + $0x1f1c] sm:$0xf]  ;;  %v12142_v45 = vor.u32 %v13810_v18, %v12139_v7  ;;  %8744 = vmatpush.bf16.msrb.mxu3 %v11534_v5 }
 0x8aa   :  { %v12907_v20 = vld [vmem:[%s21196_s7 + $0x1f38] sm:$0xf0] }
 0x8ab   :  { %v13858_v4 = vld [vmem:[%s21196_s7 + $0x1a9c] sm:$0xf]  ;;  %v12910_v57 = vor.u32 %v14002_v29, %v12907_v20  ;;  %8767 = vmatpush.bf16.msra.mxu0 %v12142_v45 }
 0x8ac   :  { %v12331_v17 = vld [vmem:[%s21196_s7 + $0x1ab8] sm:$0xf0] }
 0x8ad   :  { %v13650_v35 = vld [vmem:[%s21196_s7 + $0x141c] sm:$0xf]  ;;  %v12334_v33 = vor.u32 %v13858_v4, %v12331_v17  ;;  %8806 = vmatpush.bf16.msra.mxu2 %v12910_v57  ;;  %v8554_v9 = vpop.f32.mrf.mxu2 }
 0x8ae   :  { %v11499_v22 = vld [vmem:[%s21196_s7 + $0x1438] sm:$0xf0] }
 0x8af   :  { %v13802_v19 = vld [vmem:[%s21196_s7 + $0x18dc] sm:$0xf]  ;;  %v11502_v63 = vor.u32 %v13650_v35, %v11499_v22  ;;  %8782 = vmatpush.bf16.msra.mxu1 %v12334_v33  ;;  %v8539_v22 = vpop.f32.mrf.mxu3  ;;  %v8578_v33 = vpop.f32.mrf.mxu1 }
 0x8b0   :  { %v12107_v40 = vld [vmem:[%s21196_s7 + $0x18f8] sm:$0xf0]  ;;  %v8540_v57 = vadd.f32 %v8539_v22, %v8527_v41 }
 0x8b1   :  { %v13962_v60 = vld [vmem:[%s21196_s7 + $0x1ddc] sm:$0xf]  ;;  %v12110_v14 = vor.u32 %v13802_v19, %v12107_v40  ;;  %8745 = vmatpush.bf16.msrb.mxu3 %v11502_v63 }
 0x8b2   :  { %v12747_v49 = vld [vmem:[%s21196_s7 + $0x1df8] sm:$0xf0] }
 0x8b3   :  { %v13994_v38 = vld [vmem:[%s21196_s7 + $0x1edc] sm:$0xf]  ;;  %v12750_v12 = vor.u32 %v13962_v60, %v12747_v49  ;;  %8768 = vmatpush.bf16.msra.mxu0 %v12110_v14  ;;  %v8553_v60 = vadd.f32 %v8552_v0, %v8540_v57 }
 0x8b4   :  { %v12875_v53 = vld [vmem:[%s21196_s7 + $0x1ef8] sm:$0xf0]  ;;  %8746 = vmatmul.bf16.vlgmr.msrb.gmra.mxu3 %v15377_v15 }
 0x8b5   :  { %v13850_v30 = vld [vmem:[%s21196_s7 + $0x1a5c] sm:$0xf]  ;;  %v12878_v31 = vor.u32 %v13994_v38, %v12875_v53  ;;  %8790 = vmatpush.bf16.msra.mxu3 %v12750_v12  ;;  %v8565_v38 = vpop.f32.mrf.mxu0  ;;  %v8604_v8 = vpop.f32.mrf.mxu2 }
 0x8b6   :  { %v12299_v26 = vld [vmem:[%s21196_s7 + $0x1a78] sm:$0xf0] }
 0x8b7   :  { %v13794_v2 = vld [vmem:[%s21196_s7 + $0x189c] sm:$0xf]  ;;  %v12302_v52 = vor.u32 %v13850_v30, %v12299_v26  ;;  %8807 = vmatpush.bf16.msra.mxu2 %v12878_v31  ;;  %v8566_v30 = vadd.f32 %v8565_v38, %v8553_v60  ;;  %v8541_v26 = vpop.f32.mrf.mxu3  ;;  %v8580_v28 = vpop.f32.mrf.mxu1  ;;  %v2023_v31 = vperm.slane %v20654_v1, 7 }
 0x8b8   :  { %v12075_v46 = vld [vmem:[%s21196_s7 + $0x18b8] sm:$0xf0] }
 0x8b9   :  { %v13954_v59 = vld [vmem:[%s21196_s7 + $0x1d9c] sm:$0xf]  ;;  %v12078_v56 = vor.u32 %v13794_v2, %v12075_v46  ;;  %8783 = vmatpush.bf16.msra.mxu1 %v12302_v52  ;;  %v8579_v63 = vadd.f32 %v8578_v33, %v8566_v30 }
 0x8ba   :  { %v12715_v42 = vld [vmem:[%s21196_s7 + $0x1db8] sm:$0xf0] }
 0x8bb   :  { %v13986_v27 = vld [vmem:[%s21196_s7 + $0x1e9c] sm:$0xf]  ;;  %v12718_v39 = vor.u32 %v13954_v59, %v12715_v42  ;;  %8769 = vmatpush.bf16.msra.mxu0 %v12078_v56 }
 0x8bc   :  { %v12843_v10 = vld [vmem:[%s21196_s7 + $0x1eb8] sm:$0xf0] }
 0x8bd   :  { %v13842_v43 = vld [vmem:[%s21196_s7 + $0x1a1c] sm:$0xf]  ;;  %v12846_v6 = vor.u32 %v13986_v27, %v12843_v10  ;;  %8791 = vmatpush.bf16.msra.mxu3 %v12718_v39  ;;  %v8567_v13 = vpop.f32.mrf.mxu0  ;;  %v8606_v14 = vpop.f32.mrf.mxu2 }
 0x8be   :  { %v12267_v25 = vld [vmem:[%s21196_s7 + $0x1a38] sm:$0xf0] }
 0x8bf   :  { %v13786_v34 = vld [vmem:[%s21196_s7 + $0x185c] sm:$0xf]  ;;  %v12270_v61 = vor.u32 %v13842_v43, %v12267_v25  ;;  %8808 = vmatpush.bf16.msra.mxu2 %v12846_v6  ;;  %v8591_v12 = vpop.f32.mrf.mxu3  ;;  %v8630_v46 = vpop.f32.mrf.mxu1 }
 0x8c0   :  { %v12043_v11 = vld [vmem:[%s21196_s7 + $0x1878] sm:$0xf0]  ;;  %v8592_v2 = vadd.f32 %v8591_v12, %v8579_v63 }
 0x8c1   :  { %v13946_v36 = vld [vmem:[%s21196_s7 + $0x1d5c] sm:$0xf]  ;;  %v12046_v37 = vor.u32 %v13786_v34, %v12043_v11  ;;  %8784 = vmatpush.bf16.msra.mxu1 %v12270_v61 }
 0x8c2   :  { %v12683_v47 = vld [vmem:[%s21196_s7 + $0x1d78] sm:$0xf0]  ;;  %v8605_v24 = vadd.f32 %v8604_v8, %v8592_v2 }
 0x8c3   :  { %v13978_v51 = vld [vmem:[%s21196_s7 + $0x1e5c] sm:$0xf]  ;;  %v12686_v55 = vor.u32 %v13946_v36, %v12683_v47  ;;  %8770 = vmatpush.bf16.msra.mxu0 %v12046_v37 }
 0x8c4   :  { %v12811_v58 = vld [vmem:[%s21196_s7 + $0x1e78] sm:$0xf0]  ;;  %8785 = vmatmul.bf16.vlgmr.msra.gmra.mxu1 %v15440_v48 }
 0x8c5   :  { %v13778_v3 = vld [vmem:[%s21196_s7 + $0x181c] sm:$0xf]  ;;  %v12814_v15 = vor.u32 %v13978_v51, %v12811_v58  ;;  %8792 = vmatpush.bf16.msra.mxu3 %v12686_v55  ;;  %v8617_v52 = vpop.f32.mrf.mxu0  ;;  %v8656_v43 = vpop.f32.mrf.mxu2 }
 0x8c6   :  { %v12011_v62 = vld [vmem:[%s21196_s7 + $0x1838] sm:$0xf0]  ;;  %v8618_v59 = vadd.f32 %v8617_v52, %v2023_v31 }
 0x8c7   :  { %v13938_v32 = vld [vmem:[%s21196_s7 + $0x1d1c] sm:$0xf]  ;;  %v12014_v7 = vor.u32 %v13778_v3, %v12011_v62  ;;  %8809 = vmatpush.bf16.msra.mxu2 %v12814_v15  ;;  %v8593_v42 = vpop.f32.mrf.mxu3  ;;  %v8632_v27 = vpop.f32.mrf.mxu1 }
 0x8c8   :  { %v12651_v16 = vld [vmem:[%s21196_s7 + $0x1d38] sm:$0xf0]  ;;  %v8631_v10 = vadd.f32 %v8630_v46, %v8618_v59 }
 0x8c9   :  { %v13970_v50 = vld [vmem:[%s21196_s7 + $0x1e1c] sm:$0xf]  ;;  %v12654_v29 = vor.u32 %v13938_v32, %v12651_v16  ;;  %8771 = vmatpush.bf16.msra.mxu0 %v12014_v7 }
 0x8ca   :  { %v12779_v18 = vld [vmem:[%s21196_s7 + $0x1e38] sm:$0xf0] }
 0x8cb   :  { %v12782_v20 = vor.u32 %v13970_v50, %v12779_v18  ;;  %v13930_v4 = vld [vmem:[%s21196_s7 + $0x1cdc] sm:$0xf]  ;;  %8793 = vmatpush.bf16.msra.mxu3 %v12654_v29 }
 0x8cc   :  { %v12619_v17 = vld [vmem:[%s21196_s7 + $0x1cf8] sm:$0xf0]  ;;  %8772 = vmatmul.bf16.vlgmr.msra.gmra.mxu0 %v15476_v23 }
 0x8cd   :  { %v12622_v5 = vor.u32 %v13930_v4, %v12619_v17  ;;  %8810 = vmatpush.bf16.msra.mxu2 %v12782_v20  ;;  %v13922_v35 = vld [vmem:[%s21196_s7 + $0x1c9c] sm:$0xf]  ;;  %v8619_v25 = vpop.f32.mrf.mxu0  ;;  %v8658_v41 = vpop.f32.mrf.mxu2 }
 0x8ce   :  { %v12587_v48 = vld [vmem:[%s21196_s7 + $0x1cb8] sm:$0xf0] }
 0x8cf   :  { %8794 = vmatpush.bf16.msra.mxu3 %v12622_v5  ;;  %v12590_v45 = vor.u32 %v13922_v35, %v12587_v48  ;;  %v13914_v19 = vld [vmem:[%s21196_s7 + $0x1c5c] sm:$0xf]  ;;  %v8643_v56 = vpop.f32.mrf.mxu3  ;;  %v8682_v34 = vpop.f32.mrf.mxu1 }
 0x8d0   :  { %8811 = vmatmul.bf16.vlgmr.msra.gmra.mxu2 %v15484_v54  ;;  %v12555_v40 = vld [vmem:[%s21196_s7 + $0x1c78] sm:$0xf0]  ;;  %v8644_v39 = vadd.f32 %v8643_v56, %v8631_v10 }
 0x8d1   :  { %v12558_v49 = vor.u32 %v13914_v19, %v12555_v40  ;;  %v13906_v23 = vld [vmem:[%s21196_s7 + $0x1c1c] sm:$0xf] }
 0x8d2   :  { %v12523_v54 = vld [vmem:[%s21196_s7 + $0x1c38] sm:$0xf0] }
 0x8d3   :  { %8795 = vmatpush.bf16.msra.mxu3 %v12590_v45  ;;  %v12526_v53 = vor.u32 %v13906_v23, %v12523_v54 }
 0x8d5   :  { %v8669_v6 = vpop.f32.mrf.mxu0 }
 0x8d7   :  { %8796 = vmatpush.bf16.msra.mxu3 %v12558_v49  ;;  %v8645_v11 = vpop.f32.mrf.mxu3  ;;  %v8684_v36 = vpop.f32.mrf.mxu1 }
 0x8d8   :  { %v8708_v0 = vpop.f32.mrf.mxu2 }
 0x8db   :  { %8797 = vmatpush.bf16.msra.mxu3 %v12526_v53 }
 0x8dd   :  { %v8671_v51 = vpop.f32.mrf.mxu0 }
 0x8de   :  { %8798 = vmatmul.bf16.vlgmr.msra.gmra.mxu3 %v15591_v44  ;;  %v8657_v44 = vadd.f32 %v8656_v43, %v8644_v39 }
 0x8e0   :  { %v8670_v61 = vadd.f32 %v8669_v6, %v8657_v44  ;;  %v8710_v1 = vpop.f32.mrf.mxu2 }
 0x8e2   :  { %v8683_v47 = vadd.f32 %v8682_v34, %v8670_v61 }
 0x8f7   :  { %v8695_v58 = vpop.f32.mrf.mxu3 }
 0x8f8   :  { %v8696_v18 = vadd.f32 %v8695_v58, %v8683_v47 }
 0x8fa   :  { %v8709_v4 = vadd.f32 %v8708_v0, %v8696_v18 }
 0x8ff   :  { %v8697_v55 = vpop.f32.mrf.mxu3 }
 0x901   :  { %v8734_v21 = vpop.f32.mrf.mxu1 }
 0x909   :  { %v8736_v3 = vpop.f32.mrf.mxu1 }
 0x90d   :  { %v8721_v37 = vpop.f32.mrf.mxu0 }
 0x90e   :  { %v8722_v17 = vadd.f32 %v8721_v37, %v8709_v4 }
 0x910   :  { %v8735_v35 = vadd.f32 %v8734_v21, %v8722_v17 }
 0x915   :  { %v8723_v62 = vpop.f32.mrf.mxu0 }
 0x917   :  { %v8760_v15 = vpop.f32.mrf.mxu2 }
 0x91f   :  { %v8762_v32 = vpop.f32.mrf.mxu2 }
 0x937   :  { %v8747_v16 = vpop.f32.mrf.mxu3 }
 0x938   :  { %v8748_v48 = vadd.f32 %v8747_v16, %v8735_v35 }
 0x93a   :  { %v8761_v45 = vadd.f32 %v8760_v15, %v8748_v48 }
 0x93f   :  { %v8749_v29 = vpop.f32.mrf.mxu3 }
 0x941   :  { %v8786_v50 = vpop.f32.mrf.mxu1 }
 0x949   :  { %v8773_v7 = vpop.f32.mrf.mxu0  ;;  %v8788_v20 = vpop.f32.mrf.mxu1 }
 0x94a   :  { %v8774_v19 = vadd.f32 %v8773_v7, %v8761_v45 }
 0x94c   :  { %v8787_v40 = vadd.f32 %v8786_v50, %v8774_v19 }
 0x951   :  { %v8775_v5 = vpop.f32.mrf.mxu0 }
 0x953   :  { %v8812_v9 = vpop.f32.mrf.mxu2 }
 0x95b   :  { %v8814_v22 = vpop.f32.mrf.mxu2 }
 0x961   :  { %v8799_v57 = vpop.f32.mrf.mxu3 }
 0x962   :  { %v8800_v33 = vadd.f32 %v8799_v57, %v8787_v40 }
 0x964   :  { %v8813_v60 = vadd.f32 %v8812_v9, %v8800_v33 }
 0x966   :  { %v8827_v49 = vrot.slane %v8813_v60, 4 }
 0x968   :  { %v8832_v23 = vsel %vm8828_vm5, %v8605_v24, %v8827_v49 }
 0x969   :  { %8840 = vst [vmem:[%s21199_s9 + $0x18] sm:$0xff] %v8832_v23  ;;  %v8801_v54 = vpop.f32.mrf.mxu3 }

</bundles_post_ra>
